<compile_context>
chip_gen: v6e
topology: v6e:2x2x1
jax: 0.10.0
libtpu: 0.0.40
codegen_flags: <defaults>
</compile_context>

<pallas_src>
import math
import functools

import jax
import jax.numpy as jnp
from jax.experimental import pallas as pl
from jax.experimental.pallas import tpu as pltpu


def _round_up(x, m):
    return ((x + m - 1) // m) * m


# ----------------------------------------------------------------------------
# Kernel
# ----------------------------------------------------------------------------
def _lstm_critic_kernel(
    emb_ref,      # (S, Bb, Hp)   time-major embedded sequence (lane padded)
    h0_ref,       # (L, Bb, Hp)   initial hidden
    c0_ref,       # (L, Bb, Hp)   initial cell
    wih_ref,      # (L, Hp, 4Hp)  weight_ih^T per layer, gate-block lane padded
    whh_ref,      # (L, Hp, 4Hp)  weight_hh^T per layer
    bih_ref,      # (L, 1, 4Hp)
    bhh_ref,      # (L, 1, 4Hp)
    gih_ref,      # (L, 1, 4Hp)   ln_ih gamma
    bihln_ref,    # (L, 1, 4Hp)   ln_ih beta
    ghh_ref,      # (L, 1, 4Hp)   ln_hh gamma
    bhhln_ref,    # (L, 1, 4Hp)   ln_hh beta
    gho_ref,      # (L, 1, Hp)    ln_ho gamma
    bholn_ref,    # (L, 1, Hp)    ln_ho beta
    wv_ref,       # (1, Hp)       value weight (row)
    bv_ref,       # (1, 1)        value bias
    drop_ref,     # (Bb, Hp)      pre-scaled dropout keep mask
    out_ref,      # (Bb, 1)       value head output
    x_buf,        # scratch VMEM (S, Bb, Hp)   inner-layer output sequence
    gi_buf,       # scratch VMEM (S, Bb, 4Hp)  hoisted input projections
    *,
    num_layers,
    hidden_size,
    hidden_pad,
    seq_len,
):
    H, Hp, S, L = hidden_size, hidden_pad, seq_len, num_layers
    Bb = emb_ref.shape[1]
    eps = 1e-5

    def layer_norm(v, gamma, beta, n_true):
        # Padded lanes of `v` are exactly zero, so plain lane sums equal sums
        # over the true `n_true` elements.  One-pass variance; clamp guards
        # fp cancellation (review feedback).  gamma/beta are zero in padded
        # lanes, so the output's padded lanes stay exactly zero.
        inv_n = 1.0 / float(n_true)
        mu = jnp.sum(v, axis=-1, keepdims=True) * inv_n
        var = jnp.sum(v * v, axis=-1, keepdims=True) * inv_n - mu * mu
        var = jnp.maximum(var, 0.0)
        return (v - mu) * jax.lax.rsqrt(var + eps) * gamma + beta

    h_last = None
    for l in range(L):  # static, small layer count -> layer-major schedule
        # ---- Hoisted whole-sequence input projection (one big MXU matmul) --
        if l == 0:
            x2d = emb_ref[...].reshape(S * Bb, Hp)
        else:
            x2d = x_buf[...].reshape(S * Bb, Hp)
        gi = jnp.dot(x2d, wih_ref[l], preferred_element_type=jnp.float32)
        gi = layer_norm(gi + bih_ref[l], gih_ref[l], bihln_ref[l], 4 * H)
        gi_buf[...] = gi.reshape(S, Bb, 4 * Hp)

        # ---- Hoist loop-invariant per-layer constants out of the time loop -
        whh_l   = whh_ref[l]                                    # (Hp, 4Hp)
        bhh_l   = jnp.broadcast_to(bhh_ref[l],   (Bb, 4 * Hp))
        ghh_l   = jnp.broadcast_to(ghh_ref[l],   (Bb, 4 * Hp))
        bhhln_l = jnp.broadcast_to(bhhln_ref[l], (Bb, 4 * Hp))
        gho_l   = jnp.broadcast_to(gho_ref[l],   (Bb, Hp))
        bholn_l = jnp.broadcast_to(bholn_ref[l], (Bb, Hp))
        write_seq = (l < L - 1)   # only inner layers feed a next layer

        # ---- Serial recurrence: h/c carried in vregs; only gh matmul left --
        def step(t, carry):
            h, c = carry
            gh = jnp.dot(h, whh_l, preferred_element_type=jnp.float32)
            gh = layer_norm(gh + bhh_l, ghh_l, bhhln_l, 4 * H)
            gates = gi_buf[t] + gh
            # Module gate order: i, f, o (sigmoid) then g (tanh).
            # Each gate block is a lane-aligned full-vreg slice (Hp % 128 == 0).
            i_g = jax.nn.sigmoid(gates[:, 0 * Hp:1 * Hp])
            f_g = jax.nn.sigmoid(gates[:, 1 * Hp:2 * Hp])
            o_g = jax.nn.sigmoid(gates[:, 2 * Hp:3 * Hp])
            g_g = jnp.tanh(gates[:, 3 * Hp:4 * Hp])
            cy = f_g * c + i_g * g_g
            hy = o_g * jnp.tanh(layer_norm(cy, gho_l, bholn_l, H))
            if write_seq:
                x_buf[t] = hy        # off the serial dependency chain
            return (hy, cy)

        h_last, _ = jax.lax.fori_loop(
            0, S, step, (h0_ref[l], c0_ref[l]), unroll=(S <= 16))

    # ---- Dropout (runtime mask) + value head as a VPU/XLU reduction ---------
    h_drop = h_last * drop_ref[...]
    out_ref[...] = (
        jnp.sum(h_drop * wv_ref[...], axis=-1, keepdims=True) + bv_ref[...]
    )


# ----------------------------------------------------------------------------
# Lane-padding helpers (run outside the kernel, once per trace)
# ----------------------------------------------------------------------------
def _pad_gate_mat(w, H, Hp):
    """(L, H, 4H) -> (L, Hp, 4Hp); gate block k placed at lanes [k*Hp, k*Hp+H)."""
    L = w.shape[0]
    out = jnp.zeros((L, Hp, 4 * Hp), w.dtype)
    for k in range(4):
        out = out.at[:, :H, k * Hp:k * Hp + H].set(w[:, :, k * H:(k + 1) * H])
    return out


def _pad_gate_vec(v, H, Hp):
    """(L, 1, 4H) -> (L, 1, 4Hp); same per-gate lane alignment."""
    L = v.shape[0]
    out = jnp.zeros((L, 1, 4 * Hp), v.dtype)
    for k in range(4):
        out = out.at[:, :, k * Hp:k * Hp + H].set(v[:, :, k * H:(k + 1) * H])
    return out


def _pad_last(v, H, Hp):
    pad = [(0, 0)] * (v.ndim - 1) + [(0, Hp - H)]
    return jnp.pad(v, pad)


# ----------------------------------------------------------------------------
# Wrapper (glue)
# ----------------------------------------------------------------------------
def critic_forward(params, inputs, hidden, dropout_p=0.0, dropout_key=None):
    """Equivalent of Critic.forward(inputs, hidden) -> (bsz,) value vector."""
    table = params["embedding"]                     # (vocab, H)
    emb = jnp.take(table, inputs[:, :-1], axis=0)   # (bsz, seq, H)
    bsz, seq_len, H = emb.shape
    # Reproduce torch's `input.view(seq, bsz, H)` (a reshape, NOT a transpose).
    emb_tm = emb.reshape(seq_len, bsz, H).astype(jnp.float32)

    h0, c0 = hidden
    h0 = h0.astype(jnp.float32)
    c0 = c0.astype(jnp.float32)
    L = h0.shape[0]

    # ---- Batch padding (sublane) and optional 2-way split for v7x megacore --
    Bp = max(8, _round_up(bsz, 8))
    if Bp >= 16:
        Bp = _round_up(Bp, 16)
        n_blk, Bb = 2, Bp // 2          # one batch block per TensorCore on v7x
    else:
        n_blk, Bb = 1, Bp
    pad_b = Bp - bsz
    if pad_b:
        emb_tm = jnp.pad(emb_tm, ((0, 0), (0, pad_b), (0, 0)))
        h0 = jnp.pad(h0, ((0, 0), (0, pad_b), (0, 0)))
        c0 = jnp.pad(c0, ((0, 0), (0, pad_b), (0, 0)))

    # ---- Lane padding: per-gate blocks lane-aligned to Hp = round_up(H,128) -
    Hp = max(128, _round_up(H, 128))
    emb_tm = _pad_last(emb_tm, H, Hp)
    h0p = _pad_last(h0, H, Hp)
    c0p = _pad_last(c0, H, Hp)
    wih = _pad_gate_mat(params["wih_t"], H, Hp)
    whh = _pad_gate_mat(params["whh_t"], H, Hp)
    bih = _pad_gate_vec(params["bih"], H, Hp)
    bhh = _pad_gate_vec(params["bhh"], H, Hp)
    gih = _pad_gate_vec(params["ln_ih_g"], H, Hp)
    bihln = _pad_gate_vec(params["ln_ih_b"], H, Hp)
    ghh = _pad_gate_vec(params["ln_hh_g"], H, Hp)
    bhhln = _pad_gate_vec(params["ln_hh_b"], H, Hp)
    gho = _pad_last(params["ln_ho_g"], H, Hp)
    bholn = _pad_last(params["ln_ho_b"], H, Hp)
    wv = _pad_last(params["wv"], H, Hp)
    bv = params["bv"]

    # ---- Dropout keep mask (F.dropout defaults to training=True) -----------
    if dropout_p > 0.0:
        if dropout_key is None:
            dropout_key = jax.random.PRNGKey(0)
        keep = jax.random.bernoulli(dropout_key, 1.0 - dropout_p, (Bp, H))
        drop_mask = keep.astype(jnp.float32) * (1.0 / (1.0 - dropout_p))
    else:
        drop_mask = jnp.ones((Bp, H), jnp.float32)
    drop_mask = _pad_last(drop_mask, H, Hp)

    kernel = functools.partial(
        _lstm_critic_kernel,
        num_layers=L, hidden_size=H, hidden_pad=Hp, seq_len=seq_len,
    )

    batch3 = lambda i: (0, i, 0)
    fixed3 = lambda i: (0, 0, 0)
    batch2 = lambda i: (i, 0)
    fixed2 = lambda i: (0, 0)

    out = pl.pallas_call(
        kernel,
        out_shape=jax.ShapeDtypeStruct((Bp, 1), jnp.float32),
        grid=(n_blk,),
        in_specs=[
            pl.BlockSpec((seq_len, Bb, Hp), batch3),   # emb (time-major)
            pl.BlockSpec((L, Bb, Hp), batch3),         # h0
            pl.BlockSpec((L, Bb, Hp), batch3),         # c0
            pl.BlockSpec((L, Hp, 4 * Hp), fixed3),     # W_ih^T (padded)
            pl.BlockSpec((L, Hp, 4 * Hp), fixed3),     # W_hh^T (padded)
            pl.BlockSpec((L, 1, 4 * Hp), fixed3),      # b_ih
            pl.BlockSpec((L, 1, 4 * Hp), fixed3),      # b_hh
            pl.BlockSpec((L, 1, 4 * Hp), fixed3),      # ln_ih gamma
            pl.BlockSpec((L, 1, 4 * Hp), fixed3),      # ln_ih beta
            pl.BlockSpec((L, 1, 4 * Hp), fixed3),      # ln_hh gamma
            pl.BlockSpec((L, 1, 4 * Hp), fixed3),      # ln_hh beta
            pl.BlockSpec((L, 1, Hp), fixed3),          # ln_ho gamma
            pl.BlockSpec((L, 1, Hp), fixed3),          # ln_ho beta
            pl.BlockSpec((1, Hp), fixed2),             # value weight row
            pl.BlockSpec((1, 1), fixed2),              # value bias
            pl.BlockSpec((Bb, Hp), batch2),            # dropout keep mask
        ],
        out_specs=pl.BlockSpec((Bb, 1), batch2),
        scratch_shapes=[
            pltpu.VMEM((seq_len, Bb, Hp), jnp.float32),      # layer-output seq
            pltpu.VMEM((seq_len, Bb, 4 * Hp), jnp.float32),  # hoisted gi
        ],
        compiler_params=pltpu.CompilerParams(
            dimension_semantics=("parallel",),
            vmem_limit_bytes=48 * 1024 * 1024,
        ),
    )(
        emb_tm, h0p, c0p, wih, whh, bih, bhh,
        gih, bihln, ghh, bhhln, gho, bholn, wv, bv, drop_mask,
    )
    return out[:bsz, 0]  # .squeeze()


# ----------------------------------------------------------------------------
# Deterministic parameter init (mirrors shapes in Critic.__init__)
# ----------------------------------------------------------------------------
def init_params(key, vocab_size, H, L):
    ks = jax.random.split(key, 7)
    stdv_v = 1.0 / math.sqrt(vocab_size)
    stdv_h = 1.0 / math.sqrt(H)
    u = lambda k, shape, s: jax.random.uniform(k, shape, jnp.float32, -s, s)
    return {
        "embedding": u(ks[0], (vocab_size, H), stdv_v),
        "wih_t": u(ks[1], (L, H, 4 * H), stdv_h),   # weight_ih^T per layer
        "whh_t": u(ks[2], (L, H, 4 * H), stdv_h),   # weight_hh^T per layer
        "bih": u(ks[3], (L, 1, 4 * H), stdv_h),
        "bhh": u(ks[4], (L, 1, 4 * H), stdv_h),
        "ln_ih_g": jnp.ones((L, 1, 4 * H), jnp.float32),
        "ln_ih_b": jnp.zeros((L, 1, 4 * H), jnp.float32),
        "ln_hh_g": jnp.ones((L, 1, 4 * H), jnp.float32),
        "ln_hh_b": jnp.zeros((L, 1, 4 * H), jnp.float32),
        "ln_ho_g": jnp.ones((L, 1, H), jnp.float32),
        "ln_ho_b": jnp.zeros((L, 1, H), jnp.float32),
        "wv": u(ks[5], (1, H), stdv_v),             # value weight (row)
        "bv": u(ks[6], (1, 1), stdv_h),             # value bias
    }


# ----------------------------------------------------------------------------
# Pure-JAX reference (no dropout) for correctness check
# ----------------------------------------------------------------------------
def critic_reference(params, inputs, hidden):
    emb = jnp.take(params["embedding"], inputs[:, :-1], axis=0)
    bsz, seq_len, H = emb.shape
    x_seq = emb.reshape(seq_len, bsz, H)
    h0, c0 = hidden
    L = h0.shape[0]

    def ln(v, g, b):
        mu = jnp.mean(v, axis=-1, keepdims=True)
        var = jnp.mean(jnp.square(v - mu), axis=-1, keepdims=True)
        return (v - mu) / jnp.sqrt(var + 1e-5) * g + b

    h = [h0[l] for l in range(L)]
    c = [c0[l] for l in range(L)]
    for t in range(seq_len):
        x = x_seq[t]
        for l in range(L):
            gi = ln(x @ params["wih_t"][l] + params["bih"][l, 0],
                    params["ln_ih_g"][l, 0], params["ln_ih_b"][l, 0])
            gh = ln(h[l] @ params["whh_t"][l] + params["bhh"][l, 0],
                    params["ln_hh_g"][l, 0], params["ln_hh_b"][l, 0])
            g = gi + gh
            i_g = jax.nn.sigmoid(g[:, :H])
            f_g = jax.nn.sigmoid(g[:, H:2 * H])
            o_g = jax.nn.sigmoid(g[:, 2 * H:3 * H])
            g_g = jnp.tanh(g[:, 3 * H:])
            cy = f_g * c[l] + i_g * g_g
            hy = o_g * jnp.tanh(ln(cy, params["ln_ho_g"][l, 0], params["ln_ho_b"][l, 0]))
            h[l], c[l] = hy, cy
            x = hy
    return jnp.sum(h[-1] * params["wv"], axis=-1) + params["bv"][0, 0]


# ----------------------------------------------------------------------------
if __name__ == "__main__":
    vocab_size, dec_hsz, rnn_layers = 50, 32, 2
    bsz, max_len, dropout = 4, 9, 0.1

    key = jax.random.PRNGKey(0)
    kp, ki, ke, kd = jax.random.split(key, 4)
    params = init_params(kp, vocab_size, dec_hsz, rnn_layers)

    inputs = jax.random.randint(ki, (bsz, max_len), 0, vocab_size, dtype=jnp.int32)
    enc = jax.random.normal(ke, (bsz, dec_hsz), jnp.float32)

    # feed_enc equivalent: h = enc broadcast over layers, c = zeros.
    h0 = jnp.tile(enc[None], (rnn_layers, 1, 1))
    c0 = jnp.zeros((rnn_layers, bsz, dec_hsz), jnp.float32)
    hidden = (h0, c0)

    # Correctness check against pure-JAX reference (dropout disabled).
    out_nodrop = jax.block_until_ready(
        critic_forward(params, inputs, hidden, dropout_p=0.0))
    ref = critic_reference(params, inputs, hidden)
    assert out_nodrop.shape == (bsz,)
    assert jnp.allclose(out_nodrop, ref, atol=1e-2, rtol=1e-2), (out_nodrop, ref)

    # Run with dropout active, as in the module (F.dropout defaults training=True).
    out = jax.block_until_ready(
        critic_forward(params, inputs, hidden, dropout_p=dropout, dropout_key=kd))
    assert out.shape == (bsz,)

    print("KERNEL_OK")
</pallas_src>

<mosaic_0001>
module attributes {stable_mosaic.version = 11 : i64} {
  func.func @_lstm_critic_kernel(%arg0: i32, %arg1: memref<8x8x128xf32, #tpu.memory_space<vmem>>, %arg2: memref<2x8x128xf32, #tpu.memory_space<vmem>>, %arg3: memref<2x8x128xf32, #tpu.memory_space<vmem>>, %arg4: memref<2x128x512xf32, #tpu.memory_space<vmem>>, %arg5: memref<2x128x512xf32, #tpu.memory_space<vmem>>, %arg6: memref<2x1x512xf32, #tpu.memory_space<vmem>>, %arg7: memref<2x1x512xf32, #tpu.memory_space<vmem>>, %arg8: memref<2x1x512xf32, #tpu.memory_space<vmem>>, %arg9: memref<2x1x512xf32, #tpu.memory_space<vmem>>, %arg10: memref<2x1x512xf32, #tpu.memory_space<vmem>>, %arg11: memref<2x1x512xf32, #tpu.memory_space<vmem>>, %arg12: memref<2x1x128xf32, #tpu.memory_space<vmem>>, %arg13: memref<2x1x128xf32, #tpu.memory_space<vmem>>, %arg14: memref<1x128xf32, #tpu.memory_space<vmem>>, %arg15: memref<1x1xf32, #tpu.memory_space<vmem>>, %arg16: memref<8x128xf32, #tpu.memory_space<vmem>>, %arg17: memref<8x1xf32, #tpu.memory_space<vmem>>, %arg18: memref<8x8x128xf32, #tpu.memory_space<vmem>>, %arg19: memref<8x8x512xf32, #tpu.memory_space<vmem>>) attributes {dimension_semantics = [#tpu.dimension_semantics<parallel>], iteration_bounds = array<i64: 1>, scalar_prefetch = 0 : i64, scratch_operands = 2 : i64, tpu.core_type = #tpu.core_type<tc>, window_params = [{transform_indices = @transform_0, window_bounds = array<i64: 8, 8, 128>}, {transform_indices = @transform_1, window_bounds = array<i64: 2, 8, 128>}, {transform_indices = @transform_2, window_bounds = array<i64: 2, 8, 128>}, {pipeline_mode = #tpu.pipeline_mode<synchronous>, transform_indices = @transform_3, window_bounds = array<i64: 2, 128, 512>}, {pipeline_mode = #tpu.pipeline_mode<synchronous>, transform_indices = @transform_4, window_bounds = array<i64: 2, 128, 512>}, {pipeline_mode = #tpu.pipeline_mode<synchronous>, transform_indices = @transform_5, window_bounds = array<i64: 2, 1, 512>}, {pipeline_mode = #tpu.pipeline_mode<synchronous>, transform_indices = @transform_6, window_bounds = array<i64: 2, 1, 512>}, {pipeline_mode = #tpu.pipeline_mode<synchronous>, transform_indices = @transform_7, window_bounds = array<i64: 2, 1, 512>}, {pipeline_mode = #tpu.pipeline_mode<synchronous>, transform_indices = @transform_8, window_bounds = array<i64: 2, 1, 512>}, {pipeline_mode = #tpu.pipeline_mode<synchronous>, transform_indices = @transform_9, window_bounds = array<i64: 2, 1, 512>}, {pipeline_mode = #tpu.pipeline_mode<synchronous>, transform_indices = @transform_10, window_bounds = array<i64: 2, 1, 512>}, {pipeline_mode = #tpu.pipeline_mode<synchronous>, transform_indices = @transform_11, window_bounds = array<i64: 2, 1, 128>}, {pipeline_mode = #tpu.pipeline_mode<synchronous>, transform_indices = @transform_12, window_bounds = array<i64: 2, 1, 128>}, {pipeline_mode = #tpu.pipeline_mode<synchronous>, transform_indices = @transform_13, window_bounds = array<i64: 1, 128>}, {pipeline_mode = #tpu.pipeline_mode<synchronous>, transform_indices = @transform_14, window_bounds = array<i64: 1, 1>}, {transform_indices = @transform_15, window_bounds = array<i64: 8, 128>}, {transform_indices = @transform_16, window_bounds = array<i64: 8, 1>}]} {
    %c0 = arith.constant 0 : index
    %c0_0 = arith.constant 0 : index
    %c0_1 = arith.constant 0 : index
    %0 = vector.load %arg1[%c0, %c0_0, %c0_1] : memref<8x8x128xf32, #tpu.memory_space<vmem>>, vector<8x8x128xf32>
    %1 = vector.shape_cast %0 : vector<8x8x128xf32> to vector<64x128xf32>
    %c0_2 = arith.constant 0 : index
    %c0_3 = arith.constant 0 : index
    %c0_4 = arith.constant 0 : index
    %2 = vector.load %arg4[%c0_2, %c0_3, %c0_4] : memref<2x128x512xf32, #tpu.memory_space<vmem>>, vector<1x128x512xf32>
    %3 = vector.shape_cast %2 : vector<1x128x512xf32> to vector<128x512xf32>
    %cst = arith.constant dense<0.000000e+00> : vector<64x512xf32>
    %4 = tpu.matmul %1, %3, %cst {dimension_numbers = #tpu.dot_dimension_numbers<[1], [0], [0], [1], [0, 0, 1, 1], [], []>} : vector<64x128xf32>, vector<128x512xf32>, vector<64x512xf32> -> vector<64x512xf32>
    %c0_5 = arith.constant 0 : index
    %c0_6 = arith.constant 0 : index
    %c0_7 = arith.constant 0 : index
    %5 = vector.load %arg6[%c0_5, %c0_6, %c0_7] : memref<2x1x512xf32, #tpu.memory_space<vmem>>, vector<1x1x512xf32>
    %6 = vector.shape_cast %5 : vector<1x1x512xf32> to vector<1x512xf32>
    %7 = vector.broadcast %6 : vector<1x512xf32> to vector<64x512xf32>
    %8 = arith.addf %4, %7 : vector<64x512xf32>
    %c0_8 = arith.constant 0 : index
    %c0_9 = arith.constant 0 : index
    %c0_10 = arith.constant 0 : index
    %9 = vector.load %arg8[%c0_8, %c0_9, %c0_10] : memref<2x1x512xf32, #tpu.memory_space<vmem>>, vector<1x1x512xf32>
    %10 = vector.shape_cast %9 : vector<1x1x512xf32> to vector<1x512xf32>
    %c0_11 = arith.constant 0 : index
    %c0_12 = arith.constant 0 : index
    %c0_13 = arith.constant 0 : index
    %11 = vector.load %arg9[%c0_11, %c0_12, %c0_13] : memref<2x1x512xf32, #tpu.memory_space<vmem>>, vector<1x1x512xf32>
    %12 = vector.shape_cast %11 : vector<1x1x512xf32> to vector<1x512xf32>
    %cst_14 = arith.constant dense<0.000000e+00> : vector<64xf32>
    %13 = vector.multi_reduction <add>, %8, %cst_14 [1] : vector<64x512xf32> to vector<64xf32>
    %14 = vector.shape_cast %13 : vector<64xf32> to vector<64x1xf32>
    %cst_15 = arith.constant 7.812500e-03 : f32
    %15 = vector.broadcast %cst_15 : f32 to vector<64x1xf32>
    %16 = arith.mulf %14, %15 : vector<64x1xf32>
    %17 = arith.mulf %8, %8 : vector<64x512xf32>
    %cst_16 = arith.constant dense<0.000000e+00> : vector<64xf32>
    %18 = vector.multi_reduction <add>, %17, %cst_16 [1] : vector<64x512xf32> to vector<64xf32>
    %19 = vector.shape_cast %18 : vector<64xf32> to vector<64x1xf32>
    %cst_17 = arith.constant 7.812500e-03 : f32
    %20 = vector.broadcast %cst_17 : f32 to vector<64x1xf32>
    %21 = arith.mulf %19, %20 : vector<64x1xf32>
    %22 = arith.mulf %16, %16 : vector<64x1xf32>
    %23 = arith.subf %21, %22 : vector<64x1xf32>
    %cst_18 = arith.constant 0.000000e+00 : f32
    %24 = vector.broadcast %cst_18 : f32 to vector<64x1xf32>
    %25 = arith.maximumf %23, %24 : vector<64x1xf32>
    %26 = vector.broadcast %16 : vector<64x1xf32> to vector<64x512xf32>
    %27 = arith.subf %8, %26 : vector<64x512xf32>
    %cst_19 = arith.constant 9.99999974E-6 : f32
    %28 = vector.broadcast %cst_19 : f32 to vector<64x1xf32>
    %29 = arith.addf %25, %28 : vector<64x1xf32>
    %30 = math.rsqrt %29 : vector<64x1xf32>
    %31 = vector.broadcast %30 : vector<64x1xf32> to vector<64x512xf32>
    %32 = arith.mulf %27, %31 : vector<64x512xf32>
    %33 = vector.broadcast %10 : vector<1x512xf32> to vector<64x512xf32>
    %34 = arith.mulf %32, %33 : vector<64x512xf32>
    %35 = vector.broadcast %12 : vector<1x512xf32> to vector<64x512xf32>
    %36 = arith.addf %34, %35 : vector<64x512xf32>
    %37 = vector.shape_cast %36 : vector<64x512xf32> to vector<8x8x512xf32>
    %c0_20 = arith.constant 0 : index
    %c0_21 = arith.constant 0 : index
    %c0_22 = arith.constant 0 : index
    %38 = vector.load %arg19[%c0_20, %c0_21, %c0_22] : memref<8x8x512xf32, #tpu.memory_space<vmem>>, vector<8x8x512xf32>
    tpu.vector_store %arg19[%c0_20, %c0_21, %c0_22], %37 {strides = array<i32>} : memref<8x8x512xf32, #tpu.memory_space<vmem>>, vector<8x8x512xf32>,
    %c0_23 = arith.constant 0 : index
    %c0_24 = arith.constant 0 : index
    %c0_25 = arith.constant 0 : index
    %39 = vector.load %arg5[%c0_23, %c0_24, %c0_25] : memref<2x128x512xf32, #tpu.memory_space<vmem>>, vector<1x128x512xf32>
    %40 = vector.shape_cast %39 : vector<1x128x512xf32> to vector<128x512xf32>
    %c0_26 = arith.constant 0 : index
    %c0_27 = arith.constant 0 : index
    %c0_28 = arith.constant 0 : index
    %41 = vector.load %arg7[%c0_26, %c0_27, %c0_28] : memref<2x1x512xf32, #tpu.memory_space<vmem>>, vector<1x1x512xf32>
    %42 = vector.shape_cast %41 : vector<1x1x512xf32> to vector<1x512xf32>
    %43 = vector.shape_cast %42 : vector<1x512xf32> to vector<1x512xf32>
    %44 = vector.broadcast %43 : vector<1x512xf32> to vector<8x512xf32>
    %c0_29 = arith.constant 0 : index
    %c0_30 = arith.constant 0 : index
    %c0_31 = arith.constant 0 : index
    %45 = vector.load %arg10[%c0_29, %c0_30, %c0_31] : memref<2x1x512xf32, #tpu.memory_space<vmem>>, vector<1x1x512xf32>
    %46 = vector.shape_cast %45 : vector<1x1x512xf32> to vector<1x512xf32>
    %47 = vector.shape_cast %46 : vector<1x512xf32> to vector<1x512xf32>
    %48 = vector.broadcast %47 : vector<1x512xf32> to vector<8x512xf32>
    %c0_32 = arith.constant 0 : index
    %c0_33 = arith.constant 0 : index
    %c0_34 = arith.constant 0 : index
    %49 = vector.load %arg11[%c0_32, %c0_33, %c0_34] : memref<2x1x512xf32, #tpu.memory_space<vmem>>, vector<1x1x512xf32>
    %50 = vector.shape_cast %49 : vector<1x1x512xf32> to vector<1x512xf32>
    %51 = vector.shape_cast %50 : vector<1x512xf32> to vector<1x512xf32>
    %52 = vector.broadcast %51 : vector<1x512xf32> to vector<8x512xf32>
    %c0_35 = arith.constant 0 : index
    %c0_36 = arith.constant 0 : index
    %c0_37 = arith.constant 0 : index
    %53 = vector.load %arg12[%c0_35, %c0_36, %c0_37] : memref<2x1x128xf32, #tpu.memory_space<vmem>>, vector<1x1x128xf32>
    %54 = vector.shape_cast %53 : vector<1x1x128xf32> to vector<1x128xf32>
    %55 = vector.shape_cast %54 : vector<1x128xf32> to vector<1x128xf32>
    %56 = vector.broadcast %55 : vector<1x128xf32> to vector<8x128xf32>
    %c0_38 = arith.constant 0 : index
    %c0_39 = arith.constant 0 : index
    %c0_40 = arith.constant 0 : index
    %57 = vector.load %arg13[%c0_38, %c0_39, %c0_40] : memref<2x1x128xf32, #tpu.memory_space<vmem>>, vector<1x1x128xf32>
    %58 = vector.shape_cast %57 : vector<1x1x128xf32> to vector<1x128xf32>
    %59 = vector.shape_cast %58 : vector<1x128xf32> to vector<1x128xf32>
    %60 = vector.broadcast %59 : vector<1x128xf32> to vector<8x128xf32>
    %c0_41 = arith.constant 0 : index
    %c0_42 = arith.constant 0 : index
    %c0_43 = arith.constant 0 : index
    %61 = vector.load %arg2[%c0_41, %c0_42, %c0_43] : memref<2x8x128xf32, #tpu.memory_space<vmem>>, vector<1x8x128xf32>
    %62 = vector.shape_cast %61 : vector<1x8x128xf32> to vector<8x128xf32>
    %c0_44 = arith.constant 0 : index
    %c0_45 = arith.constant 0 : index
    %c0_46 = arith.constant 0 : index
    %63 = vector.load %arg3[%c0_44, %c0_45, %c0_46] : memref<2x8x128xf32, #tpu.memory_space<vmem>>, vector<1x8x128xf32>
    %64 = vector.shape_cast %63 : vector<1x8x128xf32> to vector<8x128xf32>
    %c0_i32 = arith.constant 0 : i32
    %cst_47 = arith.constant dense<0.000000e+00> : vector<8x512xf32>
    %65 = tpu.matmul %62, %40, %cst_47 {dimension_numbers = #tpu.dot_dimension_numbers<[1], [0], [0], [1], [0, 0, 1, 1], [], []>} : vector<8x128xf32>, vector<128x512xf32>, vector<8x512xf32> -> vector<8x512xf32>
    %66 = arith.addf %65, %44 : vector<8x512xf32>
    %cst_48 = arith.constant dense<0.000000e+00> : vector<8xf32>
    %67 = vector.multi_reduction <add>, %66, %cst_48 [1] : vector<8x512xf32> to vector<8xf32>
    %68 = vector.shape_cast %67 : vector<8xf32> to vector<8x1xf32>
    %cst_49 = arith.constant 7.812500e-03 : f32
    %69 = vector.broadcast %cst_49 : f32 to vector<8x1xf32>
    %70 = arith.mulf %68, %69 : vector<8x1xf32>
    %71 = arith.mulf %66, %66 : vector<8x512xf32>
    %cst_50 = arith.constant dense<0.000000e+00> : vector<8xf32>
    %72 = vector.multi_reduction <add>, %71, %cst_50 [1] : vector<8x512xf32> to vector<8xf32>
    %73 = vector.shape_cast %72 : vector<8xf32> to vector<8x1xf32>
    %cst_51 = arith.constant 7.812500e-03 : f32
    %74 = vector.broadcast %cst_51 : f32 to vector<8x1xf32>
    %75 = arith.mulf %73, %74 : vector<8x1xf32>
    %76 = arith.mulf %70, %70 : vector<8x1xf32>
    %77 = arith.subf %75, %76 : vector<8x1xf32>
    %cst_52 = arith.constant 0.000000e+00 : f32
    %78 = vector.broadcast %cst_52 : f32 to vector<8x1xf32>
    %79 = arith.maximumf %77, %78 : vector<8x1xf32>
    %80 = vector.broadcast %70 : vector<8x1xf32> to vector<8x512xf32>
    %81 = arith.subf %66, %80 : vector<8x512xf32>
    %cst_53 = arith.constant 9.99999974E-6 : f32
    %82 = vector.broadcast %cst_53 : f32 to vector<8x1xf32>
    %83 = arith.addf %79, %82 : vector<8x1xf32>
    %84 = math.rsqrt %83 : vector<8x1xf32>
    %85 = vector.broadcast %84 : vector<8x1xf32> to vector<8x512xf32>
    %86 = arith.mulf %81, %85 : vector<8x512xf32>
    %87 = arith.mulf %86, %48 : vector<8x512xf32>
    %88 = arith.addf %87, %52 : vector<8x512xf32>
    %89 = arith.index_cast %c0_i32 : i32 to index
    %c0_54 = arith.constant 0 : index
    %c0_55 = arith.constant 0 : index
    %90 = vector.load %arg19[%89, %c0_54, %c0_55] : memref<8x8x512xf32, #tpu.memory_space<vmem>>, vector<1x8x512xf32>
    %91 = vector.shape_cast %90 : vector<1x8x512xf32> to vector<8x512xf32>
    %92 = arith.addf %91, %88 : vector<8x512xf32>
    %93 = vector.extract_strided_slice %92 {offsets = [0, 0], sizes = [8, 128], strides = [1, 1]} : vector<8x512xf32> to vector<8x128xf32>
    %94 = arith.negf %93 : vector<8x128xf32>
    %95 = math.exp %94 : vector<8x128xf32>
    %cst_56 = arith.constant 1.000000e+00 : f32
    %96 = vector.broadcast %cst_56 : f32 to vector<8x128xf32>
    %97 = arith.addf %96, %95 : vector<8x128xf32>
    %98 = arith.divf %96, %97 : vector<8x128xf32>
    %99 = vector.extract_strided_slice %92 {offsets = [0, 128], sizes = [8, 128], strides = [1, 1]} : vector<8x512xf32> to vector<8x128xf32>
    %100 = arith.negf %99 : vector<8x128xf32>
    %101 = math.exp %100 : vector<8x128xf32>
    %cst_57 = arith.constant 1.000000e+00 : f32
    %102 = vector.broadcast %cst_57 : f32 to vector<8x128xf32>
    %103 = arith.addf %102, %101 : vector<8x128xf32>
    %104 = arith.divf %102, %103 : vector<8x128xf32>
    %105 = vector.extract_strided_slice %92 {offsets = [0, 256], sizes = [8, 128], strides = [1, 1]} : vector<8x512xf32> to vector<8x128xf32>
    %106 = arith.negf %105 : vector<8x128xf32>
    %107 = math.exp %106 : vector<8x128xf32>
    %cst_58 = arith.constant 1.000000e+00 : f32
    %108 = vector.broadcast %cst_58 : f32 to vector<8x128xf32>
    %109 = arith.addf %108, %107 : vector<8x128xf32>
    %110 = arith.divf %108, %109 : vector<8x128xf32>
    %111 = vector.extract_strided_slice %92 {offsets = [0, 384], sizes = [8, 128], strides = [1, 1]} : vector<8x512xf32> to vector<8x128xf32>
    %112 = math.tanh %111 : vector<8x128xf32>
    %113 = arith.mulf %104, %64 : vector<8x128xf32>
    %114 = arith.mulf %98, %112 : vector<8x128xf32>
    %115 = arith.addf %113, %114 : vector<8x128xf32>
    %cst_59 = arith.constant dense<0.000000e+00> : vector<8xf32>
    %116 = vector.multi_reduction <add>, %115, %cst_59 [1] : vector<8x128xf32> to vector<8xf32>
    %117 = vector.shape_cast %116 : vector<8xf32> to vector<8x1xf32>
    %cst_60 = arith.constant 3.125000e-02 : f32
    %118 = vector.broadcast %cst_60 : f32 to vector<8x1xf32>
    %119 = arith.mulf %117, %118 : vector<8x1xf32>
    %120 = arith.mulf %115, %115 : vector<8x128xf32>
    %cst_61 = arith.constant dense<0.000000e+00> : vector<8xf32>
    %121 = vector.multi_reduction <add>, %120, %cst_61 [1] : vector<8x128xf32> to vector<8xf32>
    %122 = vector.shape_cast %121 : vector<8xf32> to vector<8x1xf32>
    %cst_62 = arith.constant 3.125000e-02 : f32
    %123 = vector.broadcast %cst_62 : f32 to vector<8x1xf32>
    %124 = arith.mulf %122, %123 : vector<8x1xf32>
    %125 = arith.mulf %119, %119 : vector<8x1xf32>
    %126 = arith.subf %124, %125 : vector<8x1xf32>
    %cst_63 = arith.constant 0.000000e+00 : f32
    %127 = vector.broadcast %cst_63 : f32 to vector<8x1xf32>
    %128 = arith.maximumf %126, %127 : vector<8x1xf32>
    %129 = vector.broadcast %119 : vector<8x1xf32> to vector<8x128xf32>
    %130 = arith.subf %115, %129 : vector<8x128xf32>
    %cst_64 = arith.constant 9.99999974E-6 : f32
    %131 = vector.broadcast %cst_64 : f32 to vector<8x1xf32>
    %132 = arith.addf %128, %131 : vector<8x1xf32>
    %133 = math.rsqrt %132 : vector<8x1xf32>
    %134 = vector.broadcast %133 : vector<8x1xf32> to vector<8x128xf32>
    %135 = arith.mulf %130, %134 : vector<8x128xf32>
    %136 = arith.mulf %135, %56 : vector<8x128xf32>
    %137 = arith.addf %136, %60 : vector<8x128xf32>
    %138 = math.tanh %137 : vector<8x128xf32>
    %139 = arith.mulf %110, %138 : vector<8x128xf32>
    %140 = arith.index_cast %c0_i32 : i32 to index
    %c0_65 = arith.constant 0 : index
    %c0_66 = arith.constant 0 : index
    %141 = vector.load %arg18[%140, %c0_65, %c0_66] : memref<8x8x128xf32, #tpu.memory_space<vmem>>, vector<1x8x128xf32>
    %142 = vector.shape_cast %141 : vector<1x8x128xf32> to vector<8x128xf32>
    %143 = vector.shape_cast %139 : vector<8x128xf32> to vector<1x8x128xf32>
    tpu.vector_store %arg18[%140, %c0_65, %c0_66], %143 {strides = array<i32>} : memref<8x8x128xf32, #tpu.memory_space<vmem>>, vector<1x8x128xf32>,
    %c1_i32 = arith.constant 1 : i32
    %cst_67 = arith.constant dense<0.000000e+00> : vector<8x512xf32>
    %144 = tpu.matmul %139, %40, %cst_67 {dimension_numbers = #tpu.dot_dimension_numbers<[1], [0], [0], [1], [0, 0, 1, 1], [], []>} : vector<8x128xf32>, vector<128x512xf32>, vector<8x512xf32> -> vector<8x512xf32>
    %145 = arith.addf %144, %44 : vector<8x512xf32>
    %cst_68 = arith.constant dense<0.000000e+00> : vector<8xf32>
    %146 = vector.multi_reduction <add>, %145, %cst_68 [1] : vector<8x512xf32> to vector<8xf32>
    %147 = vector.shape_cast %146 : vector<8xf32> to vector<8x1xf32>
    %cst_69 = arith.constant 7.812500e-03 : f32
    %148 = vector.broadcast %cst_69 : f32 to vector<8x1xf32>
    %149 = arith.mulf %147, %148 : vector<8x1xf32>
    %150 = arith.mulf %145, %145 : vector<8x512xf32>
    %cst_70 = arith.constant dense<0.000000e+00> : vector<8xf32>
    %151 = vector.multi_reduction <add>, %150, %cst_70 [1] : vector<8x512xf32> to vector<8xf32>
    %152 = vector.shape_cast %151 : vector<8xf32> to vector<8x1xf32>
    %cst_71 = arith.constant 7.812500e-03 : f32
    %153 = vector.broadcast %cst_71 : f32 to vector<8x1xf32>
    %154 = arith.mulf %152, %153 : vector<8x1xf32>
    %155 = arith.mulf %149, %149 : vector<8x1xf32>
    %156 = arith.subf %154, %155 : vector<8x1xf32>
    %cst_72 = arith.constant 0.000000e+00 : f32
    %157 = vector.broadcast %cst_72 : f32 to vector<8x1xf32>
    %158 = arith.maximumf %156, %157 : vector<8x1xf32>
    %159 = vector.broadcast %149 : vector<8x1xf32> to vector<8x512xf32>
    %160 = arith.subf %145, %159 : vector<8x512xf32>
    %cst_73 = arith.constant 9.99999974E-6 : f32
    %161 = vector.broadcast %cst_73 : f32 to vector<8x1xf32>
    %162 = arith.addf %158, %161 : vector<8x1xf32>
    %163 = math.rsqrt %162 : vector<8x1xf32>
    %164 = vector.broadcast %163 : vector<8x1xf32> to vector<8x512xf32>
    %165 = arith.mulf %160, %164 : vector<8x512xf32>
    %166 = arith.mulf %165, %48 : vector<8x512xf32>
    %167 = arith.addf %166, %52 : vector<8x512xf32>
    %168 = arith.index_cast %c1_i32 : i32 to index
    %c0_74 = arith.constant 0 : index
    %c0_75 = arith.constant 0 : index
    %169 = vector.load %arg19[%168, %c0_74, %c0_75] : memref<8x8x512xf32, #tpu.memory_space<vmem>>, vector<1x8x512xf32>
    %170 = vector.shape_cast %169 : vector<1x8x512xf32> to vector<8x512xf32>
    %171 = arith.addf %170, %167 : vector<8x512xf32>
    %172 = vector.extract_strided_slice %171 {offsets = [0, 0], sizes = [8, 128], strides = [1, 1]} : vector<8x512xf32> to vector<8x128xf32>
    %173 = arith.negf %172 : vector<8x128xf32>
    %174 = math.exp %173 : vector<8x128xf32>
    %cst_76 = arith.constant 1.000000e+00 : f32
    %175 = vector.broadcast %cst_76 : f32 to vector<8x128xf32>
    %176 = arith.addf %175, %174 : vector<8x128xf32>
    %177 = arith.divf %175, %176 : vector<8x128xf32>
    %178 = vector.extract_strided_slice %171 {offsets = [0, 128], sizes = [8, 128], strides = [1, 1]} : vector<8x512xf32> to vector<8x128xf32>
    %179 = arith.negf %178 : vector<8x128xf32>
    %180 = math.exp %179 : vector<8x128xf32>
    %cst_77 = arith.constant 1.000000e+00 : f32
    %181 = vector.broadcast %cst_77 : f32 to vector<8x128xf32>
    %182 = arith.addf %181, %180 : vector<8x128xf32>
    %183 = arith.divf %181, %182 : vector<8x128xf32>
    %184 = vector.extract_strided_slice %171 {offsets = [0, 256], sizes = [8, 128], strides = [1, 1]} : vector<8x512xf32> to vector<8x128xf32>
    %185 = arith.negf %184 : vector<8x128xf32>
    %186 = math.exp %185 : vector<8x128xf32>
    %cst_78 = arith.constant 1.000000e+00 : f32
    %187 = vector.broadcast %cst_78 : f32 to vector<8x128xf32>
    %188 = arith.addf %187, %186 : vector<8x128xf32>
    %189 = arith.divf %187, %188 : vector<8x128xf32>
    %190 = vector.extract_strided_slice %171 {offsets = [0, 384], sizes = [8, 128], strides = [1, 1]} : vector<8x512xf32> to vector<8x128xf32>
    %191 = math.tanh %190 : vector<8x128xf32>
    %192 = arith.mulf %183, %115 : vector<8x128xf32>
    %193 = arith.mulf %177, %191 : vector<8x128xf32>
    %194 = arith.addf %192, %193 : vector<8x128xf32>
    %cst_79 = arith.constant dense<0.000000e+00> : vector<8xf32>
    %195 = vector.multi_reduction <add>, %194, %cst_79 [1] : vector<8x128xf32> to vector<8xf32>
    %196 = vector.shape_cast %195 : vector<8xf32> to vector<8x1xf32>
    %cst_80 = arith.constant 3.125000e-02 : f32
    %197 = vector.broadcast %cst_80 : f32 to vector<8x1xf32>
    %198 = arith.mulf %196, %197 : vector<8x1xf32>
    %199 = arith.mulf %194, %194 : vector<8x128xf32>
    %cst_81 = arith.constant dense<0.000000e+00> : vector<8xf32>
    %200 = vector.multi_reduction <add>, %199, %cst_81 [1] : vector<8x128xf32> to vector<8xf32>
    %201 = vector.shape_cast %200 : vector<8xf32> to vector<8x1xf32>
    %cst_82 = arith.constant 3.125000e-02 : f32
    %202 = vector.broadcast %cst_82 : f32 to vector<8x1xf32>
    %203 = arith.mulf %201, %202 : vector<8x1xf32>
    %204 = arith.mulf %198, %198 : vector<8x1xf32>
    %205 = arith.subf %203, %204 : vector<8x1xf32>
    %cst_83 = arith.constant 0.000000e+00 : f32
    %206 = vector.broadcast %cst_83 : f32 to vector<8x1xf32>
    %207 = arith.maximumf %205, %206 : vector<8x1xf32>
    %208 = vector.broadcast %198 : vector<8x1xf32> to vector<8x128xf32>
    %209 = arith.subf %194, %208 : vector<8x128xf32>
    %cst_84 = arith.constant 9.99999974E-6 : f32
    %210 = vector.broadcast %cst_84 : f32 to vector<8x1xf32>
    %211 = arith.addf %207, %210 : vector<8x1xf32>
    %212 = math.rsqrt %211 : vector<8x1xf32>
    %213 = vector.broadcast %212 : vector<8x1xf32> to vector<8x128xf32>
    %214 = arith.mulf %209, %213 : vector<8x128xf32>
    %215 = arith.mulf %214, %56 : vector<8x128xf32>
    %216 = arith.addf %215, %60 : vector<8x128xf32>
    %217 = math.tanh %216 : vector<8x128xf32>
    %218 = arith.mulf %189, %217 : vector<8x128xf32>
    %219 = arith.index_cast %c1_i32 : i32 to index
    %c0_85 = arith.constant 0 : index
    %c0_86 = arith.constant 0 : index
    %220 = vector.load %arg18[%219, %c0_85, %c0_86] : memref<8x8x128xf32, #tpu.memory_space<vmem>>, vector<1x8x128xf32>
    %221 = vector.shape_cast %220 : vector<1x8x128xf32> to vector<8x128xf32>
    %222 = vector.shape_cast %218 : vector<8x128xf32> to vector<1x8x128xf32>
    tpu.vector_store %arg18[%219, %c0_85, %c0_86], %222 {strides = array<i32>} : memref<8x8x128xf32, #tpu.memory_space<vmem>>, vector<1x8x128xf32>,
    %c2_i32 = arith.constant 2 : i32
    %cst_87 = arith.constant dense<0.000000e+00> : vector<8x512xf32>
    %223 = tpu.matmul %218, %40, %cst_87 {dimension_numbers = #tpu.dot_dimension_numbers<[1], [0], [0], [1], [0, 0, 1, 1], [], []>} : vector<8x128xf32>, vector<128x512xf32>, vector<8x512xf32> -> vector<8x512xf32>
    %224 = arith.addf %223, %44 : vector<8x512xf32>
    %cst_88 = arith.constant dense<0.000000e+00> : vector<8xf32>
    %225 = vector.multi_reduction <add>, %224, %cst_88 [1] : vector<8x512xf32> to vector<8xf32>
    %226 = vector.shape_cast %225 : vector<8xf32> to vector<8x1xf32>
    %cst_89 = arith.constant 7.812500e-03 : f32
    %227 = vector.broadcast %cst_89 : f32 to vector<8x1xf32>
    %228 = arith.mulf %226, %227 : vector<8x1xf32>
    %229 = arith.mulf %224, %224 : vector<8x512xf32>
    %cst_90 = arith.constant dense<0.000000e+00> : vector<8xf32>
    %230 = vector.multi_reduction <add>, %229, %cst_90 [1] : vector<8x512xf32> to vector<8xf32>
    %231 = vector.shape_cast %230 : vector<8xf32> to vector<8x1xf32>
    %cst_91 = arith.constant 7.812500e-03 : f32
    %232 = vector.broadcast %cst_91 : f32 to vector<8x1xf32>
    %233 = arith.mulf %231, %232 : vector<8x1xf32>
    %234 = arith.mulf %228, %228 : vector<8x1xf32>
    %235 = arith.subf %233, %234 : vector<8x1xf32>
    %cst_92 = arith.constant 0.000000e+00 : f32
    %236 = vector.broadcast %cst_92 : f32 to vector<8x1xf32>
    %237 = arith.maximumf %235, %236 : vector<8x1xf32>
    %238 = vector.broadcast %228 : vector<8x1xf32> to vector<8x512xf32>
    %239 = arith.subf %224, %238 : vector<8x512xf32>
    %cst_93 = arith.constant 9.99999974E-6 : f32
    %240 = vector.broadcast %cst_93 : f32 to vector<8x1xf32>
    %241 = arith.addf %237, %240 : vector<8x1xf32>
    %242 = math.rsqrt %241 : vector<8x1xf32>
    %243 = vector.broadcast %242 : vector<8x1xf32> to vector<8x512xf32>
    %244 = arith.mulf %239, %243 : vector<8x512xf32>
    %245 = arith.mulf %244, %48 : vector<8x512xf32>
    %246 = arith.addf %245, %52 : vector<8x512xf32>
    %247 = arith.index_cast %c2_i32 : i32 to index
    %c0_94 = arith.constant 0 : index
    %c0_95 = arith.constant 0 : index
    %248 = vector.load %arg19[%247, %c0_94, %c0_95] : memref<8x8x512xf32, #tpu.memory_space<vmem>>, vector<1x8x512xf32>
    %249 = vector.shape_cast %248 : vector<1x8x512xf32> to vector<8x512xf32>
    %250 = arith.addf %249, %246 : vector<8x512xf32>
    %251 = vector.extract_strided_slice %250 {offsets = [0, 0], sizes = [8, 128], strides = [1, 1]} : vector<8x512xf32> to vector<8x128xf32>
    %252 = arith.negf %251 : vector<8x128xf32>
    %253 = math.exp %252 : vector<8x128xf32>
    %cst_96 = arith.constant 1.000000e+00 : f32
    %254 = vector.broadcast %cst_96 : f32 to vector<8x128xf32>
    %255 = arith.addf %254, %253 : vector<8x128xf32>
    %256 = arith.divf %254, %255 : vector<8x128xf32>
    %257 = vector.extract_strided_slice %250 {offsets = [0, 128], sizes = [8, 128], strides = [1, 1]} : vector<8x512xf32> to vector<8x128xf32>
    %258 = arith.negf %257 : vector<8x128xf32>
    %259 = math.exp %258 : vector<8x128xf32>
    %cst_97 = arith.constant 1.000000e+00 : f32
    %260 = vector.broadcast %cst_97 : f32 to vector<8x128xf32>
    %261 = arith.addf %260, %259 : vector<8x128xf32>
    %262 = arith.divf %260, %261 : vector<8x128xf32>
    %263 = vector.extract_strided_slice %250 {offsets = [0, 256], sizes = [8, 128], strides = [1, 1]} : vector<8x512xf32> to vector<8x128xf32>
    %264 = arith.negf %263 : vector<8x128xf32>
    %265 = math.exp %264 : vector<8x128xf32>
    %cst_98 = arith.constant 1.000000e+00 : f32
    %266 = vector.broadcast %cst_98 : f32 to vector<8x128xf32>
    %267 = arith.addf %266, %265 : vector<8x128xf32>
    %268 = arith.divf %266, %267 : vector<8x128xf32>
    %269 = vector.extract_strided_slice %250 {offsets = [0, 384], sizes = [8, 128], strides = [1, 1]} : vector<8x512xf32> to vector<8x128xf32>
    %270 = math.tanh %269 : vector<8x128xf32>
    %271 = arith.mulf %262, %194 : vector<8x128xf32>
    %272 = arith.mulf %256, %270 : vector<8x128xf32>
    %273 = arith.addf %271, %272 : vector<8x128xf32>
    %cst_99 = arith.constant dense<0.000000e+00> : vector<8xf32>
    %274 = vector.multi_reduction <add>, %273, %cst_99 [1] : vector<8x128xf32> to vector<8xf32>
    %275 = vector.shape_cast %274 : vector<8xf32> to vector<8x1xf32>
    %cst_100 = arith.constant 3.125000e-02 : f32
    %276 = vector.broadcast %cst_100 : f32 to vector<8x1xf32>
    %277 = arith.mulf %275, %276 : vector<8x1xf32>
    %278 = arith.mulf %273, %273 : vector<8x128xf32>
    %cst_101 = arith.constant dense<0.000000e+00> : vector<8xf32>
    %279 = vector.multi_reduction <add>, %278, %cst_101 [1] : vector<8x128xf32> to vector<8xf32>
    %280 = vector.shape_cast %279 : vector<8xf32> to vector<8x1xf32>
    %cst_102 = arith.constant 3.125000e-02 : f32
    %281 = vector.broadcast %cst_102 : f32 to vector<8x1xf32>
    %282 = arith.mulf %280, %281 : vector<8x1xf32>
    %283 = arith.mulf %277, %277 : vector<8x1xf32>
    %284 = arith.subf %282, %283 : vector<8x1xf32>
    %cst_103 = arith.constant 0.000000e+00 : f32
    %285 = vector.broadcast %cst_103 : f32 to vector<8x1xf32>
    %286 = arith.maximumf %284, %285 : vector<8x1xf32>
    %287 = vector.broadcast %277 : vector<8x1xf32> to vector<8x128xf32>
    %288 = arith.subf %273, %287 : vector<8x128xf32>
    %cst_104 = arith.constant 9.99999974E-6 : f32
    %289 = vector.broadcast %cst_104 : f32 to vector<8x1xf32>
    %290 = arith.addf %286, %289 : vector<8x1xf32>
    %291 = math.rsqrt %290 : vector<8x1xf32>
    %292 = vector.broadcast %291 : vector<8x1xf32> to vector<8x128xf32>
    %293 = arith.mulf %288, %292 : vector<8x128xf32>
    %294 = arith.mulf %293, %56 : vector<8x128xf32>
    %295 = arith.addf %294, %60 : vector<8x128xf32>
    %296 = math.tanh %295 : vector<8x128xf32>
    %297 = arith.mulf %268, %296 : vector<8x128xf32>
    %298 = arith.index_cast %c2_i32 : i32 to index
    %c0_105 = arith.constant 0 : index
    %c0_106 = arith.constant 0 : index
    %299 = vector.load %arg18[%298, %c0_105, %c0_106] : memref<8x8x128xf32, #tpu.memory_space<vmem>>, vector<1x8x128xf32>
    %300 = vector.shape_cast %299 : vector<1x8x128xf32> to vector<8x128xf32>
    %301 = vector.shape_cast %297 : vector<8x128xf32> to vector<1x8x128xf32>
    tpu.vector_store %arg18[%298, %c0_105, %c0_106], %301 {strides = array<i32>} : memref<8x8x128xf32, #tpu.memory_space<vmem>>, vector<1x8x128xf32>,
    %c3_i32 = arith.constant 3 : i32
    %cst_107 = arith.constant dense<0.000000e+00> : vector<8x512xf32>
    %302 = tpu.matmul %297, %40, %cst_107 {dimension_numbers = #tpu.dot_dimension_numbers<[1], [0], [0], [1], [0, 0, 1, 1], [], []>} : vector<8x128xf32>, vector<128x512xf32>, vector<8x512xf32> -> vector<8x512xf32>
    %303 = arith.addf %302, %44 : vector<8x512xf32>
    %cst_108 = arith.constant dense<0.000000e+00> : vector<8xf32>
    %304 = vector.multi_reduction <add>, %303, %cst_108 [1] : vector<8x512xf32> to vector<8xf32>
    %305 = vector.shape_cast %304 : vector<8xf32> to vector<8x1xf32>
    %cst_109 = arith.constant 7.812500e-03 : f32
    %306 = vector.broadcast %cst_109 : f32 to vector<8x1xf32>
    %307 = arith.mulf %305, %306 : vector<8x1xf32>
    %308 = arith.mulf %303, %303 : vector<8x512xf32>
    %cst_110 = arith.constant dense<0.000000e+00> : vector<8xf32>
    %309 = vector.multi_reduction <add>, %308, %cst_110 [1] : vector<8x512xf32> to vector<8xf32>
    %310 = vector.shape_cast %309 : vector<8xf32> to vector<8x1xf32>
    %cst_111 = arith.constant 7.812500e-03 : f32
    %311 = vector.broadcast %cst_111 : f32 to vector<8x1xf32>
    %312 = arith.mulf %310, %311 : vector<8x1xf32>
    %313 = arith.mulf %307, %307 : vector<8x1xf32>
    %314 = arith.subf %312, %313 : vector<8x1xf32>
    %cst_112 = arith.constant 0.000000e+00 : f32
    %315 = vector.broadcast %cst_112 : f32 to vector<8x1xf32>
    %316 = arith.maximumf %314, %315 : vector<8x1xf32>
    %317 = vector.broadcast %307 : vector<8x1xf32> to vector<8x512xf32>
    %318 = arith.subf %303, %317 : vector<8x512xf32>
    %cst_113 = arith.constant 9.99999974E-6 : f32
    %319 = vector.broadcast %cst_113 : f32 to vector<8x1xf32>
    %320 = arith.addf %316, %319 : vector<8x1xf32>
    %321 = math.rsqrt %320 : vector<8x1xf32>
    %322 = vector.broadcast %321 : vector<8x1xf32> to vector<8x512xf32>
    %323 = arith.mulf %318, %322 : vector<8x512xf32>
    %324 = arith.mulf %323, %48 : vector<8x512xf32>
    %325 = arith.addf %324, %52 : vector<8x512xf32>
    %326 = arith.index_cast %c3_i32 : i32 to index
    %c0_114 = arith.constant 0 : index
    %c0_115 = arith.constant 0 : index
    %327 = vector.load %arg19[%326, %c0_114, %c0_115] : memref<8x8x512xf32, #tpu.memory_space<vmem>>, vector<1x8x512xf32>
    %328 = vector.shape_cast %327 : vector<1x8x512xf32> to vector<8x512xf32>
    %329 = arith.addf %328, %325 : vector<8x512xf32>
    %330 = vector.extract_strided_slice %329 {offsets = [0, 0], sizes = [8, 128], strides = [1, 1]} : vector<8x512xf32> to vector<8x128xf32>
    %331 = arith.negf %330 : vector<8x128xf32>
    %332 = math.exp %331 : vector<8x128xf32>
    %cst_116 = arith.constant 1.000000e+00 : f32
    %333 = vector.broadcast %cst_116 : f32 to vector<8x128xf32>
    %334 = arith.addf %333, %332 : vector<8x128xf32>
    %335 = arith.divf %333, %334 : vector<8x128xf32>
    %336 = vector.extract_strided_slice %329 {offsets = [0, 128], sizes = [8, 128], strides = [1, 1]} : vector<8x512xf32> to vector<8x128xf32>
    %337 = arith.negf %336 : vector<8x128xf32>
    %338 = math.exp %337 : vector<8x128xf32>
    %cst_117 = arith.constant 1.000000e+00 : f32
    %339 = vector.broadcast %cst_117 : f32 to vector<8x128xf32>
    %340 = arith.addf %339, %338 : vector<8x128xf32>
    %341 = arith.divf %339, %340 : vector<8x128xf32>
    %342 = vector.extract_strided_slice %329 {offsets = [0, 256], sizes = [8, 128], strides = [1, 1]} : vector<8x512xf32> to vector<8x128xf32>
    %343 = arith.negf %342 : vector<8x128xf32>
    %344 = math.exp %343 : vector<8x128xf32>
    %cst_118 = arith.constant 1.000000e+00 : f32
    %345 = vector.broadcast %cst_118 : f32 to vector<8x128xf32>
    %346 = arith.addf %345, %344 : vector<8x128xf32>
    %347 = arith.divf %345, %346 : vector<8x128xf32>
    %348 = vector.extract_strided_slice %329 {offsets = [0, 384], sizes = [8, 128], strides = [1, 1]} : vector<8x512xf32> to vector<8x128xf32>
    %349 = math.tanh %348 : vector<8x128xf32>
    %350 = arith.mulf %341, %273 : vector<8x128xf32>
    %351 = arith.mulf %335, %349 : vector<8x128xf32>
    %352 = arith.addf %350, %351 : vector<8x128xf32>
    %cst_119 = arith.constant dense<0.000000e+00> : vector<8xf32>
    %353 = vector.multi_reduction <add>, %352, %cst_119 [1] : vector<8x128xf32> to vector<8xf32>
    %354 = vector.shape_cast %353 : vector<8xf32> to vector<8x1xf32>
    %cst_120 = arith.constant 3.125000e-02 : f32
    %355 = vector.broadcast %cst_120 : f32 to vector<8x1xf32>
    %356 = arith.mulf %354, %355 : vector<8x1xf32>
    %357 = arith.mulf %352, %352 : vector<8x128xf32>
    %cst_121 = arith.constant dense<0.000000e+00> : vector<8xf32>
    %358 = vector.multi_reduction <add>, %357, %cst_121 [1] : vector<8x128xf32> to vector<8xf32>
    %359 = vector.shape_cast %358 : vector<8xf32> to vector<8x1xf32>
    %cst_122 = arith.constant 3.125000e-02 : f32
    %360 = vector.broadcast %cst_122 : f32 to vector<8x1xf32>
    %361 = arith.mulf %359, %360 : vector<8x1xf32>
    %362 = arith.mulf %356, %356 : vector<8x1xf32>
    %363 = arith.subf %361, %362 : vector<8x1xf32>
    %cst_123 = arith.constant 0.000000e+00 : f32
    %364 = vector.broadcast %cst_123 : f32 to vector<8x1xf32>
    %365 = arith.maximumf %363, %364 : vector<8x1xf32>
    %366 = vector.broadcast %356 : vector<8x1xf32> to vector<8x128xf32>
    %367 = arith.subf %352, %366 : vector<8x128xf32>
    %cst_124 = arith.constant 9.99999974E-6 : f32
    %368 = vector.broadcast %cst_124 : f32 to vector<8x1xf32>
    %369 = arith.addf %365, %368 : vector<8x1xf32>
    %370 = math.rsqrt %369 : vector<8x1xf32>
    %371 = vector.broadcast %370 : vector<8x1xf32> to vector<8x128xf32>
    %372 = arith.mulf %367, %371 : vector<8x128xf32>
    %373 = arith.mulf %372, %56 : vector<8x128xf32>
    %374 = arith.addf %373, %60 : vector<8x128xf32>
    %375 = math.tanh %374 : vector<8x128xf32>
    %376 = arith.mulf %347, %375 : vector<8x128xf32>
    %377 = arith.index_cast %c3_i32 : i32 to index
    %c0_125 = arith.constant 0 : index
    %c0_126 = arith.constant 0 : index
    %378 = vector.load %arg18[%377, %c0_125, %c0_126] : memref<8x8x128xf32, #tpu.memory_space<vmem>>, vector<1x8x128xf32>
    %379 = vector.shape_cast %378 : vector<1x8x128xf32> to vector<8x128xf32>
    %380 = vector.shape_cast %376 : vector<8x128xf32> to vector<1x8x128xf32>
    tpu.vector_store %arg18[%377, %c0_125, %c0_126], %380 {strides = array<i32>} : memref<8x8x128xf32, #tpu.memory_space<vmem>>, vector<1x8x128xf32>,
    %c4_i32 = arith.constant 4 : i32
    %cst_127 = arith.constant dense<0.000000e+00> : vector<8x512xf32>
    %381 = tpu.matmul %376, %40, %cst_127 {dimension_numbers = #tpu.dot_dimension_numbers<[1], [0], [0], [1], [0, 0, 1, 1], [], []>} : vector<8x128xf32>, vector<128x512xf32>, vector<8x512xf32> -> vector<8x512xf32>
    %382 = arith.addf %381, %44 : vector<8x512xf32>
    %cst_128 = arith.constant dense<0.000000e+00> : vector<8xf32>
    %383 = vector.multi_reduction <add>, %382, %cst_128 [1] : vector<8x512xf32> to vector<8xf32>
    %384 = vector.shape_cast %383 : vector<8xf32> to vector<8x1xf32>
    %cst_129 = arith.constant 7.812500e-03 : f32
    %385 = vector.broadcast %cst_129 : f32 to vector<8x1xf32>
    %386 = arith.mulf %384, %385 : vector<8x1xf32>
    %387 = arith.mulf %382, %382 : vector<8x512xf32>
    %cst_130 = arith.constant dense<0.000000e+00> : vector<8xf32>
    %388 = vector.multi_reduction <add>, %387, %cst_130 [1] : vector<8x512xf32> to vector<8xf32>
    %389 = vector.shape_cast %388 : vector<8xf32> to vector<8x1xf32>
    %cst_131 = arith.constant 7.812500e-03 : f32
    %390 = vector.broadcast %cst_131 : f32 to vector<8x1xf32>
    %391 = arith.mulf %389, %390 : vector<8x1xf32>
    %392 = arith.mulf %386, %386 : vector<8x1xf32>
    %393 = arith.subf %391, %392 : vector<8x1xf32>
    %cst_132 = arith.constant 0.000000e+00 : f32
    %394 = vector.broadcast %cst_132 : f32 to vector<8x1xf32>
    %395 = arith.maximumf %393, %394 : vector<8x1xf32>
    %396 = vector.broadcast %386 : vector<8x1xf32> to vector<8x512xf32>
    %397 = arith.subf %382, %396 : vector<8x512xf32>
    %cst_133 = arith.constant 9.99999974E-6 : f32
    %398 = vector.broadcast %cst_133 : f32 to vector<8x1xf32>
    %399 = arith.addf %395, %398 : vector<8x1xf32>
    %400 = math.rsqrt %399 : vector<8x1xf32>
    %401 = vector.broadcast %400 : vector<8x1xf32> to vector<8x512xf32>
    %402 = arith.mulf %397, %401 : vector<8x512xf32>
    %403 = arith.mulf %402, %48 : vector<8x512xf32>
    %404 = arith.addf %403, %52 : vector<8x512xf32>
    %405 = arith.index_cast %c4_i32 : i32 to index
    %c0_134 = arith.constant 0 : index
    %c0_135 = arith.constant 0 : index
    %406 = vector.load %arg19[%405, %c0_134, %c0_135] : memref<8x8x512xf32, #tpu.memory_space<vmem>>, vector<1x8x512xf32>
    %407 = vector.shape_cast %406 : vector<1x8x512xf32> to vector<8x512xf32>
    %408 = arith.addf %407, %404 : vector<8x512xf32>
    %409 = vector.extract_strided_slice %408 {offsets = [0, 0], sizes = [8, 128], strides = [1, 1]} : vector<8x512xf32> to vector<8x128xf32>
    %410 = arith.negf %409 : vector<8x128xf32>
    %411 = math.exp %410 : vector<8x128xf32>
    %cst_136 = arith.constant 1.000000e+00 : f32
    %412 = vector.broadcast %cst_136 : f32 to vector<8x128xf32>
    %413 = arith.addf %412, %411 : vector<8x128xf32>
    %414 = arith.divf %412, %413 : vector<8x128xf32>
    %415 = vector.extract_strided_slice %408 {offsets = [0, 128], sizes = [8, 128], strides = [1, 1]} : vector<8x512xf32> to vector<8x128xf32>
    %416 = arith.negf %415 : vector<8x128xf32>
    %417 = math.exp %416 : vector<8x128xf32>
    %cst_137 = arith.constant 1.000000e+00 : f32
    %418 = vector.broadcast %cst_137 : f32 to vector<8x128xf32>
    %419 = arith.addf %418, %417 : vector<8x128xf32>
    %420 = arith.divf %418, %419 : vector<8x128xf32>
    %421 = vector.extract_strided_slice %408 {offsets = [0, 256], sizes = [8, 128], strides = [1, 1]} : vector<8x512xf32> to vector<8x128xf32>
    %422 = arith.negf %421 : vector<8x128xf32>
    %423 = math.exp %422 : vector<8x128xf32>
    %cst_138 = arith.constant 1.000000e+00 : f32
    %424 = vector.broadcast %cst_138 : f32 to vector<8x128xf32>
    %425 = arith.addf %424, %423 : vector<8x128xf32>
    %426 = arith.divf %424, %425 : vector<8x128xf32>
    %427 = vector.extract_strided_slice %408 {offsets = [0, 384], sizes = [8, 128], strides = [1, 1]} : vector<8x512xf32> to vector<8x128xf32>
    %428 = math.tanh %427 : vector<8x128xf32>
    %429 = arith.mulf %420, %352 : vector<8x128xf32>
    %430 = arith.mulf %414, %428 : vector<8x128xf32>
    %431 = arith.addf %429, %430 : vector<8x128xf32>
    %cst_139 = arith.constant dense<0.000000e+00> : vector<8xf32>
    %432 = vector.multi_reduction <add>, %431, %cst_139 [1] : vector<8x128xf32> to vector<8xf32>
    %433 = vector.shape_cast %432 : vector<8xf32> to vector<8x1xf32>
    %cst_140 = arith.constant 3.125000e-02 : f32
    %434 = vector.broadcast %cst_140 : f32 to vector<8x1xf32>
    %435 = arith.mulf %433, %434 : vector<8x1xf32>
    %436 = arith.mulf %431, %431 : vector<8x128xf32>
    %cst_141 = arith.constant dense<0.000000e+00> : vector<8xf32>
    %437 = vector.multi_reduction <add>, %436, %cst_141 [1] : vector<8x128xf32> to vector<8xf32>
    %438 = vector.shape_cast %437 : vector<8xf32> to vector<8x1xf32>
    %cst_142 = arith.constant 3.125000e-02 : f32
    %439 = vector.broadcast %cst_142 : f32 to vector<8x1xf32>
    %440 = arith.mulf %438, %439 : vector<8x1xf32>
    %441 = arith.mulf %435, %435 : vector<8x1xf32>
    %442 = arith.subf %440, %441 : vector<8x1xf32>
    %cst_143 = arith.constant 0.000000e+00 : f32
    %443 = vector.broadcast %cst_143 : f32 to vector<8x1xf32>
    %444 = arith.maximumf %442, %443 : vector<8x1xf32>
    %445 = vector.broadcast %435 : vector<8x1xf32> to vector<8x128xf32>
    %446 = arith.subf %431, %445 : vector<8x128xf32>
    %cst_144 = arith.constant 9.99999974E-6 : f32
    %447 = vector.broadcast %cst_144 : f32 to vector<8x1xf32>
    %448 = arith.addf %444, %447 : vector<8x1xf32>
    %449 = math.rsqrt %448 : vector<8x1xf32>
    %450 = vector.broadcast %449 : vector<8x1xf32> to vector<8x128xf32>
    %451 = arith.mulf %446, %450 : vector<8x128xf32>
    %452 = arith.mulf %451, %56 : vector<8x128xf32>
    %453 = arith.addf %452, %60 : vector<8x128xf32>
    %454 = math.tanh %453 : vector<8x128xf32>
    %455 = arith.mulf %426, %454 : vector<8x128xf32>
    %456 = arith.index_cast %c4_i32 : i32 to index
    %c0_145 = arith.constant 0 : index
    %c0_146 = arith.constant 0 : index
    %457 = vector.load %arg18[%456, %c0_145, %c0_146] : memref<8x8x128xf32, #tpu.memory_space<vmem>>, vector<1x8x128xf32>
    %458 = vector.shape_cast %457 : vector<1x8x128xf32> to vector<8x128xf32>
    %459 = vector.shape_cast %455 : vector<8x128xf32> to vector<1x8x128xf32>
    tpu.vector_store %arg18[%456, %c0_145, %c0_146], %459 {strides = array<i32>} : memref<8x8x128xf32, #tpu.memory_space<vmem>>, vector<1x8x128xf32>,
    %c5_i32 = arith.constant 5 : i32
    %cst_147 = arith.constant dense<0.000000e+00> : vector<8x512xf32>
    %460 = tpu.matmul %455, %40, %cst_147 {dimension_numbers = #tpu.dot_dimension_numbers<[1], [0], [0], [1], [0, 0, 1, 1], [], []>} : vector<8x128xf32>, vector<128x512xf32>, vector<8x512xf32> -> vector<8x512xf32>
    %461 = arith.addf %460, %44 : vector<8x512xf32>
    %cst_148 = arith.constant dense<0.000000e+00> : vector<8xf32>
    %462 = vector.multi_reduction <add>, %461, %cst_148 [1] : vector<8x512xf32> to vector<8xf32>
    %463 = vector.shape_cast %462 : vector<8xf32> to vector<8x1xf32>
    %cst_149 = arith.constant 7.812500e-03 : f32
    %464 = vector.broadcast %cst_149 : f32 to vector<8x1xf32>
    %465 = arith.mulf %463, %464 : vector<8x1xf32>
    %466 = arith.mulf %461, %461 : vector<8x512xf32>
    %cst_150 = arith.constant dense<0.000000e+00> : vector<8xf32>
    %467 = vector.multi_reduction <add>, %466, %cst_150 [1] : vector<8x512xf32> to vector<8xf32>
    %468 = vector.shape_cast %467 : vector<8xf32> to vector<8x1xf32>
    %cst_151 = arith.constant 7.812500e-03 : f32
    %469 = vector.broadcast %cst_151 : f32 to vector<8x1xf32>
    %470 = arith.mulf %468, %469 : vector<8x1xf32>
    %471 = arith.mulf %465, %465 : vector<8x1xf32>
    %472 = arith.subf %470, %471 : vector<8x1xf32>
    %cst_152 = arith.constant 0.000000e+00 : f32
    %473 = vector.broadcast %cst_152 : f32 to vector<8x1xf32>
    %474 = arith.maximumf %472, %473 : vector<8x1xf32>
    %475 = vector.broadcast %465 : vector<8x1xf32> to vector<8x512xf32>
    %476 = arith.subf %461, %475 : vector<8x512xf32>
    %cst_153 = arith.constant 9.99999974E-6 : f32
    %477 = vector.broadcast %cst_153 : f32 to vector<8x1xf32>
    %478 = arith.addf %474, %477 : vector<8x1xf32>
    %479 = math.rsqrt %478 : vector<8x1xf32>
    %480 = vector.broadcast %479 : vector<8x1xf32> to vector<8x512xf32>
    %481 = arith.mulf %476, %480 : vector<8x512xf32>
    %482 = arith.mulf %481, %48 : vector<8x512xf32>
    %483 = arith.addf %482, %52 : vector<8x512xf32>
    %484 = arith.index_cast %c5_i32 : i32 to index
    %c0_154 = arith.constant 0 : index
    %c0_155 = arith.constant 0 : index
    %485 = vector.load %arg19[%484, %c0_154, %c0_155] : memref<8x8x512xf32, #tpu.memory_space<vmem>>, vector<1x8x512xf32>
    %486 = vector.shape_cast %485 : vector<1x8x512xf32> to vector<8x512xf32>
    %487 = arith.addf %486, %483 : vector<8x512xf32>
    %488 = vector.extract_strided_slice %487 {offsets = [0, 0], sizes = [8, 128], strides = [1, 1]} : vector<8x512xf32> to vector<8x128xf32>
    %489 = arith.negf %488 : vector<8x128xf32>
    %490 = math.exp %489 : vector<8x128xf32>
    %cst_156 = arith.constant 1.000000e+00 : f32
    %491 = vector.broadcast %cst_156 : f32 to vector<8x128xf32>
    %492 = arith.addf %491, %490 : vector<8x128xf32>
    %493 = arith.divf %491, %492 : vector<8x128xf32>
    %494 = vector.extract_strided_slice %487 {offsets = [0, 128], sizes = [8, 128], strides = [1, 1]} : vector<8x512xf32> to vector<8x128xf32>
    %495 = arith.negf %494 : vector<8x128xf32>
    %496 = math.exp %495 : vector<8x128xf32>
    %cst_157 = arith.constant 1.000000e+00 : f32
    %497 = vector.broadcast %cst_157 : f32 to vector<8x128xf32>
    %498 = arith.addf %497, %496 : vector<8x128xf32>
    %499 = arith.divf %497, %498 : vector<8x128xf32>
    %500 = vector.extract_strided_slice %487 {offsets = [0, 256], sizes = [8, 128], strides = [1, 1]} : vector<8x512xf32> to vector<8x128xf32>
    %501 = arith.negf %500 : vector<8x128xf32>
    %502 = math.exp %501 : vector<8x128xf32>
    %cst_158 = arith.constant 1.000000e+00 : f32
    %503 = vector.broadcast %cst_158 : f32 to vector<8x128xf32>
    %504 = arith.addf %503, %502 : vector<8x128xf32>
    %505 = arith.divf %503, %504 : vector<8x128xf32>
    %506 = vector.extract_strided_slice %487 {offsets = [0, 384], sizes = [8, 128], strides = [1, 1]} : vector<8x512xf32> to vector<8x128xf32>
    %507 = math.tanh %506 : vector<8x128xf32>
    %508 = arith.mulf %499, %431 : vector<8x128xf32>
    %509 = arith.mulf %493, %507 : vector<8x128xf32>
    %510 = arith.addf %508, %509 : vector<8x128xf32>
    %cst_159 = arith.constant dense<0.000000e+00> : vector<8xf32>
    %511 = vector.multi_reduction <add>, %510, %cst_159 [1] : vector<8x128xf32> to vector<8xf32>
    %512 = vector.shape_cast %511 : vector<8xf32> to vector<8x1xf32>
    %cst_160 = arith.constant 3.125000e-02 : f32
    %513 = vector.broadcast %cst_160 : f32 to vector<8x1xf32>
    %514 = arith.mulf %512, %513 : vector<8x1xf32>
    %515 = arith.mulf %510, %510 : vector<8x128xf32>
    %cst_161 = arith.constant dense<0.000000e+00> : vector<8xf32>
    %516 = vector.multi_reduction <add>, %515, %cst_161 [1] : vector<8x128xf32> to vector<8xf32>
    %517 = vector.shape_cast %516 : vector<8xf32> to vector<8x1xf32>
    %cst_162 = arith.constant 3.125000e-02 : f32
    %518 = vector.broadcast %cst_162 : f32 to vector<8x1xf32>
    %519 = arith.mulf %517, %518 : vector<8x1xf32>
    %520 = arith.mulf %514, %514 : vector<8x1xf32>
    %521 = arith.subf %519, %520 : vector<8x1xf32>
    %cst_163 = arith.constant 0.000000e+00 : f32
    %522 = vector.broadcast %cst_163 : f32 to vector<8x1xf32>
    %523 = arith.maximumf %521, %522 : vector<8x1xf32>
    %524 = vector.broadcast %514 : vector<8x1xf32> to vector<8x128xf32>
    %525 = arith.subf %510, %524 : vector<8x128xf32>
    %cst_164 = arith.constant 9.99999974E-6 : f32
    %526 = vector.broadcast %cst_164 : f32 to vector<8x1xf32>
    %527 = arith.addf %523, %526 : vector<8x1xf32>
    %528 = math.rsqrt %527 : vector<8x1xf32>
    %529 = vector.broadcast %528 : vector<8x1xf32> to vector<8x128xf32>
    %530 = arith.mulf %525, %529 : vector<8x128xf32>
    %531 = arith.mulf %530, %56 : vector<8x128xf32>
    %532 = arith.addf %531, %60 : vector<8x128xf32>
    %533 = math.tanh %532 : vector<8x128xf32>
    %534 = arith.mulf %505, %533 : vector<8x128xf32>
    %535 = arith.index_cast %c5_i32 : i32 to index
    %c0_165 = arith.constant 0 : index
    %c0_166 = arith.constant 0 : index
    %536 = vector.load %arg18[%535, %c0_165, %c0_166] : memref<8x8x128xf32, #tpu.memory_space<vmem>>, vector<1x8x128xf32>
    %537 = vector.shape_cast %536 : vector<1x8x128xf32> to vector<8x128xf32>
    %538 = vector.shape_cast %534 : vector<8x128xf32> to vector<1x8x128xf32>
    tpu.vector_store %arg18[%535, %c0_165, %c0_166], %538 {strides = array<i32>} : memref<8x8x128xf32, #tpu.memory_space<vmem>>, vector<1x8x128xf32>,
    %c6_i32 = arith.constant 6 : i32
    %cst_167 = arith.constant dense<0.000000e+00> : vector<8x512xf32>
    %539 = tpu.matmul %534, %40, %cst_167 {dimension_numbers = #tpu.dot_dimension_numbers<[1], [0], [0], [1], [0, 0, 1, 1], [], []>} : vector<8x128xf32>, vector<128x512xf32>, vector<8x512xf32> -> vector<8x512xf32>
    %540 = arith.addf %539, %44 : vector<8x512xf32>
    %cst_168 = arith.constant dense<0.000000e+00> : vector<8xf32>
    %541 = vector.multi_reduction <add>, %540, %cst_168 [1] : vector<8x512xf32> to vector<8xf32>
    %542 = vector.shape_cast %541 : vector<8xf32> to vector<8x1xf32>
    %cst_169 = arith.constant 7.812500e-03 : f32
    %543 = vector.broadcast %cst_169 : f32 to vector<8x1xf32>
    %544 = arith.mulf %542, %543 : vector<8x1xf32>
    %545 = arith.mulf %540, %540 : vector<8x512xf32>
    %cst_170 = arith.constant dense<0.000000e+00> : vector<8xf32>
    %546 = vector.multi_reduction <add>, %545, %cst_170 [1] : vector<8x512xf32> to vector<8xf32>
    %547 = vector.shape_cast %546 : vector<8xf32> to vector<8x1xf32>
    %cst_171 = arith.constant 7.812500e-03 : f32
    %548 = vector.broadcast %cst_171 : f32 to vector<8x1xf32>
    %549 = arith.mulf %547, %548 : vector<8x1xf32>
    %550 = arith.mulf %544, %544 : vector<8x1xf32>
    %551 = arith.subf %549, %550 : vector<8x1xf32>
    %cst_172 = arith.constant 0.000000e+00 : f32
    %552 = vector.broadcast %cst_172 : f32 to vector<8x1xf32>
    %553 = arith.maximumf %551, %552 : vector<8x1xf32>
    %554 = vector.broadcast %544 : vector<8x1xf32> to vector<8x512xf32>
    %555 = arith.subf %540, %554 : vector<8x512xf32>
    %cst_173 = arith.constant 9.99999974E-6 : f32
    %556 = vector.broadcast %cst_173 : f32 to vector<8x1xf32>
    %557 = arith.addf %553, %556 : vector<8x1xf32>
    %558 = math.rsqrt %557 : vector<8x1xf32>
    %559 = vector.broadcast %558 : vector<8x1xf32> to vector<8x512xf32>
    %560 = arith.mulf %555, %559 : vector<8x512xf32>
    %561 = arith.mulf %560, %48 : vector<8x512xf32>
    %562 = arith.addf %561, %52 : vector<8x512xf32>
    %563 = arith.index_cast %c6_i32 : i32 to index
    %c0_174 = arith.constant 0 : index
    %c0_175 = arith.constant 0 : index
    %564 = vector.load %arg19[%563, %c0_174, %c0_175] : memref<8x8x512xf32, #tpu.memory_space<vmem>>, vector<1x8x512xf32>
    %565 = vector.shape_cast %564 : vector<1x8x512xf32> to vector<8x512xf32>
    %566 = arith.addf %565, %562 : vector<8x512xf32>
    %567 = vector.extract_strided_slice %566 {offsets = [0, 0], sizes = [8, 128], strides = [1, 1]} : vector<8x512xf32> to vector<8x128xf32>
    %568 = arith.negf %567 : vector<8x128xf32>
    %569 = math.exp %568 : vector<8x128xf32>
    %cst_176 = arith.constant 1.000000e+00 : f32
    %570 = vector.broadcast %cst_176 : f32 to vector<8x128xf32>
    %571 = arith.addf %570, %569 : vector<8x128xf32>
    %572 = arith.divf %570, %571 : vector<8x128xf32>
    %573 = vector.extract_strided_slice %566 {offsets = [0, 128], sizes = [8, 128], strides = [1, 1]} : vector<8x512xf32> to vector<8x128xf32>
    %574 = arith.negf %573 : vector<8x128xf32>
    %575 = math.exp %574 : vector<8x128xf32>
    %cst_177 = arith.constant 1.000000e+00 : f32
    %576 = vector.broadcast %cst_177 : f32 to vector<8x128xf32>
    %577 = arith.addf %576, %575 : vector<8x128xf32>
    %578 = arith.divf %576, %577 : vector<8x128xf32>
    %579 = vector.extract_strided_slice %566 {offsets = [0, 256], sizes = [8, 128], strides = [1, 1]} : vector<8x512xf32> to vector<8x128xf32>
    %580 = arith.negf %579 : vector<8x128xf32>
    %581 = math.exp %580 : vector<8x128xf32>
    %cst_178 = arith.constant 1.000000e+00 : f32
    %582 = vector.broadcast %cst_178 : f32 to vector<8x128xf32>
    %583 = arith.addf %582, %581 : vector<8x128xf32>
    %584 = arith.divf %582, %583 : vector<8x128xf32>
    %585 = vector.extract_strided_slice %566 {offsets = [0, 384], sizes = [8, 128], strides = [1, 1]} : vector<8x512xf32> to vector<8x128xf32>
    %586 = math.tanh %585 : vector<8x128xf32>
    %587 = arith.mulf %578, %510 : vector<8x128xf32>
    %588 = arith.mulf %572, %586 : vector<8x128xf32>
    %589 = arith.addf %587, %588 : vector<8x128xf32>
    %cst_179 = arith.constant dense<0.000000e+00> : vector<8xf32>
    %590 = vector.multi_reduction <add>, %589, %cst_179 [1] : vector<8x128xf32> to vector<8xf32>
    %591 = vector.shape_cast %590 : vector<8xf32> to vector<8x1xf32>
    %cst_180 = arith.constant 3.125000e-02 : f32
    %592 = vector.broadcast %cst_180 : f32 to vector<8x1xf32>
    %593 = arith.mulf %591, %592 : vector<8x1xf32>
    %594 = arith.mulf %589, %589 : vector<8x128xf32>
    %cst_181 = arith.constant dense<0.000000e+00> : vector<8xf32>
    %595 = vector.multi_reduction <add>, %594, %cst_181 [1] : vector<8x128xf32> to vector<8xf32>
    %596 = vector.shape_cast %595 : vector<8xf32> to vector<8x1xf32>
    %cst_182 = arith.constant 3.125000e-02 : f32
    %597 = vector.broadcast %cst_182 : f32 to vector<8x1xf32>
    %598 = arith.mulf %596, %597 : vector<8x1xf32>
    %599 = arith.mulf %593, %593 : vector<8x1xf32>
    %600 = arith.subf %598, %599 : vector<8x1xf32>
    %cst_183 = arith.constant 0.000000e+00 : f32
    %601 = vector.broadcast %cst_183 : f32 to vector<8x1xf32>
    %602 = arith.maximumf %600, %601 : vector<8x1xf32>
    %603 = vector.broadcast %593 : vector<8x1xf32> to vector<8x128xf32>
    %604 = arith.subf %589, %603 : vector<8x128xf32>
    %cst_184 = arith.constant 9.99999974E-6 : f32
    %605 = vector.broadcast %cst_184 : f32 to vector<8x1xf32>
    %606 = arith.addf %602, %605 : vector<8x1xf32>
    %607 = math.rsqrt %606 : vector<8x1xf32>
    %608 = vector.broadcast %607 : vector<8x1xf32> to vector<8x128xf32>
    %609 = arith.mulf %604, %608 : vector<8x128xf32>
    %610 = arith.mulf %609, %56 : vector<8x128xf32>
    %611 = arith.addf %610, %60 : vector<8x128xf32>
    %612 = math.tanh %611 : vector<8x128xf32>
    %613 = arith.mulf %584, %612 : vector<8x128xf32>
    %614 = arith.index_cast %c6_i32 : i32 to index
    %c0_185 = arith.constant 0 : index
    %c0_186 = arith.constant 0 : index
    %615 = vector.load %arg18[%614, %c0_185, %c0_186] : memref<8x8x128xf32, #tpu.memory_space<vmem>>, vector<1x8x128xf32>
    %616 = vector.shape_cast %615 : vector<1x8x128xf32> to vector<8x128xf32>
    %617 = vector.shape_cast %613 : vector<8x128xf32> to vector<1x8x128xf32>
    tpu.vector_store %arg18[%614, %c0_185, %c0_186], %617 {strides = array<i32>} : memref<8x8x128xf32, #tpu.memory_space<vmem>>, vector<1x8x128xf32>,
    %c7_i32 = arith.constant 7 : i32
    %cst_187 = arith.constant dense<0.000000e+00> : vector<8x512xf32>
    %618 = tpu.matmul %613, %40, %cst_187 {dimension_numbers = #tpu.dot_dimension_numbers<[1], [0], [0], [1], [0, 0, 1, 1], [], []>} : vector<8x128xf32>, vector<128x512xf32>, vector<8x512xf32> -> vector<8x512xf32>
    %619 = arith.addf %618, %44 : vector<8x512xf32>
    %cst_188 = arith.constant dense<0.000000e+00> : vector<8xf32>
    %620 = vector.multi_reduction <add>, %619, %cst_188 [1] : vector<8x512xf32> to vector<8xf32>
    %621 = vector.shape_cast %620 : vector<8xf32> to vector<8x1xf32>
    %cst_189 = arith.constant 7.812500e-03 : f32
    %622 = vector.broadcast %cst_189 : f32 to vector<8x1xf32>
    %623 = arith.mulf %621, %622 : vector<8x1xf32>
    %624 = arith.mulf %619, %619 : vector<8x512xf32>
    %cst_190 = arith.constant dense<0.000000e+00> : vector<8xf32>
    %625 = vector.multi_reduction <add>, %624, %cst_190 [1] : vector<8x512xf32> to vector<8xf32>
    %626 = vector.shape_cast %625 : vector<8xf32> to vector<8x1xf32>
    %cst_191 = arith.constant 7.812500e-03 : f32
    %627 = vector.broadcast %cst_191 : f32 to vector<8x1xf32>
    %628 = arith.mulf %626, %627 : vector<8x1xf32>
    %629 = arith.mulf %623, %623 : vector<8x1xf32>
    %630 = arith.subf %628, %629 : vector<8x1xf32>
    %cst_192 = arith.constant 0.000000e+00 : f32
    %631 = vector.broadcast %cst_192 : f32 to vector<8x1xf32>
    %632 = arith.maximumf %630, %631 : vector<8x1xf32>
    %633 = vector.broadcast %623 : vector<8x1xf32> to vector<8x512xf32>
    %634 = arith.subf %619, %633 : vector<8x512xf32>
    %cst_193 = arith.constant 9.99999974E-6 : f32
    %635 = vector.broadcast %cst_193 : f32 to vector<8x1xf32>
    %636 = arith.addf %632, %635 : vector<8x1xf32>
    %637 = math.rsqrt %636 : vector<8x1xf32>
    %638 = vector.broadcast %637 : vector<8x1xf32> to vector<8x512xf32>
    %639 = arith.mulf %634, %638 : vector<8x512xf32>
    %640 = arith.mulf %639, %48 : vector<8x512xf32>
    %641 = arith.addf %640, %52 : vector<8x512xf32>
    %642 = arith.index_cast %c7_i32 : i32 to index
    %c0_194 = arith.constant 0 : index
    %c0_195 = arith.constant 0 : index
    %643 = vector.load %arg19[%642, %c0_194, %c0_195] : memref<8x8x512xf32, #tpu.memory_space<vmem>>, vector<1x8x512xf32>
    %644 = vector.shape_cast %643 : vector<1x8x512xf32> to vector<8x512xf32>
    %645 = arith.addf %644, %641 : vector<8x512xf32>
    %646 = vector.extract_strided_slice %645 {offsets = [0, 0], sizes = [8, 128], strides = [1, 1]} : vector<8x512xf32> to vector<8x128xf32>
    %647 = arith.negf %646 : vector<8x128xf32>
    %648 = math.exp %647 : vector<8x128xf32>
    %cst_196 = arith.constant 1.000000e+00 : f32
    %649 = vector.broadcast %cst_196 : f32 to vector<8x128xf32>
    %650 = arith.addf %649, %648 : vector<8x128xf32>
    %651 = arith.divf %649, %650 : vector<8x128xf32>
    %652 = vector.extract_strided_slice %645 {offsets = [0, 128], sizes = [8, 128], strides = [1, 1]} : vector<8x512xf32> to vector<8x128xf32>
    %653 = arith.negf %652 : vector<8x128xf32>
    %654 = math.exp %653 : vector<8x128xf32>
    %cst_197 = arith.constant 1.000000e+00 : f32
    %655 = vector.broadcast %cst_197 : f32 to vector<8x128xf32>
    %656 = arith.addf %655, %654 : vector<8x128xf32>
    %657 = arith.divf %655, %656 : vector<8x128xf32>
    %658 = vector.extract_strided_slice %645 {offsets = [0, 256], sizes = [8, 128], strides = [1, 1]} : vector<8x512xf32> to vector<8x128xf32>
    %659 = arith.negf %658 : vector<8x128xf32>
    %660 = math.exp %659 : vector<8x128xf32>
    %cst_198 = arith.constant 1.000000e+00 : f32
    %661 = vector.broadcast %cst_198 : f32 to vector<8x128xf32>
    %662 = arith.addf %661, %660 : vector<8x128xf32>
    %663 = arith.divf %661, %662 : vector<8x128xf32>
    %664 = vector.extract_strided_slice %645 {offsets = [0, 384], sizes = [8, 128], strides = [1, 1]} : vector<8x512xf32> to vector<8x128xf32>
    %665 = math.tanh %664 : vector<8x128xf32>
    %666 = arith.mulf %657, %589 : vector<8x128xf32>
    %667 = arith.mulf %651, %665 : vector<8x128xf32>
    %668 = arith.addf %666, %667 : vector<8x128xf32>
    %cst_199 = arith.constant dense<0.000000e+00> : vector<8xf32>
    %669 = vector.multi_reduction <add>, %668, %cst_199 [1] : vector<8x128xf32> to vector<8xf32>
    %670 = vector.shape_cast %669 : vector<8xf32> to vector<8x1xf32>
    %cst_200 = arith.constant 3.125000e-02 : f32
    %671 = vector.broadcast %cst_200 : f32 to vector<8x1xf32>
    %672 = arith.mulf %670, %671 : vector<8x1xf32>
    %673 = arith.mulf %668, %668 : vector<8x128xf32>
    %cst_201 = arith.constant dense<0.000000e+00> : vector<8xf32>
    %674 = vector.multi_reduction <add>, %673, %cst_201 [1] : vector<8x128xf32> to vector<8xf32>
    %675 = vector.shape_cast %674 : vector<8xf32> to vector<8x1xf32>
    %cst_202 = arith.constant 3.125000e-02 : f32
    %676 = vector.broadcast %cst_202 : f32 to vector<8x1xf32>
    %677 = arith.mulf %675, %676 : vector<8x1xf32>
    %678 = arith.mulf %672, %672 : vector<8x1xf32>
    %679 = arith.subf %677, %678 : vector<8x1xf32>
    %cst_203 = arith.constant 0.000000e+00 : f32
    %680 = vector.broadcast %cst_203 : f32 to vector<8x1xf32>
    %681 = arith.maximumf %679, %680 : vector<8x1xf32>
    %682 = vector.broadcast %672 : vector<8x1xf32> to vector<8x128xf32>
    %683 = arith.subf %668, %682 : vector<8x128xf32>
    %cst_204 = arith.constant 9.99999974E-6 : f32
    %684 = vector.broadcast %cst_204 : f32 to vector<8x1xf32>
    %685 = arith.addf %681, %684 : vector<8x1xf32>
    %686 = math.rsqrt %685 : vector<8x1xf32>
    %687 = vector.broadcast %686 : vector<8x1xf32> to vector<8x128xf32>
    %688 = arith.mulf %683, %687 : vector<8x128xf32>
    %689 = arith.mulf %688, %56 : vector<8x128xf32>
    %690 = arith.addf %689, %60 : vector<8x128xf32>
    %691 = math.tanh %690 : vector<8x128xf32>
    %692 = arith.mulf %663, %691 : vector<8x128xf32>
    %693 = arith.index_cast %c7_i32 : i32 to index
    %c0_205 = arith.constant 0 : index
    %c0_206 = arith.constant 0 : index
    %694 = vector.load %arg18[%693, %c0_205, %c0_206] : memref<8x8x128xf32, #tpu.memory_space<vmem>>, vector<1x8x128xf32>
    %695 = vector.shape_cast %694 : vector<1x8x128xf32> to vector<8x128xf32>
    %696 = vector.shape_cast %692 : vector<8x128xf32> to vector<1x8x128xf32>
    tpu.vector_store %arg18[%693, %c0_205, %c0_206], %696 {strides = array<i32>} : memref<8x8x128xf32, #tpu.memory_space<vmem>>, vector<1x8x128xf32>,
    %c8_i32 = arith.constant 8 : i32
    %c0_207 = arith.constant 0 : index
    %c0_208 = arith.constant 0 : index
    %c0_209 = arith.constant 0 : index
    %697 = vector.load %arg18[%c0_207, %c0_208, %c0_209] : memref<8x8x128xf32, #tpu.memory_space<vmem>>, vector<8x8x128xf32>
    %698 = vector.shape_cast %697 : vector<8x8x128xf32> to vector<64x128xf32>
    %c1 = arith.constant 1 : index
    %c0_210 = arith.constant 0 : index
    %c0_211 = arith.constant 0 : index
    %699 = vector.load %arg4[%c1, %c0_210, %c0_211] : memref<2x128x512xf32, #tpu.memory_space<vmem>>, vector<1x128x512xf32>
    %700 = vector.shape_cast %699 : vector<1x128x512xf32> to vector<128x512xf32>
    %cst_212 = arith.constant dense<0.000000e+00> : vector<64x512xf32>
    %701 = tpu.matmul %698, %700, %cst_212 {dimension_numbers = #tpu.dot_dimension_numbers<[1], [0], [0], [1], [0, 0, 1, 1], [], []>} : vector<64x128xf32>, vector<128x512xf32>, vector<64x512xf32> -> vector<64x512xf32>
    %c1_213 = arith.constant 1 : index
    %c0_214 = arith.constant 0 : index
    %c0_215 = arith.constant 0 : index
    %702 = vector.load %arg6[%c1_213, %c0_214, %c0_215] : memref<2x1x512xf32, #tpu.memory_space<vmem>>, vector<1x1x512xf32>
    %703 = vector.shape_cast %702 : vector<1x1x512xf32> to vector<1x512xf32>
    %704 = vector.broadcast %703 : vector<1x512xf32> to vector<64x512xf32>
    %705 = arith.addf %701, %704 : vector<64x512xf32>
    %c1_216 = arith.constant 1 : index
    %c0_217 = arith.constant 0 : index
    %c0_218 = arith.constant 0 : index
    %706 = vector.load %arg8[%c1_216, %c0_217, %c0_218] : memref<2x1x512xf32, #tpu.memory_space<vmem>>, vector<1x1x512xf32>
    %707 = vector.shape_cast %706 : vector<1x1x512xf32> to vector<1x512xf32>
    %c1_219 = arith.constant 1 : index
    %c0_220 = arith.constant 0 : index
    %c0_221 = arith.constant 0 : index
    %708 = vector.load %arg9[%c1_219, %c0_220, %c0_221] : memref<2x1x512xf32, #tpu.memory_space<vmem>>, vector<1x1x512xf32>
    %709 = vector.shape_cast %708 : vector<1x1x512xf32> to vector<1x512xf32>
    %cst_222 = arith.constant dense<0.000000e+00> : vector<64xf32>
    %710 = vector.multi_reduction <add>, %705, %cst_222 [1] : vector<64x512xf32> to vector<64xf32>
    %711 = vector.shape_cast %710 : vector<64xf32> to vector<64x1xf32>
    %cst_223 = arith.constant 7.812500e-03 : f32
    %712 = vector.broadcast %cst_223 : f32 to vector<64x1xf32>
    %713 = arith.mulf %711, %712 : vector<64x1xf32>
    %714 = arith.mulf %705, %705 : vector<64x512xf32>
    %cst_224 = arith.constant dense<0.000000e+00> : vector<64xf32>
    %715 = vector.multi_reduction <add>, %714, %cst_224 [1] : vector<64x512xf32> to vector<64xf32>
    %716 = vector.shape_cast %715 : vector<64xf32> to vector<64x1xf32>
    %cst_225 = arith.constant 7.812500e-03 : f32
    %717 = vector.broadcast %cst_225 : f32 to vector<64x1xf32>
    %718 = arith.mulf %716, %717 : vector<64x1xf32>
    %719 = arith.mulf %713, %713 : vector<64x1xf32>
    %720 = arith.subf %718, %719 : vector<64x1xf32>
    %cst_226 = arith.constant 0.000000e+00 : f32
    %721 = vector.broadcast %cst_226 : f32 to vector<64x1xf32>
    %722 = arith.maximumf %720, %721 : vector<64x1xf32>
    %723 = vector.broadcast %713 : vector<64x1xf32> to vector<64x512xf32>
    %724 = arith.subf %705, %723 : vector<64x512xf32>
    %cst_227 = arith.constant 9.99999974E-6 : f32
    %725 = vector.broadcast %cst_227 : f32 to vector<64x1xf32>
    %726 = arith.addf %722, %725 : vector<64x1xf32>
    %727 = math.rsqrt %726 : vector<64x1xf32>
    %728 = vector.broadcast %727 : vector<64x1xf32> to vector<64x512xf32>
    %729 = arith.mulf %724, %728 : vector<64x512xf32>
    %730 = vector.broadcast %707 : vector<1x512xf32> to vector<64x512xf32>
    %731 = arith.mulf %729, %730 : vector<64x512xf32>
    %732 = vector.broadcast %709 : vector<1x512xf32> to vector<64x512xf32>
    %733 = arith.addf %731, %732 : vector<64x512xf32>
    %734 = vector.shape_cast %733 : vector<64x512xf32> to vector<8x8x512xf32>
    %c0_228 = arith.constant 0 : index
    %c0_229 = arith.constant 0 : index
    %c0_230 = arith.constant 0 : index
    %735 = vector.load %arg19[%c0_228, %c0_229, %c0_230] : memref<8x8x512xf32, #tpu.memory_space<vmem>>, vector<8x8x512xf32>
    tpu.vector_store %arg19[%c0_228, %c0_229, %c0_230], %734 {strides = array<i32>} : memref<8x8x512xf32, #tpu.memory_space<vmem>>, vector<8x8x512xf32>,
    %c1_231 = arith.constant 1 : index
    %c0_232 = arith.constant 0 : index
    %c0_233 = arith.constant 0 : index
    %736 = vector.load %arg5[%c1_231, %c0_232, %c0_233] : memref<2x128x512xf32, #tpu.memory_space<vmem>>, vector<1x128x512xf32>
    %737 = vector.shape_cast %736 : vector<1x128x512xf32> to vector<128x512xf32>
    %c1_234 = arith.constant 1 : index
    %c0_235 = arith.constant 0 : index
    %c0_236 = arith.constant 0 : index
    %738 = vector.load %arg7[%c1_234, %c0_235, %c0_236] : memref<2x1x512xf32, #tpu.memory_space<vmem>>, vector<1x1x512xf32>
    %739 = vector.shape_cast %738 : vector<1x1x512xf32> to vector<1x512xf32>
    %740 = vector.shape_cast %739 : vector<1x512xf32> to vector<1x512xf32>
    %741 = vector.broadcast %740 : vector<1x512xf32> to vector<8x512xf32>
    %c1_237 = arith.constant 1 : index
    %c0_238 = arith.constant 0 : index
    %c0_239 = arith.constant 0 : index
    %742 = vector.load %arg10[%c1_237, %c0_238, %c0_239] : memref<2x1x512xf32, #tpu.memory_space<vmem>>, vector<1x1x512xf32>
    %743 = vector.shape_cast %742 : vector<1x1x512xf32> to vector<1x512xf32>
    %744 = vector.shape_cast %743 : vector<1x512xf32> to vector<1x512xf32>
    %745 = vector.broadcast %744 : vector<1x512xf32> to vector<8x512xf32>
    %c1_240 = arith.constant 1 : index
    %c0_241 = arith.constant 0 : index
    %c0_242 = arith.constant 0 : index
    %746 = vector.load %arg11[%c1_240, %c0_241, %c0_242] : memref<2x1x512xf32, #tpu.memory_space<vmem>>, vector<1x1x512xf32>
    %747 = vector.shape_cast %746 : vector<1x1x512xf32> to vector<1x512xf32>
    %748 = vector.shape_cast %747 : vector<1x512xf32> to vector<1x512xf32>
    %749 = vector.broadcast %748 : vector<1x512xf32> to vector<8x512xf32>
    %c1_243 = arith.constant 1 : index
    %c0_244 = arith.constant 0 : index
    %c0_245 = arith.constant 0 : index
    %750 = vector.load %arg12[%c1_243, %c0_244, %c0_245] : memref<2x1x128xf32, #tpu.memory_space<vmem>>, vector<1x1x128xf32>
    %751 = vector.shape_cast %750 : vector<1x1x128xf32> to vector<1x128xf32>
    %752 = vector.shape_cast %751 : vector<1x128xf32> to vector<1x128xf32>
    %753 = vector.broadcast %752 : vector<1x128xf32> to vector<8x128xf32>
    %c1_246 = arith.constant 1 : index
    %c0_247 = arith.constant 0 : index
    %c0_248 = arith.constant 0 : index
    %754 = vector.load %arg13[%c1_246, %c0_247, %c0_248] : memref<2x1x128xf32, #tpu.memory_space<vmem>>, vector<1x1x128xf32>
    %755 = vector.shape_cast %754 : vector<1x1x128xf32> to vector<1x128xf32>
    %756 = vector.shape_cast %755 : vector<1x128xf32> to vector<1x128xf32>
    %757 = vector.broadcast %756 : vector<1x128xf32> to vector<8x128xf32>
    %c1_249 = arith.constant 1 : index
    %c0_250 = arith.constant 0 : index
    %c0_251 = arith.constant 0 : index
    %758 = vector.load %arg2[%c1_249, %c0_250, %c0_251] : memref<2x8x128xf32, #tpu.memory_space<vmem>>, vector<1x8x128xf32>
    %759 = vector.shape_cast %758 : vector<1x8x128xf32> to vector<8x128xf32>
    %c1_252 = arith.constant 1 : index
    %c0_253 = arith.constant 0 : index
    %c0_254 = arith.constant 0 : index
    %760 = vector.load %arg3[%c1_252, %c0_253, %c0_254] : memref<2x8x128xf32, #tpu.memory_space<vmem>>, vector<1x8x128xf32>
    %761 = vector.shape_cast %760 : vector<1x8x128xf32> to vector<8x128xf32>
    %c0_i32_255 = arith.constant 0 : i32
    %cst_256 = arith.constant dense<0.000000e+00> : vector<8x512xf32>
    %762 = tpu.matmul %759, %737, %cst_256 {dimension_numbers = #tpu.dot_dimension_numbers<[1], [0], [0], [1], [0, 0, 1, 1], [], []>} : vector<8x128xf32>, vector<128x512xf32>, vector<8x512xf32> -> vector<8x512xf32>
    %763 = arith.addf %762, %741 : vector<8x512xf32>
    %cst_257 = arith.constant dense<0.000000e+00> : vector<8xf32>
    %764 = vector.multi_reduction <add>, %763, %cst_257 [1] : vector<8x512xf32> to vector<8xf32>
    %765 = vector.shape_cast %764 : vector<8xf32> to vector<8x1xf32>
    %cst_258 = arith.constant 7.812500e-03 : f32
    %766 = vector.broadcast %cst_258 : f32 to vector<8x1xf32>
    %767 = arith.mulf %765, %766 : vector<8x1xf32>
    %768 = arith.mulf %763, %763 : vector<8x512xf32>
    %cst_259 = arith.constant dense<0.000000e+00> : vector<8xf32>
    %769 = vector.multi_reduction <add>, %768, %cst_259 [1] : vector<8x512xf32> to vector<8xf32>
    %770 = vector.shape_cast %769 : vector<8xf32> to vector<8x1xf32>
    %cst_260 = arith.constant 7.812500e-03 : f32
    %771 = vector.broadcast %cst_260 : f32 to vector<8x1xf32>
    %772 = arith.mulf %770, %771 : vector<8x1xf32>
    %773 = arith.mulf %767, %767 : vector<8x1xf32>
    %774 = arith.subf %772, %773 : vector<8x1xf32>
    %cst_261 = arith.constant 0.000000e+00 : f32
    %775 = vector.broadcast %cst_261 : f32 to vector<8x1xf32>
    %776 = arith.maximumf %774, %775 : vector<8x1xf32>
    %777 = vector.broadcast %767 : vector<8x1xf32> to vector<8x512xf32>
    %778 = arith.subf %763, %777 : vector<8x512xf32>
    %cst_262 = arith.constant 9.99999974E-6 : f32
    %779 = vector.broadcast %cst_262 : f32 to vector<8x1xf32>
    %780 = arith.addf %776, %779 : vector<8x1xf32>
    %781 = math.rsqrt %780 : vector<8x1xf32>
    %782 = vector.broadcast %781 : vector<8x1xf32> to vector<8x512xf32>
    %783 = arith.mulf %778, %782 : vector<8x512xf32>
    %784 = arith.mulf %783, %745 : vector<8x512xf32>
    %785 = arith.addf %784, %749 : vector<8x512xf32>
    %786 = arith.index_cast %c0_i32_255 : i32 to index
    %c0_263 = arith.constant 0 : index
    %c0_264 = arith.constant 0 : index
    %787 = vector.load %arg19[%786, %c0_263, %c0_264] : memref<8x8x512xf32, #tpu.memory_space<vmem>>, vector<1x8x512xf32>
    %788 = vector.shape_cast %787 : vector<1x8x512xf32> to vector<8x512xf32>
    %789 = arith.addf %788, %785 : vector<8x512xf32>
    %790 = vector.extract_strided_slice %789 {offsets = [0, 0], sizes = [8, 128], strides = [1, 1]} : vector<8x512xf32> to vector<8x128xf32>
    %791 = arith.negf %790 : vector<8x128xf32>
    %792 = math.exp %791 : vector<8x128xf32>
    %cst_265 = arith.constant 1.000000e+00 : f32
    %793 = vector.broadcast %cst_265 : f32 to vector<8x128xf32>
    %794 = arith.addf %793, %792 : vector<8x128xf32>
    %795 = arith.divf %793, %794 : vector<8x128xf32>
    %796 = vector.extract_strided_slice %789 {offsets = [0, 128], sizes = [8, 128], strides = [1, 1]} : vector<8x512xf32> to vector<8x128xf32>
    %797 = arith.negf %796 : vector<8x128xf32>
    %798 = math.exp %797 : vector<8x128xf32>
    %cst_266 = arith.constant 1.000000e+00 : f32
    %799 = vector.broadcast %cst_266 : f32 to vector<8x128xf32>
    %800 = arith.addf %799, %798 : vector<8x128xf32>
    %801 = arith.divf %799, %800 : vector<8x128xf32>
    %802 = vector.extract_strided_slice %789 {offsets = [0, 256], sizes = [8, 128], strides = [1, 1]} : vector<8x512xf32> to vector<8x128xf32>
    %803 = arith.negf %802 : vector<8x128xf32>
    %804 = math.exp %803 : vector<8x128xf32>
    %cst_267 = arith.constant 1.000000e+00 : f32
    %805 = vector.broadcast %cst_267 : f32 to vector<8x128xf32>
    %806 = arith.addf %805, %804 : vector<8x128xf32>
    %807 = arith.divf %805, %806 : vector<8x128xf32>
    %808 = vector.extract_strided_slice %789 {offsets = [0, 384], sizes = [8, 128], strides = [1, 1]} : vector<8x512xf32> to vector<8x128xf32>
    %809 = math.tanh %808 : vector<8x128xf32>
    %810 = arith.mulf %801, %761 : vector<8x128xf32>
    %811 = arith.mulf %795, %809 : vector<8x128xf32>
    %812 = arith.addf %810, %811 : vector<8x128xf32>
    %cst_268 = arith.constant dense<0.000000e+00> : vector<8xf32>
    %813 = vector.multi_reduction <add>, %812, %cst_268 [1] : vector<8x128xf32> to vector<8xf32>
    %814 = vector.shape_cast %813 : vector<8xf32> to vector<8x1xf32>
    %cst_269 = arith.constant 3.125000e-02 : f32
    %815 = vector.broadcast %cst_269 : f32 to vector<8x1xf32>
    %816 = arith.mulf %814, %815 : vector<8x1xf32>
    %817 = arith.mulf %812, %812 : vector<8x128xf32>
    %cst_270 = arith.constant dense<0.000000e+00> : vector<8xf32>
    %818 = vector.multi_reduction <add>, %817, %cst_270 [1] : vector<8x128xf32> to vector<8xf32>
    %819 = vector.shape_cast %818 : vector<8xf32> to vector<8x1xf32>
    %cst_271 = arith.constant 3.125000e-02 : f32
    %820 = vector.broadcast %cst_271 : f32 to vector<8x1xf32>
    %821 = arith.mulf %819, %820 : vector<8x1xf32>
    %822 = arith.mulf %816, %816 : vector<8x1xf32>
    %823 = arith.subf %821, %822 : vector<8x1xf32>
    %cst_272 = arith.constant 0.000000e+00 : f32
    %824 = vector.broadcast %cst_272 : f32 to vector<8x1xf32>
    %825 = arith.maximumf %823, %824 : vector<8x1xf32>
    %826 = vector.broadcast %816 : vector<8x1xf32> to vector<8x128xf32>
    %827 = arith.subf %812, %826 : vector<8x128xf32>
    %cst_273 = arith.constant 9.99999974E-6 : f32
    %828 = vector.broadcast %cst_273 : f32 to vector<8x1xf32>
    %829 = arith.addf %825, %828 : vector<8x1xf32>
    %830 = math.rsqrt %829 : vector<8x1xf32>
    %831 = vector.broadcast %830 : vector<8x1xf32> to vector<8x128xf32>
    %832 = arith.mulf %827, %831 : vector<8x128xf32>
    %833 = arith.mulf %832, %753 : vector<8x128xf32>
    %834 = arith.addf %833, %757 : vector<8x128xf32>
    %835 = math.tanh %834 : vector<8x128xf32>
    %836 = arith.mulf %807, %835 : vector<8x128xf32>
    %c1_i32_274 = arith.constant 1 : i32
    %cst_275 = arith.constant dense<0.000000e+00> : vector<8x512xf32>
    %837 = tpu.matmul %836, %737, %cst_275 {dimension_numbers = #tpu.dot_dimension_numbers<[1], [0], [0], [1], [0, 0, 1, 1], [], []>} : vector<8x128xf32>, vector<128x512xf32>, vector<8x512xf32> -> vector<8x512xf32>
    %838 = arith.addf %837, %741 : vector<8x512xf32>
    %cst_276 = arith.constant dense<0.000000e+00> : vector<8xf32>
    %839 = vector.multi_reduction <add>, %838, %cst_276 [1] : vector<8x512xf32> to vector<8xf32>
    %840 = vector.shape_cast %839 : vector<8xf32> to vector<8x1xf32>
    %cst_277 = arith.constant 7.812500e-03 : f32
    %841 = vector.broadcast %cst_277 : f32 to vector<8x1xf32>
    %842 = arith.mulf %840, %841 : vector<8x1xf32>
    %843 = arith.mulf %838, %838 : vector<8x512xf32>
    %cst_278 = arith.constant dense<0.000000e+00> : vector<8xf32>
    %844 = vector.multi_reduction <add>, %843, %cst_278 [1] : vector<8x512xf32> to vector<8xf32>
    %845 = vector.shape_cast %844 : vector<8xf32> to vector<8x1xf32>
    %cst_279 = arith.constant 7.812500e-03 : f32
    %846 = vector.broadcast %cst_279 : f32 to vector<8x1xf32>
    %847 = arith.mulf %845, %846 : vector<8x1xf32>
    %848 = arith.mulf %842, %842 : vector<8x1xf32>
    %849 = arith.subf %847, %848 : vector<8x1xf32>
    %cst_280 = arith.constant 0.000000e+00 : f32
    %850 = vector.broadcast %cst_280 : f32 to vector<8x1xf32>
    %851 = arith.maximumf %849, %850 : vector<8x1xf32>
    %852 = vector.broadcast %842 : vector<8x1xf32> to vector<8x512xf32>
    %853 = arith.subf %838, %852 : vector<8x512xf32>
    %cst_281 = arith.constant 9.99999974E-6 : f32
    %854 = vector.broadcast %cst_281 : f32 to vector<8x1xf32>
    %855 = arith.addf %851, %854 : vector<8x1xf32>
    %856 = math.rsqrt %855 : vector<8x1xf32>
    %857 = vector.broadcast %856 : vector<8x1xf32> to vector<8x512xf32>
    %858 = arith.mulf %853, %857 : vector<8x512xf32>
    %859 = arith.mulf %858, %745 : vector<8x512xf32>
    %860 = arith.addf %859, %749 : vector<8x512xf32>
    %861 = arith.index_cast %c1_i32_274 : i32 to index
    %c0_282 = arith.constant 0 : index
    %c0_283 = arith.constant 0 : index
    %862 = vector.load %arg19[%861, %c0_282, %c0_283] : memref<8x8x512xf32, #tpu.memory_space<vmem>>, vector<1x8x512xf32>
    %863 = vector.shape_cast %862 : vector<1x8x512xf32> to vector<8x512xf32>
    %864 = arith.addf %863, %860 : vector<8x512xf32>
    %865 = vector.extract_strided_slice %864 {offsets = [0, 0], sizes = [8, 128], strides = [1, 1]} : vector<8x512xf32> to vector<8x128xf32>
    %866 = arith.negf %865 : vector<8x128xf32>
    %867 = math.exp %866 : vector<8x128xf32>
    %cst_284 = arith.constant 1.000000e+00 : f32
    %868 = vector.broadcast %cst_284 : f32 to vector<8x128xf32>
    %869 = arith.addf %868, %867 : vector<8x128xf32>
    %870 = arith.divf %868, %869 : vector<8x128xf32>
    %871 = vector.extract_strided_slice %864 {offsets = [0, 128], sizes = [8, 128], strides = [1, 1]} : vector<8x512xf32> to vector<8x128xf32>
    %872 = arith.negf %871 : vector<8x128xf32>
    %873 = math.exp %872 : vector<8x128xf32>
    %cst_285 = arith.constant 1.000000e+00 : f32
    %874 = vector.broadcast %cst_285 : f32 to vector<8x128xf32>
    %875 = arith.addf %874, %873 : vector<8x128xf32>
    %876 = arith.divf %874, %875 : vector<8x128xf32>
    %877 = vector.extract_strided_slice %864 {offsets = [0, 256], sizes = [8, 128], strides = [1, 1]} : vector<8x512xf32> to vector<8x128xf32>
    %878 = arith.negf %877 : vector<8x128xf32>
    %879 = math.exp %878 : vector<8x128xf32>
    %cst_286 = arith.constant 1.000000e+00 : f32
    %880 = vector.broadcast %cst_286 : f32 to vector<8x128xf32>
    %881 = arith.addf %880, %879 : vector<8x128xf32>
    %882 = arith.divf %880, %881 : vector<8x128xf32>
    %883 = vector.extract_strided_slice %864 {offsets = [0, 384], sizes = [8, 128], strides = [1, 1]} : vector<8x512xf32> to vector<8x128xf32>
    %884 = math.tanh %883 : vector<8x128xf32>
    %885 = arith.mulf %876, %812 : vector<8x128xf32>
    %886 = arith.mulf %870, %884 : vector<8x128xf32>
    %887 = arith.addf %885, %886 : vector<8x128xf32>
    %cst_287 = arith.constant dense<0.000000e+00> : vector<8xf32>
    %888 = vector.multi_reduction <add>, %887, %cst_287 [1] : vector<8x128xf32> to vector<8xf32>
    %889 = vector.shape_cast %888 : vector<8xf32> to vector<8x1xf32>
    %cst_288 = arith.constant 3.125000e-02 : f32
    %890 = vector.broadcast %cst_288 : f32 to vector<8x1xf32>
    %891 = arith.mulf %889, %890 : vector<8x1xf32>
    %892 = arith.mulf %887, %887 : vector<8x128xf32>
    %cst_289 = arith.constant dense<0.000000e+00> : vector<8xf32>
    %893 = vector.multi_reduction <add>, %892, %cst_289 [1] : vector<8x128xf32> to vector<8xf32>
    %894 = vector.shape_cast %893 : vector<8xf32> to vector<8x1xf32>
    %cst_290 = arith.constant 3.125000e-02 : f32
    %895 = vector.broadcast %cst_290 : f32 to vector<8x1xf32>
    %896 = arith.mulf %894, %895 : vector<8x1xf32>
    %897 = arith.mulf %891, %891 : vector<8x1xf32>
    %898 = arith.subf %896, %897 : vector<8x1xf32>
    %cst_291 = arith.constant 0.000000e+00 : f32
    %899 = vector.broadcast %cst_291 : f32 to vector<8x1xf32>
    %900 = arith.maximumf %898, %899 : vector<8x1xf32>
    %901 = vector.broadcast %891 : vector<8x1xf32> to vector<8x128xf32>
    %902 = arith.subf %887, %901 : vector<8x128xf32>
    %cst_292 = arith.constant 9.99999974E-6 : f32
    %903 = vector.broadcast %cst_292 : f32 to vector<8x1xf32>
    %904 = arith.addf %900, %903 : vector<8x1xf32>
    %905 = math.rsqrt %904 : vector<8x1xf32>
    %906 = vector.broadcast %905 : vector<8x1xf32> to vector<8x128xf32>
    %907 = arith.mulf %902, %906 : vector<8x128xf32>
    %908 = arith.mulf %907, %753 : vector<8x128xf32>
    %909 = arith.addf %908, %757 : vector<8x128xf32>
    %910 = math.tanh %909 : vector<8x128xf32>
    %911 = arith.mulf %882, %910 : vector<8x128xf32>
    %c2_i32_293 = arith.constant 2 : i32
    %cst_294 = arith.constant dense<0.000000e+00> : vector<8x512xf32>
    %912 = tpu.matmul %911, %737, %cst_294 {dimension_numbers = #tpu.dot_dimension_numbers<[1], [0], [0], [1], [0, 0, 1, 1], [], []>} : vector<8x128xf32>, vector<128x512xf32>, vector<8x512xf32> -> vector<8x512xf32>
    %913 = arith.addf %912, %741 : vector<8x512xf32>
    %cst_295 = arith.constant dense<0.000000e+00> : vector<8xf32>
    %914 = vector.multi_reduction <add>, %913, %cst_295 [1] : vector<8x512xf32> to vector<8xf32>
    %915 = vector.shape_cast %914 : vector<8xf32> to vector<8x1xf32>
    %cst_296 = arith.constant 7.812500e-03 : f32
    %916 = vector.broadcast %cst_296 : f32 to vector<8x1xf32>
    %917 = arith.mulf %915, %916 : vector<8x1xf32>
    %918 = arith.mulf %913, %913 : vector<8x512xf32>
    %cst_297 = arith.constant dense<0.000000e+00> : vector<8xf32>
    %919 = vector.multi_reduction <add>, %918, %cst_297 [1] : vector<8x512xf32> to vector<8xf32>
    %920 = vector.shape_cast %919 : vector<8xf32> to vector<8x1xf32>
    %cst_298 = arith.constant 7.812500e-03 : f32
    %921 = vector.broadcast %cst_298 : f32 to vector<8x1xf32>
    %922 = arith.mulf %920, %921 : vector<8x1xf32>
    %923 = arith.mulf %917, %917 : vector<8x1xf32>
    %924 = arith.subf %922, %923 : vector<8x1xf32>
    %cst_299 = arith.constant 0.000000e+00 : f32
    %925 = vector.broadcast %cst_299 : f32 to vector<8x1xf32>
    %926 = arith.maximumf %924, %925 : vector<8x1xf32>
    %927 = vector.broadcast %917 : vector<8x1xf32> to vector<8x512xf32>
    %928 = arith.subf %913, %927 : vector<8x512xf32>
    %cst_300 = arith.constant 9.99999974E-6 : f32
    %929 = vector.broadcast %cst_300 : f32 to vector<8x1xf32>
    %930 = arith.addf %926, %929 : vector<8x1xf32>
    %931 = math.rsqrt %930 : vector<8x1xf32>
    %932 = vector.broadcast %931 : vector<8x1xf32> to vector<8x512xf32>
    %933 = arith.mulf %928, %932 : vector<8x512xf32>
    %934 = arith.mulf %933, %745 : vector<8x512xf32>
    %935 = arith.addf %934, %749 : vector<8x512xf32>
    %936 = arith.index_cast %c2_i32_293 : i32 to index
    %c0_301 = arith.constant 0 : index
    %c0_302 = arith.constant 0 : index
    %937 = vector.load %arg19[%936, %c0_301, %c0_302] : memref<8x8x512xf32, #tpu.memory_space<vmem>>, vector<1x8x512xf32>
    %938 = vector.shape_cast %937 : vector<1x8x512xf32> to vector<8x512xf32>
    %939 = arith.addf %938, %935 : vector<8x512xf32>
    %940 = vector.extract_strided_slice %939 {offsets = [0, 0], sizes = [8, 128], strides = [1, 1]} : vector<8x512xf32> to vector<8x128xf32>
    %941 = arith.negf %940 : vector<8x128xf32>
    %942 = math.exp %941 : vector<8x128xf32>
    %cst_303 = arith.constant 1.000000e+00 : f32
    %943 = vector.broadcast %cst_303 : f32 to vector<8x128xf32>
    %944 = arith.addf %943, %942 : vector<8x128xf32>
    %945 = arith.divf %943, %944 : vector<8x128xf32>
    %946 = vector.extract_strided_slice %939 {offsets = [0, 128], sizes = [8, 128], strides = [1, 1]} : vector<8x512xf32> to vector<8x128xf32>
    %947 = arith.negf %946 : vector<8x128xf32>
    %948 = math.exp %947 : vector<8x128xf32>
    %cst_304 = arith.constant 1.000000e+00 : f32
    %949 = vector.broadcast %cst_304 : f32 to vector<8x128xf32>
    %950 = arith.addf %949, %948 : vector<8x128xf32>
    %951 = arith.divf %949, %950 : vector<8x128xf32>
    %952 = vector.extract_strided_slice %939 {offsets = [0, 256], sizes = [8, 128], strides = [1, 1]} : vector<8x512xf32> to vector<8x128xf32>
    %953 = arith.negf %952 : vector<8x128xf32>
    %954 = math.exp %953 : vector<8x128xf32>
    %cst_305 = arith.constant 1.000000e+00 : f32
    %955 = vector.broadcast %cst_305 : f32 to vector<8x128xf32>
    %956 = arith.addf %955, %954 : vector<8x128xf32>
    %957 = arith.divf %955, %956 : vector<8x128xf32>
    %958 = vector.extract_strided_slice %939 {offsets = [0, 384], sizes = [8, 128], strides = [1, 1]} : vector<8x512xf32> to vector<8x128xf32>
    %959 = math.tanh %958 : vector<8x128xf32>
    %960 = arith.mulf %951, %887 : vector<8x128xf32>
    %961 = arith.mulf %945, %959 : vector<8x128xf32>
    %962 = arith.addf %960, %961 : vector<8x128xf32>
    %cst_306 = arith.constant dense<0.000000e+00> : vector<8xf32>
    %963 = vector.multi_reduction <add>, %962, %cst_306 [1] : vector<8x128xf32> to vector<8xf32>
    %964 = vector.shape_cast %963 : vector<8xf32> to vector<8x1xf32>
    %cst_307 = arith.constant 3.125000e-02 : f32
    %965 = vector.broadcast %cst_307 : f32 to vector<8x1xf32>
    %966 = arith.mulf %964, %965 : vector<8x1xf32>
    %967 = arith.mulf %962, %962 : vector<8x128xf32>
    %cst_308 = arith.constant dense<0.000000e+00> : vector<8xf32>
    %968 = vector.multi_reduction <add>, %967, %cst_308 [1] : vector<8x128xf32> to vector<8xf32>
    %969 = vector.shape_cast %968 : vector<8xf32> to vector<8x1xf32>
    %cst_309 = arith.constant 3.125000e-02 : f32
    %970 = vector.broadcast %cst_309 : f32 to vector<8x1xf32>
    %971 = arith.mulf %969, %970 : vector<8x1xf32>
    %972 = arith.mulf %966, %966 : vector<8x1xf32>
    %973 = arith.subf %971, %972 : vector<8x1xf32>
    %cst_310 = arith.constant 0.000000e+00 : f32
    %974 = vector.broadcast %cst_310 : f32 to vector<8x1xf32>
    %975 = arith.maximumf %973, %974 : vector<8x1xf32>
    %976 = vector.broadcast %966 : vector<8x1xf32> to vector<8x128xf32>
    %977 = arith.subf %962, %976 : vector<8x128xf32>
    %cst_311 = arith.constant 9.99999974E-6 : f32
    %978 = vector.broadcast %cst_311 : f32 to vector<8x1xf32>
    %979 = arith.addf %975, %978 : vector<8x1xf32>
    %980 = math.rsqrt %979 : vector<8x1xf32>
    %981 = vector.broadcast %980 : vector<8x1xf32> to vector<8x128xf32>
    %982 = arith.mulf %977, %981 : vector<8x128xf32>
    %983 = arith.mulf %982, %753 : vector<8x128xf32>
    %984 = arith.addf %983, %757 : vector<8x128xf32>
    %985 = math.tanh %984 : vector<8x128xf32>
    %986 = arith.mulf %957, %985 : vector<8x128xf32>
    %c3_i32_312 = arith.constant 3 : i32
    %cst_313 = arith.constant dense<0.000000e+00> : vector<8x512xf32>
    %987 = tpu.matmul %986, %737, %cst_313 {dimension_numbers = #tpu.dot_dimension_numbers<[1], [0], [0], [1], [0, 0, 1, 1], [], []>} : vector<8x128xf32>, vector<128x512xf32>, vector<8x512xf32> -> vector<8x512xf32>
    %988 = arith.addf %987, %741 : vector<8x512xf32>
    %cst_314 = arith.constant dense<0.000000e+00> : vector<8xf32>
    %989 = vector.multi_reduction <add>, %988, %cst_314 [1] : vector<8x512xf32> to vector<8xf32>
    %990 = vector.shape_cast %989 : vector<8xf32> to vector<8x1xf32>
    %cst_315 = arith.constant 7.812500e-03 : f32
    %991 = vector.broadcast %cst_315 : f32 to vector<8x1xf32>
    %992 = arith.mulf %990, %991 : vector<8x1xf32>
    %993 = arith.mulf %988, %988 : vector<8x512xf32>
    %cst_316 = arith.constant dense<0.000000e+00> : vector<8xf32>
    %994 = vector.multi_reduction <add>, %993, %cst_316 [1] : vector<8x512xf32> to vector<8xf32>
    %995 = vector.shape_cast %994 : vector<8xf32> to vector<8x1xf32>
    %cst_317 = arith.constant 7.812500e-03 : f32
    %996 = vector.broadcast %cst_317 : f32 to vector<8x1xf32>
    %997 = arith.mulf %995, %996 : vector<8x1xf32>
    %998 = arith.mulf %992, %992 : vector<8x1xf32>
    %999 = arith.subf %997, %998 : vector<8x1xf32>
    %cst_318 = arith.constant 0.000000e+00 : f32
    %1000 = vector.broadcast %cst_318 : f32 to vector<8x1xf32>
    %1001 = arith.maximumf %999, %1000 : vector<8x1xf32>
    %1002 = vector.broadcast %992 : vector<8x1xf32> to vector<8x512xf32>
    %1003 = arith.subf %988, %1002 : vector<8x512xf32>
    %cst_319 = arith.constant 9.99999974E-6 : f32
    %1004 = vector.broadcast %cst_319 : f32 to vector<8x1xf32>
    %1005 = arith.addf %1001, %1004 : vector<8x1xf32>
    %1006 = math.rsqrt %1005 : vector<8x1xf32>
    %1007 = vector.broadcast %1006 : vector<8x1xf32> to vector<8x512xf32>
    %1008 = arith.mulf %1003, %1007 : vector<8x512xf32>
    %1009 = arith.mulf %1008, %745 : vector<8x512xf32>
    %1010 = arith.addf %1009, %749 : vector<8x512xf32>
    %1011 = arith.index_cast %c3_i32_312 : i32 to index
    %c0_320 = arith.constant 0 : index
    %c0_321 = arith.constant 0 : index
    %1012 = vector.load %arg19[%1011, %c0_320, %c0_321] : memref<8x8x512xf32, #tpu.memory_space<vmem>>, vector<1x8x512xf32>
    %1013 = vector.shape_cast %1012 : vector<1x8x512xf32> to vector<8x512xf32>
    %1014 = arith.addf %1013, %1010 : vector<8x512xf32>
    %1015 = vector.extract_strided_slice %1014 {offsets = [0, 0], sizes = [8, 128], strides = [1, 1]} : vector<8x512xf32> to vector<8x128xf32>
    %1016 = arith.negf %1015 : vector<8x128xf32>
    %1017 = math.exp %1016 : vector<8x128xf32>
    %cst_322 = arith.constant 1.000000e+00 : f32
    %1018 = vector.broadcast %cst_322 : f32 to vector<8x128xf32>
    %1019 = arith.addf %1018, %1017 : vector<8x128xf32>
    %1020 = arith.divf %1018, %1019 : vector<8x128xf32>
    %1021 = vector.extract_strided_slice %1014 {offsets = [0, 128], sizes = [8, 128], strides = [1, 1]} : vector<8x512xf32> to vector<8x128xf32>
    %1022 = arith.negf %1021 : vector<8x128xf32>
    %1023 = math.exp %1022 : vector<8x128xf32>
    %cst_323 = arith.constant 1.000000e+00 : f32
    %1024 = vector.broadcast %cst_323 : f32 to vector<8x128xf32>
    %1025 = arith.addf %1024, %1023 : vector<8x128xf32>
    %1026 = arith.divf %1024, %1025 : vector<8x128xf32>
    %1027 = vector.extract_strided_slice %1014 {offsets = [0, 256], sizes = [8, 128], strides = [1, 1]} : vector<8x512xf32> to vector<8x128xf32>
    %1028 = arith.negf %1027 : vector<8x128xf32>
    %1029 = math.exp %1028 : vector<8x128xf32>
    %cst_324 = arith.constant 1.000000e+00 : f32
    %1030 = vector.broadcast %cst_324 : f32 to vector<8x128xf32>
    %1031 = arith.addf %1030, %1029 : vector<8x128xf32>
    %1032 = arith.divf %1030, %1031 : vector<8x128xf32>
    %1033 = vector.extract_strided_slice %1014 {offsets = [0, 384], sizes = [8, 128], strides = [1, 1]} : vector<8x512xf32> to vector<8x128xf32>
    %1034 = math.tanh %1033 : vector<8x128xf32>
    %1035 = arith.mulf %1026, %962 : vector<8x128xf32>
    %1036 = arith.mulf %1020, %1034 : vector<8x128xf32>
    %1037 = arith.addf %1035, %1036 : vector<8x128xf32>
    %cst_325 = arith.constant dense<0.000000e+00> : vector<8xf32>
    %1038 = vector.multi_reduction <add>, %1037, %cst_325 [1] : vector<8x128xf32> to vector<8xf32>
    %1039 = vector.shape_cast %1038 : vector<8xf32> to vector<8x1xf32>
    %cst_326 = arith.constant 3.125000e-02 : f32
    %1040 = vector.broadcast %cst_326 : f32 to vector<8x1xf32>
    %1041 = arith.mulf %1039, %1040 : vector<8x1xf32>
    %1042 = arith.mulf %1037, %1037 : vector<8x128xf32>
    %cst_327 = arith.constant dense<0.000000e+00> : vector<8xf32>
    %1043 = vector.multi_reduction <add>, %1042, %cst_327 [1] : vector<8x128xf32> to vector<8xf32>
    %1044 = vector.shape_cast %1043 : vector<8xf32> to vector<8x1xf32>
    %cst_328 = arith.constant 3.125000e-02 : f32
    %1045 = vector.broadcast %cst_328 : f32 to vector<8x1xf32>
    %1046 = arith.mulf %1044, %1045 : vector<8x1xf32>
    %1047 = arith.mulf %1041, %1041 : vector<8x1xf32>
    %1048 = arith.subf %1046, %1047 : vector<8x1xf32>
    %cst_329 = arith.constant 0.000000e+00 : f32
    %1049 = vector.broadcast %cst_329 : f32 to vector<8x1xf32>
    %1050 = arith.maximumf %1048, %1049 : vector<8x1xf32>
    %1051 = vector.broadcast %1041 : vector<8x1xf32> to vector<8x128xf32>
    %1052 = arith.subf %1037, %1051 : vector<8x128xf32>
    %cst_330 = arith.constant 9.99999974E-6 : f32
    %1053 = vector.broadcast %cst_330 : f32 to vector<8x1xf32>
    %1054 = arith.addf %1050, %1053 : vector<8x1xf32>
    %1055 = math.rsqrt %1054 : vector<8x1xf32>
    %1056 = vector.broadcast %1055 : vector<8x1xf32> to vector<8x128xf32>
    %1057 = arith.mulf %1052, %1056 : vector<8x128xf32>
    %1058 = arith.mulf %1057, %753 : vector<8x128xf32>
    %1059 = arith.addf %1058, %757 : vector<8x128xf32>
    %1060 = math.tanh %1059 : vector<8x128xf32>
    %1061 = arith.mulf %1032, %1060 : vector<8x128xf32>
    %c4_i32_331 = arith.constant 4 : i32
    %cst_332 = arith.constant dense<0.000000e+00> : vector<8x512xf32>
    %1062 = tpu.matmul %1061, %737, %cst_332 {dimension_numbers = #tpu.dot_dimension_numbers<[1], [0], [0], [1], [0, 0, 1, 1], [], []>} : vector<8x128xf32>, vector<128x512xf32>, vector<8x512xf32> -> vector<8x512xf32>
    %1063 = arith.addf %1062, %741 : vector<8x512xf32>
    %cst_333 = arith.constant dense<0.000000e+00> : vector<8xf32>
    %1064 = vector.multi_reduction <add>, %1063, %cst_333 [1] : vector<8x512xf32> to vector<8xf32>
    %1065 = vector.shape_cast %1064 : vector<8xf32> to vector<8x1xf32>
    %cst_334 = arith.constant 7.812500e-03 : f32
    %1066 = vector.broadcast %cst_334 : f32 to vector<8x1xf32>
    %1067 = arith.mulf %1065, %1066 : vector<8x1xf32>
    %1068 = arith.mulf %1063, %1063 : vector<8x512xf32>
    %cst_335 = arith.constant dense<0.000000e+00> : vector<8xf32>
    %1069 = vector.multi_reduction <add>, %1068, %cst_335 [1] : vector<8x512xf32> to vector<8xf32>
    %1070 = vector.shape_cast %1069 : vector<8xf32> to vector<8x1xf32>
    %cst_336 = arith.constant 7.812500e-03 : f32
    %1071 = vector.broadcast %cst_336 : f32 to vector<8x1xf32>
    %1072 = arith.mulf %1070, %1071 : vector<8x1xf32>
    %1073 = arith.mulf %1067, %1067 : vector<8x1xf32>
    %1074 = arith.subf %1072, %1073 : vector<8x1xf32>
    %cst_337 = arith.constant 0.000000e+00 : f32
    %1075 = vector.broadcast %cst_337 : f32 to vector<8x1xf32>
    %1076 = arith.maximumf %1074, %1075 : vector<8x1xf32>
    %1077 = vector.broadcast %1067 : vector<8x1xf32> to vector<8x512xf32>
    %1078 = arith.subf %1063, %1077 : vector<8x512xf32>
    %cst_338 = arith.constant 9.99999974E-6 : f32
    %1079 = vector.broadcast %cst_338 : f32 to vector<8x1xf32>
    %1080 = arith.addf %1076, %1079 : vector<8x1xf32>
    %1081 = math.rsqrt %1080 : vector<8x1xf32>
    %1082 = vector.broadcast %1081 : vector<8x1xf32> to vector<8x512xf32>
    %1083 = arith.mulf %1078, %1082 : vector<8x512xf32>
    %1084 = arith.mulf %1083, %745 : vector<8x512xf32>
    %1085 = arith.addf %1084, %749 : vector<8x512xf32>
    %1086 = arith.index_cast %c4_i32_331 : i32 to index
    %c0_339 = arith.constant 0 : index
    %c0_340 = arith.constant 0 : index
    %1087 = vector.load %arg19[%1086, %c0_339, %c0_340] : memref<8x8x512xf32, #tpu.memory_space<vmem>>, vector<1x8x512xf32>
    %1088 = vector.shape_cast %1087 : vector<1x8x512xf32> to vector<8x512xf32>
    %1089 = arith.addf %1088, %1085 : vector<8x512xf32>
    %1090 = vector.extract_strided_slice %1089 {offsets = [0, 0], sizes = [8, 128], strides = [1, 1]} : vector<8x512xf32> to vector<8x128xf32>
    %1091 = arith.negf %1090 : vector<8x128xf32>
    %1092 = math.exp %1091 : vector<8x128xf32>
    %cst_341 = arith.constant 1.000000e+00 : f32
    %1093 = vector.broadcast %cst_341 : f32 to vector<8x128xf32>
    %1094 = arith.addf %1093, %1092 : vector<8x128xf32>
    %1095 = arith.divf %1093, %1094 : vector<8x128xf32>
    %1096 = vector.extract_strided_slice %1089 {offsets = [0, 128], sizes = [8, 128], strides = [1, 1]} : vector<8x512xf32> to vector<8x128xf32>
    %1097 = arith.negf %1096 : vector<8x128xf32>
    %1098 = math.exp %1097 : vector<8x128xf32>
    %cst_342 = arith.constant 1.000000e+00 : f32
    %1099 = vector.broadcast %cst_342 : f32 to vector<8x128xf32>
    %1100 = arith.addf %1099, %1098 : vector<8x128xf32>
    %1101 = arith.divf %1099, %1100 : vector<8x128xf32>
    %1102 = vector.extract_strided_slice %1089 {offsets = [0, 256], sizes = [8, 128], strides = [1, 1]} : vector<8x512xf32> to vector<8x128xf32>
    %1103 = arith.negf %1102 : vector<8x128xf32>
    %1104 = math.exp %1103 : vector<8x128xf32>
    %cst_343 = arith.constant 1.000000e+00 : f32
    %1105 = vector.broadcast %cst_343 : f32 to vector<8x128xf32>
    %1106 = arith.addf %1105, %1104 : vector<8x128xf32>
    %1107 = arith.divf %1105, %1106 : vector<8x128xf32>
    %1108 = vector.extract_strided_slice %1089 {offsets = [0, 384], sizes = [8, 128], strides = [1, 1]} : vector<8x512xf32> to vector<8x128xf32>
    %1109 = math.tanh %1108 : vector<8x128xf32>
    %1110 = arith.mulf %1101, %1037 : vector<8x128xf32>
    %1111 = arith.mulf %1095, %1109 : vector<8x128xf32>
    %1112 = arith.addf %1110, %1111 : vector<8x128xf32>
    %cst_344 = arith.constant dense<0.000000e+00> : vector<8xf32>
    %1113 = vector.multi_reduction <add>, %1112, %cst_344 [1] : vector<8x128xf32> to vector<8xf32>
    %1114 = vector.shape_cast %1113 : vector<8xf32> to vector<8x1xf32>
    %cst_345 = arith.constant 3.125000e-02 : f32
    %1115 = vector.broadcast %cst_345 : f32 to vector<8x1xf32>
    %1116 = arith.mulf %1114, %1115 : vector<8x1xf32>
    %1117 = arith.mulf %1112, %1112 : vector<8x128xf32>
    %cst_346 = arith.constant dense<0.000000e+00> : vector<8xf32>
    %1118 = vector.multi_reduction <add>, %1117, %cst_346 [1] : vector<8x128xf32> to vector<8xf32>
    %1119 = vector.shape_cast %1118 : vector<8xf32> to vector<8x1xf32>
    %cst_347 = arith.constant 3.125000e-02 : f32
    %1120 = vector.broadcast %cst_347 : f32 to vector<8x1xf32>
    %1121 = arith.mulf %1119, %1120 : vector<8x1xf32>
    %1122 = arith.mulf %1116, %1116 : vector<8x1xf32>
    %1123 = arith.subf %1121, %1122 : vector<8x1xf32>
    %cst_348 = arith.constant 0.000000e+00 : f32
    %1124 = vector.broadcast %cst_348 : f32 to vector<8x1xf32>
    %1125 = arith.maximumf %1123, %1124 : vector<8x1xf32>
    %1126 = vector.broadcast %1116 : vector<8x1xf32> to vector<8x128xf32>
    %1127 = arith.subf %1112, %1126 : vector<8x128xf32>
    %cst_349 = arith.constant 9.99999974E-6 : f32
    %1128 = vector.broadcast %cst_349 : f32 to vector<8x1xf32>
    %1129 = arith.addf %1125, %1128 : vector<8x1xf32>
    %1130 = math.rsqrt %1129 : vector<8x1xf32>
    %1131 = vector.broadcast %1130 : vector<8x1xf32> to vector<8x128xf32>
    %1132 = arith.mulf %1127, %1131 : vector<8x128xf32>
    %1133 = arith.mulf %1132, %753 : vector<8x128xf32>
    %1134 = arith.addf %1133, %757 : vector<8x128xf32>
    %1135 = math.tanh %1134 : vector<8x128xf32>
    %1136 = arith.mulf %1107, %1135 : vector<8x128xf32>
    %c5_i32_350 = arith.constant 5 : i32
    %cst_351 = arith.constant dense<0.000000e+00> : vector<8x512xf32>
    %1137 = tpu.matmul %1136, %737, %cst_351 {dimension_numbers = #tpu.dot_dimension_numbers<[1], [0], [0], [1], [0, 0, 1, 1], [], []>} : vector<8x128xf32>, vector<128x512xf32>, vector<8x512xf32> -> vector<8x512xf32>
    %1138 = arith.addf %1137, %741 : vector<8x512xf32>
    %cst_352 = arith.constant dense<0.000000e+00> : vector<8xf32>
    %1139 = vector.multi_reduction <add>, %1138, %cst_352 [1] : vector<8x512xf32> to vector<8xf32>
    %1140 = vector.shape_cast %1139 : vector<8xf32> to vector<8x1xf32>
    %cst_353 = arith.constant 7.812500e-03 : f32
    %1141 = vector.broadcast %cst_353 : f32 to vector<8x1xf32>
    %1142 = arith.mulf %1140, %1141 : vector<8x1xf32>
    %1143 = arith.mulf %1138, %1138 : vector<8x512xf32>
    %cst_354 = arith.constant dense<0.000000e+00> : vector<8xf32>
    %1144 = vector.multi_reduction <add>, %1143, %cst_354 [1] : vector<8x512xf32> to vector<8xf32>
    %1145 = vector.shape_cast %1144 : vector<8xf32> to vector<8x1xf32>
    %cst_355 = arith.constant 7.812500e-03 : f32
    %1146 = vector.broadcast %cst_355 : f32 to vector<8x1xf32>
    %1147 = arith.mulf %1145, %1146 : vector<8x1xf32>
    %1148 = arith.mulf %1142, %1142 : vector<8x1xf32>
    %1149 = arith.subf %1147, %1148 : vector<8x1xf32>
    %cst_356 = arith.constant 0.000000e+00 : f32
    %1150 = vector.broadcast %cst_356 : f32 to vector<8x1xf32>
    %1151 = arith.maximumf %1149, %1150 : vector<8x1xf32>
    %1152 = vector.broadcast %1142 : vector<8x1xf32> to vector<8x512xf32>
    %1153 = arith.subf %1138, %1152 : vector<8x512xf32>
    %cst_357 = arith.constant 9.99999974E-6 : f32
    %1154 = vector.broadcast %cst_357 : f32 to vector<8x1xf32>
    %1155 = arith.addf %1151, %1154 : vector<8x1xf32>
    %1156 = math.rsqrt %1155 : vector<8x1xf32>
    %1157 = vector.broadcast %1156 : vector<8x1xf32> to vector<8x512xf32>
    %1158 = arith.mulf %1153, %1157 : vector<8x512xf32>
    %1159 = arith.mulf %1158, %745 : vector<8x512xf32>
    %1160 = arith.addf %1159, %749 : vector<8x512xf32>
    %1161 = arith.index_cast %c5_i32_350 : i32 to index
    %c0_358 = arith.constant 0 : index
    %c0_359 = arith.constant 0 : index
    %1162 = vector.load %arg19[%1161, %c0_358, %c0_359] : memref<8x8x512xf32, #tpu.memory_space<vmem>>, vector<1x8x512xf32>
    %1163 = vector.shape_cast %1162 : vector<1x8x512xf32> to vector<8x512xf32>
    %1164 = arith.addf %1163, %1160 : vector<8x512xf32>
    %1165 = vector.extract_strided_slice %1164 {offsets = [0, 0], sizes = [8, 128], strides = [1, 1]} : vector<8x512xf32> to vector<8x128xf32>
    %1166 = arith.negf %1165 : vector<8x128xf32>
    %1167 = math.exp %1166 : vector<8x128xf32>
    %cst_360 = arith.constant 1.000000e+00 : f32
    %1168 = vector.broadcast %cst_360 : f32 to vector<8x128xf32>
    %1169 = arith.addf %1168, %1167 : vector<8x128xf32>
    %1170 = arith.divf %1168, %1169 : vector<8x128xf32>
    %1171 = vector.extract_strided_slice %1164 {offsets = [0, 128], sizes = [8, 128], strides = [1, 1]} : vector<8x512xf32> to vector<8x128xf32>
    %1172 = arith.negf %1171 : vector<8x128xf32>
    %1173 = math.exp %1172 : vector<8x128xf32>
    %cst_361 = arith.constant 1.000000e+00 : f32
    %1174 = vector.broadcast %cst_361 : f32 to vector<8x128xf32>
    %1175 = arith.addf %1174, %1173 : vector<8x128xf32>
    %1176 = arith.divf %1174, %1175 : vector<8x128xf32>
    %1177 = vector.extract_strided_slice %1164 {offsets = [0, 256], sizes = [8, 128], strides = [1, 1]} : vector<8x512xf32> to vector<8x128xf32>
    %1178 = arith.negf %1177 : vector<8x128xf32>
    %1179 = math.exp %1178 : vector<8x128xf32>
    %cst_362 = arith.constant 1.000000e+00 : f32
    %1180 = vector.broadcast %cst_362 : f32 to vector<8x128xf32>
    %1181 = arith.addf %1180, %1179 : vector<8x128xf32>
    %1182 = arith.divf %1180, %1181 : vector<8x128xf32>
    %1183 = vector.extract_strided_slice %1164 {offsets = [0, 384], sizes = [8, 128], strides = [1, 1]} : vector<8x512xf32> to vector<8x128xf32>
    %1184 = math.tanh %1183 : vector<8x128xf32>
    %1185 = arith.mulf %1176, %1112 : vector<8x128xf32>
    %1186 = arith.mulf %1170, %1184 : vector<8x128xf32>
    %1187 = arith.addf %1185, %1186 : vector<8x128xf32>
    %cst_363 = arith.constant dense<0.000000e+00> : vector<8xf32>
    %1188 = vector.multi_reduction <add>, %1187, %cst_363 [1] : vector<8x128xf32> to vector<8xf32>
    %1189 = vector.shape_cast %1188 : vector<8xf32> to vector<8x1xf32>
    %cst_364 = arith.constant 3.125000e-02 : f32
    %1190 = vector.broadcast %cst_364 : f32 to vector<8x1xf32>
    %1191 = arith.mulf %1189, %1190 : vector<8x1xf32>
    %1192 = arith.mulf %1187, %1187 : vector<8x128xf32>
    %cst_365 = arith.constant dense<0.000000e+00> : vector<8xf32>
    %1193 = vector.multi_reduction <add>, %1192, %cst_365 [1] : vector<8x128xf32> to vector<8xf32>
    %1194 = vector.shape_cast %1193 : vector<8xf32> to vector<8x1xf32>
    %cst_366 = arith.constant 3.125000e-02 : f32
    %1195 = vector.broadcast %cst_366 : f32 to vector<8x1xf32>
    %1196 = arith.mulf %1194, %1195 : vector<8x1xf32>
    %1197 = arith.mulf %1191, %1191 : vector<8x1xf32>
    %1198 = arith.subf %1196, %1197 : vector<8x1xf32>
    %cst_367 = arith.constant 0.000000e+00 : f32
    %1199 = vector.broadcast %cst_367 : f32 to vector<8x1xf32>
    %1200 = arith.maximumf %1198, %1199 : vector<8x1xf32>
    %1201 = vector.broadcast %1191 : vector<8x1xf32> to vector<8x128xf32>
    %1202 = arith.subf %1187, %1201 : vector<8x128xf32>
    %cst_368 = arith.constant 9.99999974E-6 : f32
    %1203 = vector.broadcast %cst_368 : f32 to vector<8x1xf32>
    %1204 = arith.addf %1200, %1203 : vector<8x1xf32>
    %1205 = math.rsqrt %1204 : vector<8x1xf32>
    %1206 = vector.broadcast %1205 : vector<8x1xf32> to vector<8x128xf32>
    %1207 = arith.mulf %1202, %1206 : vector<8x128xf32>
    %1208 = arith.mulf %1207, %753 : vector<8x128xf32>
    %1209 = arith.addf %1208, %757 : vector<8x128xf32>
    %1210 = math.tanh %1209 : vector<8x128xf32>
    %1211 = arith.mulf %1182, %1210 : vector<8x128xf32>
    %c6_i32_369 = arith.constant 6 : i32
    %cst_370 = arith.constant dense<0.000000e+00> : vector<8x512xf32>
    %1212 = tpu.matmul %1211, %737, %cst_370 {dimension_numbers = #tpu.dot_dimension_numbers<[1], [0], [0], [1], [0, 0, 1, 1], [], []>} : vector<8x128xf32>, vector<128x512xf32>, vector<8x512xf32> -> vector<8x512xf32>
    %1213 = arith.addf %1212, %741 : vector<8x512xf32>
    %cst_371 = arith.constant dense<0.000000e+00> : vector<8xf32>
    %1214 = vector.multi_reduction <add>, %1213, %cst_371 [1] : vector<8x512xf32> to vector<8xf32>
    %1215 = vector.shape_cast %1214 : vector<8xf32> to vector<8x1xf32>
    %cst_372 = arith.constant 7.812500e-03 : f32
    %1216 = vector.broadcast %cst_372 : f32 to vector<8x1xf32>
    %1217 = arith.mulf %1215, %1216 : vector<8x1xf32>
    %1218 = arith.mulf %1213, %1213 : vector<8x512xf32>
    %cst_373 = arith.constant dense<0.000000e+00> : vector<8xf32>
    %1219 = vector.multi_reduction <add>, %1218, %cst_373 [1] : vector<8x512xf32> to vector<8xf32>
    %1220 = vector.shape_cast %1219 : vector<8xf32> to vector<8x1xf32>
    %cst_374 = arith.constant 7.812500e-03 : f32
    %1221 = vector.broadcast %cst_374 : f32 to vector<8x1xf32>
    %1222 = arith.mulf %1220, %1221 : vector<8x1xf32>
    %1223 = arith.mulf %1217, %1217 : vector<8x1xf32>
    %1224 = arith.subf %1222, %1223 : vector<8x1xf32>
    %cst_375 = arith.constant 0.000000e+00 : f32
    %1225 = vector.broadcast %cst_375 : f32 to vector<8x1xf32>
    %1226 = arith.maximumf %1224, %1225 : vector<8x1xf32>
    %1227 = vector.broadcast %1217 : vector<8x1xf32> to vector<8x512xf32>
    %1228 = arith.subf %1213, %1227 : vector<8x512xf32>
    %cst_376 = arith.constant 9.99999974E-6 : f32
    %1229 = vector.broadcast %cst_376 : f32 to vector<8x1xf32>
    %1230 = arith.addf %1226, %1229 : vector<8x1xf32>
    %1231 = math.rsqrt %1230 : vector<8x1xf32>
    %1232 = vector.broadcast %1231 : vector<8x1xf32> to vector<8x512xf32>
    %1233 = arith.mulf %1228, %1232 : vector<8x512xf32>
    %1234 = arith.mulf %1233, %745 : vector<8x512xf32>
    %1235 = arith.addf %1234, %749 : vector<8x512xf32>
    %1236 = arith.index_cast %c6_i32_369 : i32 to index
    %c0_377 = arith.constant 0 : index
    %c0_378 = arith.constant 0 : index
    %1237 = vector.load %arg19[%1236, %c0_377, %c0_378] : memref<8x8x512xf32, #tpu.memory_space<vmem>>, vector<1x8x512xf32>
    %1238 = vector.shape_cast %1237 : vector<1x8x512xf32> to vector<8x512xf32>
    %1239 = arith.addf %1238, %1235 : vector<8x512xf32>
    %1240 = vector.extract_strided_slice %1239 {offsets = [0, 0], sizes = [8, 128], strides = [1, 1]} : vector<8x512xf32> to vector<8x128xf32>
    %1241 = arith.negf %1240 : vector<8x128xf32>
    %1242 = math.exp %1241 : vector<8x128xf32>
    %cst_379 = arith.constant 1.000000e+00 : f32
    %1243 = vector.broadcast %cst_379 : f32 to vector<8x128xf32>
    %1244 = arith.addf %1243, %1242 : vector<8x128xf32>
    %1245 = arith.divf %1243, %1244 : vector<8x128xf32>
    %1246 = vector.extract_strided_slice %1239 {offsets = [0, 128], sizes = [8, 128], strides = [1, 1]} : vector<8x512xf32> to vector<8x128xf32>
    %1247 = arith.negf %1246 : vector<8x128xf32>
    %1248 = math.exp %1247 : vector<8x128xf32>
    %cst_380 = arith.constant 1.000000e+00 : f32
    %1249 = vector.broadcast %cst_380 : f32 to vector<8x128xf32>
    %1250 = arith.addf %1249, %1248 : vector<8x128xf32>
    %1251 = arith.divf %1249, %1250 : vector<8x128xf32>
    %1252 = vector.extract_strided_slice %1239 {offsets = [0, 256], sizes = [8, 128], strides = [1, 1]} : vector<8x512xf32> to vector<8x128xf32>
    %1253 = arith.negf %1252 : vector<8x128xf32>
    %1254 = math.exp %1253 : vector<8x128xf32>
    %cst_381 = arith.constant 1.000000e+00 : f32
    %1255 = vector.broadcast %cst_381 : f32 to vector<8x128xf32>
    %1256 = arith.addf %1255, %1254 : vector<8x128xf32>
    %1257 = arith.divf %1255, %1256 : vector<8x128xf32>
    %1258 = vector.extract_strided_slice %1239 {offsets = [0, 384], sizes = [8, 128], strides = [1, 1]} : vector<8x512xf32> to vector<8x128xf32>
    %1259 = math.tanh %1258 : vector<8x128xf32>
    %1260 = arith.mulf %1251, %1187 : vector<8x128xf32>
    %1261 = arith.mulf %1245, %1259 : vector<8x128xf32>
    %1262 = arith.addf %1260, %1261 : vector<8x128xf32>
    %cst_382 = arith.constant dense<0.000000e+00> : vector<8xf32>
    %1263 = vector.multi_reduction <add>, %1262, %cst_382 [1] : vector<8x128xf32> to vector<8xf32>
    %1264 = vector.shape_cast %1263 : vector<8xf32> to vector<8x1xf32>
    %cst_383 = arith.constant 3.125000e-02 : f32
    %1265 = vector.broadcast %cst_383 : f32 to vector<8x1xf32>
    %1266 = arith.mulf %1264, %1265 : vector<8x1xf32>
    %1267 = arith.mulf %1262, %1262 : vector<8x128xf32>
    %cst_384 = arith.constant dense<0.000000e+00> : vector<8xf32>
    %1268 = vector.multi_reduction <add>, %1267, %cst_384 [1] : vector<8x128xf32> to vector<8xf32>
    %1269 = vector.shape_cast %1268 : vector<8xf32> to vector<8x1xf32>
    %cst_385 = arith.constant 3.125000e-02 : f32
    %1270 = vector.broadcast %cst_385 : f32 to vector<8x1xf32>
    %1271 = arith.mulf %1269, %1270 : vector<8x1xf32>
    %1272 = arith.mulf %1266, %1266 : vector<8x1xf32>
    %1273 = arith.subf %1271, %1272 : vector<8x1xf32>
    %cst_386 = arith.constant 0.000000e+00 : f32
    %1274 = vector.broadcast %cst_386 : f32 to vector<8x1xf32>
    %1275 = arith.maximumf %1273, %1274 : vector<8x1xf32>
    %1276 = vector.broadcast %1266 : vector<8x1xf32> to vector<8x128xf32>
    %1277 = arith.subf %1262, %1276 : vector<8x128xf32>
    %cst_387 = arith.constant 9.99999974E-6 : f32
    %1278 = vector.broadcast %cst_387 : f32 to vector<8x1xf32>
    %1279 = arith.addf %1275, %1278 : vector<8x1xf32>
    %1280 = math.rsqrt %1279 : vector<8x1xf32>
    %1281 = vector.broadcast %1280 : vector<8x1xf32> to vector<8x128xf32>
    %1282 = arith.mulf %1277, %1281 : vector<8x128xf32>
    %1283 = arith.mulf %1282, %753 : vector<8x128xf32>
    %1284 = arith.addf %1283, %757 : vector<8x128xf32>
    %1285 = math.tanh %1284 : vector<8x128xf32>
    %1286 = arith.mulf %1257, %1285 : vector<8x128xf32>
    %c7_i32_388 = arith.constant 7 : i32
    %cst_389 = arith.constant dense<0.000000e+00> : vector<8x512xf32>
    %1287 = tpu.matmul %1286, %737, %cst_389 {dimension_numbers = #tpu.dot_dimension_numbers<[1], [0], [0], [1], [0, 0, 1, 1], [], []>} : vector<8x128xf32>, vector<128x512xf32>, vector<8x512xf32> -> vector<8x512xf32>
    %1288 = arith.addf %1287, %741 : vector<8x512xf32>
    %cst_390 = arith.constant dense<0.000000e+00> : vector<8xf32>
    %1289 = vector.multi_reduction <add>, %1288, %cst_390 [1] : vector<8x512xf32> to vector<8xf32>
    %1290 = vector.shape_cast %1289 : vector<8xf32> to vector<8x1xf32>
    %cst_391 = arith.constant 7.812500e-03 : f32
    %1291 = vector.broadcast %cst_391 : f32 to vector<8x1xf32>
    %1292 = arith.mulf %1290, %1291 : vector<8x1xf32>
    %1293 = arith.mulf %1288, %1288 : vector<8x512xf32>
    %cst_392 = arith.constant dense<0.000000e+00> : vector<8xf32>
    %1294 = vector.multi_reduction <add>, %1293, %cst_392 [1] : vector<8x512xf32> to vector<8xf32>
    %1295 = vector.shape_cast %1294 : vector<8xf32> to vector<8x1xf32>
    %cst_393 = arith.constant 7.812500e-03 : f32
    %1296 = vector.broadcast %cst_393 : f32 to vector<8x1xf32>
    %1297 = arith.mulf %1295, %1296 : vector<8x1xf32>
    %1298 = arith.mulf %1292, %1292 : vector<8x1xf32>
    %1299 = arith.subf %1297, %1298 : vector<8x1xf32>
    %cst_394 = arith.constant 0.000000e+00 : f32
    %1300 = vector.broadcast %cst_394 : f32 to vector<8x1xf32>
    %1301 = arith.maximumf %1299, %1300 : vector<8x1xf32>
    %1302 = vector.broadcast %1292 : vector<8x1xf32> to vector<8x512xf32>
    %1303 = arith.subf %1288, %1302 : vector<8x512xf32>
    %cst_395 = arith.constant 9.99999974E-6 : f32
    %1304 = vector.broadcast %cst_395 : f32 to vector<8x1xf32>
    %1305 = arith.addf %1301, %1304 : vector<8x1xf32>
    %1306 = math.rsqrt %1305 : vector<8x1xf32>
    %1307 = vector.broadcast %1306 : vector<8x1xf32> to vector<8x512xf32>
    %1308 = arith.mulf %1303, %1307 : vector<8x512xf32>
    %1309 = arith.mulf %1308, %745 : vector<8x512xf32>
    %1310 = arith.addf %1309, %749 : vector<8x512xf32>
    %1311 = arith.index_cast %c7_i32_388 : i32 to index
    %c0_396 = arith.constant 0 : index
    %c0_397 = arith.constant 0 : index
    %1312 = vector.load %arg19[%1311, %c0_396, %c0_397] : memref<8x8x512xf32, #tpu.memory_space<vmem>>, vector<1x8x512xf32>
    %1313 = vector.shape_cast %1312 : vector<1x8x512xf32> to vector<8x512xf32>
    %1314 = arith.addf %1313, %1310 : vector<8x512xf32>
    %1315 = vector.extract_strided_slice %1314 {offsets = [0, 0], sizes = [8, 128], strides = [1, 1]} : vector<8x512xf32> to vector<8x128xf32>
    %1316 = arith.negf %1315 : vector<8x128xf32>
    %1317 = math.exp %1316 : vector<8x128xf32>
    %cst_398 = arith.constant 1.000000e+00 : f32
    %1318 = vector.broadcast %cst_398 : f32 to vector<8x128xf32>
    %1319 = arith.addf %1318, %1317 : vector<8x128xf32>
    %1320 = arith.divf %1318, %1319 : vector<8x128xf32>
    %1321 = vector.extract_strided_slice %1314 {offsets = [0, 128], sizes = [8, 128], strides = [1, 1]} : vector<8x512xf32> to vector<8x128xf32>
    %1322 = arith.negf %1321 : vector<8x128xf32>
    %1323 = math.exp %1322 : vector<8x128xf32>
    %cst_399 = arith.constant 1.000000e+00 : f32
    %1324 = vector.broadcast %cst_399 : f32 to vector<8x128xf32>
    %1325 = arith.addf %1324, %1323 : vector<8x128xf32>
    %1326 = arith.divf %1324, %1325 : vector<8x128xf32>
    %1327 = vector.extract_strided_slice %1314 {offsets = [0, 256], sizes = [8, 128], strides = [1, 1]} : vector<8x512xf32> to vector<8x128xf32>
    %1328 = arith.negf %1327 : vector<8x128xf32>
    %1329 = math.exp %1328 : vector<8x128xf32>
    %cst_400 = arith.constant 1.000000e+00 : f32
    %1330 = vector.broadcast %cst_400 : f32 to vector<8x128xf32>
    %1331 = arith.addf %1330, %1329 : vector<8x128xf32>
    %1332 = arith.divf %1330, %1331 : vector<8x128xf32>
    %1333 = vector.extract_strided_slice %1314 {offsets = [0, 384], sizes = [8, 128], strides = [1, 1]} : vector<8x512xf32> to vector<8x128xf32>
    %1334 = math.tanh %1333 : vector<8x128xf32>
    %1335 = arith.mulf %1326, %1262 : vector<8x128xf32>
    %1336 = arith.mulf %1320, %1334 : vector<8x128xf32>
    %1337 = arith.addf %1335, %1336 : vector<8x128xf32>
    %cst_401 = arith.constant dense<0.000000e+00> : vector<8xf32>
    %1338 = vector.multi_reduction <add>, %1337, %cst_401 [1] : vector<8x128xf32> to vector<8xf32>
    %1339 = vector.shape_cast %1338 : vector<8xf32> to vector<8x1xf32>
    %cst_402 = arith.constant 3.125000e-02 : f32
    %1340 = vector.broadcast %cst_402 : f32 to vector<8x1xf32>
    %1341 = arith.mulf %1339, %1340 : vector<8x1xf32>
    %1342 = arith.mulf %1337, %1337 : vector<8x128xf32>
    %cst_403 = arith.constant dense<0.000000e+00> : vector<8xf32>
    %1343 = vector.multi_reduction <add>, %1342, %cst_403 [1] : vector<8x128xf32> to vector<8xf32>
    %1344 = vector.shape_cast %1343 : vector<8xf32> to vector<8x1xf32>
    %cst_404 = arith.constant 3.125000e-02 : f32
    %1345 = vector.broadcast %cst_404 : f32 to vector<8x1xf32>
    %1346 = arith.mulf %1344, %1345 : vector<8x1xf32>
    %1347 = arith.mulf %1341, %1341 : vector<8x1xf32>
    %1348 = arith.subf %1346, %1347 : vector<8x1xf32>
    %cst_405 = arith.constant 0.000000e+00 : f32
    %1349 = vector.broadcast %cst_405 : f32 to vector<8x1xf32>
    %1350 = arith.maximumf %1348, %1349 : vector<8x1xf32>
    %1351 = vector.broadcast %1341 : vector<8x1xf32> to vector<8x128xf32>
    %1352 = arith.subf %1337, %1351 : vector<8x128xf32>
    %cst_406 = arith.constant 9.99999974E-6 : f32
    %1353 = vector.broadcast %cst_406 : f32 to vector<8x1xf32>
    %1354 = arith.addf %1350, %1353 : vector<8x1xf32>
    %1355 = math.rsqrt %1354 : vector<8x1xf32>
    %1356 = vector.broadcast %1355 : vector<8x1xf32> to vector<8x128xf32>
    %1357 = arith.mulf %1352, %1356 : vector<8x128xf32>
    %1358 = arith.mulf %1357, %753 : vector<8x128xf32>
    %1359 = arith.addf %1358, %757 : vector<8x128xf32>
    %1360 = math.tanh %1359 : vector<8x128xf32>
    %1361 = arith.mulf %1332, %1360 : vector<8x128xf32>
    %c8_i32_407 = arith.constant 8 : i32
    %c0_408 = arith.constant 0 : index
    %c0_409 = arith.constant 0 : index
    %1362 = vector.load %arg16[%c0_408, %c0_409] : memref<8x128xf32, #tpu.memory_space<vmem>>, vector<8x128xf32>
    %1363 = arith.mulf %1361, %1362 : vector<8x128xf32>
    %c0_410 = arith.constant 0 : index
    %c0_411 = arith.constant 0 : index
    %1364 = vector.load %arg14[%c0_410, %c0_411] : memref<1x128xf32, #tpu.memory_space<vmem>>, vector<1x128xf32>
    %1365 = vector.broadcast %1364 : vector<1x128xf32> to vector<8x128xf32>
    %1366 = arith.mulf %1363, %1365 : vector<8x128xf32>
    %cst_412 = arith.constant dense<0.000000e+00> : vector<8xf32>
    %1367 = vector.multi_reduction <add>, %1366, %cst_412 [1] : vector<8x128xf32> to vector<8xf32>
    %1368 = vector.shape_cast %1367 : vector<8xf32> to vector<8x1xf32>
    %c0_413 = arith.constant 0 : index
    %c0_414 = arith.constant 0 : index
    %1369 = vector.load %arg15[%c0_413, %c0_414] : memref<1x1xf32, #tpu.memory_space<vmem>>, vector<1x1xf32>
    %1370 = vector.broadcast %1369 : vector<1x1xf32> to vector<8x1xf32>
    %1371 = arith.addf %1368, %1370 : vector<8x1xf32>
    %c0_415 = arith.constant 0 : index
    %c0_416 = arith.constant 0 : index
    %1372 = vector.load %arg17[%c0_415, %c0_416] : memref<8x1xf32, #tpu.memory_space<vmem>>, vector<8x1xf32>
    tpu.vector_store %arg17[%c0_415, %c0_416], %1371 {strides = array<i32>} : memref<8x1xf32, #tpu.memory_space<vmem>>, vector<8x1xf32>,
    return
  }
  func.func @transform_0(%arg0: i32) -> (i32, i32, i32) {
    %c0_i32 = arith.constant 0 : i32
    %c0_i32_0 = arith.constant 0 : i32
    %c0_i32_1 = arith.constant 0 : i32
    return %c0_i32, %arg0, %c0_i32_0 : i32, i32, i32
  }
  func.func @transform_1(%arg0: i32) -> (i32, i32, i32) {
    %c0_i32 = arith.constant 0 : i32
    %c0_i32_0 = arith.constant 0 : i32
    %c0_i32_1 = arith.constant 0 : i32
    return %c0_i32, %arg0, %c0_i32_0 : i32, i32, i32
  }
  func.func @transform_2(%arg0: i32) -> (i32, i32, i32) {
    %c0_i32 = arith.constant 0 : i32
    %c0_i32_0 = arith.constant 0 : i32
    %c0_i32_1 = arith.constant 0 : i32
    return %c0_i32, %arg0, %c0_i32_0 : i32, i32, i32
  }
  func.func @transform_3(%arg0: i32) -> (i32, i32, i32) {
    %c0_i32 = arith.constant 0 : i32
    %c0_i32_0 = arith.constant 0 : i32
    %c0_i32_1 = arith.constant 0 : i32
    %c0_i32_2 = arith.constant 0 : i32
    return %c0_i32, %c0_i32_0, %c0_i32_1 : i32, i32, i32
  }
  func.func @transform_4(%arg0: i32) -> (i32, i32, i32) {
    %c0_i32 = arith.constant 0 : i32
    %c0_i32_0 = arith.constant 0 : i32
    %c0_i32_1 = arith.constant 0 : i32
    %c0_i32_2 = arith.constant 0 : i32
    return %c0_i32, %c0_i32_0, %c0_i32_1 : i32, i32, i32
  }
  func.func @transform_5(%arg0: i32) -> (i32, i32, i32) {
    %c0_i32 = arith.constant 0 : i32
    %c0_i32_0 = arith.constant 0 : i32
    %c0_i32_1 = arith.constant 0 : i32
    %c0_i32_2 = arith.constant 0 : i32
    return %c0_i32, %c0_i32_0, %c0_i32_1 : i32, i32, i32
  }
  func.func @transform_6(%arg0: i32) -> (i32, i32, i32) {
    %c0_i32 = arith.constant 0 : i32
    %c0_i32_0 = arith.constant 0 : i32
    %c0_i32_1 = arith.constant 0 : i32
    %c0_i32_2 = arith.constant 0 : i32
    return %c0_i32, %c0_i32_0, %c0_i32_1 : i32, i32, i32
  }
  func.func @transform_7(%arg0: i32) -> (i32, i32, i32) {
    %c0_i32 = arith.constant 0 : i32
    %c0_i32_0 = arith.constant 0 : i32
    %c0_i32_1 = arith.constant 0 : i32
    %c0_i32_2 = arith.constant 0 : i32
    return %c0_i32, %c0_i32_0, %c0_i32_1 : i32, i32, i32
  }
  func.func @transform_8(%arg0: i32) -> (i32, i32, i32) {
    %c0_i32 = arith.constant 0 : i32
    %c0_i32_0 = arith.constant 0 : i32
    %c0_i32_1 = arith.constant 0 : i32
    %c0_i32_2 = arith.constant 0 : i32
    return %c0_i32, %c0_i32_0, %c0_i32_1 : i32, i32, i32
  }
  func.func @transform_9(%arg0: i32) -> (i32, i32, i32) {
    %c0_i32 = arith.constant 0 : i32
    %c0_i32_0 = arith.constant 0 : i32
    %c0_i32_1 = arith.constant 0 : i32
    %c0_i32_2 = arith.constant 0 : i32
    return %c0_i32, %c0_i32_0, %c0_i32_1 : i32, i32, i32
  }
  func.func @transform_10(%arg0: i32) -> (i32, i32, i32) {
    %c0_i32 = arith.constant 0 : i32
    %c0_i32_0 = arith.constant 0 : i32
    %c0_i32_1 = arith.constant 0 : i32
    %c0_i32_2 = arith.constant 0 : i32
    return %c0_i32, %c0_i32_0, %c0_i32_1 : i32, i32, i32
  }
  func.func @transform_11(%arg0: i32) -> (i32, i32, i32) {
    %c0_i32 = arith.constant 0 : i32
    %c0_i32_0 = arith.constant 0 : i32
    %c0_i32_1 = arith.constant 0 : i32
    %c0_i32_2 = arith.constant 0 : i32
    return %c0_i32, %c0_i32_0, %c0_i32_1 : i32, i32, i32
  }
  func.func @transform_12(%arg0: i32) -> (i32, i32, i32) {
    %c0_i32 = arith.constant 0 : i32
    %c0_i32_0 = arith.constant 0 : i32
    %c0_i32_1 = arith.constant 0 : i32
    %c0_i32_2 = arith.constant 0 : i32
    return %c0_i32, %c0_i32_0, %c0_i32_1 : i32, i32, i32
  }
  func.func @transform_13(%arg0: i32) -> (i32, i32) {
    %c0_i32 = arith.constant 0 : i32
    %c0_i32_0 = arith.constant 0 : i32
    %c0_i32_1 = arith.constant 0 : i32
    return %c0_i32, %c0_i32_0 : i32, i32
  }
  func.func @transform_14(%arg0: i32) -> (i32, i32) {
    %c0_i32 = arith.constant 0 : i32
    %c0_i32_0 = arith.constant 0 : i32
    %c0_i32_1 = arith.constant 0 : i32
    return %c0_i32, %c0_i32_0 : i32, i32
  }
  func.func @transform_15(%arg0: i32) -> (i32, i32) {
    %c0_i32 = arith.constant 0 : i32
    %c0_i32_0 = arith.constant 0 : i32
    return %arg0, %c0_i32 : i32, i32
  }
  func.func @transform_16(%arg0: i32) -> (i32, i32) {
    %c0_i32 = arith.constant 0 : i32
    %c0_i32_0 = arith.constant 0 : i32
    return %arg0, %c0_i32 : i32, i32
  }
}

</mosaic_0001>

<bundles_post_ra>
// kernel: tpu_custom_call.1
= control target key start
LH: loop header
LB: loop body
LE: loop exit
PB: predicated region body
PF: predicated region fallthrough
CT: control target
= control target key end

     0   :  { %s10004_s0 = inlined_call_operand.hbm [shape: f32[8,8,128], index: 0, kind: input, shape index: {}]   ;;  %s10005_s1 = inlined_call_operand.hbm [shape: f32[2,8,128], index: 1, kind: input, shape index: {}]   ;;  %s10006_s2 = inlined_call_operand.hbm [shape: f32[2,8,128], index: 2, kind: input, shape index: {}]   ;;  %s10007_s3 = inlined_call_operand.hbm [shape: f32[2,128,512], index: 3, kind: input, shape index: {}]   ;;  %s10008_s4 = inlined_call_operand.hbm [shape: f32[2,128,512], index: 4, kind: input, shape index: {}]   ;;  %s10009_s5 = inlined_call_operand.vmem [shape: f32[2,1,512], index: 5, kind: input, shape index: {}]   ;;  %s10010_s6 = inlined_call_operand.hbm [shape: f32[2,1,512], index: 6, kind: input, shape index: {}]   ;;  %s10011_s7 = inlined_call_operand.hbm [shape: f32[2,1,512], index: 7, kind: input, shape index: {}]   ;;  %s10012_s8 = inlined_call_operand.vmem [shape: f32[2,1,512], index: 8, kind: input, shape index: {}]   ;;  %s10013_s9 = inlined_call_operand.hbm [shape: f32[2,1,512], index: 9, kind: input, shape index: {}]   ;;  %s10014_s10 = inlined_call_operand.hbm [shape: f32[2,1,512], index: 10, kind: input, shape index: {}]   ;;  %s10015_s11 = inlined_call_operand.hbm [shape: f32[2,1,128], index: 11, kind: input, shape index: {}]   ;;  %s10016_s12 = inlined_call_operand.hbm [shape: f32[2,1,128], index: 12, kind: input, shape index: {}]   ;;  %s10017_s13 = inlined_call_operand.vmem [shape: f32[1,128], index: 13, kind: input, shape index: {}]   ;;  %s10018_s14 = inlined_call_operand.<no memory space> [shape: f32[1,1], index: 14, kind: input, shape index: {}]   ;;  %s10019_s15 = inlined_call_operand.vmem [shape: f32[8,128], index: 15, kind: input, shape index: {}]   ;;  %s10020_s16 = inlined_call_operand.vmem [shape: f32[8,1], index: 16, kind: output, shape index: {}]  }
   0x1   :  { %10533 = sst [smem:[#allocation106_spill]] %s10004_s0  ;;  %v21_v0 = vstv %s10018_s14 }
   0x2   :  { %22 = vst [vmem:[#allocation4] sm:$0x1] %v21_v0 }
   0x3   :  { %23 = vsyncpa [#allocation6], 0 }
   0x4   :  { %24 = vsyncpa [#allocation8], 0 }
   0x5   :  { %25 = vsyncpa [#allocation11], 0 }
   0x6   :  { %26 = vsyncpa [#allocation14], 0 }
   0x7   :  { %27 = vsyncpa [#allocation17], 0 }
   0x8   :  { %28 = vsyncpa [#allocation20], 0  ;;  %s6502_s23 = smov [#allocation7]   ;;  %s6503_s25 = smov [#allocation10]  }
   0x9   :  { %s46_s24 = sshll.u32 %s6502_s23, 4  ;;  %s70_s26 = sshll.u32 %s6503_s25, 4  ;;  %s47_s24 = int_to_ptr.vmem [resolvable:$true] %s46_s24  ;;  %s71_s26 = int_to_ptr.vmem [resolvable:$true] %s70_s26 }
   0xa   :  { %s6278_s27 = scalar_lea.vmem %s47_s24, 256  ;;  %p6283_p1 = scmp.lt.s32.totalorder %s47_s24, %s47_s24 }
   0xb   :  { %p6279_p0 = scmp.ne.s32.totalorder %s47_s24, %s6278_s27  ;;  %p6284_p2 = scmp.lt.s32.totalorder %s6278_s27, %s6278_s27 }
   0xd   :  { %p6285_p3 = por %p6284_p2, %p6283_p1 }
   0xf   :  { %p6286_p4 = pnand %p6285_p3, %p6279_p0 }
  0x11   :  { %6289 = shalt.err (!%p6286_p4)
}
  0x12   :  { %s6504_s14 = smov 128   ;;  %s6505_s28 = smov 8  }
  0x13   :  { %52 = dma.hbm_to_vmem [thread:$0]  %s10005_s1, 256, %s47_s24, [#allocation8], %s6504_s14, %s6504_s14, %s6505_s28  }
  0x14   :  { %s6298_s0 = scalar_lea.vmem %s71_s26, 16384  ;;  %p6303_p6 = scmp.lt.s32.totalorder %s71_s26, %s71_s26 }
  0x15   :  { %p6299_p5 = scmp.ne.s32.totalorder %s71_s26, %s6298_s0  ;;  %p6304_p7 = scmp.lt.s32.totalorder %s6298_s0, %s6298_s0 }
  0x17   :  { %p6305_p8 = por %p6304_p7, %p6303_p6 }
  0x19   :  { %p6306_p9 = pnand %p6305_p8, %p6299_p5 }
  0x1b   :  { %6309 = shalt.err (!%p6306_p9)
}
  0x1c   :  { %s6506_s17 = smov 512   ;;  %s6507_s18 = smov 32  }
  0x1d   :  { %76 = dma.hbm_to_vmem [thread:$0]  %s10007_s3, 16384, %s71_s26, [#allocation11], %s6506_s17, %s6506_s17, %s6507_s18  }
  0x1e   :  { %s6508_s21 = smov [#allocation13]  }
  0x1f   :  { %s96_s22 = sshll.u32 %s6508_s21, 4  ;;  %s97_s22 = int_to_ptr.vmem [resolvable:$true] %s96_s22 }
  0x20   :  { %s6318_s1 = scalar_lea.vmem %s97_s22, 128  ;;  %p6323_p11 = scmp.lt.s32.totalorder %s97_s22, %s97_s22 }
  0x21   :  { %p6319_p10 = scmp.ne.s32.totalorder %s97_s22, %s6318_s1  ;;  %p6324_p12 = scmp.lt.s32.totalorder %s6318_s1, %s6318_s1 }
  0x23   :  { %p6325_p13 = por %p6324_p12, %p6323_p11 }
  0x25   :  { %p6326_p0 = pnand %p6325_p13, %p6319_p10 }
  0x27   :  { %6329 = shalt.err (!%p6326_p0)
}
  0x28   :  { %s6509_s23 = smov 64   ;;  %s6510_s24 = smov 4  }
  0x29   :  { %102 = dma.hbm_to_vmem [thread:$0]  %s10010_s6, 128, %s97_s22, [#allocation14], %s6509_s23, %s6509_s23, %s6510_s24  }
  0x2a   :  { %s6511_s3 = smov [#allocation16]   ;;  %s6512_s29 = smov [#allocation19]  }
  0x2b   :  { %s122_s26 = sshll.u32 %s6511_s3, 4  ;;  %s146_s30 = sshll.u32 %s6512_s29, 4  ;;  %s123_s26 = int_to_ptr.vmem [resolvable:$true] %s122_s26  ;;  %s147_s30 = int_to_ptr.vmem [resolvable:$true] %s146_s30 }
  0x2c   :  { %s6338_s0 = scalar_lea.vmem %s123_s26, 128  ;;  %p6343_p2 = scmp.lt.s32.totalorder %s123_s26, %s123_s26 }
  0x2d   :  { %p6339_p1 = scmp.ne.s32.totalorder %s123_s26, %s6338_s0  ;;  %p6344_p3 = scmp.lt.s32.totalorder %s6338_s0, %s6338_s0 }
  0x2f   :  { %p6345_p4 = por %p6344_p3, %p6343_p2 }
  0x31   :  { %p6346_p5 = pnand %p6345_p4, %p6339_p1 }
  0x33   :  { %6349 = shalt.err (!%p6346_p5)
}
  0x34   :  { %128 = dma.hbm_to_vmem [thread:$0]  %s10013_s9, 128, %s123_s26, [#allocation17], %s6509_s23, %s6509_s23, %s6510_s24  }
  0x35   :  { %s6358_s6 = scalar_lea.vmem %s147_s30, 32  ;;  %p6363_p7 = scmp.lt.s32.totalorder %s147_s30, %s147_s30 }
  0x36   :  { %p6359_p6 = scmp.ne.s32.totalorder %s147_s30, %s6358_s6  ;;  %p6364_p8 = scmp.lt.s32.totalorder %s6358_s6, %s6358_s6 }
  0x38   :  { %p6365_p9 = por %p6364_p8, %p6363_p7 }
  0x3a   :  { %p6366_p10 = pnand %p6365_p9, %p6359_p6 }
  0x3c   :  { %6369 = shalt.err (!%p6366_p10)
}
  0x3d   :  { %s6513_s21 = smov 16   ;;  %s6514_s22 = smov 1  }
  0x3e   :  { %152 = dma.hbm_to_vmem [thread:$0]  %s10015_s11, 32, %s147_s30, [#allocation20], %s6513_s21, %s6513_s21, %s6514_s22  }
  0x3f   :  { %s6515_s27 = smov [#allocation5]   ;;  %s6516_s9 = smov [#allocation9]  }
  0x40   :  { %s34_s3 = sshll.u32 %s6515_s27, 4  ;;  %s58_s26 = sshll.u32 %s6516_s9, 4  ;;  %s35_s3 = int_to_ptr.vmem [resolvable:$true] %s34_s3  ;;  %s59_s26 = int_to_ptr.vmem [resolvable:$true] %s58_s26 }
  0x41   :  { %s6378_s29 = scalar_lea.vmem %s35_s3, 1024  ;;  %p6383_p12 = scmp.lt.s32.totalorder %s35_s3, %s35_s3 }
  0x42   :  { %p6379_p11 = scmp.ne.s32.totalorder %s35_s3, %s6378_s29  ;;  %p6384_p13 = scmp.lt.s32.totalorder %s6378_s29, %s6378_s29 }
  0x44   :  { %p6385_p0 = por %p6384_p13, %p6383_p12 }
  0x46   :  { %p6386_p1 = pnand %p6385_p0, %p6379_p11 }
  0x48   :  { %6389 = shalt.err (!%p6386_p1)
}
  0x49   :  { %s10534_s20 = sld [smem:[#allocation106_spill]]  ;;  %s6398_s11 = scalar_lea.vmem %s59_s26, 256 }
  0x4a   :  { %p6399_p2 = scmp.ne.s32.totalorder %s59_s26, %s6398_s11  ;;  %p6403_p3 = scmp.lt.s32.totalorder %s59_s26, %s59_s26 }
  0x4b   :  { %p6404_p4 = scmp.lt.s32.totalorder %s6398_s11, %s6398_s11 }
  0x4d   :  { %p6405_p5 = por %p6404_p4, %p6403_p3 }
  0x4f   :  { %40 = dma.hbm_to_vmem [thread:$0]  %s10534_s20, 1024, %s35_s3, [#allocation6], %s6504_s14, %s6504_s14, %s6505_s28  }
  0x50   :  { %p6406_p6 = pnand %p6405_p5, %p6399_p2 }
  0x52   :  { %6409 = shalt.err (!%p6406_p6)
}
  0x53   :  { %64 = dma.hbm_to_vmem [thread:$0]  %s10006_s2, 256, %s59_s26, [#allocation8], %s6504_s14, %s6504_s14, %s6505_s28  }
  0x54   :  { %s6517_s1 = smov [#allocation12]   ;;  %s6518_s27 = smov [#allocation15]  }
  0x55   :  { %s82_s25 = sshll.u32 %s6517_s1, 4  ;;  %s108_s3 = sshll.u32 %s6518_s27, 4  ;;  %s83_s25 = int_to_ptr.vmem [resolvable:$true] %s82_s25  ;;  %s109_s3 = int_to_ptr.vmem [resolvable:$true] %s108_s3 }
  0x56   :  { %s6418_s9 = scalar_lea.vmem %s83_s25, 16384  ;;  %p6423_p8 = scmp.lt.s32.totalorder %s83_s25, %s83_s25 }
  0x57   :  { %p6419_p7 = scmp.ne.s32.totalorder %s83_s25, %s6418_s9  ;;  %p6424_p9 = scmp.lt.s32.totalorder %s6418_s9, %s6418_s9 }
  0x59   :  { %p6425_p10 = por %p6424_p9, %p6423_p8 }
  0x5b   :  { %p6426_p11 = pnand %p6425_p10, %p6419_p7 }
  0x5d   :  { %6429 = shalt.err (!%p6426_p11)
}
  0x5e   :  { %88 = dma.hbm_to_vmem [thread:$0]  %s10008_s4, 16384, %s83_s25, [#allocation11], %s6506_s17, %s6506_s17, %s6507_s18  }
  0x5f   :  { %s6438_s2 = scalar_lea.vmem %s109_s3, 128  ;;  %p6443_p13 = scmp.lt.s32.totalorder %s109_s3, %s109_s3 }
  0x60   :  { %p6439_p12 = scmp.ne.s32.totalorder %s109_s3, %s6438_s2  ;;  %p6444_p0 = scmp.lt.s32.totalorder %s6438_s2, %s6438_s2 }
  0x62   :  { %p6445_p1 = por %p6444_p0, %p6443_p13 }
  0x64   :  { %p6446_p2 = pnand %p6445_p1, %p6439_p12 }
  0x66   :  { %6449 = shalt.err (!%p6446_p2)
}
  0x67   :  { %114 = dma.hbm_to_vmem [thread:$0]  %s10011_s7, 128, %s109_s3, [#allocation14], %s6509_s23, %s6509_s23, %s6510_s24  }
  0x68   :  { %s6519_s26 = smov [#allocation18]   ;;  %s6520_s20 = smov [#allocation21]  }
  0x69   :  { %s134_s19 = sshll.u32 %s6519_s26, 4  ;;  %s158_s4 = sshll.u32 %s6520_s20, 4  ;;  %s135_s19 = int_to_ptr.vmem [resolvable:$true] %s134_s19  ;;  %s159_s4 = int_to_ptr.vmem [resolvable:$true] %s158_s4 }
  0x6a   :  { %s6458_s17 = scalar_lea.vmem %s135_s19, 128  ;;  %p6463_p4 = scmp.lt.s32.totalorder %s135_s19, %s135_s19 }
  0x6b   :  { %p6459_p3 = scmp.ne.s32.totalorder %s135_s19, %s6458_s17  ;;  %p6464_p5 = scmp.lt.s32.totalorder %s6458_s17, %s6458_s17 }
  0x6d   :  { %p6465_p6 = por %p6464_p5, %p6463_p4 }
  0x6f   :  { %p6466_p7 = pnand %p6465_p6, %p6459_p3 }
  0x71   :  { %6469 = shalt.err (!%p6466_p7)
}
  0x72   :  { %140 = dma.hbm_to_vmem [thread:$0]  %s10014_s10, 128, %s135_s19, [#allocation17], %s6509_s23, %s6509_s23, %s6510_s24  }
  0x73   :  { %s6478_s7 = scalar_lea.vmem %s159_s4, 32  ;;  %p6483_p9 = scmp.lt.s32.totalorder %s159_s4, %s159_s4 }
  0x74   :  { %p6479_p8 = scmp.ne.s32.totalorder %s159_s4, %s6478_s7  ;;  %p6484_p10 = scmp.lt.s32.totalorder %s6478_s7, %s6478_s7 }
  0x76   :  { %p6485_p11 = por %p6484_p10, %p6483_p9 }
  0x78   :  { %p6486_p12 = pnand %p6485_p11, %p6479_p8 }
  0x7a   :  { %6489 = shalt.err (!%p6486_p12)
}
  0x7b   :  { %164 = dma.hbm_to_vmem [thread:$0]  %s10016_s12, 32, %s159_s4, [#allocation20], %s6513_s21, %s6513_s21, %s6514_s22  }
  0x7c   :  { %6490 = dma.done.wait [#allocation6], 1024  }
  0x7d   :  { %6491 = vsyncadd [#allocation6], 4294966272 }
  0x7e   :  { %6492 = dma.done.wait [#allocation8], 512  }
  0x7f   :  { %6493 = vsyncadd [#allocation8], 4294966784 }
  0x80   :  { %6494 = dma.done.wait [#allocation11], 32768  }
  0x81   :  { %6495 = vsyncadd [#allocation11], 4294934528 }
  0x82   :  { %6496 = dma.done.wait [#allocation14], 256  }
  0x83   :  { %6497 = vsyncadd [#allocation14], 4294967040 }
  0x84   :  { %6498 = dma.done.wait [#allocation17], 256  }
  0x85   :  { %6499 = vsyncadd [#allocation17], 4294967040 }
  0x86   :  { %6500 = dma.done.wait [#allocation20], 64  }
  0x87   :  { %6501 = vsyncadd [#allocation20], 4294967232  ;;  %v10027_v1 = vmov 0.0   ;;  %v273_v2 = vld [vmem:[#allocation10 + $0x1e8] sm:$0xff]  ;;  %v272_v3 = vld [vmem:[#allocation10 + $0x1e0] sm:$0xff]  ;;  %vm5566_vm0 = vcmask 7168  }
  0x88   :  { %362 = vmatprep.mubr.f32.mxu0 %v10027_v1  ;;  %475 = vmatprep.mubr.f32.mxu1 %v10027_v1  ;;  %v269_v4 = vld [vmem:[#allocation10 + $0x1c8] sm:$0xff]  ;;  %v268_v5 = vld [vmem:[#allocation10 + $0x1c0] sm:$0xff]  ;;  %v275_v6 = vld [vmem:[#allocation10 + $0x1f8] sm:$0xff] }
  0x89   :  { %298 = vmatprep.subr.mxu0 %v273_v2  ;;  %411 = vmatprep.subr.mxu1 %v275_v6  ;;  %v265_v7 = vld [vmem:[#allocation10 + $0x1a8] sm:$0xff]  ;;  %v274_v8 = vld [vmem:[#allocation10 + $0x1f0] sm:$0xff]  ;;  %v271_v9 = vld [vmem:[#allocation10 + $0x1d8] sm:$0xff] }
  0x8a   :  { %299 = vmatpush1.msra.mxu0 %v272_v3  ;;  %412 = vmatpush1.msra.mxu1 %v274_v8  ;;  %v264_v10 = vld [vmem:[#allocation10 + $0x1a0] sm:$0xff]  ;;  %v270_v11 = vld [vmem:[#allocation10 + $0x1d0] sm:$0xff]  ;;  %v261_v12 = vld [vmem:[#allocation10 + $0x188] sm:$0xff] }
  0x8b   :  { %300 = vmatprep.subr.mxu0 %v269_v4  ;;  %413 = vmatprep.subr.mxu1 %v271_v9  ;;  %v267_v13 = vld [vmem:[#allocation10 + $0x1b8] sm:$0xff]  ;;  %v266_v14 = vld [vmem:[#allocation10 + $0x1b0] sm:$0xff]  ;;  %v260_v15 = vld [vmem:[#allocation10 + $0x180] sm:$0xff] }
  0x8c   :  { %301 = vmatpush1.msra.mxu0 %v268_v5  ;;  %414 = vmatpush1.msra.mxu1 %v270_v11  ;;  %v263_v16 = vld [vmem:[#allocation10 + $0x198] sm:$0xff]  ;;  %v257_v17 = vld [vmem:[#allocation10 + $0x168] sm:$0xff]  ;;  %v262_v18 = vld [vmem:[#allocation10 + $0x190] sm:$0xff] }
  0x8d   :  { %302 = vmatprep.subr.mxu0 %v265_v7  ;;  %415 = vmatprep.subr.mxu1 %v267_v13  ;;  %v256_v19 = vld [vmem:[#allocation10 + $0x160] sm:$0xff]  ;;  %v259_v20 = vld [vmem:[#allocation10 + $0x178] sm:$0xff]  ;;  %v253_v21 = vld [vmem:[#allocation10 + $0x148] sm:$0xff] }
  0x8e   :  { %303 = vmatpush1.msra.mxu0 %v264_v10  ;;  %416 = vmatpush1.msra.mxu1 %v266_v14  ;;  %v258_v22 = vld [vmem:[#allocation10 + $0x170] sm:$0xff]  ;;  %v252_v23 = vld [vmem:[#allocation10 + $0x140] sm:$0xff]  ;;  %v255_v24 = vld [vmem:[#allocation10 + $0x158] sm:$0xff] }
  0x8f   :  { %304 = vmatprep.subr.mxu0 %v261_v12  ;;  %417 = vmatprep.subr.mxu1 %v263_v16  ;;  %v249_v25 = vld [vmem:[#allocation10 + $0x128] sm:$0xff]  ;;  %v254_v26 = vld [vmem:[#allocation10 + $0x150] sm:$0xff]  ;;  %v248_v27 = vld [vmem:[#allocation10 + $0x120] sm:$0xff] }
  0x90   :  { %305 = vmatpush1.msra.mxu0 %v260_v15  ;;  %418 = vmatpush1.msra.mxu1 %v262_v18  ;;  %v251_v28 = vld [vmem:[#allocation10 + $0x138] sm:$0xff]  ;;  %v245_v29 = vld [vmem:[#allocation10 + $0x108] sm:$0xff]  ;;  %v250_v30 = vld [vmem:[#allocation10 + $0x130] sm:$0xff] }
  0x91   :  { %306 = vmatprep.subr.mxu0 %v257_v17  ;;  %419 = vmatprep.subr.mxu1 %v259_v20  ;;  %v244_v31 = vld [vmem:[#allocation10 + $0x100] sm:$0xff]  ;;  %v247_v32 = vld [vmem:[#allocation10 + $0x118] sm:$0xff]  ;;  %v241_v33 = vld [vmem:[#allocation10 + $0xe8] sm:$0xff] }
  0x92   :  { %307 = vmatpush1.msra.mxu0 %v256_v19  ;;  %420 = vmatpush1.msra.mxu1 %v258_v22  ;;  %v246_v34 = vld [vmem:[#allocation10 + $0x110] sm:$0xff]  ;;  %v240_v35 = vld [vmem:[#allocation10 + $0xe0] sm:$0xff]  ;;  %v243_v36 = vld [vmem:[#allocation10 + $0xf8] sm:$0xff] }
  0x93   :  { %308 = vmatprep.subr.mxu0 %v253_v21  ;;  %421 = vmatprep.subr.mxu1 %v255_v24  ;;  %v237_v37 = vld [vmem:[#allocation10 + $0xc8] sm:$0xff]  ;;  %v242_v38 = vld [vmem:[#allocation10 + $0xf0] sm:$0xff]  ;;  %v236_v39 = vld [vmem:[#allocation10 + $0xc0] sm:$0xff] }
  0x94   :  { %309 = vmatpush1.msra.mxu0 %v252_v23  ;;  %422 = vmatpush1.msra.mxu1 %v254_v26  ;;  %v239_v40 = vld [vmem:[#allocation10 + $0xd8] sm:$0xff]  ;;  %v233_v41 = vld [vmem:[#allocation10 + $0xa8] sm:$0xff]  ;;  %v238_v42 = vld [vmem:[#allocation10 + $0xd0] sm:$0xff] }
  0x95   :  { %310 = vmatprep.subr.mxu0 %v249_v25  ;;  %423 = vmatprep.subr.mxu1 %v251_v28  ;;  %v232_v43 = vld [vmem:[#allocation10 + $0xa0] sm:$0xff]  ;;  %v235_v44 = vld [vmem:[#allocation10 + $0xb8] sm:$0xff]  ;;  %v229_v45 = vld [vmem:[#allocation10 + $0x88] sm:$0xff] }
  0x96   :  { %311 = vmatpush1.msra.mxu0 %v248_v27  ;;  %424 = vmatpush1.msra.mxu1 %v250_v30  ;;  %v234_v46 = vld [vmem:[#allocation10 + $0xb0] sm:$0xff]  ;;  %v228_v47 = vld [vmem:[#allocation10 + $0x80] sm:$0xff]  ;;  %v231_v48 = vld [vmem:[#allocation10 + $0x98] sm:$0xff] }
  0x97   :  { %312 = vmatprep.subr.mxu0 %v245_v29  ;;  %425 = vmatprep.subr.mxu1 %v247_v32  ;;  %v225_v49 = vld [vmem:[#allocation10 + $0x68] sm:$0xff]  ;;  %v230_v50 = vld [vmem:[#allocation10 + $0x90] sm:$0xff]  ;;  %v224_v51 = vld [vmem:[#allocation10 + $0x60] sm:$0xff] }
  0x98   :  { %313 = vmatpush1.msra.mxu0 %v244_v31  ;;  %426 = vmatpush1.msra.mxu1 %v246_v34  ;;  %v227_v52 = vld [vmem:[#allocation10 + $0x78] sm:$0xff]  ;;  %v221_v53 = vld [vmem:[#allocation10 + $0x48] sm:$0xff]  ;;  %v226_v54 = vld [vmem:[#allocation10 + $0x70] sm:$0xff] }
  0x99   :  { %314 = vmatprep.subr.mxu0 %v241_v33  ;;  %427 = vmatprep.subr.mxu1 %v243_v36  ;;  %v220_v55 = vld [vmem:[#allocation10 + $0x40] sm:$0xff]  ;;  %v223_v56 = vld [vmem:[#allocation10 + $0x58] sm:$0xff]  ;;  %v217_v57 = vld [vmem:[#allocation10 + $0x28] sm:$0xff] }
  0x9a   :  { %315 = vmatpush1.msra.mxu0 %v240_v35  ;;  %428 = vmatpush1.msra.mxu1 %v242_v38  ;;  %v222_v58 = vld [vmem:[#allocation10 + $0x50] sm:$0xff]  ;;  %v216_v59 = vld [vmem:[#allocation10 + $0x20] sm:$0xff]  ;;  %v219_v60 = vld [vmem:[#allocation10 + $0x38] sm:$0xff] }
  0x9b   :  { %316 = vmatprep.subr.mxu0 %v237_v37  ;;  %429 = vmatprep.subr.mxu1 %v239_v40  ;;  %v213_v61 = vld [vmem:[#allocation10 + $0x8] sm:$0xff]  ;;  %v218_v62 = vld [vmem:[#allocation10 + $0x30] sm:$0xff]  ;;  %v212_v63 = vld [vmem:[#allocation10] sm:$0xff] }
  0x9c   :  { %317 = vmatpush1.msra.mxu0 %v236_v39  ;;  %430 = vmatpush1.msra.mxu1 %v238_v42  ;;  %v215_v0 = vld [vmem:[#allocation10 + $0x18] sm:$0xff]  ;;  %v204_v2 = vld [vmem:[#allocation5] sm:$0xff]  ;;  %v6678_v3 = vld [vmem:[#allocation12 + $0x1e8] sm:$0xff] }
  0x9d   :  { %318 = vmatprep.subr.mxu0 %v233_v41  ;;  %431 = vmatprep.subr.mxu1 %v235_v44  ;;  %v6680_v4 = vld [vmem:[#allocation12 + $0x1e0] sm:$0xff]  ;;  %v214_v5 = vld [vmem:[#allocation10 + $0x10] sm:$0xff]  ;;  %v6682_v6 = vld [vmem:[#allocation12 + $0x1c8] sm:$0xff] }
  0x9e   :  { %319 = vmatpush1.msra.mxu0 %v232_v43  ;;  %432 = vmatpush1.msra.mxu1 %v234_v46  ;;  %v6685_v7 = vld [vmem:[#allocation12 + $0x1c0] sm:$0xff]  ;;  %v6688_v8 = vld [vmem:[#allocation12 + $0x1f8] sm:$0xff]  ;;  %v205_v9 = vld [vmem:[#allocation5 + $0x8] sm:$0xff] }
  0x9f   :  { %320 = vmatprep.subr.mxu0 %v229_v45  ;;  %433 = vmatprep.subr.mxu1 %v231_v48  ;;  %v6692_v10 = vld [vmem:[#allocation12 + $0x1a8] sm:$0xff]  ;;  %v6694_v11 = vld [vmem:[#allocation12 + $0x1f0] sm:$0xff]  ;;  %v6697_v12 = vld [vmem:[#allocation12 + $0x1a0] sm:$0xff] }
  0xa0   :  { %321 = vmatpush1.msra.mxu0 %v228_v47  ;;  %434 = vmatpush1.msra.mxu1 %v230_v50  ;;  %v6699_v13 = vld [vmem:[#allocation12 + $0x1d8] sm:$0xff]  ;;  %v6702_v14 = vld [vmem:[#allocation12 + $0x188] sm:$0xff]  ;;  %v6706_v15 = vld [vmem:[#allocation12 + $0x1d0] sm:$0xff] }
  0xa1   :  { %322 = vmatprep.subr.mxu0 %v225_v49  ;;  %435 = vmatprep.subr.mxu1 %v227_v52  ;;  %v6710_v16 = vld [vmem:[#allocation12 + $0x180] sm:$0xff]  ;;  %v6714_v17 = vld [vmem:[#allocation12 + $0x1b8] sm:$0xff]  ;;  %v206_v18 = vld [vmem:[#allocation5 + $0x10] sm:$0xff] }
  0xa2   :  { %323 = vmatpush1.msra.mxu0 %v224_v51  ;;  %436 = vmatpush1.msra.mxu1 %v226_v54  ;;  %v6718_v19 = vld [vmem:[#allocation12 + $0x168] sm:$0xff]  ;;  %v6720_v20 = vld [vmem:[#allocation12 + $0x1b0] sm:$0xff]  ;;  %v6723_v21 = vld [vmem:[#allocation12 + $0x160] sm:$0xff] }
  0xa3   :  { %324 = vmatprep.subr.mxu0 %v221_v53  ;;  %437 = vmatprep.subr.mxu1 %v223_v56  ;;  %v6725_v22 = vld [vmem:[#allocation12 + $0x198] sm:$0xff]  ;;  %v6728_v23 = vld [vmem:[#allocation12 + $0x148] sm:$0xff]  ;;  %v6732_v24 = vld [vmem:[#allocation12 + $0x190] sm:$0xff] }
  0xa4   :  { %325 = vmatpush1.msra.mxu0 %v220_v55  ;;  %438 = vmatpush1.msra.mxu1 %v222_v58  ;;  %v6736_v25 = vld [vmem:[#allocation12 + $0x140] sm:$0xff]  ;;  %v6740_v26 = vld [vmem:[#allocation12 + $0x178] sm:$0xff]  ;;  %v6744_v28 = vld [vmem:[#allocation12 + $0x128] sm:$0xff] }
  0xa5   :  { %326 = vmatprep.subr.mxu0 %v217_v57  ;;  %439 = vmatprep.subr.mxu1 %v219_v60  ;;  %10535 = vst [vmem:[#allocation28_spill] sm:$0xff] %v6736_v25  ;;  %v207_v27 = vld [vmem:[#allocation5 + $0x18] sm:$0xff]  ;;  %10536 = vst [vmem:[#allocation29_spill] sm:$0xff] %v6744_v28  ;;  %v6746_v29 = vld [vmem:[#allocation12 + $0x170] sm:$0xff] }
  0xa6   :  { %327 = vmatpush1.msra.mxu0 %v216_v59  ;;  %440 = vmatpush1.msra.mxu1 %v218_v62  ;;  %v6749_v30 = vld [vmem:[#allocation12 + $0x120] sm:$0xff]  ;;  %v6751_v31 = vld [vmem:[#allocation12 + $0x158] sm:$0xff]  ;;  %v6754_v32 = vld [vmem:[#allocation12 + $0x108] sm:$0xff] }
  0xa7   :  { %328 = vmatprep.subr.mxu0 %v213_v61  ;;  %441 = vmatprep.subr.mxu1 %v215_v0  ;;  %10537 = vst [vmem:[#allocation30_spill] sm:$0xff] %v6749_v30  ;;  %10538 = vst [vmem:[#allocation31_spill] sm:$0xff] %v6754_v32  ;;  %v6758_v33 = vld [vmem:[#allocation12 + $0x150] sm:$0xff]  ;;  %v6762_v34 = vld [vmem:[#allocation12 + $0x100] sm:$0xff] }
  0xa8   :  { %329 = vmatpush1.msra.mxu0 %v212_v63  ;;  %442 = vmatpush1.msra.mxu1 %v214_v5  ;;  %10539 = vst [vmem:[#allocation32_spill] sm:$0xff] %v6758_v33  ;;  %10540 = vst [vmem:[#allocation33_spill] sm:$0xff] %v6762_v34  ;;  %v6766_v35 = vld [vmem:[#allocation12 + $0x138] sm:$0xff]  ;;  %v208_v36 = vld [vmem:[#allocation5 + $0x20] sm:$0xff] }
  0xa9   :  { %363 = vmatmul.mubr.f32.vlgmr.msra.gmra.mxu0 %v204_v2  ;;  %1042 = vmatprep.subr.mxu0 %v6678_v3  ;;  %10541 = vst [vmem:[#allocation34_spill] sm:$0xff] %v6766_v35  ;;  %v6770_v37 = vld [vmem:[#allocation12 + $0xe8] sm:$0xff]  ;;  %v6772_v38 = vld [vmem:[#allocation12 + $0x130] sm:$0xff]  ;;  %v6775_v39 = vld [vmem:[#allocation12 + $0xe0] sm:$0xff] }
  0xaa   :  { %1043 = vmatpush1.msra.mxu0 %v6680_v4  ;;  %368 = vmatprep.mubr.f32.mxu0 %v10027_v1  ;;  %10542 = vst [vmem:[#allocation35_spill] sm:$0xff] %v6770_v37  ;;  %10543 = vst [vmem:[#allocation36_spill] sm:$0xff] %v6772_v38  ;;  %v6777_v40 = vld [vmem:[#allocation12 + $0x118] sm:$0xff]  ;;  %v6780_v41 = vld [vmem:[#allocation12 + $0xc8] sm:$0xff] }
  0xab   :  { %1044 = vmatprep.subr.mxu0 %v6682_v6  ;;  %476 = vmatmul.mubr.f32.vlgmr.msra.gmra.mxu1 %v204_v2  ;;  %10544 = vst [vmem:[#allocation37_spill] sm:$0xff] %v6775_v39  ;;  %10545 = vst [vmem:[#allocation38_spill] sm:$0xff] %v6777_v40  ;;  %v6784_v42 = vld [vmem:[#allocation12 + $0x110] sm:$0xff]  ;;  %v6788_v43 = vld [vmem:[#allocation12 + $0xc0] sm:$0xff] }
  0xac   :  { %1045 = vmatpush1.msra.mxu0 %v6685_v7  ;;  %1113 = vmatprep.subr.mxu1 %v6688_v8  ;;  %10546 = vst [vmem:[#allocation39_spill] sm:$0xff] %v6780_v41  ;;  %10547 = vst [vmem:[#allocation40_spill] sm:$0xff] %v6784_v42  ;;  %v6792_v44 = vld [vmem:[#allocation12 + $0xf8] sm:$0xff]  ;;  %v209_v45 = vld [vmem:[#allocation5 + $0x28] sm:$0xff] }
  0xad   :  { %369 = vmatmul.mubr.f32.gmra.mxu0 %v205_v9  ;;  %1046 = vmatprep.subr.mxu0 %v6692_v10  ;;  %10548 = vst [vmem:[#allocation41_spill] sm:$0xff] %v6788_v43  ;;  %10549 = vst [vmem:[#allocation42_spill] sm:$0xff] %v6792_v44  ;;  %v6796_v46 = vld [vmem:[#allocation12 + $0xa8] sm:$0xff]  ;;  %v6798_v47 = vld [vmem:[#allocation12 + $0xf0] sm:$0xff] }
  0xae   :  { %1114 = vmatpush1.msra.mxu1 %v6694_v11  ;;  %1047 = vmatpush1.msra.mxu0 %v6697_v12  ;;  %10550 = vst [vmem:[#allocation43_spill] sm:$0xff] %v6796_v46  ;;  %10551 = vst [vmem:[#allocation44_spill] sm:$0xff] %v6798_v47  ;;  %v6801_v48 = vld [vmem:[#allocation12 + $0xa0] sm:$0xff]  ;;  %v6803_v49 = vld [vmem:[#allocation12 + $0xd8] sm:$0xff] }
  0xaf   :  { %1115 = vmatprep.subr.mxu1 %v6699_v13  ;;  %481 = vmatprep.mubr.f32.mxu1 %v10027_v1  ;;  %10552 = vst [vmem:[#allocation45_spill] sm:$0xff] %v6801_v48  ;;  %10553 = vst [vmem:[#allocation46_spill] sm:$0xff] %v6803_v49  ;;  %v6806_v50 = vld [vmem:[#allocation12 + $0x88] sm:$0xff]  ;;  %v6810_v51 = vld [vmem:[#allocation12 + $0xd0] sm:$0xff] }
  0xb0   :  { %1048 = vmatprep.subr.mxu0 %v6702_v14  ;;  %1116 = vmatpush1.msra.mxu1 %v6706_v15  ;;  %10554 = vst [vmem:[#allocation47_spill] sm:$0xff] %v6806_v50  ;;  %10555 = vst [vmem:[#allocation48_spill] sm:$0xff] %v6810_v51  ;;  %v6814_v52 = vld [vmem:[#allocation12 + $0x80] sm:$0xff]  ;;  %v6818_v53 = vld [vmem:[#allocation12 + $0xb8] sm:$0xff] }
  0xb1   :  { %374 = vmatprep.mubr.f32.mxu0 %v10027_v1  ;;  %482 = vmatmul.mubr.f32.gmra.mxu1 %v205_v9  ;;  %10556 = vst [vmem:[#allocation49_spill] sm:$0xff] %v6814_v52  ;;  %10557 = vst [vmem:[#allocation50_spill] sm:$0xff] %v6818_v53  ;;  %v210_v54 = vld [vmem:[#allocation5 + $0x30] sm:$0xff]  ;;  %v6822_v55 = vld [vmem:[#allocation12 + $0x68] sm:$0xff] }
  0xb2   :  { %1049 = vmatpush1.msra.mxu0 %v6710_v16  ;;  %1117 = vmatprep.subr.mxu1 %v6714_v17  ;;  %10558 = vst [vmem:[#allocation51_spill] sm:$0xff] %v6822_v55  ;;  %v6824_v56 = vld [vmem:[#allocation12 + $0xb0] sm:$0xff]  ;;  %v6827_v57 = vld [vmem:[#allocation12 + $0x60] sm:$0xff]  ;;  %v6829_v58 = vld [vmem:[#allocation12 + $0x98] sm:$0xff] }
  0xb3   :  { %375 = vmatmul.mubr.f32.gmra.mxu0 %v206_v18  ;;  %1050 = vmatprep.subr.mxu0 %v6718_v19  ;;  %10559 = vst [vmem:[#allocation52_spill] sm:$0xff] %v6824_v56  ;;  %10560 = vst [vmem:[#allocation53_spill] sm:$0xff] %v6827_v57  ;;  %v6832_v59 = vld [vmem:[#allocation12 + $0x48] sm:$0xff]  ;;  %v6836_v60 = vld [vmem:[#allocation12 + $0x90] sm:$0xff] }
  0xb4   :  { %1118 = vmatpush1.msra.mxu1 %v6720_v20  ;;  %1051 = vmatpush1.msra.mxu0 %v6723_v21  ;;  %10561 = vst [vmem:[#allocation54_spill] sm:$0xff] %v6829_v58  ;;  %10562 = vst [vmem:[#allocation55_spill] sm:$0xff] %v6832_v59  ;;  %v6840_v61 = vld [vmem:[#allocation12 + $0x40] sm:$0xff]  ;;  %v6844_v62 = vld [vmem:[#allocation12 + $0x78] sm:$0xff] }
  0xb5   :  { %1119 = vmatprep.subr.mxu1 %v6725_v22  ;;  %487 = vmatprep.mubr.f32.mxu1 %v10027_v1  ;;  %10563 = vst [vmem:[#allocation56_spill] sm:$0xff] %v6836_v60  ;;  %10564 = vst [vmem:[#allocation57_spill] sm:$0xff] %v6840_v61  ;;  %v211_v63 = vld [vmem:[#allocation5 + $0x38] sm:$0xff]  ;;  %v6848_v0 = vld [vmem:[#allocation12 + $0x28] sm:$0xff] }
  0xb6   :  { %1052 = vmatprep.subr.mxu0 %v6728_v23  ;;  %1120 = vmatpush1.msra.mxu1 %v6732_v24  ;;  %10565 = vst [vmem:[#allocation58_spill] sm:$0xff] %v6844_v62  ;;  %10566 = vst [vmem:[#allocation59_spill] sm:$0xff] %v6848_v0  ;;  %v6850_v2 = vld [vmem:[#allocation12 + $0x70] sm:$0xff]  ;;  %v6853_v5 = vld [vmem:[#allocation12 + $0x20] sm:$0xff] }
  0xb7   :  { %380 = vmatprep.mubr.f32.mxu0 %v10027_v1  ;;  %488 = vmatmul.mubr.f32.gmra.mxu1 %v206_v18  ;;  %10567 = vst [vmem:[#allocation60_spill] sm:$0xff] %v6850_v2  ;;  %10568 = vst [vmem:[#allocation61_spill] sm:$0xff] %v6853_v5  ;;  %v6855_v9 = vld [vmem:[#allocation12 + $0x58] sm:$0xff]  ;;  %v6858_v18 = vld [vmem:[#allocation12 + $0x8] sm:$0xff] }
  0xb8   :  { %1053 = vmatpush1.msra.mxu0 %v6736_v25  ;;  %1121 = vmatprep.subr.mxu1 %v6740_v26  ;;  %10569 = vst [vmem:[#allocation62_spill] sm:$0xff] %v6855_v9  ;;  %10570 = vst [vmem:[#allocation63_spill] sm:$0xff] %v6858_v18 }
  0xb9   :  { %381 = vmatmul.mubr.f32.gmra.mxu0 %v207_v27  ;;  %1054 = vmatprep.subr.mxu0 %v6744_v28 }
  0xba   :  { %1122 = vmatpush1.msra.mxu1 %v6746_v29  ;;  %1055 = vmatpush1.msra.mxu0 %v6749_v30 }
  0xbb   :  { %1123 = vmatprep.subr.mxu1 %v6751_v31  ;;  %493 = vmatprep.mubr.f32.mxu1 %v10027_v1 }
  0xbc   :  { %1056 = vmatprep.subr.mxu0 %v6754_v32  ;;  %1124 = vmatpush1.msra.mxu1 %v6758_v33 }
  0xbd   :  { %386 = vmatprep.mubr.f32.mxu0 %v10027_v1  ;;  %494 = vmatmul.mubr.f32.gmra.mxu1 %v207_v27  ;;  %v6862_v27 = vld [vmem:[#allocation12 + $0x50] sm:$0xff] }
  0xbe   :  { %1057 = vmatpush1.msra.mxu0 %v6762_v34  ;;  %1125 = vmatprep.subr.mxu1 %v6766_v35  ;;  %10571 = vst [vmem:[#allocation64_spill] sm:$0xff] %v6862_v27 }
  0xbf   :  { %387 = vmatmul.mubr.f32.gmra.mxu0 %v208_v36  ;;  %1058 = vmatprep.subr.mxu0 %v6770_v37 }
  0xc0   :  { %1126 = vmatpush1.msra.mxu1 %v6772_v38  ;;  %1059 = vmatpush1.msra.mxu0 %v6775_v39 }
  0xc1   :  { %1127 = vmatprep.subr.mxu1 %v6777_v40  ;;  %499 = vmatprep.mubr.f32.mxu1 %v10027_v1 }
  0xc2   :  { %1060 = vmatprep.subr.mxu0 %v6780_v41  ;;  %1128 = vmatpush1.msra.mxu1 %v6784_v42 }
  0xc3   :  { %392 = vmatprep.mubr.f32.mxu0 %v10027_v1  ;;  %500 = vmatmul.mubr.f32.gmra.mxu1 %v208_v36  ;;  %v6864_v36 = vld [vmem:[#allocation12] sm:$0xff] }
  0xc4   :  { %1061 = vmatpush1.msra.mxu0 %v6788_v43  ;;  %1129 = vmatprep.subr.mxu1 %v6792_v44  ;;  %10572 = vst [vmem:[#allocation65_spill] sm:$0xff] %v6864_v36 }
  0xc5   :  { %393 = vmatmul.mubr.f32.gmra.mxu0 %v209_v45  ;;  %1062 = vmatprep.subr.mxu0 %v6796_v46 }
  0xc6   :  { %1130 = vmatpush1.msra.mxu1 %v6798_v47  ;;  %1063 = vmatpush1.msra.mxu0 %v6801_v48 }
  0xc7   :  { %1131 = vmatprep.subr.mxu1 %v6803_v49  ;;  %505 = vmatprep.mubr.f32.mxu1 %v10027_v1 }
  0xc8   :  { %1064 = vmatprep.subr.mxu0 %v6806_v50  ;;  %1132 = vmatpush1.msra.mxu1 %v6810_v51 }
  0xc9   :  { %398 = vmatprep.mubr.f32.mxu0 %v10027_v1  ;;  %506 = vmatmul.mubr.f32.gmra.mxu1 %v209_v45  ;;  %v6870_v45 = vld [vmem:[#allocation12 + $0x38] sm:$0xff] }
  0xca   :  { %1065 = vmatpush1.msra.mxu0 %v6814_v52  ;;  %1133 = vmatprep.subr.mxu1 %v6818_v53  ;;  %10573 = vst [vmem:[#allocation66_spill] sm:$0xff] %v6870_v45 }
  0xcb   :  { %399 = vmatmul.mubr.f32.gmra.mxu0 %v210_v54  ;;  %1066 = vmatprep.subr.mxu0 %v6822_v55 }
  0xcc   :  { %1134 = vmatpush1.msra.mxu1 %v6824_v56  ;;  %1067 = vmatpush1.msra.mxu0 %v6827_v57 }
  0xcd   :  { %1135 = vmatprep.subr.mxu1 %v6829_v58  ;;  %511 = vmatprep.mubr.f32.mxu1 %v10027_v1 }
  0xce   :  { %1068 = vmatprep.subr.mxu0 %v6832_v59  ;;  %1136 = vmatpush1.msra.mxu1 %v6836_v60 }
  0xcf   :  { %404 = vmatprep.mubr.f32.mxu0 %v10027_v1  ;;  %512 = vmatmul.mubr.f32.gmra.mxu1 %v210_v54  ;;  %v1040_v54 = vld [vmem:[#allocation7] sm:$0xff] }
  0xd0   :  { %1069 = vmatpush1.msra.mxu0 %v6840_v61  ;;  %1137 = vmatprep.subr.mxu1 %v6844_v62  ;;  %v6877_v61 = vld [vmem:[#allocation12 + $0x18] sm:$0xff] }
  0xd1   :  { %405 = vmatmul.mubr.f32.gmra.mxu0 %v211_v63  ;;  %1070 = vmatprep.subr.mxu0 %v6848_v0  ;;  %v6874_v0 = vld [vmem:[#allocation12 + $0x30] sm:$0xff]  ;;  %10575 = vst [vmem:[#allocation68_spill] sm:$0xff] %v6877_v61 }
  0xd2   :  { %1138 = vmatpush1.msra.mxu1 %v6850_v2  ;;  %1071 = vmatpush1.msra.mxu0 %v6853_v5  ;;  %10574 = vst [vmem:[#allocation67_spill] sm:$0xff] %v6874_v0  ;;  %v6880_v5 = vld [vmem:[#allocation12 + $0x10] sm:$0xff] }
  0xd3   :  { %1139 = vmatprep.subr.mxu1 %v6855_v9  ;;  %517 = vmatprep.mubr.f32.mxu1 %v10027_v1  ;;  %10576 = vst [vmem:[#allocation69_spill] sm:$0xff] %v6880_v5 }
  0xd4   :  { %1072 = vmatprep.subr.mxu0 %v6858_v18  ;;  %1140 = vmatpush1.msra.mxu1 %v6862_v27 }
  0xd5   :  { %1073 = vmatpush1.msra.mxu0 %v6864_v36  ;;  %518 = vmatmul.mubr.f32.gmra.mxu1 %v211_v63  ;;  %v10577_v63 = vld [vmem:[#allocation57_spill] sm:$0xff] }
  0xd6   :  { %1106 = vmatprep.mubr.f32.mxu0 %v10027_v1  ;;  %1141 = vmatprep.subr.mxu1 %v6870_v45 }
  0xd7   :  { %1107 = vmatmul.mubr.f32.vlgmr.msra.gmra.mxu0 %v1040_v54  ;;  %1142 = vmatpush1.msra.mxu1 %v6874_v0 }
  0xd8   :  { %1177 = vmatprep.mubr.f32.mxu1 %v10027_v1  ;;  %1143 = vmatprep.subr.mxu1 %v6877_v61  ;;  %v10579_v1 = vld [vmem:[#allocation61_spill] sm:$0xff] }
  0xd9   :  { %1270 = vmatprep.subr.mxu0 %v6678_v3  ;;  %1144 = vmatpush1.msra.mxu1 %v6880_v5 }
  0xda   :  { %1271 = vmatpush1.msra.mxu0 %v6680_v4  ;;  %1178 = vmatmul.mubr.f32.vlgmr.msra.gmra.mxu1 %v1040_v54  ;;  %v10578_v54 = vld [vmem:[#allocation59_spill] sm:$0xff] }
  0xdb   :  { %1341 = vmatprep.subr.mxu1 %v6688_v8  ;;  %1272 = vmatprep.subr.mxu0 %v6682_v6 }
  0xdc   :  { %1342 = vmatpush1.msra.mxu1 %v6694_v11  ;;  %1273 = vmatpush1.msra.mxu0 %v6685_v7 }
  0xdd   :  { %1343 = vmatprep.subr.mxu1 %v6699_v13  ;;  %1274 = vmatprep.subr.mxu0 %v6692_v10 }
  0xde   :  { %1344 = vmatpush1.msra.mxu1 %v6706_v15  ;;  %1275 = vmatpush1.msra.mxu0 %v6697_v12 }
  0xdf   :  { %1345 = vmatprep.subr.mxu1 %v6714_v17  ;;  %1276 = vmatprep.subr.mxu0 %v6702_v14 }
  0xe0   :  { %1346 = vmatpush1.msra.mxu1 %v6720_v20  ;;  %1277 = vmatpush1.msra.mxu0 %v6710_v16 }
  0xe1   :  { %1347 = vmatprep.subr.mxu1 %v6725_v22  ;;  %1278 = vmatprep.subr.mxu0 %v6718_v19 }
  0xe2   :  { %1348 = vmatpush1.msra.mxu1 %v6732_v24  ;;  %1279 = vmatpush1.msra.mxu0 %v6723_v21 }
  0xe3   :  { %1349 = vmatprep.subr.mxu1 %v6740_v26  ;;  %1280 = vmatprep.subr.mxu0 %v6728_v23 }
  0xe4   :  { %1350 = vmatpush1.msra.mxu1 %v6746_v29  ;;  %1281 = vmatpush1.msra.mxu0 %v6736_v25 }
  0xe5   :  { %1351 = vmatprep.subr.mxu1 %v6751_v31  ;;  %1282 = vmatprep.subr.mxu0 %v6744_v28 }
  0xe6   :  { %1352 = vmatpush1.msra.mxu1 %v6758_v33  ;;  %1283 = vmatpush1.msra.mxu0 %v6749_v30 }
  0xe7   :  { %1353 = vmatprep.subr.mxu1 %v6766_v35  ;;  %1284 = vmatprep.subr.mxu0 %v6754_v32 }
  0xe8   :  { %1354 = vmatpush1.msra.mxu1 %v6772_v38  ;;  %1285 = vmatpush1.msra.mxu0 %v6762_v34 }
  0xe9   :  { %1355 = vmatprep.subr.mxu1 %v6777_v40  ;;  %1286 = vmatprep.subr.mxu0 %v6770_v37  ;;  %v524_v37 = vld [vmem:[#allocation15] sm:$0xf] }
  0xea   :  { %1356 = vmatpush1.msra.mxu1 %v6784_v42  ;;  %1287 = vmatpush1.msra.mxu0 %v6775_v39 }
  0xeb   :  { %1357 = vmatprep.subr.mxu1 %v6792_v44  ;;  %1288 = vmatprep.subr.mxu0 %v6780_v41 }
  0xec   :  { %1358 = vmatpush1.msra.mxu1 %v6798_v47  ;;  %1289 = vmatpush1.msra.mxu0 %v6788_v43 }
  0xed   :  { %1359 = vmatprep.subr.mxu1 %v6803_v49  ;;  %1290 = vmatprep.subr.mxu0 %v6796_v46 }
  0xee   :  { %1360 = vmatpush1.msra.mxu1 %v6810_v51  ;;  %1291 = vmatpush1.msra.mxu0 %v6801_v48 }
  0xef   :  { %1361 = vmatprep.subr.mxu1 %v6818_v53  ;;  %1292 = vmatprep.subr.mxu0 %v6806_v50 }
  0xf0   :  { %1362 = vmatpush1.msra.mxu1 %v6824_v56  ;;  %1293 = vmatpush1.msra.mxu0 %v6814_v52 }
  0xf1   :  { %1363 = vmatprep.subr.mxu1 %v6829_v58  ;;  %1294 = vmatprep.subr.mxu0 %v6822_v55 }
  0xf2   :  { %1364 = vmatpush1.msra.mxu1 %v6836_v60  ;;  %1295 = vmatpush1.msra.mxu0 %v6827_v57 }
  0xf3   :  { %1365 = vmatprep.subr.mxu1 %v6844_v62  ;;  %1296 = vmatprep.subr.mxu0 %v6832_v59  ;;  %v10580_v59 = vmov 0.0  }
  0xf4   :  { %1366 = vmatpush1.msra.mxu1 %v6850_v2  ;;  %1297 = vmatpush1.msra.mxu0 %v10577_v63 }
  0xf5   :  { %1367 = vmatprep.subr.mxu1 %v6855_v9  ;;  %1298 = vmatprep.subr.mxu0 %v10578_v54 }
  0xf6   :  { %1368 = vmatpush1.msra.mxu1 %v6862_v27  ;;  %1299 = vmatpush1.msra.mxu0 %v10579_v1 }
  0xf7   :  { %1369 = vmatprep.subr.mxu1 %v6870_v45  ;;  %1300 = vmatprep.subr.mxu0 %v6858_v18  ;;  %v278_v45 = vlaneseq }
  0xf8   :  { %1370 = vmatpush1.msra.mxu1 %v6874_v0  ;;  %1301 = vmatpush1.msra.mxu0 %v6864_v36 }
  0xf9   :  { %1371 = vmatprep.subr.mxu1 %v6877_v61  ;;  %1334 = vmatprep.mubr.f32.mxu0 %v10580_v59  ;;  %v279_v1 = vshrl.u32 %v278_v45, 7  ;;  %v276_v61 = vld [vmem:[%s10009_s5] sm:$0xf] }
  0xfa   :  { %1372 = vmatpush1.msra.mxu1 %v6880_v5  ;;  %1405 = vmatprep.mubr.f32.mxu1 %v10580_v59 }
  0xfb   :  { %1500 = vmatprep.subr.mxu0 %v6678_v3  ;;  %1571 = vmatprep.subr.mxu1 %v6688_v8  ;;  %v6954_v54 = vsub.s32 0, %v279_v1  ;;  %v6959_v18 = vsub.s32 1, %v279_v1  ;;  %v6961_v36 = vsub.s32 2, %v279_v1  ;;  %v6966_v59 = vsub.s32 3, %v279_v1 }
  0xfd   :  { %10581 = vst [vmem:[#allocation70_spill] sm:$0xff] %v6954_v54  ;;  %10582 = vst [vmem:[#allocation71_spill] sm:$0xff] %v6959_v18  ;;  %v6964_v5 = vrot.slane %v276_v61, %v6954_v54  ;;  %v6969_v3 = vrot.slane %v276_v61, %v6959_v18  ;;  %v6972_v45 = vrot.slane %v276_v61, %v6961_v36 }
  0xfe   :  { %10583 = vst [vmem:[#allocation72_spill] sm:$0xff] %v6961_v36  ;;  %10584 = vst [vmem:[#allocation73_spill] sm:$0xff] %v6966_v59  ;;  %v6978_v63 = vrot.slane %v276_v61, %v6966_v59 }
 0x169   :  { %v364_v8 = vpop.f32.mrf.mxu0 }
 0x16a   :  { %v6975_v0 = vadd.f32 %v364_v8, %v6964_v5 }
 0x16b   :  { %v366_v27 = vpop.f32.mrf.mxu0  ;;  %v477_v2 = vpop.f32.mrf.mxu1 }
 0x16c   :  { %v6981_v9 = vadd.f32 %v366_v27, %v6969_v3  ;;  %v6984_v1 = vadd.f32 %v477_v2, %v6972_v45  ;;  %v574_v62 = vmul.f32 %v6975_v0, %v6975_v0 }
 0x16d   :  { %v370_v57 = vpop.f32.mrf.mxu0  ;;  %v479_v60 = vpop.f32.mrf.mxu1 }
 0x16e   :  { %v575_v55 = vmul.f32 %v6981_v9, %v6981_v9  ;;  %v6991_v8 = vadd.f32 %v370_v57, %v6964_v5  ;;  %v526_v61 = vadd.f32 %v6981_v9, %v6975_v0  ;;  %v6996_v27 = vadd.f32 %v479_v60, %v6978_v63 }
 0x16f   :  { %v372_v52 = vpop.f32.mrf.mxu0  ;;  %v576_v2 = vmul.f32 %v6984_v1, %v6984_v1 }
 0x170   :  { %v7001_v58 = vadd.f32 %v372_v52, %v6969_v3  ;;  %v527_v50 = vadd.f32 %v526_v61, %v6984_v1  ;;  %v606_v56 = vadd.f32 %v575_v55, %v574_v62  ;;  %v577_v53 = vmul.f32 %v6996_v27, %v6996_v27 }
 0x171   :  { %v483_v48 = vpop.f32.mrf.mxu1 }
 0x172   :  { %v528_v57 = vadd.f32 %v527_v50, %v6996_v27  ;;  %v607_v46 = vadd.f32 %v606_v56, %v576_v2  ;;  %v7008_v60 = vadd.f32 %v483_v48, %v6972_v45 }
 0x173   :  { %v376_v51 = vpop.f32.mrf.mxu0  ;;  %v485_v49 = vpop.f32.mrf.mxu1 }
 0x174   :  { %v7011_v43 = vadd.f32 %v376_v51, %v6964_v5  ;;  %529 = vadd.xlane.f32.xlu0 %v528_v57  ;;  %v608_v52 = vadd.f32 %v607_v46, %v577_v53  ;;  %v7014_v61 = vadd.f32 %v485_v49, %v6978_v63 }
 0x175   :  { %v378_v55 = vpop.f32.mrf.mxu0 }
 0x176   :  { %10585 = vst [vmem:[#allocation74_spill] sm:$0xff] %v7011_v43  ;;  %v7017_v50 = vadd.f32 %v378_v55, %v6969_v3  ;;  %609 = vadd.xlane.f32.xlu1 %v608_v52 }
 0x177   :  { %v489_v62 = vpop.f32.mrf.mxu1 }
 0x178   :  { %10586 = vst [vmem:[#allocation75_spill] sm:$0xff] %v7017_v50  ;;  %v7020_v56 = vadd.f32 %v489_v62, %v6972_v45  ;;  %v960_v50 = vld [vmem:[#allocation13] sm:$0xf] }
 0x179   :  { %v382_v48 = vpop.f32.mrf.mxu0  ;;  %v491_v51 = vpop.f32.mrf.mxu1 }
 0x17a   :  { %10587 = vst [vmem:[#allocation76_spill] sm:$0xff] %v7020_v56  ;;  %v7023_v2 = vadd.f32 %v382_v48, %v6964_v5  ;;  %v7026_v57 = vadd.f32 %v491_v51, %v6978_v63 }
 0x17b   :  { %v384_v46 = vpop.f32.mrf.mxu0 }
 0x17c   :  { %10588 = vst [vmem:[#allocation77_spill] sm:$0xff] %v7023_v2  ;;  %10589 = vst [vmem:[#allocation78_spill] sm:$0xff] %v7026_v57  ;;  %v7029_v49 = vadd.f32 %v384_v46, %v6969_v3 }
 0x17d   :  { %v495_v53 = vpop.f32.mrf.mxu1 }
 0x17e   :  { %10590 = vst [vmem:[#allocation79_spill] sm:$0xff] %v7029_v49  ;;  %v7032_v55 = vadd.f32 %v495_v53, %v6972_v45 }
 0x17f   :  { %v388_v52 = vpop.f32.mrf.mxu0  ;;  %v497_v56 = vpop.f32.mrf.mxu1 }
 0x180   :  { %10591 = vst [vmem:[#allocation80_spill] sm:$0xff] %v7032_v55  ;;  %v7035_v62 = vadd.f32 %v388_v52, %v6964_v5  ;;  %v7038_v48 = vadd.f32 %v497_v56, %v6978_v63 }
 0x181   :  { %v390_v2 = vpop.f32.mrf.mxu0 }
 0x182   :  { %10592 = vst [vmem:[#allocation81_spill] sm:$0xff] %v7035_v62  ;;  %10593 = vst [vmem:[#allocation82_spill] sm:$0xff] %v7038_v48  ;;  %v7041_v51 = vadd.f32 %v390_v2, %v6969_v3 }
 0x183   :  { %v501_v57 = vpop.f32.mrf.mxu1 }
 0x184   :  { %10594 = vst [vmem:[#allocation83_spill] sm:$0xff] %v7041_v51  ;;  %v7044_v46 = vadd.f32 %v501_v57, %v6972_v45 }
 0x185   :  { %v394_v49 = vpop.f32.mrf.mxu0  ;;  %v503_v55 = vpop.f32.mrf.mxu1 }
 0x186   :  { %10595 = vst [vmem:[#allocation84_spill] sm:$0xff] %v7044_v46  ;;  %v7047_v53 = vadd.f32 %v394_v49, %v6964_v5  ;;  %v7050_v52 = vadd.f32 %v503_v55, %v6978_v63 }
 0x187   :  { %v396_v62 = vpop.f32.mrf.mxu0 }
 0x188   :  { %10596 = vst [vmem:[#allocation85_spill] sm:$0xff] %v7047_v53  ;;  %10597 = vst [vmem:[#allocation86_spill] sm:$0xff] %v7050_v52  ;;  %v7053_v56 = vadd.f32 %v396_v62, %v6969_v3 }
 0x189   :  { %v507_v48 = vpop.f32.mrf.mxu1 }
 0x18a   :  { %10598 = vst [vmem:[#allocation87_spill] sm:$0xff] %v7053_v56  ;;  %v7056_v2 = vadd.f32 %v507_v48, %v6972_v45 }
 0x18b   :  { %v400_v51 = vpop.f32.mrf.mxu0  ;;  %v509_v46 = vpop.f32.mrf.mxu1 }
 0x18c   :  { %10599 = vst [vmem:[#allocation88_spill] sm:$0xff] %v7056_v2  ;;  %v7059_v57 = vadd.f32 %v400_v51, %v6964_v5  ;;  %v7062_v49 = vadd.f32 %v509_v46, %v6978_v63 }
 0x18d   :  { %v402_v53 = vpop.f32.mrf.mxu0 }
 0x18e   :  { %10600 = vst [vmem:[#allocation89_spill] sm:$0xff] %v7059_v57  ;;  %10601 = vst [vmem:[#allocation90_spill] sm:$0xff] %v7062_v49  ;;  %v7065_v55 = vadd.f32 %v402_v53, %v6969_v3  ;;  %v7080_v53 = vrot.slane %v960_v50, %v6954_v54 }
 0x18f   :  { %v513_v52 = vpop.f32.mrf.mxu1 }
 0x190   :  { %10602 = vst [vmem:[#allocation91_spill] sm:$0xff] %v7065_v55  ;;  %v7068_v62 = vadd.f32 %v513_v52, %v6972_v45  ;;  %10607 = vst [vmem:[#allocation96_spill] sm:$0xff] %v7080_v53  ;;  %v7083_v52 = vrot.slane %v960_v50, %v6959_v18 }
 0x191   :  { %v406_v56 = vpop.f32.mrf.mxu0  ;;  %v515_v2 = vpop.f32.mrf.mxu1 }
 0x192   :  { %10603 = vst [vmem:[#allocation92_spill] sm:$0xff] %v7068_v62  ;;  %v7071_v48 = vadd.f32 %v406_v56, %v6964_v5  ;;  %v7074_v51 = vadd.f32 %v515_v2, %v6978_v63  ;;  %10608 = vst [vmem:[#allocation97_spill] sm:$0xff] %v7083_v52 }
 0x193   :  { %v408_v57 = vpop.f32.mrf.mxu0 }
 0x194   :  { %10604 = vst [vmem:[#allocation93_spill] sm:$0xff] %v7071_v48  ;;  %10605 = vst [vmem:[#allocation94_spill] sm:$0xff] %v7074_v51  ;;  %v7077_v46 = vadd.f32 %v408_v57, %v6969_v3  ;;  %v7092_v48 = vrot.slane %v960_v50, %v6961_v36  ;;  %v7101_v51 = vrot.slane %v960_v50, %v6966_v59 }
 0x195   :  { %v519_v55 = vpop.f32.mrf.mxu1 }
 0x196   :  { %10606 = vst [vmem:[#allocation95_spill] sm:$0xff] %v7077_v46  ;;  %v7086_v62 = vadd.f32 %v519_v55, %v6972_v45  ;;  %10610 = vst [vmem:[#allocation99_spill] sm:$0xff] %v7092_v48 }
 0x197   :  { %v1108_v5 = vpop.f32.mrf.mxu0  ;;  %v521_v2 = vpop.f32.mrf.mxu1  ;;  %10612 = vst [vmem:[#allocation101_spill] sm:$0xff] %v7101_v51 }
 0x198   :  { %10609 = vst [vmem:[#allocation98_spill] sm:$0xff] %v7086_v62  ;;  %v7089_v56 = vadd.f32 %v1108_v5, %v7080_v53  ;;  %v7095_v3 = vadd.f32 %v521_v2, %v6978_v63 }
 0x199   :  { %v1110_v57 = vpop.f32.mrf.mxu0 }
 0x19a   :  { %10611 = vst [vmem:[#allocation100_spill] sm:$0xff] %v7095_v3  ;;  %v7098_v46 = vadd.f32 %v1110_v57, %v7083_v52  ;;  %v1179_v45 = vpop.f32.mrf.mxu1  ;;  %v1190_v55 = vmul.f32 %v7089_v56, %v7089_v56 }
 0x19b   :  { %v7110_v63 = vadd.f32 %v1179_v45, %v7092_v48 }
 0x19c   :  { %v1184_v5 = vadd.f32 %v7098_v46, %v7089_v56  ;;  %v1191_v62 = vmul.f32 %v7098_v46, %v7098_v46  ;;  %v1181_v2 = vpop.f32.mrf.mxu1 }
 0x19d   :  { %v1192_v57 = vmul.f32 %v7110_v63, %v7110_v63  ;;  %v7115_v50 = vadd.f32 %v1181_v2, %v7101_v51 }
 0x19e   :  { %v1185_v3 = vadd.f32 %v1184_v5, %v7110_v63  ;;  %v1194_v49 = vadd.f32 %v1191_v62, %v1190_v55 }
 0x19f   :  { %v1193_v52 = vmul.f32 %v7115_v50, %v7115_v50 }
 0x1a0   :  { %v1186_v43 = vadd.f32 %v1185_v3, %v7115_v50  ;;  %v1195_v53 = vadd.f32 %v1194_v49, %v1192_v57 }
 0x1a2   :  { %1187 = vadd.xlane.f32.xlu0 %v1186_v43  ;;  %v1196_v41 = vadd.f32 %v1195_v53, %v1193_v52 }
 0x1a4   :  { %1197 = vadd.xlane.f32.xlu1 %v1196_v41 }
 0x1fd   :  { %v530_v45 = vpop.xlane.xlu0 %529 }
 0x1fe   :  { %v7121_v48 = vmul.f32 0.0078125, %v530_v45 }
 0x1ff   :  { %v610_v47 = vpop.xlane.xlu1 %609 }
 0x200   :  { %v646_v39 = vmul.f32 0.0078125, %v610_v47  ;;  %v654_v2 = vmul.f32 %v7121_v48, %v7121_v48  ;;  %v680_v3 = vsub.f32 %v6984_v1, %v7121_v48  ;;  %v525_v1 = vld [vmem:[%s10012_s8] sm:$0xf] }
 0x202   :  { %v662_v51 = vsub.f32 %v646_v39, %v654_v2  ;;  %v678_v39 = vsub.f32 %v6975_v0, %v7121_v48  ;;  %v982_v2 = vld [vmem:[#allocation16] sm:$0xf]  ;;  %v7144_v0 = vrot.slane %v525_v1, %v6959_v18 }
 0x203   :  { %v7165_v34 = vrot.slane %v982_v2, %v6961_v36 }
 0x204   :  { %v670_v5 = vmax.f32 %v662_v51, 0.0  ;;  %v679_v51 = vsub.f32 %v6981_v9, %v7121_v48  ;;  %v7147_v9 = vrot.slane %v524_v37, %v6961_v36 }
 0x206   :  { %v710_v62 = vadd.f32 1e-05, %v670_v5  ;;  %v1004_v5 = vld [vmem:[#allocation18] sm:$0xf]  ;;  %10613 = vst [vmem:[#allocation102_spill] sm:$0xff] %v7147_v9 }
 0x207   :  { %v7173_v30 = vrot.slane %v1004_v5, %v6961_v36 }
 0x208   :  { %5654 = vrsqrt.f32 %v710_v62 }
 0x215   :  { %v5655_v55 = vpop.eup %5654 }
 0x216   :  { %v728_v49 = vmul.f32 %v5655_v55, %v680_v3  ;;  %v726_v62 = vmul.f32 %v5655_v55, %v678_v39  ;;  %v727_v3 = vmul.f32 %v5655_v55, %v679_v51 }
 0x22b   :  { %v1188_v43 = vpop.xlane.xlu0 %1187 }
 0x22c   :  { %v1189_v53 = vmul.f32 0.0078125, %v1188_v43  ;;  %v7135_v43 = vrot.slane %v524_v37, %v6954_v54 }
 0x22d   :  { %v1198_v41 = vpop.xlane.xlu1 %1197 }
 0x22e   :  { %v1199_v52 = vmul.f32 0.0078125, %v1198_v41  ;;  %v1200_v57 = vmul.f32 %v1189_v53, %v1189_v53  ;;  %v7141_v41 = vrot.slane %v525_v1, %v6954_v54  ;;  %v1203_v39 = vsub.f32 %v7089_v56, %v1189_v53 }
 0x22f   :  { %v1204_v51 = vsub.f32 %v7098_v46, %v1189_v53  ;;  %v1205_v42 = vsub.f32 %v7110_v63, %v1189_v53  ;;  %v779_v32 = vmul.f32 %v7135_v43, %v726_v62  ;;  %v781_v46 = vmul.f32 %v7147_v9, %v728_v49 }
 0x230   :  { %v1201_v45 = vsub.f32 %v1199_v52, %v1200_v57  ;;  %v7150_v52 = vrot.slane %v982_v2, %v6954_v54  ;;  %v7153_v57 = vrot.slane %v982_v2, %v6959_v18 }
 0x231   :  { %v832_v62 = vadd.f32 %v7141_v41, %v779_v32  ;;  %v7189_v32 = vrot.slane %v982_v2, %v6966_v59 }
 0x232   :  { %v1202_v44 = vmax.f32 %v1201_v45, 0.0  ;;  %10614 = vst [vmem:[#allocation103_spill] sm:$0xff] %v7153_v57  ;;  %v7156_v45 = vrot.slane %v1004_v5, %v6954_v54  ;;  %v7170_v54 = vrot.slane %v1004_v5, %v6959_v18 }
 0x234   :  { %v1207_v47 = vadd.f32 1e-05, %v1202_v44  ;;  %v7138_v44 = vrot.slane %v524_v37, %v6959_v18 }
 0x236   :  { %5656 = vrsqrt.f32 %v1207_v47  ;;  %v7159_v47 = vrot.slane %v525_v1, %v6961_v36  ;;  %v780_v38 = vmul.f32 %v7138_v44, %v727_v3 }
 0x238   :  { %v833_v3 = vadd.f32 %v7144_v0, %v780_v38 }
 0x243   :  { %v5657_v40 = vpop.eup %5656 }
 0x244   :  { %v1209_v35 = vmul.f32 %v5657_v40, %v1203_v39  ;;  %v1210_v56 = vmul.f32 %v5657_v40, %v1204_v51  ;;  %v1211_v28 = vmul.f32 %v5657_v40, %v1205_v42  ;;  %v834_v39 = vadd.f32 %v7159_v47, %v781_v46 }
 0x245   :  { %v7192_v46 = vrot.slane %v524_v37, %v6966_v59 }
 0x246   :  { %v1213_v63 = vmul.f32 %v1209_v35, %v7150_v52  ;;  %v1214_v33 = vmul.f32 %v1210_v56, %v7153_v57  ;;  %v1215_v25 = vmul.f32 %v1211_v28, %v7165_v34  ;;  %v1206_v35 = vsub.f32 %v7115_v50, %v1189_v53 }
 0x247   :  { %v681_v28 = vsub.f32 %v6996_v27, %v7121_v48  ;;  %v7200_v50 = vrot.slane %v525_v1, %v6966_v59  ;;  %v579_v1 = vmul.f32 %v7001_v58, %v7001_v58 }
 0x248   :  { %v1217_v18 = vadd.f32 %v1213_v63, %v7156_v45  ;;  %v1218_v36 = vadd.f32 %v1214_v33, %v7170_v54  ;;  %v1219_v51 = vadd.f32 %v1215_v25, %v7173_v30  ;;  %v1212_v38 = vmul.f32 %v5657_v40, %v1206_v35 }
 0x249   :  { %v729_v33 = vmul.f32 %v5655_v55, %v681_v28  ;;  %v7195_v25 = vrot.slane %v1004_v5, %v6966_v59  ;;  %v7466_v59 = vld [vmem:[#allocation12 + $0x110] sm:$0xff] }
 0x24a   :  { %v1225_v49 = vadd.f32 %v1217_v18, %v832_v62  ;;  %v1226_v42 = vadd.f32 %v1218_v36, %v833_v3  ;;  %v1227_v9 = vadd.f32 %v1219_v51, %v834_v39  ;;  %v1216_v18 = vmul.f32 %v1212_v38, %v7189_v32 }
 0x24b   :  { %v782_v36 = vmul.f32 %v7192_v46, %v729_v33  ;;  %v531_v62 = vadd.f32 %v7001_v58, %v6991_v8  ;;  %v578_v51 = vmul.f32 %v6991_v8, %v6991_v8 }
 0x24c   :  { %v5580_v56 = vmul.f32 -1.442695, %v1225_v49  ;;  %v5581_v57 = vmul.f32 -1.442695, %v1226_v42  ;;  %v1220_v27 = vadd.f32 %v1216_v18, %v7195_v25  ;;  %v580_v42 = vmul.f32 %v7008_v60, %v7008_v60 }
 0x24d   :  { %v835_v40 = vadd.f32 %v7200_v50, %v782_v36  ;;  %v611_v28 = vadd.f32 %v579_v1, %v578_v51  ;;  %v581_v36 = vmul.f32 %v7014_v61, %v7014_v61 }
 0x24e   :  { %5658 = vpow2.f32 %v5580_v56  ;;  %v532_v56 = vadd.f32 %v531_v62, %v7008_v60 }
 0x24f   :  { %5660 = vpow2.f32 %v5581_v57  ;;  %v1228_v48 = vadd.f32 %v1220_v27, %v835_v40  ;;  %v1041_v57 = vld [vmem:[#allocation9] sm:$0xff]  ;;  %v612_v18 = vadd.f32 %v611_v28, %v580_v42 }
 0x250   :  { %v533_v33 = vadd.f32 %v532_v56, %v7014_v61 }
 0x251   :  { %5662 = vtanh.f32 %v1228_v48  ;;  %v613_v27 = vadd.f32 %v612_v18, %v581_v36  ;;  %v7226_v18 = vld [vmem:[#allocation19] ss:$0 sm:$0xff]  ;;  %v7228_v36 = vld [vmem:[#allocation21] ss:$0 sm:$0xff] }
 0x25b   :  { %v5659_v55 = vpop.eup %5658 }
 0x25c   :  { %v5661_v53 = vpop.eup %5660  ;;  %v1232_v37 = vadd.f32 1.0, %v5659_v55 }
 0x25d   :  { %v1238_v2 = vadd.f32 1.0, %v5661_v53 }
 0x25e   :  { %5664 = vrcp.f32 %v1232_v37  ;;  %v5663_v5 = vpop.eup %5662 }
 0x25f   :  { %5666 = vrcp.f32 %v1238_v2 }
 0x26b   :  { %v5665_v63 = vpop.eup %5664 }
 0x26c   :  { %v5667_v3 = vpop.eup %5666  ;;  %v1249_v39 = vmul.f32 %v5665_v63, %v5663_v5  ;;  %v5582_v63 = vmul.f32 -1.442695, %v1227_v9 }
 0x26d   :  { %v1248_v49 = vmul.f32 %v5667_v3, %v1041_v57 }
 0x26e   :  { %5668 = vpow2.f32 %v5582_v63 }
 0x26f   :  { %v7212_v35 = vadd.f32 %v1249_v39, %v1248_v49 }
 0x271   :  { %1251 = vadd.xlane.f32.xlu0 %v7212_v35  ;;  %v1254_v38 = vmul.f32 %v7212_v35, %v7212_v35 }
 0x273   :  { %1255 = vadd.xlane.f32.xlu1 %v1254_v38 }
 0x275   :  { %534 = vadd.xlane.f32.xlu0 %v533_v33 }
 0x279   :  { %614 = vadd.xlane.f32.xlu0 %v613_v27 }
 0x27b   :  { %v5669_v28 = vpop.eup %5668 }
 0x27c   :  { %v1244_v27 = vadd.f32 1.0, %v5669_v28  ;;  %v10645_v28 = vld [vmem:[#allocation60_spill] sm:$0xff] }
 0x2fa   :  { %v1252_v40 = vpop.xlane.xlu0 %1251 }
 0x2fb   :  { %v1253_v48 = vmul.f32 0.03125, %v1252_v40 }
 0x2fc   :  { %v1256_v55 = vpop.xlane.xlu1 %1255 }
 0x2fd   :  { %v1258_v53 = vmul.f32 %v1253_v48, %v1253_v48  ;;  %v1257_v37 = vmul.f32 0.03125, %v1256_v55  ;;  %v1261_v38 = vsub.f32 %v7212_v35, %v1253_v48 }
 0x2fe   :  { %v535_v2 = vpop.xlane.xlu0 %534 }
 0x2ff   :  { %v1259_v5 = vsub.f32 %v1257_v37, %v1258_v53  ;;  %v7221_v57 = vmul.f32 0.0078125, %v535_v2 }
 0x301   :  { %v1260_v62 = vmax.f32 %v1259_v5, 0.0  ;;  %v655_v39 = vmul.f32 %v7221_v57, %v7221_v57  ;;  %v684_v37 = vsub.f32 %v7008_v60, %v7221_v57  ;;  %v10636_v60 = vld [vmem:[#allocation45_spill] sm:$0xff] }
 0x302   :  { %v615_v1 = vpop.xlane.xlu0 %614 }
 0x303   :  { %v1262_v3 = vadd.f32 1e-05, %v1260_v62  ;;  %v647_v51 = vmul.f32 0.0078125, %v615_v1  ;;  %v10637_v62 = vld [vmem:[#allocation52_spill] sm:$0xff]  ;;  %v10638_v1 = vld [vmem:[#allocation47_spill] sm:$0xff] }
 0x305   :  { %5670 = vrsqrt.f32 %v1262_v3  ;;  %v663_v49 = vsub.f32 %v647_v51, %v655_v39  ;;  %v10639_v3 = vld [vmem:[#allocation54_spill] sm:$0xff]  ;;  %v10640_v39 = vld [vmem:[#allocation49_spill] sm:$0xff]  ;;  %v10641_v51 = vld [vmem:[#allocation56_spill] sm:$0xff] }
 0x307   :  { %v671_v42 = vmax.f32 %v663_v49, 0.0  ;;  %v10642_v49 = vld [vmem:[#allocation51_spill] sm:$0xff] }
 0x309   :  { %v711_v56 = vadd.f32 1e-05, %v671_v42  ;;  %v10643_v42 = vld [vmem:[#allocation58_spill] sm:$0xff] }
 0x30b   :  { %5672 = vrsqrt.f32 %v711_v56  ;;  %v10644_v56 = vld [vmem:[#allocation53_spill] sm:$0xff] }
 0x30c   :  { %5674 = vrcp.f32 %v1244_v27  ;;  %v10649_v27 = vld [vmem:[#allocation64_spill] sm:$0xff] }
 0x312   :  { %v5671_v33 = vpop.eup %5670 }
 0x313   :  { %v1264_v9 = vmul.f32 %v5671_v33, %v1261_v38  ;;  %v10646_v38 = vld [vmem:[#allocation55_spill] sm:$0xff]  ;;  %v10647_v33 = vld [vmem:[#allocation62_spill] sm:$0xff] }
 0x315   :  { %v1265_v40 = vmul.f32 %v7226_v18, %v1264_v9  ;;  %v10648_v9 = vld [vmem:[#allocation57_spill] sm:$0xff] }
 0x317   :  { %v1266_v55 = vadd.f32 %v7228_v36, %v1265_v40  ;;  %v10650_v40 = vld [vmem:[#allocation59_spill] sm:$0xff] }
 0x318   :  { %v7232_v53 = vpop.eup %5672 }
 0x319   :  { %5676 = vtanh.f32 %v1266_v55  ;;  %v7237_v48 = vmul.f32 %v7232_v53, %v684_v37  ;;  %v5675_v2 = vpop.eup %5674  ;;  %v10651_v55 = vld [vmem:[#allocation66_spill] sm:$0xff]  ;;  %v10652_v37 = vld [vmem:[#allocation61_spill] sm:$0xff] }
 0x326   :  { %v5677_v5 = vpop.eup %5676 }
 0x327   :  { %v7239_v63 = vmul.f32 %v5677_v5, %v5675_v2  ;;  %v10653_v2 = vld [vmem:[#allocation67_spill] sm:$0xff] }
 0x328   :  { %v10654_v5 = vld [vmem:[#allocation63_spill] sm:$0xff] }
 0x329   :  { %10615 = vst [vmem:[#allocation104_spill] sm:$0xff] %v7239_v63  ;;  %1335 = vmatmul.mubr.f32.vlgmr.msra.gmra.mxu0 %v7239_v63  ;;  %1406 = vmatmul.mubr.f32.vlgmr.msra.gmra.mxu1 %v7239_v63  ;;  %v7472_v63 = vld [vmem:[#allocation12 + $0xf8] sm:$0xff] }
 0x32a   :  { %1501 = vmatpush1.msra.mxu0 %v6680_v4  ;;  %1572 = vmatpush1.msra.mxu1 %v6694_v11  ;;  %v10616_v4 = vld [vmem:[#allocation28_spill] sm:$0xff]  ;;  %v10620_v11 = vld [vmem:[#allocation30_spill] sm:$0xff] }
 0x32b   :  { %1502 = vmatprep.subr.mxu0 %v6682_v6  ;;  %1573 = vmatprep.subr.mxu1 %v6699_v13  ;;  %v10617_v6 = vld [vmem:[#allocation32_spill] sm:$0xff]  ;;  %v10622_v13 = vld [vmem:[#allocation31_spill] sm:$0xff] }
 0x32c   :  { %1503 = vmatpush1.msra.mxu0 %v6685_v7  ;;  %1574 = vmatpush1.msra.mxu1 %v6706_v15  ;;  %v10618_v7 = vld [vmem:[#allocation29_spill] sm:$0xff] }
 0x32d   :  { %1504 = vmatprep.subr.mxu0 %v6692_v10  ;;  %1575 = vmatprep.subr.mxu1 %v6714_v17  ;;  %v10619_v10 = vld [vmem:[#allocation34_spill] sm:$0xff]  ;;  %v10624_v15 = vld [vmem:[#allocation33_spill] sm:$0xff]  ;;  %v10626_v17 = vld [vmem:[#allocation35_spill] sm:$0xff] }
 0x32e   :  { %1505 = vmatpush1.msra.mxu0 %v6697_v12  ;;  %1576 = vmatpush1.msra.mxu1 %v6720_v20  ;;  %v10621_v12 = vld [vmem:[#allocation36_spill] sm:$0xff]  ;;  %v10628_v20 = vld [vmem:[#allocation37_spill] sm:$0xff] }
 0x32f   :  { %1506 = vmatprep.subr.mxu0 %v6702_v14  ;;  %1577 = vmatprep.subr.mxu1 %v6725_v22  ;;  %v10623_v14 = vld [vmem:[#allocation38_spill] sm:$0xff]  ;;  %v10630_v22 = vld [vmem:[#allocation39_spill] sm:$0xff] }
 0x330   :  { %1507 = vmatpush1.msra.mxu0 %v6710_v16  ;;  %1578 = vmatpush1.msra.mxu1 %v6732_v24  ;;  %v10625_v16 = vld [vmem:[#allocation40_spill] sm:$0xff]  ;;  %v10632_v24 = vld [vmem:[#allocation41_spill] sm:$0xff] }
 0x331   :  { %1508 = vmatprep.subr.mxu0 %v6718_v19  ;;  %1579 = vmatprep.subr.mxu1 %v6740_v26  ;;  %v10627_v19 = vld [vmem:[#allocation42_spill] sm:$0xff]  ;;  %v10633_v26 = vld [vmem:[#allocation48_spill] sm:$0xff] }
 0x332   :  { %1509 = vmatpush1.msra.mxu0 %v6723_v21  ;;  %1580 = vmatpush1.msra.mxu1 %v6746_v29  ;;  %v10629_v21 = vld [vmem:[#allocation44_spill] sm:$0xff]  ;;  %v10634_v29 = vld [vmem:[#allocation43_spill] sm:$0xff]  ;;  %10686 = vst [vmem:[#allocation48_spill] sm:$0xff] %v7466_v59 }
 0x333   :  { %1510 = vmatprep.subr.mxu0 %v6728_v23  ;;  %1581 = vmatprep.subr.mxu1 %v6751_v31  ;;  %v10631_v23 = vld [vmem:[#allocation46_spill] sm:$0xff] }
 0x334   :  { %1511 = vmatpush1.msra.mxu0 %v10616_v4  ;;  %1582 = vmatpush1.msra.mxu1 %v10617_v6  ;;  %v10635_v31 = vld [vmem:[#allocation50_spill] sm:$0xff]  ;;  %v10655_v4 = vld [vmem:[#allocation68_spill] sm:$0xff]  ;;  %v10656_v6 = vld [vmem:[#allocation65_spill] sm:$0xff] }
 0x335   :  { %1512 = vmatprep.subr.mxu0 %v10618_v7  ;;  %1583 = vmatprep.subr.mxu1 %v10619_v10  ;;  %v10657_v7 = vmov 0.0   ;;  %v10658_v10 = vld [vmem:[#allocation69_spill] sm:$0xff]  ;;  %10688 = vst [vmem:[#allocation50_spill] sm:$0xff] %v7472_v63 }
 0x336   :  { %1513 = vmatpush1.msra.mxu0 %v10620_v11  ;;  %1584 = vmatpush1.msra.mxu1 %v10621_v12  ;;  %v7307_v11 = vld [vmem:[#allocation12 + $0x1e8] sm:$0xff]  ;;  %v7310_v12 = vld [vmem:[#allocation12 + $0x1f8] sm:$0xff] }
 0x337   :  { %1514 = vmatprep.subr.mxu0 %v10622_v13  ;;  %1585 = vmatprep.subr.mxu1 %v10623_v14  ;;  %10659 = vst [vmem:[#allocation28_spill] sm:$0xff] %v7307_v11  ;;  %10660 = vst [vmem:[#allocation32_spill] sm:$0xff] %v7310_v12 }
 0x338   :  { %1515 = vmatpush1.msra.mxu0 %v10624_v15  ;;  %1586 = vmatpush1.msra.mxu1 %v10625_v16  ;;  %v10661_v15 = vld [vmem:[#allocation96_spill] sm:$0xff] }
 0x339   :  { %1516 = vmatprep.subr.mxu0 %v10626_v17  ;;  %1587 = vmatprep.subr.mxu1 %v10627_v19  ;;  %v10662_v19 = vld [vmem:[#allocation99_spill] sm:$0xff] }
 0x33a   :  { %1517 = vmatpush1.msra.mxu0 %v10628_v20  ;;  %1588 = vmatpush1.msra.mxu1 %v10629_v21  ;;  %v10663_v21 = vld [vmem:[#allocation97_spill] sm:$0xff] }
 0x33b   :  { %1518 = vmatprep.subr.mxu0 %v10630_v22  ;;  %1589 = vmatprep.subr.mxu1 %v10631_v23 }
 0x33c   :  { %1519 = vmatpush1.msra.mxu0 %v10632_v24  ;;  %1590 = vmatpush1.msra.mxu1 %v10633_v26 }
 0x33d   :  { %1520 = vmatprep.subr.mxu0 %v10634_v29  ;;  %1591 = vmatprep.subr.mxu1 %v10635_v31 }
 0x33e   :  { %1521 = vmatpush1.msra.mxu0 %v10636_v60  ;;  %1592 = vmatpush1.msra.mxu1 %v10637_v62  ;;  %v10664_v60 = vld [vmem:[#allocation101_spill] sm:$0xff] }
 0x33f   :  { %1522 = vmatprep.subr.mxu0 %v10638_v1  ;;  %1593 = vmatprep.subr.mxu1 %v10639_v3 }
 0x340   :  { %1523 = vmatpush1.msra.mxu0 %v10640_v39  ;;  %1594 = vmatpush1.msra.mxu1 %v10641_v51 }
 0x341   :  { %1524 = vmatprep.subr.mxu0 %v10642_v49  ;;  %1595 = vmatprep.subr.mxu1 %v10643_v42 }
 0x342   :  { %1525 = vmatpush1.msra.mxu0 %v10644_v56  ;;  %1596 = vmatpush1.msra.mxu1 %v10645_v28 }
 0x343   :  { %1526 = vmatprep.subr.mxu0 %v10646_v38  ;;  %1597 = vmatprep.subr.mxu1 %v10647_v33 }
 0x344   :  { %1527 = vmatpush1.msra.mxu0 %v10648_v9  ;;  %1598 = vmatpush1.msra.mxu1 %v10649_v27 }
 0x345   :  { %1528 = vmatprep.subr.mxu0 %v10650_v40  ;;  %1599 = vmatprep.subr.mxu1 %v10651_v55 }
 0x346   :  { %1529 = vmatpush1.msra.mxu0 %v10652_v37  ;;  %1600 = vmatpush1.msra.mxu1 %v10653_v2  ;;  %v682_v37 = vsub.f32 %v6991_v8, %v7221_v57  ;;  %v683_v2 = vsub.f32 %v7001_v58, %v7221_v57 }
 0x347   :  { %1530 = vmatprep.subr.mxu0 %v10654_v5  ;;  %1601 = vmatprep.subr.mxu1 %v10655_v4 }
 0x348   :  { %1531 = vmatpush1.msra.mxu0 %v10656_v6  ;;  %1564 = vmatprep.mubr.f32.mxu0 %v10657_v7  ;;  %v730_v5 = vmul.f32 %v7232_v53, %v682_v37  ;;  %v731_v4 = vmul.f32 %v7232_v53, %v683_v2 }
 0x349   :  { %1602 = vmatpush1.msra.mxu1 %v10658_v10  ;;  %1635 = vmatprep.mubr.f32.mxu1 %v10657_v7 }
 0x34a   :  { %1730 = vmatprep.subr.mxu0 %v7307_v11  ;;  %1801 = vmatprep.subr.mxu1 %v7310_v12 }
 0x3e9   :  { %v1336_v13 = vpop.f32.mrf.mxu0  ;;  %v1407_v14 = vpop.f32.mrf.mxu1 }
 0x3ea   :  { %v1337_v16 = vadd.f32 %v1336_v13, %v10661_v15  ;;  %v1408_v20 = vadd.f32 %v1407_v14, %v10662_v19 }
 0x3eb   :  { %v1338_v17 = vpop.f32.mrf.mxu0  ;;  %v1409_v23 = vpop.f32.mrf.mxu1 }
 0x3ec   :  { %v1339_v22 = vadd.f32 %v1338_v17, %v10663_v21  ;;  %v1418_v24 = vmul.f32 %v1337_v16, %v1337_v16  ;;  %v1420_v31 = vmul.f32 %v1408_v20, %v1408_v20  ;;  %v1410_v62 = vadd.f32 %v1409_v23, %v10664_v60 }
 0x3ed   :  { %v783_v17 = vmul.f32 %v7135_v43, %v730_v5  ;;  %v784_v23 = vmul.f32 %v7138_v44, %v731_v4 }
 0x3ee   :  { %v1412_v26 = vadd.f32 %v1339_v22, %v1337_v16  ;;  %v1419_v29 = vmul.f32 %v1339_v22, %v1339_v22  ;;  %v1421_v49 = vmul.f32 %v1410_v62, %v1410_v62 }
 0x3f0   :  { %v1413_v1 = vadd.f32 %v1412_v26, %v1408_v20  ;;  %v1422_v3 = vadd.f32 %v1419_v29, %v1418_v24  ;;  %v10665_v29 = vld [vmem:[#allocation102_spill] sm:$0xff] }
 0x3f1   :  { %v785_v8 = vmul.f32 %v10665_v29, %v7237_v48 }
 0x3f2   :  { %v1414_v39 = vadd.f32 %v1413_v1, %v1410_v62  ;;  %v1423_v51 = vadd.f32 %v1422_v3, %v1420_v31  ;;  %v10666_v1 = vld [vmem:[#allocation103_spill] sm:$0xff] }
 0x3f4   :  { %1415 = vadd.xlane.f32.xlu1 %v1414_v39  ;;  %v1424_v42 = vadd.f32 %v1423_v51, %v1421_v49  ;;  %v838_v49 = vadd.f32 %v7159_v47, %v785_v8 }
 0x3f8   :  { %1425 = vadd.xlane.f32.xlu1 %v1424_v42 }
 0x47d   :  { %v1416_v56 = vpop.xlane.xlu1 %1415 }
 0x47e   :  { %v1417_v28 = vmul.f32 0.0078125, %v1416_v56 }
 0x480   :  { %v1428_v33 = vmul.f32 %v1417_v28, %v1417_v28  ;;  %v1431_v6 = vsub.f32 %v1337_v16, %v1417_v28  ;;  %v1432_v10 = vsub.f32 %v1339_v22, %v1417_v28  ;;  %v1433_v13 = vsub.f32 %v1408_v20, %v1417_v28 }
 0x481   :  { %v1426_v38 = vpop.xlane.xlu1 %1425  ;;  %v836_v16 = vadd.f32 %v7141_v41, %v783_v17  ;;  %v837_v20 = vadd.f32 %v7144_v0, %v784_v23 }
 0x482   :  { %v1427_v9 = vmul.f32 0.0078125, %v1426_v38 }
 0x484   :  { %v1429_v27 = vsub.f32 %v1427_v9, %v1428_v33  ;;  %v1434_v33 = vsub.f32 %v1410_v62, %v1417_v28 }
 0x486   :  { %v1430_v40 = vmax.f32 %v1429_v27, 0.0 }
 0x488   :  { %v1435_v55 = vadd.f32 1e-05, %v1430_v40  ;;  %v685_v40 = vsub.f32 %v7014_v61, %v7221_v57 }
 0x48a   :  { %5678 = vrsqrt.f32 %v1435_v55  ;;  %v733_v37 = vmul.f32 %v7232_v53, %v685_v40  ;;  %v10667_v53 = vld [vmem:[#allocation74_spill] sm:$0xff] }
 0x48c   :  { %v786_v5 = vmul.f32 %v7192_v46, %v733_v37 }
 0x497   :  { %v5679_v14 = vpop.eup %5678 }
 0x498   :  { %v1437_v24 = vmul.f32 %v5679_v14, %v1431_v6  ;;  %v1438_v26 = vmul.f32 %v5679_v14, %v1432_v10  ;;  %v1439_v31 = vmul.f32 %v5679_v14, %v1433_v13  ;;  %v1440_v55 = vmul.f32 %v5679_v14, %v1434_v33  ;;  %v10668_v14 = vld [vmem:[#allocation75_spill] sm:$0xff] }
 0x499   :  { %v839_v6 = vadd.f32 %v7200_v50, %v786_v5  ;;  %v536_v23 = vadd.f32 %v10668_v14, %v10667_v53 }
 0x49a   :  { %v1441_v58 = vmul.f32 %v1437_v24, %v7150_v52  ;;  %v1442_v3 = vmul.f32 %v1438_v26, %v10666_v1  ;;  %v1443_v39 = vmul.f32 %v1439_v31, %v7165_v34  ;;  %v1444_v2 = vmul.f32 %v1440_v55, %v7189_v32 }
 0x49b   :  { %v583_v24 = vmul.f32 %v10668_v14, %v10668_v14  ;;  %v582_v31 = vmul.f32 %v10667_v53, %v10667_v53 }
 0x49c   :  { %v1445_v22 = vadd.f32 %v1441_v58, %v7156_v45  ;;  %v1446_v51 = vadd.f32 %v1442_v3, %v7170_v54  ;;  %v1447_v42 = vadd.f32 %v1443_v39, %v7173_v30  ;;  %v1448_v4 = vadd.f32 %v1444_v2, %v7195_v25  ;;  %v10669_v3 = vld [vmem:[#allocation76_spill] sm:$0xff] }
 0x49d   :  { %v584_v39 = vmul.f32 %v10669_v3, %v10669_v3 }
 0x49e   :  { %v1454_v48 = vadd.f32 %v1445_v22, %v836_v16  ;;  %v1455_v56 = vadd.f32 %v1446_v51, %v837_v20  ;;  %v1456_v38 = vadd.f32 %v1447_v42, %v838_v49  ;;  %v1457_v10 = vadd.f32 %v1448_v4, %v839_v6  ;;  %v10670_v49 = vld [vmem:[#allocation78_spill] sm:$0xff] }
 0x49f   :  { %v537_v20 = vadd.f32 %v536_v23, %v10669_v3  ;;  %v616_v22 = vadd.f32 %v583_v24, %v582_v31 }
 0x4a0   :  { %v5583_v9 = vmul.f32 -1.442695, %v1454_v48  ;;  %v5584_v27 = vmul.f32 -1.442695, %v1455_v56  ;;  %v5585_v4 = vmul.f32 -1.442695, %v1456_v38 }
 0x4a1   :  { %v538_v42 = vadd.f32 %v537_v20, %v10670_v49  ;;  %v617_v48 = vadd.f32 %v616_v22, %v584_v39 }
 0x4a2   :  { %5680 = vpow2.f32 %v5583_v9 }
 0x4a3   :  { %5682 = vpow2.f32 %v5584_v27 }
 0x4a4   :  { %5684 = vtanh.f32 %v1457_v10 }
 0x4af   :  { %v5681_v62 = vpop.eup %5680 }
 0x4b0   :  { %v5683_v28 = vpop.eup %5682  ;;  %v1461_v13 = vadd.f32 1.0, %v5681_v62 }
 0x4b1   :  { %v1467_v17 = vadd.f32 1.0, %v5683_v28  ;;  %v5685_v61 = vpop.eup %5684 }
 0x4b2   :  { %5686 = vrcp.f32 %v1461_v13 }
 0x4b3   :  { %5688 = vrcp.f32 %v1467_v17 }
 0x4b4   :  { %5690 = vpow2.f32 %v5585_v4  ;;  %v7409_v4 = vld [vmem:[#allocation12 + $0x188] sm:$0xff] }
 0x4bf   :  { %v5687_v57 = vpop.eup %5686 }
 0x4c0   :  { %v5689_v26 = vpop.eup %5688  ;;  %v1478_v8 = vmul.f32 %v5687_v57, %v5685_v61 }
 0x4c1   :  { %v1477_v58 = vmul.f32 %v5689_v26, %v7212_v35  ;;  %v585_v35 = vmul.f32 %v10670_v49, %v10670_v49  ;;  %v5691_v23 = vpop.eup %5690 }
 0x4c2   :  { %v1473_v31 = vadd.f32 1.0, %v5691_v23  ;;  %v7436_v23 = vld [vmem:[#allocation12 + $0x158] sm:$0xff] }
 0x4c3   :  { %v7352_v16 = vadd.f32 %v1478_v8, %v1477_v58  ;;  %v618_v56 = vadd.f32 %v617_v48, %v585_v35  ;;  %v7379_v35 = vld [vmem:[#allocation12 + $0x1e0] sm:$0xff]  ;;  %10676 = vst [vmem:[#allocation38_spill] sm:$0xff] %v7436_v23 }
 0x4c5   :  { %1480 = vadd.xlane.f32.xlu0 %v7352_v16  ;;  %v1483_v51 = vmul.f32 %v7352_v16, %v7352_v16 }
 0x4c7   :  { %1484 = vadd.xlane.f32.xlu1 %v1483_v51 }
 0x4c9   :  { %539 = vadd.xlane.f32.xlu0 %v538_v42 }
 0x4cd   :  { %619 = vadd.xlane.f32.xlu0 %v618_v56  ;;  %v7382_v56 = vld [vmem:[#allocation12 + $0x1f0] sm:$0xff] }
 0x54e   :  { %v1481_v33 = vpop.xlane.xlu0 %1480 }
 0x54f   :  { %v1482_v9 = vmul.f32 0.03125, %v1481_v33  ;;  %v7388_v33 = vld [vmem:[#allocation12 + $0x1d8] sm:$0xff] }
 0x550   :  { %v1485_v27 = vpop.xlane.xlu1 %1484 }
 0x551   :  { %v1487_v40 = vmul.f32 %v1482_v9, %v1482_v9  ;;  %v1486_v55 = vmul.f32 0.03125, %v1485_v27  ;;  %v1490_v24 = vsub.f32 %v7352_v16, %v1482_v9  ;;  %v7391_v9 = vld [vmem:[#allocation12 + $0x1c0] sm:$0xff]  ;;  %v7394_v27 = vld [vmem:[#allocation12 + $0x1d0] sm:$0xff] }
 0x552   :  { %v540_v37 = vpop.xlane.xlu0 %539 }
 0x553   :  { %v1488_v2 = vsub.f32 %v1486_v55, %v1487_v40  ;;  %v7361_v5 = vmul.f32 0.0078125, %v540_v37  ;;  %v7397_v40 = vld [vmem:[#allocation12 + $0x1a8] sm:$0xff]  ;;  %v7400_v55 = vld [vmem:[#allocation12 + $0x1b8] sm:$0xff]  ;;  %v7403_v37 = vld [vmem:[#allocation12 + $0x1a0] sm:$0xff] }
 0x555   :  { %v1489_v6 = vmax.f32 %v1488_v2, 0.0  ;;  %v656_v28 = vmul.f32 %v7361_v5, %v7361_v5  ;;  %v688_v20 = vsub.f32 %v10669_v3, %v7361_v5  ;;  %v7385_v3 = vld [vmem:[#allocation12 + $0x1c8] sm:$0xff]  ;;  %v7406_v2 = vld [vmem:[#allocation12 + $0x1b0] sm:$0xff] }
 0x556   :  { %v620_v10 = vpop.xlane.xlu0 %619 }
 0x557   :  { %v1491_v62 = vadd.f32 1e-05, %v1489_v6  ;;  %v648_v13 = vmul.f32 0.0078125, %v620_v10  ;;  %v7412_v6 = vld [vmem:[#allocation12 + $0x198] sm:$0xff]  ;;  %v7415_v10 = vld [vmem:[#allocation12 + $0x180] sm:$0xff] }
 0x559   :  { %5692 = vrsqrt.f32 %v1491_v62  ;;  %v664_v17 = vsub.f32 %v648_v13, %v656_v28  ;;  %v7418_v62 = vld [vmem:[#allocation12 + $0x190] sm:$0xff]  ;;  %v7421_v28 = vld [vmem:[#allocation12 + $0x168] sm:$0xff]  ;;  %v7424_v13 = vld [vmem:[#allocation12 + $0x178] sm:$0xff] }
 0x55a   :  { %10672 = vst [vmem:[#allocation34_spill] sm:$0xff] %v7424_v13 }
 0x55b   :  { %v672_v61 = vmax.f32 %v664_v17, 0.0  ;;  %v7427_v17 = vld [vmem:[#allocation12 + $0x160] sm:$0xff] }
 0x55c   :  { %10673 = vst [vmem:[#allocation30_spill] sm:$0xff] %v7427_v17 }
 0x55d   :  { %v712_v57 = vadd.f32 1e-05, %v672_v61  ;;  %v7430_v61 = vld [vmem:[#allocation12 + $0x170] sm:$0xff] }
 0x55e   :  { %10674 = vst [vmem:[#allocation36_spill] sm:$0xff] %v7430_v61 }
 0x55f   :  { %5694 = vrsqrt.f32 %v712_v57  ;;  %v7433_v57 = vld [vmem:[#allocation12 + $0x148] sm:$0xff] }
 0x560   :  { %5696 = vrcp.f32 %v1473_v31  ;;  %10675 = vst [vmem:[#allocation31_spill] sm:$0xff] %v7433_v57  ;;  %v7448_v31 = vld [vmem:[#allocation12 + $0x138] sm:$0xff] }
 0x561   :  { %10680 = vst [vmem:[#allocation42_spill] sm:$0xff] %v7448_v31 }
 0x566   :  { %v5693_v26 = vpop.eup %5692 }
 0x567   :  { %v1493_v8 = vmul.f32 %v5693_v26, %v1490_v24  ;;  %v7439_v24 = vld [vmem:[#allocation12 + $0x140] sm:$0xff]  ;;  %v7442_v26 = vld [vmem:[#allocation12 + $0x150] sm:$0xff] }
 0x568   :  { %10677 = vst [vmem:[#allocation33_spill] sm:$0xff] %v7439_v24  ;;  %10678 = vst [vmem:[#allocation40_spill] sm:$0xff] %v7442_v26 }
 0x569   :  { %v1494_v38 = vmul.f32 %v7226_v18, %v1493_v8  ;;  %v7445_v8 = vld [vmem:[#allocation12 + $0x128] sm:$0xff] }
 0x56a   :  { %10679 = vst [vmem:[#allocation35_spill] sm:$0xff] %v7445_v8 }
 0x56b   :  { %v1495_v58 = vadd.f32 %v7228_v36, %v1494_v38  ;;  %v7451_v38 = vld [vmem:[#allocation12 + $0x120] sm:$0xff] }
 0x56c   :  { %v7368_v39 = vpop.eup %5694  ;;  %10681 = vst [vmem:[#allocation37_spill] sm:$0xff] %v7451_v38 }
 0x56d   :  { %5698 = vtanh.f32 %v1495_v58  ;;  %v7373_v22 = vmul.f32 %v7368_v39, %v688_v20  ;;  %v5697_v51 = vpop.eup %5696  ;;  %v7454_v58 = vld [vmem:[#allocation12 + $0x130] sm:$0xff]  ;;  %v7457_v20 = vld [vmem:[#allocation12 + $0x108] sm:$0xff] }
 0x56e   :  { %10682 = vst [vmem:[#allocation44_spill] sm:$0xff] %v7454_v58  ;;  %10683 = vst [vmem:[#allocation39_spill] sm:$0xff] %v7457_v20 }
 0x57a   :  { %v5699_v42 = vpop.eup %5698 }
 0x57b   :  { %v7375_v48 = vmul.f32 %v5699_v42, %v5697_v51  ;;  %v7460_v51 = vld [vmem:[#allocation12 + $0x118] sm:$0xff]  ;;  %v7463_v42 = vld [vmem:[#allocation12 + $0x100] sm:$0xff] }
 0x57c   :  { %10684 = vst [vmem:[#allocation46_spill] sm:$0xff] %v7460_v51  ;;  %10685 = vst [vmem:[#allocation41_spill] sm:$0xff] %v7463_v42 }
 0x57d   :  { %10671 = vst [vmem:[#allocation29_spill] sm:$0xff] %v7375_v48  ;;  %1565 = vmatmul.mubr.f32.vlgmr.msra.gmra.mxu0 %v7375_v48  ;;  %1636 = vmatmul.mubr.f32.vlgmr.msra.gmra.mxu1 %v7375_v48  ;;  %v7469_v48 = vld [vmem:[#allocation12 + $0xe8] sm:$0xff] }
 0x57e   :  { %1731 = vmatpush1.msra.mxu0 %v7379_v35  ;;  %1802 = vmatpush1.msra.mxu1 %v7382_v56  ;;  %10687 = vst [vmem:[#allocation43_spill] sm:$0xff] %v7469_v48 }
 0x57f   :  { %1732 = vmatprep.subr.mxu0 %v7385_v3  ;;  %1803 = vmatprep.subr.mxu1 %v7388_v33 }
 0x580   :  { %1733 = vmatpush1.msra.mxu0 %v7391_v9  ;;  %1804 = vmatpush1.msra.mxu1 %v7394_v27 }
 0x581   :  { %1734 = vmatprep.subr.mxu0 %v7397_v40  ;;  %1805 = vmatprep.subr.mxu1 %v7400_v55 }
 0x582   :  { %1735 = vmatpush1.msra.mxu0 %v7403_v37  ;;  %1806 = vmatpush1.msra.mxu1 %v7406_v2 }
 0x583   :  { %1736 = vmatprep.subr.mxu0 %v7409_v4  ;;  %1807 = vmatprep.subr.mxu1 %v7412_v6 }
 0x584   :  { %1737 = vmatpush1.msra.mxu0 %v7415_v10  ;;  %1808 = vmatpush1.msra.mxu1 %v7418_v62 }
 0x585   :  { %1738 = vmatprep.subr.mxu0 %v7421_v28  ;;  %1809 = vmatprep.subr.mxu1 %v7424_v13 }
 0x586   :  { %1739 = vmatpush1.msra.mxu0 %v7427_v17  ;;  %1810 = vmatpush1.msra.mxu1 %v7430_v61 }
 0x587   :  { %1740 = vmatprep.subr.mxu0 %v7433_v57  ;;  %1811 = vmatprep.subr.mxu1 %v7436_v23 }
 0x588   :  { %1741 = vmatpush1.msra.mxu0 %v7439_v24  ;;  %1812 = vmatpush1.msra.mxu1 %v7442_v26 }
 0x589   :  { %1742 = vmatprep.subr.mxu0 %v7445_v8  ;;  %1813 = vmatprep.subr.mxu1 %v7448_v31 }
 0x58a   :  { %1743 = vmatpush1.msra.mxu0 %v7451_v38  ;;  %1814 = vmatpush1.msra.mxu1 %v7454_v58 }
 0x58b   :  { %1744 = vmatprep.subr.mxu0 %v7457_v20  ;;  %1815 = vmatprep.subr.mxu1 %v7460_v51  ;;  %v7475_v20 = vld [vmem:[#allocation12 + $0xe0] sm:$0xff]  ;;  %v7478_v51 = vld [vmem:[#allocation12 + $0xf0] sm:$0xff] }
 0x58c   :  { %1745 = vmatpush1.msra.mxu0 %v7463_v42  ;;  %1816 = vmatpush1.msra.mxu1 %v7466_v59  ;;  %10689 = vst [vmem:[#allocation45_spill] sm:$0xff] %v7475_v20  ;;  %10690 = vst [vmem:[#allocation52_spill] sm:$0xff] %v7478_v51  ;;  %v7481_v42 = vld [vmem:[#allocation12 + $0xc8] sm:$0xff]  ;;  %v7484_v59 = vld [vmem:[#allocation12 + $0xd8] sm:$0xff] }
 0x58d   :  { %1746 = vmatprep.subr.mxu0 %v7469_v48  ;;  %1817 = vmatprep.subr.mxu1 %v7472_v63  ;;  %10691 = vst [vmem:[#allocation47_spill] sm:$0xff] %v7481_v42  ;;  %10692 = vst [vmem:[#allocation54_spill] sm:$0xff] %v7484_v59  ;;  %v7487_v48 = vld [vmem:[#allocation12 + $0xc0] sm:$0xff]  ;;  %v7490_v63 = vld [vmem:[#allocation12 + $0xd0] sm:$0xff] }
 0x58e   :  { %1747 = vmatpush1.msra.mxu0 %v7475_v20  ;;  %1818 = vmatpush1.msra.mxu1 %v7478_v51  ;;  %10693 = vst [vmem:[#allocation49_spill] sm:$0xff] %v7487_v48  ;;  %10694 = vst [vmem:[#allocation56_spill] sm:$0xff] %v7490_v63  ;;  %v7493_v20 = vld [vmem:[#allocation12 + $0xa8] sm:$0xff]  ;;  %v7496_v51 = vld [vmem:[#allocation12 + $0xb8] sm:$0xff] }
 0x58f   :  { %1748 = vmatprep.subr.mxu0 %v7481_v42  ;;  %1819 = vmatprep.subr.mxu1 %v7484_v59  ;;  %10695 = vst [vmem:[#allocation51_spill] sm:$0xff] %v7493_v20  ;;  %10696 = vst [vmem:[#allocation58_spill] sm:$0xff] %v7496_v51  ;;  %v7499_v42 = vld [vmem:[#allocation12 + $0xa0] sm:$0xff]  ;;  %v7502_v59 = vld [vmem:[#allocation12 + $0xb0] sm:$0xff] }
 0x590   :  { %1749 = vmatpush1.msra.mxu0 %v7487_v48  ;;  %1820 = vmatpush1.msra.mxu1 %v7490_v63  ;;  %10697 = vst [vmem:[#allocation53_spill] sm:$0xff] %v7499_v42  ;;  %10698 = vst [vmem:[#allocation60_spill] sm:$0xff] %v7502_v59  ;;  %v7505_v48 = vld [vmem:[#allocation12 + $0x88] sm:$0xff]  ;;  %v7508_v63 = vld [vmem:[#allocation12 + $0x98] sm:$0xff] }
 0x591   :  { %1750 = vmatprep.subr.mxu0 %v7493_v20  ;;  %1821 = vmatprep.subr.mxu1 %v7496_v51  ;;  %10699 = vst [vmem:[#allocation55_spill] sm:$0xff] %v7505_v48  ;;  %10700 = vst [vmem:[#allocation62_spill] sm:$0xff] %v7508_v63  ;;  %v7511_v20 = vld [vmem:[#allocation12 + $0x80] sm:$0xff]  ;;  %v7514_v51 = vld [vmem:[#allocation12 + $0x90] sm:$0xff] }
 0x592   :  { %1751 = vmatpush1.msra.mxu0 %v7499_v42  ;;  %1822 = vmatpush1.msra.mxu1 %v7502_v59  ;;  %10701 = vst [vmem:[#allocation57_spill] sm:$0xff] %v7511_v20  ;;  %10702 = vst [vmem:[#allocation64_spill] sm:$0xff] %v7514_v51  ;;  %v7517_v42 = vld [vmem:[#allocation12 + $0x68] sm:$0xff]  ;;  %v7520_v59 = vld [vmem:[#allocation12 + $0x78] sm:$0xff] }
 0x593   :  { %1752 = vmatprep.subr.mxu0 %v7505_v48  ;;  %1823 = vmatprep.subr.mxu1 %v7508_v63  ;;  %10703 = vst [vmem:[#allocation59_spill] sm:$0xff] %v7517_v42  ;;  %10704 = vst [vmem:[#allocation66_spill] sm:$0xff] %v7520_v59  ;;  %v7523_v48 = vld [vmem:[#allocation12 + $0x60] sm:$0xff]  ;;  %v7526_v63 = vld [vmem:[#allocation12 + $0x70] sm:$0xff] }
 0x594   :  { %1753 = vmatpush1.msra.mxu0 %v7511_v20  ;;  %1824 = vmatpush1.msra.mxu1 %v7514_v51  ;;  %10705 = vst [vmem:[#allocation61_spill] sm:$0xff] %v7523_v48  ;;  %10706 = vst [vmem:[#allocation67_spill] sm:$0xff] %v7526_v63  ;;  %v7529_v20 = vld [vmem:[#allocation12 + $0x48] sm:$0xff]  ;;  %v7532_v51 = vld [vmem:[#allocation12 + $0x58] sm:$0xff] }
 0x595   :  { %1754 = vmatprep.subr.mxu0 %v7517_v42  ;;  %1825 = vmatprep.subr.mxu1 %v7520_v59  ;;  %10707 = vst [vmem:[#allocation63_spill] sm:$0xff] %v7529_v20  ;;  %10708 = vst [vmem:[#allocation68_spill] sm:$0xff] %v7532_v51  ;;  %v7535_v42 = vld [vmem:[#allocation12 + $0x40] sm:$0xff]  ;;  %v7538_v59 = vld [vmem:[#allocation12 + $0x50] sm:$0xff] }
 0x596   :  { %1755 = vmatpush1.msra.mxu0 %v7523_v48  ;;  %1826 = vmatpush1.msra.mxu1 %v7526_v63  ;;  %10709 = vst [vmem:[#allocation65_spill] sm:$0xff] %v7535_v42  ;;  %10710 = vst [vmem:[#allocation69_spill] sm:$0xff] %v7538_v59  ;;  %v7541_v48 = vld [vmem:[#allocation12 + $0x28] sm:$0xff]  ;;  %v7544_v63 = vld [vmem:[#allocation12 + $0x38] sm:$0xff] }
 0x597   :  { %1756 = vmatprep.subr.mxu0 %v7529_v20  ;;  %1827 = vmatprep.subr.mxu1 %v7532_v51  ;;  %10711 = vst [vmem:[#allocation101_spill] sm:$0xff] %v7541_v48  ;;  %10712 = vst [vmem:[#allocation102_spill] sm:$0xff] %v7544_v63  ;;  %v7547_v20 = vld [vmem:[#allocation12 + $0x20] sm:$0xff]  ;;  %v7550_v51 = vld [vmem:[#allocation12 + $0x30] sm:$0xff] }
 0x598   :  { %1757 = vmatpush1.msra.mxu0 %v7535_v42  ;;  %1828 = vmatpush1.msra.mxu1 %v7538_v59  ;;  %10713 = vst [vmem:[#allocation103_spill] sm:$0xff] %v7547_v20  ;;  %10714 = vst [vmem:[#allocation74_spill] sm:$0xff] %v7550_v51  ;;  %v7553_v42 = vld [vmem:[#allocation12 + $0x8] sm:$0xff]  ;;  %v7556_v59 = vld [vmem:[#allocation12 + $0x18] sm:$0xff] }
 0x599   :  { %1758 = vmatprep.subr.mxu0 %v7541_v48  ;;  %1829 = vmatprep.subr.mxu1 %v7544_v63  ;;  %10715 = vst [vmem:[#allocation75_spill] sm:$0xff] %v7553_v42  ;;  %10716 = vst [vmem:[#allocation76_spill] sm:$0xff] %v7556_v59  ;;  %v7559_v48 = vld [vmem:[#allocation12] sm:$0xff]  ;;  %v7563_v63 = vld [vmem:[#allocation12 + $0x10] sm:$0xff] }
 0x59a   :  { %1759 = vmatpush1.msra.mxu0 %v7547_v20  ;;  %1830 = vmatpush1.msra.mxu1 %v7550_v51  ;;  %10717 = vst [vmem:[#allocation78_spill] sm:$0xff] %v7559_v48  ;;  %10718 = vst [vmem:[#allocation105_spill] sm:$0xff] %v7563_v63 }
 0x59b   :  { %1760 = vmatprep.subr.mxu0 %v7553_v42  ;;  %1831 = vmatprep.subr.mxu1 %v7556_v59 }
 0x59c   :  { %1761 = vmatpush1.msra.mxu0 %v7559_v48  ;;  %1794 = vmatprep.mubr.f32.mxu0 %v10657_v7 }
 0x59d   :  { %1832 = vmatpush1.msra.mxu1 %v7563_v63  ;;  %1865 = vmatprep.mubr.f32.mxu1 %v10657_v7 }
 0x59e   :  { %1960 = vmatprep.subr.mxu0 %v7307_v11  ;;  %2031 = vmatprep.subr.mxu1 %v7310_v12 }
 0x63d   :  { %v1566_v42 = vpop.f32.mrf.mxu0  ;;  %v1637_v51 = vpop.f32.mrf.mxu1 }
 0x63e   :  { %v1567_v59 = vadd.f32 %v1566_v42, %v10661_v15  ;;  %v1638_v58 = vadd.f32 %v1637_v51, %v10662_v19 }
 0x63f   :  { %v1568_v20 = vpop.f32.mrf.mxu0  ;;  %v1639_v38 = vpop.f32.mrf.mxu1 }
 0x640   :  { %v1569_v48 = vadd.f32 %v1568_v20, %v10663_v21  ;;  %v1648_v31 = vmul.f32 %v1567_v59, %v1567_v59  ;;  %v1650_v63 = vmul.f32 %v1638_v58, %v1638_v58  ;;  %v1640_v7 = vadd.f32 %v1639_v38, %v10664_v60 }
 0x641   :  { %v686_v38 = vsub.f32 %v10667_v53, %v7361_v5  ;;  %v789_v53 = vmul.f32 %v10665_v29, %v7373_v22 }
 0x642   :  { %v1642_v8 = vadd.f32 %v1569_v48, %v1567_v59  ;;  %v1649_v26 = vmul.f32 %v1569_v48, %v1569_v48  ;;  %v1651_v57 = vmul.f32 %v1640_v7, %v1640_v7 }
 0x644   :  { %v1643_v24 = vadd.f32 %v1642_v8, %v1638_v58  ;;  %v1652_v11 = vadd.f32 %v1649_v26, %v1648_v31 }
 0x646   :  { %v1644_v23 = vadd.f32 %v1643_v24, %v1640_v7  ;;  %v1653_v12 = vadd.f32 %v1652_v11, %v1650_v63  ;;  %v687_v24 = vsub.f32 %v10668_v14, %v7361_v5  ;;  %v734_v63 = vmul.f32 %v7368_v39, %v686_v38 }
 0x648   :  { %1645 = vadd.xlane.f32.xlu1 %v1644_v23  ;;  %v1654_v61 = vadd.f32 %v1653_v12, %v1651_v57  ;;  %v735_v11 = vmul.f32 %v7368_v39, %v687_v24  ;;  %v787_v26 = vmul.f32 %v7135_v43, %v734_v63 }
 0x64c   :  { %1655 = vadd.xlane.f32.xlu1 %v1654_v61 }
 0x6d1   :  { %v1646_v42 = vpop.xlane.xlu1 %1645 }
 0x6d2   :  { %v1647_v15 = vmul.f32 0.0078125, %v1646_v42 }
 0x6d4   :  { %v1658_v19 = vmul.f32 %v1647_v15, %v1647_v15  ;;  %v1661_v12 = vsub.f32 %v1567_v59, %v1647_v15  ;;  %v1662_v61 = vsub.f32 %v1569_v48, %v1647_v15  ;;  %v1663_v57 = vsub.f32 %v1638_v58, %v1647_v15 }
 0x6d5   :  { %v1656_v51 = vpop.xlane.xlu1 %1655  ;;  %v840_v59 = vadd.f32 %v7141_v41, %v787_v26  ;;  %v1664_v63 = vsub.f32 %v1640_v7, %v1647_v15 }
 0x6d6   :  { %v1657_v20 = vmul.f32 0.0078125, %v1656_v51  ;;  %v842_v51 = vadd.f32 %v7159_v47, %v789_v53 }
 0x6d8   :  { %v1659_v21 = vsub.f32 %v1657_v20, %v1658_v19  ;;  %v788_v19 = vmul.f32 %v7138_v44, %v735_v11 }
 0x6da   :  { %v1660_v17 = vmax.f32 %v1659_v21, 0.0  ;;  %v841_v48 = vadd.f32 %v7144_v0, %v788_v19 }
 0x6dc   :  { %v1665_v13 = vadd.f32 1e-05, %v1660_v17 }
 0x6de   :  { %5700 = vrsqrt.f32 %v1665_v13 }
 0x6eb   :  { %v5701_v23 = vpop.eup %5700 }
 0x6ec   :  { %v1667_v21 = vmul.f32 %v5701_v23, %v1661_v12  ;;  %v1668_v13 = vmul.f32 %v5701_v23, %v1662_v61  ;;  %v1669_v17 = vmul.f32 %v5701_v23, %v1663_v57  ;;  %v689_v61 = vsub.f32 %v10670_v49, %v7361_v5 }
 0x6ed   :  { %v1670_v57 = vmul.f32 %v5701_v23, %v1664_v63  ;;  %v10720_v23 = vld [vmem:[#allocation79_spill] sm:$0xff] }
 0x6ee   :  { %v1671_v14 = vmul.f32 %v1667_v21, %v7150_v52  ;;  %v1672_v8 = vmul.f32 %v1668_v13, %v10666_v1  ;;  %v1673_v31 = vmul.f32 %v1669_v17, %v7165_v34  ;;  %v737_v26 = vmul.f32 %v7368_v39, %v689_v61  ;;  %v10719_v39 = vld [vmem:[#allocation77_spill] sm:$0xff]  ;;  %v10722_v61 = vld [vmem:[#allocation82_spill] sm:$0xff] }
 0x6ef   :  { %v1674_v19 = vmul.f32 %v1670_v57, %v7189_v32 }
 0x6f0   :  { %v1675_v58 = vadd.f32 %v1671_v14, %v7156_v45  ;;  %v1676_v42 = vadd.f32 %v1672_v8, %v7170_v54  ;;  %v1677_v20 = vadd.f32 %v1673_v31, %v7173_v30  ;;  %v790_v21 = vmul.f32 %v7192_v46, %v737_v26 }
 0x6f1   :  { %v1678_v13 = vadd.f32 %v1674_v19, %v7195_v25  ;;  %v541_v31 = vadd.f32 %v10720_v23, %v10719_v39 }
 0x6f2   :  { %v1684_v22 = vadd.f32 %v1675_v58, %v840_v59  ;;  %v1685_v38 = vadd.f32 %v1676_v42, %v841_v48  ;;  %v1686_v24 = vadd.f32 %v1677_v20, %v842_v51  ;;  %v843_v53 = vadd.f32 %v7200_v50, %v790_v21  ;;  %v10721_v20 = vld [vmem:[#allocation80_spill] sm:$0xff] }
 0x6f3   :  { %v587_v59 = vmul.f32 %v10720_v23, %v10720_v23  ;;  %v586_v42 = vmul.f32 %v10719_v39, %v10719_v39  ;;  %v542_v63 = vadd.f32 %v541_v31, %v10721_v20 }
 0x6f4   :  { %v5586_v11 = vmul.f32 -1.442695, %v1684_v22  ;;  %v5587_v12 = vmul.f32 -1.442695, %v1685_v38  ;;  %v1687_v17 = vadd.f32 %v1678_v13, %v843_v53  ;;  %v588_v22 = vmul.f32 %v10721_v20, %v10721_v20 }
 0x6f5   :  { %v543_v57 = vadd.f32 %v542_v63, %v10722_v61 }
 0x6f6   :  { %5702 = vpow2.f32 %v5586_v11  ;;  %v621_v11 = vadd.f32 %v587_v59, %v586_v42 }
 0x6f7   :  { %5704 = vpow2.f32 %v5587_v12 }
 0x6f8   :  { %5706 = vtanh.f32 %v1687_v17  ;;  %v622_v26 = vadd.f32 %v621_v11, %v588_v22 }
 0x703   :  { %v5703_v7 = vpop.eup %5702 }
 0x704   :  { %v5705_v15 = vpop.eup %5704  ;;  %v1691_v14 = vadd.f32 1.0, %v5703_v7 }
 0x705   :  { %v1697_v8 = vadd.f32 1.0, %v5705_v15  ;;  %v5707_v49 = vpop.eup %5706 }
 0x706   :  { %5708 = vrcp.f32 %v1691_v14 }
 0x707   :  { %5710 = vrcp.f32 %v1697_v8 }
 0x713   :  { %v5709_v5 = vpop.eup %5708 }
 0x714   :  { %v5711_v48 = vpop.eup %5710  ;;  %v1708_v58 = vmul.f32 %v5709_v5, %v5707_v49  ;;  %v5588_v49 = vmul.f32 -1.442695, %v1686_v24 }
 0x715   :  { %v1707_v51 = vmul.f32 %v5711_v48, %v7352_v16  ;;  %v589_v16 = vmul.f32 %v10722_v61, %v10722_v61 }
 0x716   :  { %5712 = vpow2.f32 %v5588_v49  ;;  %v10729_v49 = vld [vmem:[#allocation33_spill] sm:$0xff] }
 0x717   :  { %v7608_v38 = vadd.f32 %v1708_v58, %v1707_v51  ;;  %v623_v19 = vadd.f32 %v622_v26, %v589_v16 }
 0x719   :  { %1710 = vadd.xlane.f32.xlu0 %v7608_v38  ;;  %v1713_v12 = vmul.f32 %v7608_v38, %v7608_v38 }
 0x71b   :  { %1714 = vadd.xlane.f32.xlu1 %v1713_v12 }
 0x71d   :  { %544 = vadd.xlane.f32.xlu0 %v543_v57 }
 0x721   :  { %624 = vadd.xlane.f32.xlu0 %v623_v19 }
 0x723   :  { %v5713_v63 = vpop.eup %5712 }
 0x724   :  { %v1703_v26 = vadd.f32 1.0, %v5713_v63  ;;  %v10738_v63 = vld [vmem:[#allocation48_spill] sm:$0xff] }
 0x7a2   :  { %v1711_v21 = vpop.xlane.xlu0 %1710 }
 0x7a3   :  { %v1712_v13 = vmul.f32 0.03125, %v1711_v21 }
 0x7a4   :  { %v1715_v53 = vpop.xlane.xlu1 %1714 }
 0x7a5   :  { %v1717_v17 = vmul.f32 %v1712_v13, %v1712_v13  ;;  %v1716_v7 = vmul.f32 0.03125, %v1715_v53  ;;  %v1720_v11 = vsub.f32 %v7608_v38, %v1712_v13 }
 0x7a6   :  { %v545_v15 = vpop.xlane.xlu0 %544 }
 0x7a7   :  { %v1718_v14 = vsub.f32 %v1716_v7, %v1717_v17  ;;  %v7617_v8 = vmul.f32 0.0078125, %v545_v15  ;;  %v10727_v15 = vld [vmem:[#allocation31_spill] sm:$0xff] }
 0x7a9   :  { %v1719_v5 = vmax.f32 %v1718_v14, 0.0  ;;  %v657_v48 = vmul.f32 %v7617_v8, %v7617_v8  ;;  %v692_v21 = vsub.f32 %v10721_v20, %v7617_v8  ;;  %v10726_v20 = vld [vmem:[#allocation36_spill] sm:$0xff]  ;;  %v10728_v14 = vld [vmem:[#allocation38_spill] sm:$0xff] }
 0x7aa   :  { %v625_v31 = vpop.xlane.xlu0 %624 }
 0x7ab   :  { %v1721_v59 = vadd.f32 1e-05, %v1719_v5  ;;  %v649_v58 = vmul.f32 0.0078125, %v625_v31  ;;  %v10730_v5 = vld [vmem:[#allocation40_spill] sm:$0xff]  ;;  %v10731_v31 = vld [vmem:[#allocation35_spill] sm:$0xff] }
 0x7ad   :  { %5714 = vrsqrt.f32 %v1721_v59  ;;  %v665_v42 = vsub.f32 %v649_v58, %v657_v48  ;;  %v10732_v59 = vld [vmem:[#allocation42_spill] sm:$0xff]  ;;  %v10733_v48 = vld [vmem:[#allocation37_spill] sm:$0xff]  ;;  %v10734_v58 = vld [vmem:[#allocation44_spill] sm:$0xff] }
 0x7af   :  { %v673_v51 = vmax.f32 %v665_v42, 0.0  ;;  %v10735_v42 = vld [vmem:[#allocation39_spill] sm:$0xff] }
 0x7b1   :  { %v713_v22 = vadd.f32 1e-05, %v673_v51  ;;  %v10736_v51 = vld [vmem:[#allocation46_spill] sm:$0xff] }
 0x7b3   :  { %5716 = vrsqrt.f32 %v713_v22  ;;  %v10737_v22 = vld [vmem:[#allocation41_spill] sm:$0xff] }
 0x7b4   :  { %5718 = vrcp.f32 %v1703_v26  ;;  %v10742_v26 = vld [vmem:[#allocation52_spill] sm:$0xff] }
 0x7ba   :  { %v5715_v12 = vpop.eup %5714 }
 0x7bb   :  { %v1723_v57 = vmul.f32 %v5715_v12, %v1720_v11  ;;  %v10739_v11 = vld [vmem:[#allocation43_spill] sm:$0xff]  ;;  %v10740_v12 = vld [vmem:[#allocation50_spill] sm:$0xff] }
 0x7bd   :  { %v1724_v24 = vmul.f32 %v7226_v18, %v1723_v57  ;;  %v10724_v18 = vld [vmem:[#allocation34_spill] sm:$0xff]  ;;  %v10741_v57 = vld [vmem:[#allocation45_spill] sm:$0xff] }
 0x7bf   :  { %v1725_v16 = vadd.f32 %v7228_v36, %v1724_v24  ;;  %v10725_v36 = vld [vmem:[#allocation30_spill] sm:$0xff]  ;;  %v10743_v24 = vld [vmem:[#allocation47_spill] sm:$0xff] }
 0x7c0   :  { %v7624_v19 = vpop.eup %5716 }
 0x7c1   :  { %5720 = vtanh.f32 %v1725_v16  ;;  %v7629_v53 = vmul.f32 %v7624_v19, %v692_v21  ;;  %v5719_v17 = vpop.eup %5718  ;;  %v10744_v16 = vld [vmem:[#allocation54_spill] sm:$0xff]  ;;  %v10745_v21 = vld [vmem:[#allocation49_spill] sm:$0xff] }
 0x7ce   :  { %v5721_v7 = vpop.eup %5720 }
 0x7cf   :  { %v7631_v13 = vmul.f32 %v5721_v7, %v5719_v17  ;;  %v10746_v17 = vld [vmem:[#allocation56_spill] sm:$0xff]  ;;  %v10747_v7 = vld [vmem:[#allocation51_spill] sm:$0xff] }
 0x7d1   :  { %10723 = vst [vmem:[#allocation77_spill] sm:$0xff] %v7631_v13  ;;  %1795 = vmatmul.mubr.f32.vlgmr.msra.gmra.mxu0 %v7631_v13  ;;  %1866 = vmatmul.mubr.f32.vlgmr.msra.gmra.mxu1 %v7631_v13  ;;  %v10748_v13 = vld [vmem:[#allocation58_spill] sm:$0xff] }
 0x7d2   :  { %1961 = vmatpush1.msra.mxu0 %v7379_v35  ;;  %2032 = vmatpush1.msra.mxu1 %v7382_v56 }
 0x7d3   :  { %1962 = vmatprep.subr.mxu0 %v7385_v3  ;;  %2033 = vmatprep.subr.mxu1 %v7388_v33 }
 0x7d4   :  { %1963 = vmatpush1.msra.mxu0 %v7391_v9  ;;  %2034 = vmatpush1.msra.mxu1 %v7394_v27 }
 0x7d5   :  { %1964 = vmatprep.subr.mxu0 %v7397_v40  ;;  %2035 = vmatprep.subr.mxu1 %v7400_v55 }
 0x7d6   :  { %1965 = vmatpush1.msra.mxu0 %v7403_v37  ;;  %2036 = vmatpush1.msra.mxu1 %v7406_v2 }
 0x7d7   :  { %1966 = vmatprep.subr.mxu0 %v7409_v4  ;;  %2037 = vmatprep.subr.mxu1 %v7412_v6 }
 0x7d8   :  { %1967 = vmatpush1.msra.mxu0 %v7415_v10  ;;  %2038 = vmatpush1.msra.mxu1 %v7418_v62 }
 0x7d9   :  { %1968 = vmatprep.subr.mxu0 %v7421_v28  ;;  %2039 = vmatprep.subr.mxu1 %v10724_v18 }
 0x7da   :  { %1969 = vmatpush1.msra.mxu0 %v10725_v36  ;;  %2040 = vmatpush1.msra.mxu1 %v10726_v20 }
 0x7db   :  { %1970 = vmatprep.subr.mxu0 %v10727_v15  ;;  %2041 = vmatprep.subr.mxu1 %v10728_v14 }
 0x7dc   :  { %1971 = vmatpush1.msra.mxu0 %v10729_v49  ;;  %2042 = vmatpush1.msra.mxu1 %v10730_v5 }
 0x7dd   :  { %1972 = vmatprep.subr.mxu0 %v10731_v31  ;;  %2043 = vmatprep.subr.mxu1 %v10732_v59 }
 0x7de   :  { %1973 = vmatpush1.msra.mxu0 %v10733_v48  ;;  %2044 = vmatpush1.msra.mxu1 %v10734_v58 }
 0x7df   :  { %1974 = vmatprep.subr.mxu0 %v10735_v42  ;;  %2045 = vmatprep.subr.mxu1 %v10736_v51 }
 0x7e0   :  { %1975 = vmatpush1.msra.mxu0 %v10737_v22  ;;  %2046 = vmatpush1.msra.mxu1 %v10738_v63  ;;  %v10749_v63 = vld [vmem:[#allocation53_spill] sm:$0xff] }
 0x7e1   :  { %1976 = vmatprep.subr.mxu0 %v10739_v11  ;;  %2047 = vmatprep.subr.mxu1 %v10740_v12  ;;  %v10750_v11 = vld [vmem:[#allocation60_spill] sm:$0xff]  ;;  %v10751_v12 = vld [vmem:[#allocation55_spill] sm:$0xff] }
 0x7e2   :  { %1977 = vmatpush1.msra.mxu0 %v10741_v57  ;;  %2048 = vmatpush1.msra.mxu1 %v10742_v26  ;;  %v10752_v57 = vld [vmem:[#allocation62_spill] sm:$0xff]  ;;  %v10753_v26 = vld [vmem:[#allocation57_spill] sm:$0xff] }
 0x7e3   :  { %1978 = vmatprep.subr.mxu0 %v10743_v24  ;;  %2049 = vmatprep.subr.mxu1 %v10744_v16  ;;  %v10754_v24 = vld [vmem:[#allocation64_spill] sm:$0xff]  ;;  %v10755_v16 = vld [vmem:[#allocation59_spill] sm:$0xff] }
 0x7e4   :  { %1979 = vmatpush1.msra.mxu0 %v10745_v21  ;;  %2050 = vmatpush1.msra.mxu1 %v10746_v17  ;;  %v10756_v21 = vld [vmem:[#allocation66_spill] sm:$0xff]  ;;  %v10757_v17 = vld [vmem:[#allocation61_spill] sm:$0xff] }
 0x7e5   :  { %1980 = vmatprep.subr.mxu0 %v10747_v7  ;;  %2051 = vmatprep.subr.mxu1 %v10748_v13  ;;  %v10758_v7 = vld [vmem:[#allocation67_spill] sm:$0xff] }
 0x7e6   :  { %1981 = vmatpush1.msra.mxu0 %v10749_v63  ;;  %2052 = vmatpush1.msra.mxu1 %v10750_v11  ;;  %v10759_v13 = vld [vmem:[#allocation63_spill] sm:$0xff]  ;;  %v10760_v63 = vld [vmem:[#allocation68_spill] sm:$0xff]  ;;  %v10761_v11 = vld [vmem:[#allocation65_spill] sm:$0xff] }
 0x7e7   :  { %1982 = vmatprep.subr.mxu0 %v10751_v12  ;;  %2053 = vmatprep.subr.mxu1 %v10752_v57  ;;  %v10762_v12 = vld [vmem:[#allocation69_spill] sm:$0xff] }
 0x7e8   :  { %1983 = vmatpush1.msra.mxu0 %v10753_v26  ;;  %2054 = vmatpush1.msra.mxu1 %v10754_v24  ;;  %v10763_v57 = vld [vmem:[#allocation101_spill] sm:$0xff]  ;;  %v10764_v26 = vld [vmem:[#allocation102_spill] sm:$0xff]  ;;  %v10765_v24 = vld [vmem:[#allocation103_spill] sm:$0xff] }
 0x7e9   :  { %1984 = vmatprep.subr.mxu0 %v10755_v16  ;;  %2055 = vmatprep.subr.mxu1 %v10756_v21  ;;  %v10766_v16 = vld [vmem:[#allocation74_spill] sm:$0xff]  ;;  %v10767_v21 = vld [vmem:[#allocation75_spill] sm:$0xff] }
 0x7ea   :  { %1985 = vmatpush1.msra.mxu0 %v10757_v17  ;;  %2056 = vmatpush1.msra.mxu1 %v10758_v7  ;;  %v10768_v17 = vld [vmem:[#allocation76_spill] sm:$0xff]  ;;  %v10769_v7 = vld [vmem:[#allocation78_spill] sm:$0xff] }
 0x7eb   :  { %1986 = vmatprep.subr.mxu0 %v10759_v13  ;;  %2057 = vmatprep.subr.mxu1 %v10760_v63  ;;  %v10770_v13 = vmov 0.0   ;;  %v10771_v63 = vld [vmem:[#allocation105_spill] sm:$0xff] }
 0x7ec   :  { %1987 = vmatpush1.msra.mxu0 %v10761_v11  ;;  %2058 = vmatpush1.msra.mxu1 %v10762_v12  ;;  %v10772_v12 = vld [vmem:[#allocation28_spill] sm:$0xff] }
 0x7ed   :  { %1988 = vmatprep.subr.mxu0 %v10763_v57  ;;  %2059 = vmatprep.subr.mxu1 %v10764_v26  ;;  %v10773_v57 = vld [vmem:[#allocation32_spill] sm:$0xff] }
 0x7ee   :  { %1989 = vmatpush1.msra.mxu0 %v10765_v24  ;;  %2060 = vmatpush1.msra.mxu1 %v10766_v16  ;;  %v10774_v11 = vld [vmem:[#allocation96_spill] sm:$0xff] }
 0x7ef   :  { %1990 = vmatprep.subr.mxu0 %v10767_v21  ;;  %2061 = vmatprep.subr.mxu1 %v10768_v17  ;;  %v10775_v21 = vld [vmem:[#allocation99_spill] sm:$0xff]  ;;  %v10776_v17 = vld [vmem:[#allocation97_spill] sm:$0xff] }
 0x7f0   :  { %1991 = vmatpush1.msra.mxu0 %v10769_v7  ;;  %2024 = vmatprep.mubr.f32.mxu0 %v10770_v13 }
 0x7f1   :  { %2062 = vmatpush1.msra.mxu1 %v10771_v63  ;;  %2095 = vmatprep.mubr.f32.mxu1 %v10770_v13 }
 0x7f2   :  { %2190 = vmatprep.subr.mxu0 %v10772_v12  ;;  %2261 = vmatprep.subr.mxu1 %v10773_v57 }
 0x891   :  { %v1796_v26 = vpop.f32.mrf.mxu0  ;;  %v1867_v24 = vpop.f32.mrf.mxu1 }
 0x892   :  { %v1797_v16 = vadd.f32 %v1796_v26, %v10774_v11  ;;  %v1868_v51 = vadd.f32 %v1867_v24, %v10775_v21 }
 0x893   :  { %v1798_v22 = vpop.f32.mrf.mxu0  ;;  %v1869_v7 = vpop.f32.mrf.mxu1 }
 0x894   :  { %v1799_v42 = vadd.f32 %v1798_v22, %v10776_v17  ;;  %v1878_v58 = vmul.f32 %v1797_v16, %v1797_v16  ;;  %v1880_v63 = vmul.f32 %v1868_v51, %v1868_v51  ;;  %v1870_v13 = vadd.f32 %v1869_v7, %v10664_v60 }
 0x895   :  { %v690_v7 = vsub.f32 %v10719_v39, %v7617_v8  ;;  %v793_v39 = vmul.f32 %v10665_v29, %v7629_v53 }
 0x896   :  { %v1872_v48 = vadd.f32 %v1799_v42, %v1797_v16  ;;  %v1879_v59 = vmul.f32 %v1799_v42, %v1799_v42  ;;  %v1881_v49 = vmul.f32 %v1870_v13, %v1870_v13 }
 0x898   :  { %v1873_v31 = vadd.f32 %v1872_v48, %v1868_v51  ;;  %v1882_v12 = vadd.f32 %v1879_v59, %v1878_v58 }
 0x89a   :  { %v1874_v5 = vadd.f32 %v1873_v31, %v1870_v13  ;;  %v1883_v57 = vadd.f32 %v1882_v12, %v1880_v63  ;;  %v691_v31 = vsub.f32 %v10720_v23, %v7617_v8 }
 0x89c   :  { %1875 = vadd.xlane.f32.xlu1 %v1874_v5  ;;  %v1884_v14 = vadd.f32 %v1883_v57, %v1881_v49  ;;  %v738_v5 = vmul.f32 %v7624_v19, %v690_v7  ;;  %v739_v49 = vmul.f32 %v7624_v19, %v691_v31 }
 0x89e   :  { %v791_v63 = vmul.f32 %v7135_v43, %v738_v5 }
 0x8a0   :  { %1885 = vadd.xlane.f32.xlu1 %v1884_v14 }
 0x925   :  { %v1876_v26 = vpop.xlane.xlu1 %1875 }
 0x926   :  { %v1877_v11 = vmul.f32 0.0078125, %v1876_v26 }
 0x928   :  { %v1888_v21 = vmul.f32 %v1877_v11, %v1877_v11  ;;  %v1891_v14 = vsub.f32 %v1797_v16, %v1877_v11  ;;  %v1892_v59 = vsub.f32 %v1799_v42, %v1877_v11  ;;  %v1893_v48 = vsub.f32 %v1868_v51, %v1877_v11 }
 0x929   :  { %v1886_v24 = vpop.xlane.xlu1 %1885  ;;  %v844_v42 = vadd.f32 %v7141_v41, %v791_v63  ;;  %v1894_v5 = vsub.f32 %v1870_v13, %v1877_v11 }
 0x92a   :  { %v1887_v22 = vmul.f32 0.0078125, %v1886_v24  ;;  %v846_v24 = vadd.f32 %v7159_v47, %v793_v39 }
 0x92c   :  { %v1889_v17 = vsub.f32 %v1887_v22, %v1888_v21  ;;  %v792_v21 = vmul.f32 %v7138_v44, %v739_v49 }
 0x92e   :  { %v1890_v15 = vmax.f32 %v1889_v17, 0.0  ;;  %v845_v51 = vadd.f32 %v7144_v0, %v792_v21 }
 0x930   :  { %v1895_v20 = vadd.f32 1e-05, %v1890_v15 }
 0x932   :  { %5722 = vrsqrt.f32 %v1895_v20 }
 0x93f   :  { %v5723_v58 = vpop.eup %5722 }
 0x940   :  { %v1897_v15 = vmul.f32 %v5723_v58, %v1891_v14  ;;  %v1898_v20 = vmul.f32 %v5723_v58, %v1892_v59  ;;  %v1899_v17 = vmul.f32 %v5723_v58, %v1893_v48  ;;  %v693_v59 = vsub.f32 %v10722_v61, %v7617_v8 }
 0x941   :  { %v1900_v48 = vmul.f32 %v5723_v58, %v1894_v5  ;;  %v10778_v58 = vld [vmem:[#allocation83_spill] sm:$0xff] }
 0x942   :  { %v1901_v23 = vmul.f32 %v1897_v15, %v7150_v52  ;;  %v1902_v12 = vmul.f32 %v1898_v20, %v10666_v1  ;;  %v1903_v57 = vmul.f32 %v1899_v17, %v7165_v34  ;;  %v741_v63 = vmul.f32 %v7624_v19, %v693_v59  ;;  %v10777_v19 = vld [vmem:[#allocation81_spill] sm:$0xff]  ;;  %v10780_v59 = vld [vmem:[#allocation86_spill] sm:$0xff] }
 0x943   :  { %v1904_v21 = vmul.f32 %v1900_v48, %v7189_v32 }
 0x944   :  { %v1905_v16 = vadd.f32 %v1901_v23, %v7156_v45  ;;  %v1906_v26 = vadd.f32 %v1902_v12, %v7170_v54  ;;  %v1907_v22 = vadd.f32 %v1903_v57, %v7173_v30  ;;  %v794_v15 = vmul.f32 %v7192_v46, %v741_v63 }
 0x945   :  { %v1908_v20 = vadd.f32 %v1904_v21, %v7195_v25  ;;  %v546_v57 = vadd.f32 %v10778_v58, %v10777_v19 }
 0x946   :  { %v1914_v53 = vadd.f32 %v1905_v16, %v844_v42  ;;  %v1915_v7 = vadd.f32 %v1906_v26, %v845_v51  ;;  %v1916_v31 = vadd.f32 %v1907_v22, %v846_v24  ;;  %v847_v39 = vadd.f32 %v7200_v50, %v794_v15  ;;  %v10779_v22 = vld [vmem:[#allocation84_spill] sm:$0xff] }
 0x947   :  { %v591_v42 = vmul.f32 %v10778_v58, %v10778_v58  ;;  %v590_v26 = vmul.f32 %v10777_v19, %v10777_v19  ;;  %v547_v5 = vadd.f32 %v546_v57, %v10779_v22 }
 0x948   :  { %v5589_v49 = vmul.f32 -1.442695, %v1914_v53  ;;  %v5590_v14 = vmul.f32 -1.442695, %v1915_v7  ;;  %v1917_v17 = vadd.f32 %v1908_v20, %v847_v39  ;;  %v592_v53 = vmul.f32 %v10779_v22, %v10779_v22 }
 0x949   :  { %v548_v48 = vadd.f32 %v547_v5, %v10780_v59 }
 0x94a   :  { %5724 = vpow2.f32 %v5589_v49  ;;  %v626_v49 = vadd.f32 %v591_v42, %v590_v26 }
 0x94b   :  { %5726 = vpow2.f32 %v5590_v14 }
 0x94c   :  { %5728 = vtanh.f32 %v1917_v17  ;;  %v627_v63 = vadd.f32 %v626_v49, %v592_v53 }
 0x957   :  { %v5725_v13 = vpop.eup %5724 }
 0x958   :  { %v5727_v11 = vpop.eup %5726  ;;  %v1921_v23 = vadd.f32 1.0, %v5725_v13 }
 0x959   :  { %v1927_v12 = vadd.f32 1.0, %v5727_v11  ;;  %v5729_v61 = vpop.eup %5728 }
 0x95a   :  { %5730 = vrcp.f32 %v1921_v23 }
 0x95b   :  { %5732 = vrcp.f32 %v1927_v12 }
 0x967   :  { %v5731_v8 = vpop.eup %5730 }
 0x968   :  { %v5733_v51 = vpop.eup %5732  ;;  %v1938_v16 = vmul.f32 %v5731_v8, %v5729_v61  ;;  %v5591_v61 = vmul.f32 -1.442695, %v1916_v31  ;;  %v7754_v31 = vld [vmem:[#allocation19] ss:$0 sm:$0xff] }
 0x969   :  { %v1937_v24 = vmul.f32 %v5733_v51, %v7608_v38  ;;  %v593_v38 = vmul.f32 %v10780_v59, %v10780_v59 }
 0x96a   :  { %5734 = vpow2.f32 %v5591_v61  ;;  %v10800_v61 = vld [vmem:[#allocation54_spill] sm:$0xff] }
 0x96b   :  { %v7740_v7 = vadd.f32 %v1938_v16, %v1937_v24  ;;  %v628_v21 = vadd.f32 %v627_v63, %v593_v38 }
 0x96d   :  { %1940 = vadd.xlane.f32.xlu0 %v7740_v7  ;;  %v1943_v14 = vmul.f32 %v7740_v7, %v7740_v7 }
 0x96f   :  { %1944 = vadd.xlane.f32.xlu1 %v1943_v14 }
 0x971   :  { %549 = vadd.xlane.f32.xlu0 %v548_v48 }
 0x975   :  { %629 = vadd.xlane.f32.xlu0 %v628_v21  ;;  %v7757_v21 = vld [vmem:[#allocation21] ss:$0 sm:$0xff] }
 0x977   :  { %v5735_v5 = vpop.eup %5734 }
 0x978   :  { %v1933_v63 = vadd.f32 1.0, %v5735_v5  ;;  %v10809_v5 = vld [vmem:[#allocation57_spill] sm:$0xff] }
 0x9f6   :  { %v1941_v15 = vpop.xlane.xlu0 %1940 }
 0x9f7   :  { %v1942_v20 = vmul.f32 0.03125, %v1941_v15 }
 0x9f8   :  { %v1945_v39 = vpop.xlane.xlu1 %1944 }
 0x9f9   :  { %v1947_v17 = vmul.f32 %v1942_v20, %v1942_v20  ;;  %v1946_v13 = vmul.f32 0.03125, %v1945_v39  ;;  %v1950_v49 = vsub.f32 %v7740_v7, %v1942_v20 }
 0x9fa   :  { %v550_v11 = vpop.xlane.xlu0 %549 }
 0x9fb   :  { %v1948_v23 = vsub.f32 %v1946_v13, %v1947_v17  ;;  %v7749_v12 = vmul.f32 0.0078125, %v550_v11 }
 0x9fd   :  { %v1949_v8 = vmax.f32 %v1948_v23, 0.0  ;;  %v658_v51 = vmul.f32 %v7749_v12, %v7749_v12  ;;  %v696_v17 = vsub.f32 %v10779_v22, %v7749_v12  ;;  %v10799_v22 = vld [vmem:[#allocation47_spill] sm:$0xff] }
 0x9fe   :  { %v630_v57 = vpop.xlane.xlu0 %629 }
 0x9ff   :  { %v1951_v42 = vadd.f32 1e-05, %v1949_v8  ;;  %v650_v16 = vmul.f32 0.0078125, %v630_v57  ;;  %v10801_v8 = vld [vmem:[#allocation49_spill] sm:$0xff]  ;;  %v10802_v57 = vld [vmem:[#allocation56_spill] sm:$0xff] }
 0xa01   :  { %5736 = vrsqrt.f32 %v1951_v42  ;;  %v666_v26 = vsub.f32 %v650_v16, %v658_v51  ;;  %v10803_v42 = vld [vmem:[#allocation51_spill] sm:$0xff]  ;;  %v10804_v51 = vld [vmem:[#allocation58_spill] sm:$0xff]  ;;  %v10805_v16 = vld [vmem:[#allocation53_spill] sm:$0xff] }
 0xa03   :  { %v674_v24 = vmax.f32 %v666_v26, 0.0  ;;  %v10806_v26 = vld [vmem:[#allocation60_spill] sm:$0xff] }
 0xa05   :  { %v714_v53 = vadd.f32 1e-05, %v674_v24  ;;  %v10807_v24 = vld [vmem:[#allocation55_spill] sm:$0xff] }
 0xa07   :  { %5738 = vrsqrt.f32 %v714_v53  ;;  %v10808_v53 = vld [vmem:[#allocation62_spill] sm:$0xff] }
 0xa08   :  { %5740 = vrcp.f32 %v1933_v63  ;;  %v10813_v63 = vld [vmem:[#allocation61_spill] sm:$0xff] }
 0xa0e   :  { %v5737_v14 = vpop.eup %5736 }
 0xa0f   :  { %v1953_v48 = vmul.f32 %v5737_v14, %v1950_v49  ;;  %v10810_v49 = vld [vmem:[#allocation64_spill] sm:$0xff]  ;;  %v10811_v14 = vld [vmem:[#allocation59_spill] sm:$0xff] }
 0xa11   :  { %v1954_v38 = vmul.f32 %v7754_v31, %v1953_v48  ;;  %v10812_v48 = vld [vmem:[#allocation66_spill] sm:$0xff] }
 0xa13   :  { %v1955_v15 = vadd.f32 %v7757_v21, %v1954_v38  ;;  %v10814_v38 = vld [vmem:[#allocation67_spill] sm:$0xff] }
 0xa14   :  { %v7760_v39 = vpop.eup %5738 }
 0xa15   :  { %5742 = vtanh.f32 %v1955_v15  ;;  %v7765_v20 = vmul.f32 %v7760_v39, %v696_v17  ;;  %v5741_v13 = vpop.eup %5740  ;;  %v10815_v15 = vld [vmem:[#allocation63_spill] sm:$0xff]  ;;  %v10816_v17 = vld [vmem:[#allocation68_spill] sm:$0xff] }
 0xa22   :  { %v5743_v11 = vpop.eup %5742 }
 0xa23   :  { %v7767_v23 = vmul.f32 %v5743_v11, %v5741_v13  ;;  %v10817_v13 = vld [vmem:[#allocation65_spill] sm:$0xff] }
 0xa24   :  { %v10818_v11 = vld [vmem:[#allocation69_spill] sm:$0xff] }
 0xa25   :  { %10781 = vst [vmem:[#allocation79_spill] sm:$0xff] %v7767_v23  ;;  %2025 = vmatmul.mubr.f32.vlgmr.msra.gmra.mxu0 %v7767_v23  ;;  %2096 = vmatmul.mubr.f32.vlgmr.msra.gmra.mxu1 %v7767_v23  ;;  %v8000_v23 = vld [vmem:[#allocation12 + $0xf8] sm:$0xff] }
 0xa26   :  { %2191 = vmatpush1.msra.mxu0 %v7379_v35  ;;  %2262 = vmatpush1.msra.mxu1 %v7382_v56  ;;  %v10782_v35 = vld [vmem:[#allocation36_spill] sm:$0xff]  ;;  %v10783_v56 = vld [vmem:[#allocation31_spill] sm:$0xff] }
 0xa27   :  { %2192 = vmatprep.subr.mxu0 %v7385_v3  ;;  %2263 = vmatprep.subr.mxu1 %v7388_v33  ;;  %v10784_v3 = vld [vmem:[#allocation38_spill] sm:$0xff]  ;;  %v10785_v33 = vld [vmem:[#allocation33_spill] sm:$0xff] }
 0xa28   :  { %2193 = vmatpush1.msra.mxu0 %v7391_v9  ;;  %2264 = vmatpush1.msra.mxu1 %v7394_v27  ;;  %v10786_v9 = vld [vmem:[#allocation40_spill] sm:$0xff]  ;;  %v10787_v27 = vld [vmem:[#allocation35_spill] sm:$0xff] }
 0xa29   :  { %2194 = vmatprep.subr.mxu0 %v7397_v40  ;;  %2265 = vmatprep.subr.mxu1 %v7400_v55  ;;  %v10788_v40 = vld [vmem:[#allocation42_spill] sm:$0xff]  ;;  %v10789_v55 = vld [vmem:[#allocation37_spill] sm:$0xff] }
 0xa2a   :  { %2195 = vmatpush1.msra.mxu0 %v7403_v37  ;;  %2266 = vmatpush1.msra.mxu1 %v7406_v2  ;;  %v10790_v37 = vld [vmem:[#allocation44_spill] sm:$0xff]  ;;  %v10791_v2 = vld [vmem:[#allocation39_spill] sm:$0xff]  ;;  %10852 = vst [vmem:[#allocation37_spill] sm:$0xff] %v8000_v23 }
 0xa2b   :  { %2196 = vmatprep.subr.mxu0 %v7409_v4  ;;  %2267 = vmatprep.subr.mxu1 %v7412_v6  ;;  %v10792_v4 = vld [vmem:[#allocation46_spill] sm:$0xff]  ;;  %v10793_v6 = vld [vmem:[#allocation41_spill] sm:$0xff] }
 0xa2c   :  { %2197 = vmatpush1.msra.mxu0 %v7415_v10  ;;  %2268 = vmatpush1.msra.mxu1 %v7418_v62  ;;  %v10794_v10 = vld [vmem:[#allocation48_spill] sm:$0xff]  ;;  %v10795_v62 = vld [vmem:[#allocation43_spill] sm:$0xff] }
 0xa2d   :  { %2198 = vmatprep.subr.mxu0 %v7421_v28  ;;  %2269 = vmatprep.subr.mxu1 %v10724_v18  ;;  %v10796_v28 = vld [vmem:[#allocation50_spill] sm:$0xff]  ;;  %v10797_v18 = vld [vmem:[#allocation45_spill] sm:$0xff] }
 0xa2e   :  { %2199 = vmatpush1.msra.mxu0 %v10725_v36  ;;  %2270 = vmatpush1.msra.mxu1 %v10782_v35  ;;  %v10798_v36 = vld [vmem:[#allocation52_spill] sm:$0xff]  ;;  %v10819_v35 = vld [vmem:[#allocation101_spill] sm:$0xff] }
 0xa2f   :  { %2200 = vmatprep.subr.mxu0 %v10783_v56  ;;  %2271 = vmatprep.subr.mxu1 %v10784_v3  ;;  %v10820_v56 = vld [vmem:[#allocation102_spill] sm:$0xff]  ;;  %v10821_v3 = vld [vmem:[#allocation103_spill] sm:$0xff] }
 0xa30   :  { %2201 = vmatpush1.msra.mxu0 %v10785_v33  ;;  %2272 = vmatpush1.msra.mxu1 %v10786_v9  ;;  %v10822_v33 = vld [vmem:[#allocation74_spill] sm:$0xff]  ;;  %v10823_v9 = vld [vmem:[#allocation75_spill] sm:$0xff] }
 0xa31   :  { %2202 = vmatprep.subr.mxu0 %v10787_v27  ;;  %2273 = vmatprep.subr.mxu1 %v10788_v40  ;;  %v10824_v27 = vld [vmem:[#allocation76_spill] sm:$0xff]  ;;  %v10825_v40 = vld [vmem:[#allocation78_spill] sm:$0xff] }
 0xa32   :  { %2203 = vmatpush1.msra.mxu0 %v10789_v55  ;;  %2274 = vmatpush1.msra.mxu1 %v10790_v37  ;;  %v10826_v55 = vmov 0.0   ;;  %v10827_v37 = vld [vmem:[#allocation105_spill] sm:$0xff] }
 0xa33   :  { %2204 = vmatprep.subr.mxu0 %v10791_v2  ;;  %2275 = vmatprep.subr.mxu1 %v10792_v4  ;;  %v7835_v2 = vld [vmem:[#allocation12 + $0x1e8] sm:$0xff]  ;;  %v7838_v4 = vld [vmem:[#allocation12 + $0x1f8] sm:$0xff] }
 0xa34   :  { %2205 = vmatpush1.msra.mxu0 %v10793_v6  ;;  %2276 = vmatpush1.msra.mxu1 %v10794_v10 }
 0xa35   :  { %2206 = vmatprep.subr.mxu0 %v10795_v62  ;;  %2277 = vmatprep.subr.mxu1 %v10796_v28  ;;  %v10828_v62 = vld [vmem:[#allocation96_spill] sm:$0xff] }
 0xa36   :  { %2207 = vmatpush1.msra.mxu0 %v10797_v18  ;;  %2278 = vmatpush1.msra.mxu1 %v10798_v36  ;;  %v10829_v36 = vld [vmem:[#allocation99_spill] sm:$0xff] }
 0xa37   :  { %2208 = vmatprep.subr.mxu0 %v10799_v22  ;;  %2279 = vmatprep.subr.mxu1 %v10800_v61  ;;  %v10830_v61 = vld [vmem:[#allocation97_spill] sm:$0xff] }
 0xa38   :  { %2209 = vmatpush1.msra.mxu0 %v10801_v8  ;;  %2280 = vmatpush1.msra.mxu1 %v10802_v57 }
 0xa39   :  { %2210 = vmatprep.subr.mxu0 %v10803_v42  ;;  %2281 = vmatprep.subr.mxu1 %v10804_v51 }
 0xa3a   :  { %2211 = vmatpush1.msra.mxu0 %v10805_v16  ;;  %2282 = vmatpush1.msra.mxu1 %v10806_v26 }
 0xa3b   :  { %2212 = vmatprep.subr.mxu0 %v10807_v24  ;;  %2283 = vmatprep.subr.mxu1 %v10808_v53 }
 0xa3c   :  { %2213 = vmatpush1.msra.mxu0 %v10809_v5  ;;  %2284 = vmatpush1.msra.mxu1 %v10810_v49 }
 0xa3d   :  { %2214 = vmatprep.subr.mxu0 %v10811_v14  ;;  %2285 = vmatprep.subr.mxu1 %v10812_v48 }
 0xa3e   :  { %2215 = vmatpush1.msra.mxu0 %v10813_v63  ;;  %2286 = vmatpush1.msra.mxu1 %v10814_v38 }
 0xa3f   :  { %2216 = vmatprep.subr.mxu0 %v10815_v15  ;;  %2287 = vmatprep.subr.mxu1 %v10816_v17 }
 0xa40   :  { %2217 = vmatpush1.msra.mxu0 %v10817_v13  ;;  %2288 = vmatpush1.msra.mxu1 %v10818_v11 }
 0xa41   :  { %2218 = vmatprep.subr.mxu0 %v10819_v35  ;;  %2289 = vmatprep.subr.mxu1 %v10820_v56 }
 0xa42   :  { %2219 = vmatpush1.msra.mxu0 %v10821_v3  ;;  %2290 = vmatpush1.msra.mxu1 %v10822_v33  ;;  %v694_v33 = vsub.f32 %v10777_v19, %v7749_v12  ;;  %v797_v19 = vmul.f32 %v10665_v29, %v7765_v20 }
 0xa43   :  { %2220 = vmatprep.subr.mxu0 %v10823_v9  ;;  %2291 = vmatprep.subr.mxu1 %v10824_v27  ;;  %v695_v9 = vsub.f32 %v10778_v58, %v7749_v12 }
 0xa44   :  { %2221 = vmatpush1.msra.mxu0 %v10825_v40  ;;  %2254 = vmatprep.mubr.f32.mxu0 %v10826_v55  ;;  %v742_v27 = vmul.f32 %v7760_v39, %v694_v33 }
 0xa45   :  { %2292 = vmatpush1.msra.mxu1 %v10827_v37  ;;  %2325 = vmatprep.mubr.f32.mxu1 %v10826_v55  ;;  %v743_v40 = vmul.f32 %v7760_v39, %v695_v9 }
 0xa46   :  { %2420 = vmatprep.subr.mxu0 %v7835_v2  ;;  %2491 = vmatprep.subr.mxu1 %v7838_v4 }
 0xae5   :  { %v2026_v6 = vpop.f32.mrf.mxu0  ;;  %v2097_v10 = vpop.f32.mrf.mxu1 }
 0xae6   :  { %v2027_v28 = vadd.f32 %v2026_v6, %v10828_v62  ;;  %v2098_v22 = vadd.f32 %v2097_v10, %v10829_v36 }
 0xae7   :  { %v2028_v18 = vpop.f32.mrf.mxu0  ;;  %v2099_v57 = vpop.f32.mrf.mxu1 }
 0xae8   :  { %v2029_v8 = vadd.f32 %v2028_v18, %v10830_v61  ;;  %v2108_v42 = vmul.f32 %v2027_v28, %v2027_v28  ;;  %v2110_v26 = vmul.f32 %v2098_v22, %v2098_v22  ;;  %v2100_v24 = vadd.f32 %v2099_v57, %v10664_v60 }
 0xae9   :  { %v795_v57 = vmul.f32 %v7135_v43, %v742_v27 }
 0xaea   :  { %v2102_v51 = vadd.f32 %v2029_v8, %v2027_v28  ;;  %v2109_v16 = vmul.f32 %v2029_v8, %v2029_v8  ;;  %v2111_v48 = vmul.f32 %v2100_v24, %v2100_v24 }
 0xaec   :  { %v2103_v53 = vadd.f32 %v2102_v51, %v2098_v22  ;;  %v2112_v5 = vadd.f32 %v2109_v16, %v2108_v42  ;;  %v796_v42 = vmul.f32 %v7138_v44, %v743_v40 }
 0xaee   :  { %v2104_v49 = vadd.f32 %v2103_v53, %v2100_v24  ;;  %v2113_v14 = vadd.f32 %v2112_v5, %v2110_v26 }
 0xaf0   :  { %2105 = vadd.xlane.f32.xlu1 %v2104_v49  ;;  %v2114_v63 = vadd.f32 %v2113_v14, %v2111_v48  ;;  %v850_v14 = vadd.f32 %v7159_v47, %v797_v19 }
 0xaf4   :  { %2115 = vadd.xlane.f32.xlu1 %v2114_v63 }
 0xb79   :  { %v2106_v38 = vpop.xlane.xlu1 %2105 }
 0xb7a   :  { %v2107_v15 = vmul.f32 0.0078125, %v2106_v38 }
 0xb7c   :  { %v2118_v13 = vmul.f32 %v2107_v15, %v2107_v15  ;;  %v2121_v37 = vsub.f32 %v2027_v28, %v2107_v15  ;;  %v2122_v6 = vsub.f32 %v2029_v8, %v2107_v15  ;;  %v2123_v10 = vsub.f32 %v2098_v22, %v2107_v15 }
 0xb7d   :  { %v2116_v17 = vpop.xlane.xlu1 %2115  ;;  %v848_v28 = vadd.f32 %v7141_v41, %v795_v57  ;;  %v849_v22 = vadd.f32 %v7144_v0, %v796_v42 }
 0xb7e   :  { %v2117_v11 = vmul.f32 0.0078125, %v2116_v17  ;;  %v2124_v17 = vsub.f32 %v2100_v24, %v2107_v15 }
 0xb80   :  { %v2119_v35 = vsub.f32 %v2117_v11, %v2118_v13 }
 0xb82   :  { %v2120_v56 = vmax.f32 %v2119_v35, 0.0  ;;  %v697_v35 = vsub.f32 %v10780_v59, %v7749_v12 }
 0xb84   :  { %v2125_v3 = vadd.f32 1e-05, %v2120_v56 }
 0xb86   :  { %5744 = vrsqrt.f32 %v2125_v3  ;;  %v745_v3 = vmul.f32 %v7760_v39, %v697_v35  ;;  %v10831_v39 = vld [vmem:[#allocation85_spill] sm:$0xff] }
 0xb87   :  { %v594_v19 = vmul.f32 %v10831_v39, %v10831_v39 }
 0xb88   :  { %v798_v9 = vmul.f32 %v7192_v46, %v745_v3 }
 0xb8a   :  { %v851_v40 = vadd.f32 %v7200_v50, %v798_v9 }
 0xb93   :  { %v5745_v18 = vpop.eup %5744 }
 0xb94   :  { %v2127_v51 = vmul.f32 %v5745_v18, %v2121_v37  ;;  %v2128_v16 = vmul.f32 %v5745_v18, %v2122_v6  ;;  %v2129_v26 = vmul.f32 %v5745_v18, %v2123_v10  ;;  %v2130_v56 = vmul.f32 %v5745_v18, %v2124_v17  ;;  %v10832_v18 = vld [vmem:[#allocation87_spill] sm:$0xff] }
 0xb95   :  { %v551_v57 = vadd.f32 %v10832_v18, %v10831_v39  ;;  %v595_v42 = vmul.f32 %v10832_v18, %v10832_v18 }
 0xb96   :  { %v2131_v58 = vmul.f32 %v2127_v51, %v7150_v52  ;;  %v2132_v53 = vmul.f32 %v2128_v16, %v10666_v1  ;;  %v2133_v5 = vmul.f32 %v2129_v26, %v7165_v34  ;;  %v2134_v33 = vmul.f32 %v2130_v56, %v7189_v32 }
 0xb98   :  { %v2135_v8 = vadd.f32 %v2131_v58, %v7156_v45  ;;  %v2136_v49 = vadd.f32 %v2132_v53, %v7170_v54  ;;  %v2137_v48 = vadd.f32 %v2133_v5, %v7173_v30  ;;  %v2138_v27 = vadd.f32 %v2134_v33, %v7195_v25  ;;  %v10833_v58 = vld [vmem:[#allocation88_spill] sm:$0xff] }
 0xb99   :  { %v596_v53 = vmul.f32 %v10833_v58, %v10833_v58 }
 0xb9a   :  { %v2144_v20 = vadd.f32 %v2135_v8, %v848_v28  ;;  %v2145_v63 = vadd.f32 %v2136_v49, %v849_v22  ;;  %v2146_v38 = vadd.f32 %v2137_v48, %v850_v14  ;;  %v2147_v37 = vadd.f32 %v2138_v27, %v851_v40  ;;  %v10834_v49 = vld [vmem:[#allocation90_spill] sm:$0xff] }
 0xb9b   :  { %v552_v28 = vadd.f32 %v551_v57, %v10833_v58  ;;  %v631_v22 = vadd.f32 %v595_v42, %v594_v19 }
 0xb9c   :  { %v5592_v13 = vmul.f32 -1.442695, %v2144_v20  ;;  %v5593_v11 = vmul.f32 -1.442695, %v2145_v63  ;;  %v5594_v9 = vmul.f32 -1.442695, %v2146_v38 }
 0xb9d   :  { %v553_v14 = vadd.f32 %v552_v28, %v10834_v49  ;;  %v632_v48 = vadd.f32 %v631_v22, %v596_v53 }
 0xb9e   :  { %5746 = vpow2.f32 %v5592_v13 }
 0xb9f   :  { %5748 = vpow2.f32 %v5593_v11 }
 0xba0   :  { %5750 = vtanh.f32 %v2147_v37 }
 0xbab   :  { %v5747_v24 = vpop.eup %5746 }
 0xbac   :  { %v5749_v15 = vpop.eup %5748  ;;  %v2151_v6 = vadd.f32 1.0, %v5747_v24 }
 0xbad   :  { %v2157_v10 = vadd.f32 1.0, %v5749_v15  ;;  %v5751_v59 = vpop.eup %5750 }
 0xbae   :  { %5752 = vrcp.f32 %v2151_v6 }
 0xbaf   :  { %5754 = vrcp.f32 %v2157_v10 }
 0xbb0   :  { %5756 = vpow2.f32 %v5594_v9  ;;  %v7940_v9 = vld [vmem:[#allocation12 + $0x198] sm:$0xff] }
 0xbbb   :  { %v5753_v12 = vpop.eup %5752 }
 0xbbc   :  { %v5755_v51 = vpop.eup %5754  ;;  %v2168_v16 = vmul.f32 %v5753_v12, %v5751_v59 }
 0xbbd   :  { %v2167_v26 = vmul.f32 %v5755_v51, %v7740_v7  ;;  %v597_v7 = vmul.f32 %v10834_v49, %v10834_v49  ;;  %v5757_v12 = vpop.eup %5756 }
 0xbbf   :  { %v7880_v5 = vadd.f32 %v2168_v16, %v2167_v26  ;;  %v633_v20 = vadd.f32 %v632_v48, %v597_v7  ;;  %v2163_v16 = vadd.f32 1.0, %v5757_v12  ;;  %v7907_v48 = vld [vmem:[#allocation12 + $0x1e0] sm:$0xff]  ;;  %v7910_v7 = vld [vmem:[#allocation12 + $0x1f0] sm:$0xff] }
 0xbc0   :  { %v7967_v12 = vld [vmem:[#allocation12 + $0x140] sm:$0xff] }
 0xbc1   :  { %2170 = vadd.xlane.f32.xlu0 %v7880_v5  ;;  %v2173_v8 = vmul.f32 %v7880_v5, %v7880_v5  ;;  %10841 = vst [vmem:[#allocation81_spill] sm:$0xff] %v7967_v12 }
 0xbc3   :  { %2174 = vadd.xlane.f32.xlu1 %v2173_v8 }
 0xbc5   :  { %554 = vadd.xlane.f32.xlu0 %v553_v14 }
 0xbc9   :  { %634 = vadd.xlane.f32.xlu0 %v633_v20  ;;  %v7916_v20 = vld [vmem:[#allocation12 + $0x1d8] sm:$0xff] }
 0xc4a   :  { %v2171_v63 = vpop.xlane.xlu0 %2170 }
 0xc4b   :  { %v2172_v17 = vmul.f32 0.03125, %v2171_v63  ;;  %v7919_v63 = vld [vmem:[#allocation12 + $0x1c0] sm:$0xff] }
 0xc4c   :  { %v2175_v13 = vpop.xlane.xlu1 %2174 }
 0xc4d   :  { %v2177_v11 = vmul.f32 %v2172_v17, %v2172_v17  ;;  %v2176_v35 = vmul.f32 0.03125, %v2175_v13  ;;  %v2180_v57 = vsub.f32 %v7880_v5, %v2172_v17  ;;  %v7922_v17 = vld [vmem:[#allocation12 + $0x1d0] sm:$0xff]  ;;  %v7925_v13 = vld [vmem:[#allocation12 + $0x1a8] sm:$0xff] }
 0xc4e   :  { %v555_v56 = vpop.xlane.xlu0 %554 }
 0xc4f   :  { %v2178_v3 = vsub.f32 %v2176_v35, %v2177_v11  ;;  %v7889_v33 = vmul.f32 0.0078125, %v555_v56  ;;  %v7928_v11 = vld [vmem:[#allocation12 + $0x1b8] sm:$0xff]  ;;  %v7931_v35 = vld [vmem:[#allocation12 + $0x1a0] sm:$0xff]  ;;  %v7934_v56 = vld [vmem:[#allocation12 + $0x1b0] sm:$0xff] }
 0xc51   :  { %v2179_v27 = vmax.f32 %v2178_v3, 0.0  ;;  %v659_v24 = vmul.f32 %v7889_v33, %v7889_v33  ;;  %v700_v53 = vsub.f32 %v10833_v58, %v7889_v33  ;;  %v7913_v58 = vld [vmem:[#allocation12 + $0x1c8] sm:$0xff] }
 0xc52   :  { %v635_v40 = vpop.xlane.xlu0 %634  ;;  %v7937_v3 = vld [vmem:[#allocation12 + $0x188] sm:$0xff] }
 0xc53   :  { %v2181_v37 = vadd.f32 1e-05, %v2179_v27  ;;  %v651_v15 = vmul.f32 0.0078125, %v635_v40  ;;  %v7943_v27 = vld [vmem:[#allocation12 + $0x180] sm:$0xff]  ;;  %v7946_v40 = vld [vmem:[#allocation12 + $0x190] sm:$0xff] }
 0xc55   :  { %5758 = vrsqrt.f32 %v2181_v37  ;;  %v667_v6 = vsub.f32 %v651_v15, %v659_v24  ;;  %v7949_v37 = vld [vmem:[#allocation12 + $0x168] sm:$0xff]  ;;  %v7952_v24 = vld [vmem:[#allocation12 + $0x178] sm:$0xff]  ;;  %v7955_v15 = vld [vmem:[#allocation12 + $0x160] sm:$0xff] }
 0xc56   :  { %10836 = vst [vmem:[#allocation82_spill] sm:$0xff] %v7952_v24  ;;  %10837 = vst [vmem:[#allocation34_spill] sm:$0xff] %v7955_v15 }
 0xc57   :  { %v675_v10 = vmax.f32 %v667_v6, 0.0  ;;  %v7958_v6 = vld [vmem:[#allocation12 + $0x170] sm:$0xff] }
 0xc58   :  { %10838 = vst [vmem:[#allocation30_spill] sm:$0xff] %v7958_v6 }
 0xc59   :  { %v715_v59 = vadd.f32 1e-05, %v675_v10  ;;  %v7961_v10 = vld [vmem:[#allocation12 + $0x148] sm:$0xff] }
 0xc5a   :  { %10839 = vst [vmem:[#allocation28_spill] sm:$0xff] %v7961_v10 }
 0xc5b   :  { %5760 = vrsqrt.f32 %v715_v59  ;;  %v7964_v59 = vld [vmem:[#allocation12 + $0x158] sm:$0xff] }
 0xc5c   :  { %5762 = vrcp.f32 %v2163_v16  ;;  %10840 = vst [vmem:[#allocation32_spill] sm:$0xff] %v7964_v59  ;;  %v7979_v16 = vld [vmem:[#allocation12 + $0x120] sm:$0xff] }
 0xc5d   :  { %10845 = vst [vmem:[#allocation36_spill] sm:$0xff] %v7979_v16 }
 0xc62   :  { %v5759_v42 = vpop.eup %5758 }
 0xc63   :  { %v2183_v51 = vmul.f32 %v5759_v42, %v2180_v57  ;;  %v7970_v57 = vld [vmem:[#allocation12 + $0x150] sm:$0xff]  ;;  %v7973_v42 = vld [vmem:[#allocation12 + $0x128] sm:$0xff] }
 0xc64   :  { %10842 = vst [vmem:[#allocation83_spill] sm:$0xff] %v7970_v57  ;;  %10843 = vst [vmem:[#allocation84_spill] sm:$0xff] %v7973_v42 }
 0xc65   :  { %v2184_v38 = vmul.f32 %v7754_v31, %v2183_v51  ;;  %v7976_v51 = vld [vmem:[#allocation12 + $0x138] sm:$0xff] }
 0xc66   :  { %10844 = vst [vmem:[#allocation86_spill] sm:$0xff] %v7976_v51 }
 0xc67   :  { %v2185_v19 = vadd.f32 %v7757_v21, %v2184_v38  ;;  %v7982_v38 = vld [vmem:[#allocation12 + $0x130] sm:$0xff] }
 0xc68   :  { %v7896_v26 = vpop.eup %5760  ;;  %10846 = vst [vmem:[#allocation31_spill] sm:$0xff] %v7982_v38 }
 0xc69   :  { %5764 = vtanh.f32 %v2185_v19  ;;  %v7901_v28 = vmul.f32 %v7896_v26, %v700_v53  ;;  %v5763_v22 = vpop.eup %5762  ;;  %v7985_v19 = vld [vmem:[#allocation12 + $0x108] sm:$0xff]  ;;  %v7988_v53 = vld [vmem:[#allocation12 + $0x118] sm:$0xff] }
 0xc6a   :  { %10847 = vst [vmem:[#allocation38_spill] sm:$0xff] %v7985_v19  ;;  %10848 = vst [vmem:[#allocation33_spill] sm:$0xff] %v7988_v53 }
 0xc76   :  { %v5765_v8 = vpop.eup %5764 }
 0xc77   :  { %v7903_v14 = vmul.f32 %v5765_v8, %v5763_v22  ;;  %v7991_v22 = vld [vmem:[#allocation12 + $0x100] sm:$0xff]  ;;  %v7994_v8 = vld [vmem:[#allocation12 + $0x110] sm:$0xff] }
 0xc78   :  { %10849 = vst [vmem:[#allocation40_spill] sm:$0xff] %v7991_v22  ;;  %10850 = vst [vmem:[#allocation35_spill] sm:$0xff] %v7994_v8 }
 0xc79   :  { %10835 = vst [vmem:[#allocation80_spill] sm:$0xff] %v7903_v14  ;;  %2255 = vmatmul.mubr.f32.vlgmr.msra.gmra.mxu0 %v7903_v14  ;;  %2326 = vmatmul.mubr.f32.vlgmr.msra.gmra.mxu1 %v7903_v14  ;;  %v7997_v14 = vld [vmem:[#allocation12 + $0xe8] sm:$0xff] }
 0xc7a   :  { %2421 = vmatpush1.msra.mxu0 %v7907_v48  ;;  %2492 = vmatpush1.msra.mxu1 %v7910_v7  ;;  %10851 = vst [vmem:[#allocation42_spill] sm:$0xff] %v7997_v14 }
 0xc7b   :  { %2422 = vmatprep.subr.mxu0 %v7913_v58  ;;  %2493 = vmatprep.subr.mxu1 %v7916_v20 }
 0xc7c   :  { %2423 = vmatpush1.msra.mxu0 %v7919_v63  ;;  %2494 = vmatpush1.msra.mxu1 %v7922_v17 }
 0xc7d   :  { %2424 = vmatprep.subr.mxu0 %v7925_v13  ;;  %2495 = vmatprep.subr.mxu1 %v7928_v11 }
 0xc7e   :  { %2425 = vmatpush1.msra.mxu0 %v7931_v35  ;;  %2496 = vmatpush1.msra.mxu1 %v7934_v56 }
 0xc7f   :  { %2426 = vmatprep.subr.mxu0 %v7937_v3  ;;  %2497 = vmatprep.subr.mxu1 %v7940_v9 }
 0xc80   :  { %2427 = vmatpush1.msra.mxu0 %v7943_v27  ;;  %2498 = vmatpush1.msra.mxu1 %v7946_v40 }
 0xc81   :  { %2428 = vmatprep.subr.mxu0 %v7949_v37  ;;  %2499 = vmatprep.subr.mxu1 %v7952_v24 }
 0xc82   :  { %2429 = vmatpush1.msra.mxu0 %v7955_v15  ;;  %2500 = vmatpush1.msra.mxu1 %v7958_v6 }
 0xc83   :  { %2430 = vmatprep.subr.mxu0 %v7961_v10  ;;  %2501 = vmatprep.subr.mxu1 %v7964_v59 }
 0xc84   :  { %2431 = vmatpush1.msra.mxu0 %v7967_v12  ;;  %2502 = vmatpush1.msra.mxu1 %v7970_v57 }
 0xc85   :  { %2432 = vmatprep.subr.mxu0 %v7973_v42  ;;  %2503 = vmatprep.subr.mxu1 %v7976_v51 }
 0xc86   :  { %2433 = vmatpush1.msra.mxu0 %v7979_v16  ;;  %2504 = vmatpush1.msra.mxu1 %v7982_v38 }
 0xc87   :  { %2434 = vmatprep.subr.mxu0 %v7985_v19  ;;  %2505 = vmatprep.subr.mxu1 %v7988_v53  ;;  %v8003_v19 = vld [vmem:[#allocation12 + $0xe0] sm:$0xff]  ;;  %v8006_v53 = vld [vmem:[#allocation12 + $0xf0] sm:$0xff] }
 0xc88   :  { %2435 = vmatpush1.msra.mxu0 %v7991_v22  ;;  %2506 = vmatpush1.msra.mxu1 %v7994_v8  ;;  %10853 = vst [vmem:[#allocation44_spill] sm:$0xff] %v8003_v19  ;;  %10854 = vst [vmem:[#allocation39_spill] sm:$0xff] %v8006_v53  ;;  %v8009_v22 = vld [vmem:[#allocation12 + $0xc8] sm:$0xff]  ;;  %v8012_v8 = vld [vmem:[#allocation12 + $0xd8] sm:$0xff] }
 0xc89   :  { %2436 = vmatprep.subr.mxu0 %v7997_v14  ;;  %2507 = vmatprep.subr.mxu1 %v8000_v23  ;;  %10855 = vst [vmem:[#allocation46_spill] sm:$0xff] %v8009_v22  ;;  %10856 = vst [vmem:[#allocation41_spill] sm:$0xff] %v8012_v8  ;;  %v8015_v14 = vld [vmem:[#allocation12 + $0xc0] sm:$0xff]  ;;  %v8018_v23 = vld [vmem:[#allocation12 + $0xd0] sm:$0xff] }
 0xc8a   :  { %2437 = vmatpush1.msra.mxu0 %v8003_v19  ;;  %2508 = vmatpush1.msra.mxu1 %v8006_v53  ;;  %10857 = vst [vmem:[#allocation48_spill] sm:$0xff] %v8015_v14  ;;  %10858 = vst [vmem:[#allocation43_spill] sm:$0xff] %v8018_v23  ;;  %v8021_v19 = vld [vmem:[#allocation12 + $0xa8] sm:$0xff]  ;;  %v8024_v53 = vld [vmem:[#allocation12 + $0xb8] sm:$0xff] }
 0xc8b   :  { %2438 = vmatprep.subr.mxu0 %v8009_v22  ;;  %2509 = vmatprep.subr.mxu1 %v8012_v8  ;;  %10859 = vst [vmem:[#allocation50_spill] sm:$0xff] %v8021_v19  ;;  %10860 = vst [vmem:[#allocation45_spill] sm:$0xff] %v8024_v53  ;;  %v8027_v22 = vld [vmem:[#allocation12 + $0xa0] sm:$0xff]  ;;  %v8030_v8 = vld [vmem:[#allocation12 + $0xb0] sm:$0xff] }
 0xc8c   :  { %2439 = vmatpush1.msra.mxu0 %v8015_v14  ;;  %2510 = vmatpush1.msra.mxu1 %v8018_v23  ;;  %10861 = vst [vmem:[#allocation52_spill] sm:$0xff] %v8027_v22  ;;  %10862 = vst [vmem:[#allocation47_spill] sm:$0xff] %v8030_v8  ;;  %v8033_v14 = vld [vmem:[#allocation12 + $0x88] sm:$0xff]  ;;  %v8036_v23 = vld [vmem:[#allocation12 + $0x98] sm:$0xff] }
 0xc8d   :  { %2440 = vmatprep.subr.mxu0 %v8021_v19  ;;  %2511 = vmatprep.subr.mxu1 %v8024_v53  ;;  %10863 = vst [vmem:[#allocation54_spill] sm:$0xff] %v8033_v14  ;;  %10864 = vst [vmem:[#allocation49_spill] sm:$0xff] %v8036_v23  ;;  %v8039_v19 = vld [vmem:[#allocation12 + $0x80] sm:$0xff]  ;;  %v8042_v53 = vld [vmem:[#allocation12 + $0x90] sm:$0xff] }
 0xc8e   :  { %2441 = vmatpush1.msra.mxu0 %v8027_v22  ;;  %2512 = vmatpush1.msra.mxu1 %v8030_v8  ;;  %10865 = vst [vmem:[#allocation56_spill] sm:$0xff] %v8039_v19  ;;  %10866 = vst [vmem:[#allocation51_spill] sm:$0xff] %v8042_v53  ;;  %v8045_v22 = vld [vmem:[#allocation12 + $0x68] sm:$0xff]  ;;  %v8048_v8 = vld [vmem:[#allocation12 + $0x78] sm:$0xff] }
 0xc8f   :  { %2442 = vmatprep.subr.mxu0 %v8033_v14  ;;  %2513 = vmatprep.subr.mxu1 %v8036_v23  ;;  %10867 = vst [vmem:[#allocation58_spill] sm:$0xff] %v8045_v22  ;;  %10868 = vst [vmem:[#allocation53_spill] sm:$0xff] %v8048_v8  ;;  %v8051_v14 = vld [vmem:[#allocation12 + $0x60] sm:$0xff]  ;;  %v8054_v23 = vld [vmem:[#allocation12 + $0x70] sm:$0xff] }
 0xc90   :  { %2443 = vmatpush1.msra.mxu0 %v8039_v19  ;;  %2514 = vmatpush1.msra.mxu1 %v8042_v53  ;;  %10869 = vst [vmem:[#allocation60_spill] sm:$0xff] %v8051_v14  ;;  %10870 = vst [vmem:[#allocation55_spill] sm:$0xff] %v8054_v23  ;;  %v8057_v19 = vld [vmem:[#allocation12 + $0x48] sm:$0xff]  ;;  %v8060_v53 = vld [vmem:[#allocation12 + $0x58] sm:$0xff] }
 0xc91   :  { %2444 = vmatprep.subr.mxu0 %v8045_v22  ;;  %2515 = vmatprep.subr.mxu1 %v8048_v8  ;;  %10871 = vst [vmem:[#allocation62_spill] sm:$0xff] %v8057_v19  ;;  %10872 = vst [vmem:[#allocation57_spill] sm:$0xff] %v8060_v53  ;;  %v8063_v22 = vld [vmem:[#allocation12 + $0x40] sm:$0xff]  ;;  %v8066_v8 = vld [vmem:[#allocation12 + $0x50] sm:$0xff] }
 0xc92   :  { %2445 = vmatpush1.msra.mxu0 %v8051_v14  ;;  %2516 = vmatpush1.msra.mxu1 %v8054_v23  ;;  %10873 = vst [vmem:[#allocation64_spill] sm:$0xff] %v8063_v22  ;;  %10874 = vst [vmem:[#allocation59_spill] sm:$0xff] %v8066_v8  ;;  %v8069_v14 = vld [vmem:[#allocation12 + $0x28] sm:$0xff]  ;;  %v8072_v23 = vld [vmem:[#allocation12 + $0x38] sm:$0xff] }
 0xc93   :  { %2446 = vmatprep.subr.mxu0 %v8057_v19  ;;  %2517 = vmatprep.subr.mxu1 %v8060_v53  ;;  %10875 = vst [vmem:[#allocation66_spill] sm:$0xff] %v8069_v14  ;;  %10876 = vst [vmem:[#allocation61_spill] sm:$0xff] %v8072_v23  ;;  %v8075_v19 = vld [vmem:[#allocation12 + $0x20] sm:$0xff]  ;;  %v8078_v53 = vld [vmem:[#allocation12 + $0x30] sm:$0xff] }
 0xc94   :  { %2447 = vmatpush1.msra.mxu0 %v8063_v22  ;;  %2518 = vmatpush1.msra.mxu1 %v8066_v8  ;;  %10877 = vst [vmem:[#allocation67_spill] sm:$0xff] %v8075_v19  ;;  %10878 = vst [vmem:[#allocation63_spill] sm:$0xff] %v8078_v53  ;;  %v8081_v22 = vld [vmem:[#allocation12 + $0x8] sm:$0xff]  ;;  %v8084_v8 = vld [vmem:[#allocation12 + $0x18] sm:$0xff] }
 0xc95   :  { %2448 = vmatprep.subr.mxu0 %v8069_v14  ;;  %2519 = vmatprep.subr.mxu1 %v8072_v23  ;;  %10879 = vst [vmem:[#allocation68_spill] sm:$0xff] %v8081_v22  ;;  %10880 = vst [vmem:[#allocation65_spill] sm:$0xff] %v8084_v8  ;;  %v8087_v14 = vld [vmem:[#allocation12] sm:$0xff]  ;;  %v8091_v23 = vld [vmem:[#allocation12 + $0x10] sm:$0xff] }
 0xc96   :  { %2449 = vmatpush1.msra.mxu0 %v8075_v19  ;;  %2520 = vmatpush1.msra.mxu1 %v8078_v53  ;;  %10881 = vst [vmem:[#allocation69_spill] sm:$0xff] %v8087_v14  ;;  %10882 = vst [vmem:[#allocation101_spill] sm:$0xff] %v8091_v23 }
 0xc97   :  { %2450 = vmatprep.subr.mxu0 %v8081_v22  ;;  %2521 = vmatprep.subr.mxu1 %v8084_v8 }
 0xc98   :  { %2451 = vmatpush1.msra.mxu0 %v8087_v14  ;;  %2484 = vmatprep.mubr.f32.mxu0 %v10826_v55 }
 0xc99   :  { %2522 = vmatpush1.msra.mxu1 %v8091_v23  ;;  %2555 = vmatprep.mubr.f32.mxu1 %v10826_v55 }
 0xc9a   :  { %2650 = vmatprep.subr.mxu0 %v7835_v2  ;;  %2721 = vmatprep.subr.mxu1 %v7838_v4 }
 0xd39   :  { %v2256_v22 = vpop.f32.mrf.mxu0  ;;  %v2327_v53 = vpop.f32.mrf.mxu1 }
 0xd3a   :  { %v2257_v8 = vadd.f32 %v2256_v22, %v10828_v62  ;;  %v2328_v38 = vadd.f32 %v2327_v53, %v10829_v36 }
 0xd3b   :  { %v2258_v19 = vpop.f32.mrf.mxu0  ;;  %v2329_v16 = vpop.f32.mrf.mxu1 }
 0xd3c   :  { %v2259_v14 = vadd.f32 %v2258_v19, %v10830_v61  ;;  %v2338_v51 = vmul.f32 %v2257_v8, %v2257_v8  ;;  %v2340_v23 = vmul.f32 %v2328_v38, %v2328_v38  ;;  %v2330_v55 = vadd.f32 %v2329_v16, %v10664_v60 }
 0xd3d   :  { %v698_v16 = vsub.f32 %v10831_v39, %v7889_v33  ;;  %v801_v39 = vmul.f32 %v10665_v29, %v7901_v28 }
 0xd3e   :  { %v2332_v42 = vadd.f32 %v2259_v14, %v2257_v8  ;;  %v2339_v57 = vmul.f32 %v2259_v14, %v2259_v14  ;;  %v2341_v10 = vmul.f32 %v2330_v55, %v2330_v55 }
 0xd40   :  { %v2333_v12 = vadd.f32 %v2332_v42, %v2328_v38  ;;  %v2342_v2 = vadd.f32 %v2339_v57, %v2338_v51 }
 0xd42   :  { %v2334_v59 = vadd.f32 %v2333_v12, %v2330_v55  ;;  %v2343_v4 = vadd.f32 %v2342_v2, %v2340_v23  ;;  %v699_v12 = vsub.f32 %v10832_v18, %v7889_v33  ;;  %v746_v23 = vmul.f32 %v7896_v26, %v698_v16 }
 0xd44   :  { %2335 = vadd.xlane.f32.xlu1 %v2334_v59  ;;  %v2344_v6 = vadd.f32 %v2343_v4, %v2341_v10  ;;  %v747_v10 = vmul.f32 %v7896_v26, %v699_v12  ;;  %v799_v51 = vmul.f32 %v7135_v43, %v746_v23 }
 0xd48   :  { %2345 = vadd.xlane.f32.xlu1 %v2344_v6 }
 0xdcd   :  { %v2336_v22 = vpop.xlane.xlu1 %2335 }
 0xdce   :  { %v2337_v62 = vmul.f32 0.0078125, %v2336_v22 }
 0xdd0   :  { %v2348_v36 = vmul.f32 %v2337_v62, %v2337_v62  ;;  %v2351_v6 = vsub.f32 %v2257_v8, %v2337_v62  ;;  %v2352_v59 = vsub.f32 %v2259_v14, %v2337_v62  ;;  %v2353_v57 = vsub.f32 %v2328_v38, %v2337_v62 }
 0xdd1   :  { %v2346_v53 = vpop.xlane.xlu1 %2345  ;;  %v852_v14 = vadd.f32 %v7141_v41, %v799_v51  ;;  %v2354_v23 = vsub.f32 %v2330_v55, %v2337_v62 }
 0xdd2   :  { %v2347_v19 = vmul.f32 0.0078125, %v2346_v53  ;;  %v854_v53 = vadd.f32 %v7159_v47, %v801_v39 }
 0xdd4   :  { %v2349_v61 = vsub.f32 %v2347_v19, %v2348_v36  ;;  %v800_v36 = vmul.f32 %v7138_v44, %v747_v10 }
 0xdd6   :  { %v2350_v15 = vmax.f32 %v2349_v61, 0.0  ;;  %v853_v38 = vadd.f32 %v7144_v0, %v800_v36 }
 0xdd8   :  { %v2355_v24 = vadd.f32 1e-05, %v2350_v15 }
 0xdda   :  { %5766 = vrsqrt.f32 %v2355_v24 }
 0xde7   :  { %v5767_v42 = vpop.eup %5766 }
 0xde8   :  { %v2357_v61 = vmul.f32 %v5767_v42, %v2351_v6  ;;  %v2358_v24 = vmul.f32 %v5767_v42, %v2352_v59  ;;  %v2359_v15 = vmul.f32 %v5767_v42, %v2353_v57  ;;  %v701_v59 = vsub.f32 %v10834_v49, %v7889_v33 }
 0xde9   :  { %v2360_v57 = vmul.f32 %v5767_v42, %v2354_v23  ;;  %v10884_v42 = vld [vmem:[#allocation91_spill] sm:$0xff] }
 0xdea   :  { %v2361_v18 = vmul.f32 %v2357_v61, %v7150_v52  ;;  %v2362_v2 = vmul.f32 %v2358_v24, %v10666_v1  ;;  %v2363_v4 = vmul.f32 %v2359_v15, %v7165_v34  ;;  %v749_v51 = vmul.f32 %v7896_v26, %v701_v59  ;;  %v10883_v26 = vld [vmem:[#allocation89_spill] sm:$0xff]  ;;  %v10886_v59 = vld [vmem:[#allocation94_spill] sm:$0xff] }
 0xdeb   :  { %v2364_v36 = vmul.f32 %v2360_v57, %v7189_v32 }
 0xdec   :  { %v2365_v8 = vadd.f32 %v2361_v18, %v7156_v45  ;;  %v2366_v22 = vadd.f32 %v2362_v2, %v7170_v54  ;;  %v2367_v19 = vadd.f32 %v2363_v4, %v7173_v30  ;;  %v802_v61 = vmul.f32 %v7192_v46, %v749_v51 }
 0xded   :  { %v2368_v24 = vadd.f32 %v2364_v36, %v7195_v25  ;;  %v556_v4 = vadd.f32 %v10884_v42, %v10883_v26 }
 0xdee   :  { %v2374_v28 = vadd.f32 %v2365_v8, %v852_v14  ;;  %v2375_v16 = vadd.f32 %v2366_v22, %v853_v38  ;;  %v2376_v12 = vadd.f32 %v2367_v19, %v854_v53  ;;  %v855_v39 = vadd.f32 %v7200_v50, %v802_v61  ;;  %v10885_v19 = vld [vmem:[#allocation92_spill] sm:$0xff] }
 0xdef   :  { %v599_v14 = vmul.f32 %v10884_v42, %v10884_v42  ;;  %v598_v22 = vmul.f32 %v10883_v26, %v10883_v26  ;;  %v557_v23 = vadd.f32 %v556_v4, %v10885_v19 }
 0xdf0   :  { %v5595_v10 = vmul.f32 -1.442695, %v2374_v28  ;;  %v5596_v6 = vmul.f32 -1.442695, %v2375_v16  ;;  %v2377_v15 = vadd.f32 %v2368_v24, %v855_v39  ;;  %v600_v28 = vmul.f32 %v10885_v19, %v10885_v19 }
 0xdf1   :  { %v558_v57 = vadd.f32 %v557_v23, %v10886_v59 }
 0xdf2   :  { %5768 = vpow2.f32 %v5595_v10  ;;  %v636_v10 = vadd.f32 %v599_v14, %v598_v22 }
 0xdf3   :  { %5770 = vpow2.f32 %v5596_v6 }
 0xdf4   :  { %5772 = vtanh.f32 %v2377_v15  ;;  %v637_v51 = vadd.f32 %v636_v10, %v600_v28 }
 0xdff   :  { %v5769_v55 = vpop.eup %5768 }
 0xe00   :  { %v5771_v62 = vpop.eup %5770  ;;  %v2381_v18 = vadd.f32 1.0, %v5769_v55 }
 0xe01   :  { %v2387_v2 = vadd.f32 1.0, %v5771_v62  ;;  %v5773_v49 = vpop.eup %5772 }
 0xe02   :  { %5774 = vrcp.f32 %v2381_v18 }
 0xe03   :  { %5776 = vrcp.f32 %v2387_v2 }
 0xe0f   :  { %v5775_v33 = vpop.eup %5774 }
 0xe10   :  { %v5777_v38 = vpop.eup %5776  ;;  %v2398_v8 = vmul.f32 %v5775_v33, %v5773_v49  ;;  %v5597_v49 = vmul.f32 -1.442695, %v2376_v12 }
 0xe11   :  { %v2397_v53 = vmul.f32 %v5777_v38, %v7880_v5  ;;  %v601_v5 = vmul.f32 %v10886_v59, %v10886_v59 }
 0xe12   :  { %5778 = vpow2.f32 %v5597_v49  ;;  %v10907_v49 = vld [vmem:[#allocation41_spill] sm:$0xff] }
 0xe13   :  { %v8136_v16 = vadd.f32 %v2398_v8, %v2397_v53  ;;  %v638_v36 = vadd.f32 %v637_v51, %v601_v5 }
 0xe15   :  { %2400 = vadd.xlane.f32.xlu0 %v8136_v16  ;;  %v2403_v6 = vmul.f32 %v8136_v16, %v8136_v16 }
 0xe17   :  { %2404 = vadd.xlane.f32.xlu1 %v2403_v6 }
 0xe19   :  { %559 = vadd.xlane.f32.xlu0 %v558_v57 }
 0xe1d   :  { %639 = vadd.xlane.f32.xlu0 %v638_v36 }
 0xe1f   :  { %v5779_v23 = vpop.eup %5778 }
 0xe20   :  { %v2393_v51 = vadd.f32 1.0, %v5779_v23  ;;  %v10916_v23 = vld [vmem:[#allocation56_spill] sm:$0xff] }
 0xe9e   :  { %v2401_v61 = vpop.xlane.xlu0 %2400 }
 0xe9f   :  { %v2402_v24 = vmul.f32 0.03125, %v2401_v61 }
 0xea0   :  { %v2405_v39 = vpop.xlane.xlu1 %2404 }
 0xea1   :  { %v2407_v15 = vmul.f32 %v2402_v24, %v2402_v24  ;;  %v2406_v55 = vmul.f32 0.03125, %v2405_v39  ;;  %v2410_v10 = vsub.f32 %v8136_v16, %v2402_v24 }
 0xea2   :  { %v560_v62 = vpop.xlane.xlu0 %559 }
 0xea3   :  { %v2408_v18 = vsub.f32 %v2406_v55, %v2407_v15  ;;  %v8145_v2 = vmul.f32 0.0078125, %v560_v62  ;;  %v10905_v62 = vld [vmem:[#allocation39_spill] sm:$0xff] }
 0xea5   :  { %v2409_v33 = vmax.f32 %v2408_v18, 0.0  ;;  %v660_v38 = vmul.f32 %v8145_v2, %v8145_v2  ;;  %v704_v61 = vsub.f32 %v10885_v19, %v8145_v2  ;;  %v10904_v19 = vld [vmem:[#allocation44_spill] sm:$0xff]  ;;  %v10906_v18 = vld [vmem:[#allocation46_spill] sm:$0xff] }
 0xea6   :  { %v640_v4 = vpop.xlane.xlu0 %639 }
 0xea7   :  { %v2411_v14 = vadd.f32 1e-05, %v2409_v33  ;;  %v652_v8 = vmul.f32 0.0078125, %v640_v4  ;;  %v10908_v33 = vld [vmem:[#allocation48_spill] sm:$0xff]  ;;  %v10909_v4 = vld [vmem:[#allocation43_spill] sm:$0xff] }
 0xea9   :  { %5780 = vrsqrt.f32 %v2411_v14  ;;  %v668_v22 = vsub.f32 %v652_v8, %v660_v38  ;;  %v10910_v14 = vld [vmem:[#allocation50_spill] sm:$0xff]  ;;  %v10911_v38 = vld [vmem:[#allocation45_spill] sm:$0xff]  ;;  %v10912_v8 = vld [vmem:[#allocation52_spill] sm:$0xff] }
 0xeab   :  { %v676_v53 = vmax.f32 %v668_v22, 0.0  ;;  %v10913_v22 = vld [vmem:[#allocation47_spill] sm:$0xff] }
 0xead   :  { %v716_v28 = vadd.f32 1e-05, %v676_v53  ;;  %v10914_v53 = vld [vmem:[#allocation54_spill] sm:$0xff] }
 0xeaf   :  { %5782 = vrsqrt.f32 %v716_v28  ;;  %v10915_v28 = vld [vmem:[#allocation49_spill] sm:$0xff] }
 0xeb0   :  { %5784 = vrcp.f32 %v2393_v51  ;;  %v10920_v51 = vld [vmem:[#allocation60_spill] sm:$0xff] }
 0xeb6   :  { %v5781_v6 = vpop.eup %5780 }
 0xeb7   :  { %v2413_v57 = vmul.f32 %v5781_v6, %v2410_v10  ;;  %v10917_v10 = vld [vmem:[#allocation51_spill] sm:$0xff]  ;;  %v10918_v6 = vld [vmem:[#allocation58_spill] sm:$0xff] }
 0xeb9   :  { %v2414_v12 = vmul.f32 %v7754_v31, %v2413_v57  ;;  %v10887_v31 = vld [vmem:[#allocation82_spill] sm:$0xff]  ;;  %v10919_v57 = vld [vmem:[#allocation53_spill] sm:$0xff] }
 0xebb   :  { %v2415_v5 = vadd.f32 %v7757_v21, %v2414_v12  ;;  %v10888_v21 = vld [vmem:[#allocation34_spill] sm:$0xff]  ;;  %v10921_v12 = vld [vmem:[#allocation55_spill] sm:$0xff] }
 0xebc   :  { %v8152_v36 = vpop.eup %5782 }
 0xebd   :  { %5786 = vtanh.f32 %v2415_v5  ;;  %v8157_v39 = vmul.f32 %v8152_v36, %v704_v61  ;;  %v5785_v15 = vpop.eup %5784  ;;  %v10922_v5 = vld [vmem:[#allocation62_spill] sm:$0xff]  ;;  %v10923_v61 = vld [vmem:[#allocation57_spill] sm:$0xff] }
 0xeca   :  { %v5787_v55 = vpop.eup %5786 }
 0xecb   :  { %v8159_v24 = vmul.f32 %v5787_v55, %v5785_v15  ;;  %v10924_v15 = vld [vmem:[#allocation64_spill] sm:$0xff]  ;;  %v10925_v55 = vld [vmem:[#allocation59_spill] sm:$0xff] }
 0xecd   :  { %2485 = vmatmul.mubr.f32.vlgmr.msra.gmra.mxu0 %v8159_v24  ;;  %2556 = vmatmul.mubr.f32.vlgmr.msra.gmra.mxu1 %v8159_v24 }
 0xece   :  { %2651 = vmatpush1.msra.mxu0 %v7907_v48  ;;  %2722 = vmatpush1.msra.mxu1 %v7910_v7  ;;  %v10889_v48 = vld [vmem:[#allocation30_spill] sm:$0xff]  ;;  %v10890_v7 = vld [vmem:[#allocation28_spill] sm:$0xff] }
 0xecf   :  { %2652 = vmatprep.subr.mxu0 %v7913_v58  ;;  %2723 = vmatprep.subr.mxu1 %v7916_v20  ;;  %v10891_v58 = vld [vmem:[#allocation32_spill] sm:$0xff]  ;;  %v10892_v20 = vld [vmem:[#allocation81_spill] sm:$0xff] }
 0xed0   :  { %2653 = vmatpush1.msra.mxu0 %v7919_v63  ;;  %2724 = vmatpush1.msra.mxu1 %v7922_v17  ;;  %v10893_v63 = vld [vmem:[#allocation83_spill] sm:$0xff]  ;;  %v10894_v17 = vld [vmem:[#allocation84_spill] sm:$0xff] }
 0xed1   :  { %2654 = vmatprep.subr.mxu0 %v7925_v13  ;;  %2725 = vmatprep.subr.mxu1 %v7928_v11  ;;  %v10895_v13 = vld [vmem:[#allocation86_spill] sm:$0xff]  ;;  %v10896_v11 = vld [vmem:[#allocation36_spill] sm:$0xff] }
 0xed2   :  { %2655 = vmatpush1.msra.mxu0 %v7931_v35  ;;  %2726 = vmatpush1.msra.mxu1 %v7934_v56  ;;  %v10897_v35 = vld [vmem:[#allocation31_spill] sm:$0xff]  ;;  %v10898_v56 = vld [vmem:[#allocation38_spill] sm:$0xff] }
 0xed3   :  { %2656 = vmatprep.subr.mxu0 %v7937_v3  ;;  %2727 = vmatprep.subr.mxu1 %v7940_v9  ;;  %v10899_v3 = vld [vmem:[#allocation33_spill] sm:$0xff]  ;;  %v10900_v9 = vld [vmem:[#allocation40_spill] sm:$0xff] }
 0xed4   :  { %2657 = vmatpush1.msra.mxu0 %v7943_v27  ;;  %2728 = vmatpush1.msra.mxu1 %v7946_v40  ;;  %v10901_v27 = vld [vmem:[#allocation35_spill] sm:$0xff]  ;;  %v10902_v40 = vld [vmem:[#allocation42_spill] sm:$0xff] }
 0xed5   :  { %2658 = vmatprep.subr.mxu0 %v7949_v37  ;;  %2729 = vmatprep.subr.mxu1 %v10887_v31  ;;  %v10903_v37 = vld [vmem:[#allocation37_spill] sm:$0xff]  ;;  %v10926_v31 = vld [vmem:[#allocation66_spill] sm:$0xff] }
 0xed6   :  { %2659 = vmatpush1.msra.mxu0 %v10888_v21  ;;  %2730 = vmatpush1.msra.mxu1 %v10889_v48  ;;  %v10927_v21 = vld [vmem:[#allocation61_spill] sm:$0xff]  ;;  %v10928_v48 = vld [vmem:[#allocation67_spill] sm:$0xff] }
 0xed7   :  { %2660 = vmatprep.subr.mxu0 %v10890_v7  ;;  %2731 = vmatprep.subr.mxu1 %v10891_v58  ;;  %v10929_v7 = vld [vmem:[#allocation63_spill] sm:$0xff]  ;;  %v10930_v58 = vld [vmem:[#allocation68_spill] sm:$0xff] }
 0xed8   :  { %2661 = vmatpush1.msra.mxu0 %v10892_v20  ;;  %2732 = vmatpush1.msra.mxu1 %v10893_v63  ;;  %v10931_v20 = vld [vmem:[#allocation65_spill] sm:$0xff] }
 0xed9   :  { %2662 = vmatprep.subr.mxu0 %v10894_v17  ;;  %2733 = vmatprep.subr.mxu1 %v10895_v13  ;;  %v10932_v63 = vld [vmem:[#allocation69_spill] sm:$0xff]  ;;  %v10934_v13 = vmov 0.0  }
 0xeda   :  { %2663 = vmatpush1.msra.mxu0 %v10896_v11  ;;  %2734 = vmatpush1.msra.mxu1 %v10897_v35  ;;  %v10933_v17 = vld [vmem:[#allocation101_spill] sm:$0xff] }
 0xedb   :  { %2664 = vmatprep.subr.mxu0 %v10898_v56  ;;  %2735 = vmatprep.subr.mxu1 %v10899_v3  ;;  %v10935_v56 = vld [vmem:[#allocation96_spill] sm:$0xff] }
 0xedc   :  { %2665 = vmatpush1.msra.mxu0 %v10900_v9  ;;  %2736 = vmatpush1.msra.mxu1 %v10901_v27  ;;  %v10936_v27 = vld [vmem:[#allocation99_spill] sm:$0xff] }
 0xedd   :  { %2666 = vmatprep.subr.mxu0 %v10902_v40  ;;  %2737 = vmatprep.subr.mxu1 %v10903_v37  ;;  %v10937_v37 = vld [vmem:[#allocation97_spill] sm:$0xff] }
 0xede   :  { %2667 = vmatpush1.msra.mxu0 %v10904_v19  ;;  %2738 = vmatpush1.msra.mxu1 %v10905_v62 }
 0xedf   :  { %2668 = vmatprep.subr.mxu0 %v10906_v18  ;;  %2739 = vmatprep.subr.mxu1 %v10907_v49 }
 0xee0   :  { %2669 = vmatpush1.msra.mxu0 %v10908_v33  ;;  %2740 = vmatpush1.msra.mxu1 %v10909_v4 }
 0xee1   :  { %2670 = vmatprep.subr.mxu0 %v10910_v14  ;;  %2741 = vmatprep.subr.mxu1 %v10911_v38 }
 0xee2   :  { %2671 = vmatpush1.msra.mxu0 %v10912_v8  ;;  %2742 = vmatpush1.msra.mxu1 %v10913_v22 }
 0xee3   :  { %2672 = vmatprep.subr.mxu0 %v10914_v53  ;;  %2743 = vmatprep.subr.mxu1 %v10915_v28 }
 0xee4   :  { %2673 = vmatpush1.msra.mxu0 %v10916_v23  ;;  %2744 = vmatpush1.msra.mxu1 %v10917_v10 }
 0xee5   :  { %2674 = vmatprep.subr.mxu0 %v10918_v6  ;;  %2745 = vmatprep.subr.mxu1 %v10919_v57 }
 0xee6   :  { %2675 = vmatpush1.msra.mxu0 %v10920_v51  ;;  %2746 = vmatpush1.msra.mxu1 %v10921_v12 }
 0xee7   :  { %2676 = vmatprep.subr.mxu0 %v10922_v5  ;;  %2747 = vmatprep.subr.mxu1 %v10923_v61 }
 0xee8   :  { %2677 = vmatpush1.msra.mxu0 %v10924_v15  ;;  %2748 = vmatpush1.msra.mxu1 %v10925_v55  ;;  %v702_v55 = vsub.f32 %v10883_v26, %v8145_v2  ;;  %v805_v26 = vmul.f32 %v10665_v29, %v8157_v39 }
 0xee9   :  { %2678 = vmatprep.subr.mxu0 %v10926_v31  ;;  %2749 = vmatprep.subr.mxu1 %v10927_v21  ;;  %v703_v31 = vsub.f32 %v10884_v42, %v8145_v2 }
 0xeea   :  { %2679 = vmatpush1.msra.mxu0 %v10928_v48  ;;  %2750 = vmatpush1.msra.mxu1 %v10929_v7  ;;  %v750_v21 = vmul.f32 %v8152_v36, %v702_v55 }
 0xeeb   :  { %2680 = vmatprep.subr.mxu0 %v10930_v58  ;;  %2751 = vmatprep.subr.mxu1 %v10931_v20  ;;  %v751_v48 = vmul.f32 %v8152_v36, %v703_v31 }
 0xeec   :  { %2681 = vmatpush1.msra.mxu0 %v10932_v63  ;;  %2752 = vmatpush1.msra.mxu1 %v10933_v17  ;;  %v803_v17 = vmul.f32 %v7135_v43, %v750_v21 }
 0xeed   :  { %2714 = vmatprep.mubr.f32.mxu0 %v10934_v13  ;;  %2785 = vmatprep.mubr.f32.mxu1 %v10934_v13 }
 0xf8d   :  { %v2486_v11 = vpop.f32.mrf.mxu0  ;;  %v2557_v35 = vpop.f32.mrf.mxu1 }
 0xf8e   :  { %v2487_v3 = vadd.f32 %v2486_v11, %v10935_v56  ;;  %v2558_v40 = vadd.f32 %v2557_v35, %v10936_v27  ;;  %v804_v11 = vmul.f32 %v7138_v44, %v751_v48  ;;  %v10939_v48 = vld [vmem:[#allocation95_spill] sm:$0xff] }
 0xf8f   :  { %v2488_v9 = vpop.f32.mrf.mxu0  ;;  %v2559_v62 = vpop.f32.mrf.mxu1 }
 0xf90   :  { %v2489_v19 = vadd.f32 %v2488_v9, %v10937_v37  ;;  %v2568_v18 = vmul.f32 %v2487_v3, %v2487_v3  ;;  %v2570_v4 = vmul.f32 %v2558_v40, %v2558_v40  ;;  %v2560_v14 = vadd.f32 %v2559_v62, %v10664_v60 }
 0xf92   :  { %v2562_v49 = vadd.f32 %v2489_v19, %v2487_v3  ;;  %v2569_v33 = vmul.f32 %v2489_v19, %v2489_v19  ;;  %v2571_v28 = vmul.f32 %v2560_v14, %v2560_v14 }
 0xf94   :  { %v2563_v38 = vadd.f32 %v2562_v49, %v2558_v40  ;;  %v2572_v8 = vadd.f32 %v2569_v33, %v2568_v18 }
 0xf96   :  { %v2564_v22 = vadd.f32 %v2563_v38, %v2560_v14  ;;  %v2573_v53 = vadd.f32 %v2572_v8, %v2570_v4  ;;  %v858_v4 = vadd.f32 %v7159_v47, %v805_v26 }
 0xf98   :  { %2565 = vadd.xlane.f32.xlu1 %v2564_v22  ;;  %v2574_v23 = vadd.f32 %v2573_v53, %v2571_v28 }
 0xf9c   :  { %2575 = vadd.xlane.f32.xlu1 %v2574_v23 }
0x1021   :  { %v2566_v10 = vpop.xlane.xlu1 %2565 }
0x1022   :  { %v2567_v6 = vmul.f32 0.0078125, %v2566_v10  ;;  %v705_v10 = vsub.f32 %v10886_v59, %v8145_v2 }
0x1024   :  { %v2578_v51 = vmul.f32 %v2567_v6, %v2567_v6  ;;  %v2581_v7 = vsub.f32 %v2487_v3, %v2567_v6  ;;  %v2582_v58 = vsub.f32 %v2489_v19, %v2567_v6  ;;  %v2583_v20 = vsub.f32 %v2558_v40, %v2567_v6 }
0x1025   :  { %v2576_v57 = vpop.xlane.xlu1 %2575  ;;  %v856_v3 = vadd.f32 %v7141_v41, %v803_v17  ;;  %v857_v40 = vadd.f32 %v7144_v0, %v804_v11  ;;  %v2584_v53 = vsub.f32 %v2560_v14, %v2567_v6 }
0x1026   :  { %v2577_v12 = vmul.f32 0.0078125, %v2576_v57 }
0x1028   :  { %v2579_v5 = vsub.f32 %v2577_v12, %v2578_v51  ;;  %v753_v51 = vmul.f32 %v8152_v36, %v705_v10  ;;  %v10938_v36 = vld [vmem:[#allocation93_spill] sm:$0xff] }
0x1029   :  { %v602_v17 = vmul.f32 %v10938_v36, %v10938_v36 }
0x102a   :  { %v2580_v61 = vmax.f32 %v2579_v5, 0.0  ;;  %v806_v5 = vmul.f32 %v7192_v46, %v753_v51 }
0x102c   :  { %v2585_v15 = vadd.f32 1e-05, %v2580_v61 }
0x102e   :  { %5788 = vrsqrt.f32 %v2585_v15  ;;  %v859_v15 = vadd.f32 %v7200_v50, %v806_v5 }
0x103b   :  { %v5789_v63 = vpop.eup %5788 }
0x103c   :  { %v2587_v35 = vmul.f32 %v5789_v63, %v2581_v7  ;;  %v2588_v9 = vmul.f32 %v5789_v63, %v2582_v58  ;;  %v2589_v62 = vmul.f32 %v5789_v63, %v2583_v20  ;;  %v2590_v57 = vmul.f32 %v5789_v63, %v2584_v53 }
0x103d   :  { %v561_v7 = vadd.f32 %v10939_v48, %v10938_v36  ;;  %v603_v58 = vmul.f32 %v10939_v48, %v10939_v48 }
0x103e   :  { %v2591_v42 = vmul.f32 %v2587_v35, %v7150_v52  ;;  %v2592_v18 = vmul.f32 %v2588_v9, %v10666_v1  ;;  %v2593_v49 = vmul.f32 %v2589_v62, %v7165_v34  ;;  %v2594_v12 = vmul.f32 %v2590_v57, %v7189_v32  ;;  %v10940_v35 = vld [vmem:[#allocation98_spill] sm:$0xff] }
0x103f   :  { %v604_v9 = vmul.f32 %v10940_v35, %v10940_v35  ;;  %v562_v62 = vadd.f32 %v561_v7, %v10940_v35 }
0x1040   :  { %v2595_v19 = vadd.f32 %v2591_v42, %v7156_v45  ;;  %v2596_v33 = vadd.f32 %v2592_v18, %v7170_v54  ;;  %v2597_v38 = vadd.f32 %v2593_v49, %v7173_v30  ;;  %v2598_v61 = vadd.f32 %v2594_v12, %v7195_v25  ;;  %v10941_v49 = vld [vmem:[#allocation100_spill] sm:$0xff] }
0x1041   :  { %v641_v42 = vadd.f32 %v603_v58, %v602_v17 }
0x1042   :  { %v2604_v39 = vadd.f32 %v2595_v19, %v856_v3  ;;  %v2605_v8 = vadd.f32 %v2596_v33, %v857_v40  ;;  %v2606_v22 = vadd.f32 %v2597_v38, %v858_v4  ;;  %v2607_v55 = vadd.f32 %v2598_v61, %v859_v15  ;;  %v2950_v33 = vld [vmem:[#allocation10 + $0x3e8] sm:$0xff]  ;;  %v2952_v4 = vld [vmem:[#allocation10 + $0x3f8] sm:$0xff] }
0x1043   :  { %v563_v3 = vadd.f32 %v562_v62, %v10941_v49  ;;  %v642_v40 = vadd.f32 %v641_v42, %v604_v9  ;;  %2976 = vmatprep.subr.mxu0 %v2950_v33  ;;  %3089 = vmatprep.subr.mxu1 %v2952_v4  ;;  %v2948_v33 = vld [vmem:[#allocation10 + $0x3d8] sm:$0xff]  ;;  %v2945_v4 = vld [vmem:[#allocation10 + $0x3c0] sm:$0xff] }
0x1044   :  { %v5598_v28 = vmul.f32 -1.442695, %v2604_v39  ;;  %v5599_v23 = vmul.f32 -1.442695, %v2605_v8  ;;  %v5600_v51 = vmul.f32 -1.442695, %v2606_v22 }
0x1045   :  { %v8280_v22 = vld [vmem:[#allocation19] ss:$0 sm:$0xff] }
0x1046   :  { %5790 = vpow2.f32 %v5598_v28 }
0x1047   :  { %5792 = vpow2.f32 %v5599_v23 }
0x1048   :  { %5794 = vtanh.f32 %v2607_v55 }
0x1053   :  { %v5791_v14 = vpop.eup %5790 }
0x1054   :  { %v5793_v6 = vpop.eup %5792  ;;  %v2611_v31 = vadd.f32 1.0, %v5791_v14 }
0x1055   :  { %v2617_v21 = vadd.f32 1.0, %v5793_v6  ;;  %v5795_v59 = vpop.eup %5794 }
0x1056   :  { %5796 = vrcp.f32 %v2611_v31 }
0x1057   :  { %5798 = vrcp.f32 %v2617_v21 }
0x1058   :  { %5800 = vpow2.f32 %v5600_v51  ;;  %v2939_v51 = vld [vmem:[#allocation10 + $0x390] sm:$0xff] }
0x1063   :  { %v5797_v2 = vpop.eup %5796 }
0x1064   :  { %v5799_v20 = vpop.eup %5798  ;;  %v2628_v63 = vmul.f32 %v5797_v2, %v5795_v59 }
0x1065   :  { %v2627_v11 = vmul.f32 %v5799_v20, %v8136_v16  ;;  %v605_v16 = vmul.f32 %v10941_v49, %v10941_v49  ;;  %v5801_v21 = vpop.eup %5800 }
0x1066   :  { %v2623_v58 = vadd.f32 1.0, %v5801_v21  ;;  %v2926_v21 = vld [vmem:[#allocation10 + $0x328] sm:$0xff] }
0x1067   :  { %v8266_v26 = vadd.f32 %v2628_v63, %v2627_v11  ;;  %v643_v19 = vadd.f32 %v642_v40, %v605_v16  ;;  %v8283_v63 = vld [vmem:[#allocation21] ss:$0 sm:$0xff]  ;;  %v2951_v16 = vld [vmem:[#allocation10 + $0x3f0] sm:$0xff] }
0x1068   :  { %v2949_v40 = vld [vmem:[#allocation10 + $0x3e0] sm:$0xff] }
0x1069   :  { %2630 = vadd.xlane.f32.xlu0 %v8266_v26  ;;  %v2633_v18 = vmul.f32 %v8266_v26, %v8266_v26 }
0x106b   :  { %2634 = vadd.xlane.f32.xlu1 %v2633_v18 }
0x106d   :  { %564 = vadd.xlane.f32.xlu0 %v563_v3 }
0x1071   :  { %644 = vadd.xlane.f32.xlu0 %v643_v19  ;;  %v2946_v19 = vld [vmem:[#allocation10 + $0x3c8] sm:$0xff] }
0x10f2   :  { %v2631_v38 = vpop.xlane.xlu0 %2630 }
0x10f3   :  { %v2632_v39 = vmul.f32 0.03125, %v2631_v38  ;;  %v2947_v38 = vld [vmem:[#allocation10 + $0x3d0] sm:$0xff] }
0x10f4   :  { %v2635_v8 = vpop.xlane.xlu1 %2634 }
0x10f5   :  { %v2637_v53 = vmul.f32 %v2632_v39, %v2632_v39  ;;  %v2636_v28 = vmul.f32 0.03125, %v2635_v8  ;;  %v2640_v59 = vsub.f32 %v8266_v26, %v2632_v39  ;;  %v2944_v39 = vld [vmem:[#allocation10 + $0x3b8] sm:$0xff]  ;;  %v2941_v8 = vld [vmem:[#allocation10 + $0x3a0] sm:$0xff] }
0x10f6   :  { %v565_v23 = vpop.xlane.xlu0 %564 }
0x10f7   :  { %v2638_v10 = vsub.f32 %v2636_v28, %v2637_v53  ;;  %v8275_v57 = vmul.f32 0.0078125, %v565_v23  ;;  %v2943_v53 = vld [vmem:[#allocation10 + $0x3b0] sm:$0xff]  ;;  %v2938_v28 = vld [vmem:[#allocation10 + $0x388] sm:$0xff]  ;;  %v2940_v23 = vld [vmem:[#allocation10 + $0x398] sm:$0xff] }
0x10f9   :  { %v2639_v12 = vmax.f32 %v2638_v10, 0.0  ;;  %v661_v15 = vmul.f32 %v8275_v57, %v8275_v57  ;;  %v708_v9 = vsub.f32 %v10940_v35, %v8275_v57  ;;  %v2942_v35 = vld [vmem:[#allocation10 + $0x3a8] sm:$0xff]  ;;  %v2937_v10 = vld [vmem:[#allocation10 + $0x380] sm:$0xff] }
0x10fa   :  { %v645_v5 = vpop.xlane.xlu0 %644 }
0x10fb   :  { %v2641_v61 = vadd.f32 1e-05, %v2639_v12  ;;  %v653_v55 = vmul.f32 0.0078125, %v645_v5  ;;  %v2934_v12 = vld [vmem:[#allocation10 + $0x368] sm:$0xff]  ;;  %v2936_v5 = vld [vmem:[#allocation10 + $0x378] sm:$0xff] }
0x10fd   :  { %5802 = vrsqrt.f32 %v2641_v61  ;;  %v669_v14 = vsub.f32 %v653_v55, %v661_v15  ;;  %v2933_v61 = vld [vmem:[#allocation10 + $0x360] sm:$0xff]  ;;  %v2935_v15 = vld [vmem:[#allocation10 + $0x370] sm:$0xff]  ;;  %v2930_v55 = vld [vmem:[#allocation10 + $0x348] sm:$0xff] }
0x10ff   :  { %v677_v6 = vmax.f32 %v669_v14, 0.0  ;;  %v2932_v14 = vld [vmem:[#allocation10 + $0x358] sm:$0xff] }
0x1101   :  { %v717_v31 = vadd.f32 1e-05, %v677_v6  ;;  %v2929_v6 = vld [vmem:[#allocation10 + $0x340] sm:$0xff] }
0x1103   :  { %5804 = vrsqrt.f32 %v717_v31  ;;  %v2931_v31 = vld [vmem:[#allocation10 + $0x350] sm:$0xff] }
0x1104   :  { %5806 = vrcp.f32 %v2623_v58  ;;  %v2922_v58 = vld [vmem:[#allocation10 + $0x308] sm:$0xff] }
0x110a   :  { %v5803_v2 = vpop.eup %5802 }
0x110b   :  { %v2643_v7 = vmul.f32 %v5803_v2, %v2640_v59  ;;  %v2928_v59 = vld [vmem:[#allocation10 + $0x338] sm:$0xff]  ;;  %v2925_v2 = vld [vmem:[#allocation10 + $0x320] sm:$0xff] }
0x110d   :  { %v2644_v20 = vmul.f32 %v8280_v22, %v2643_v7  ;;  %v2927_v7 = vld [vmem:[#allocation10 + $0x330] sm:$0xff] }
0x110f   :  { %v2645_v17 = vadd.f32 %v8283_v63, %v2644_v20  ;;  %v2924_v20 = vld [vmem:[#allocation10 + $0x318] sm:$0xff] }
0x1110   :  { %v8286_v11 = vpop.eup %5804 }
0x1111   :  { %5808 = vtanh.f32 %v2645_v17  ;;  %v8291_v62 = vmul.f32 %v8286_v11, %v708_v9  ;;  %v5807_v42 = vpop.eup %5806  ;;  %v2921_v17 = vld [vmem:[#allocation10 + $0x300] sm:$0xff]  ;;  %v2923_v9 = vld [vmem:[#allocation10 + $0x310] sm:$0xff] }
0x111e   :  { %v5809_v18 = vpop.eup %5808 }
0x111f   :  { %v8293_v3 = vmul.f32 %v5809_v18, %v5807_v42  ;;  %v2918_v42 = vld [vmem:[#allocation10 + $0x2e8] sm:$0xff]  ;;  %v2920_v18 = vld [vmem:[#allocation10 + $0x2f8] sm:$0xff] }
0x1121   :  { %2715 = vmatmul.mubr.f32.vlgmr.msra.gmra.mxu0 %v8293_v3  ;;  %2786 = vmatmul.mubr.f32.vlgmr.msra.gmra.mxu1 %v8293_v3 }
0x1122   :  { %2977 = vmatpush1.msra.mxu0 %v2949_v40  ;;  %3090 = vmatpush1.msra.mxu1 %v2951_v16  ;;  %v2917_v40 = vld [vmem:[#allocation10 + $0x2e0] sm:$0xff]  ;;  %v2919_v16 = vld [vmem:[#allocation10 + $0x2f0] sm:$0xff] }
0x1123   :  { %2978 = vmatprep.subr.mxu0 %v2946_v19  ;;  %3091 = vmatprep.subr.mxu1 %v2948_v33  ;;  %v2914_v19 = vld [vmem:[#allocation10 + $0x2c8] sm:$0xff]  ;;  %v2916_v33 = vld [vmem:[#allocation10 + $0x2d8] sm:$0xff] }
0x1124   :  { %2979 = vmatpush1.msra.mxu0 %v2945_v4  ;;  %3092 = vmatpush1.msra.mxu1 %v2947_v38  ;;  %v2913_v4 = vld [vmem:[#allocation10 + $0x2c0] sm:$0xff]  ;;  %v2915_v38 = vld [vmem:[#allocation10 + $0x2d0] sm:$0xff] }
0x1125   :  { %2980 = vmatprep.subr.mxu0 %v2942_v35  ;;  %3093 = vmatprep.subr.mxu1 %v2944_v39  ;;  %v2910_v35 = vld [vmem:[#allocation10 + $0x2a8] sm:$0xff]  ;;  %v2912_v39 = vld [vmem:[#allocation10 + $0x2b8] sm:$0xff] }
0x1126   :  { %2981 = vmatpush1.msra.mxu0 %v2941_v8  ;;  %3094 = vmatpush1.msra.mxu1 %v2943_v53  ;;  %v2909_v8 = vld [vmem:[#allocation10 + $0x2a0] sm:$0xff]  ;;  %v2911_v53 = vld [vmem:[#allocation10 + $0x2b0] sm:$0xff] }
0x1127   :  { %2982 = vmatprep.subr.mxu0 %v2938_v28  ;;  %3095 = vmatprep.subr.mxu1 %v2940_v23  ;;  %v2906_v28 = vld [vmem:[#allocation10 + $0x288] sm:$0xff]  ;;  %v2908_v23 = vld [vmem:[#allocation10 + $0x298] sm:$0xff] }
0x1128   :  { %2983 = vmatpush1.msra.mxu0 %v2937_v10  ;;  %3096 = vmatpush1.msra.mxu1 %v2939_v51  ;;  %v2905_v10 = vld [vmem:[#allocation10 + $0x280] sm:$0xff]  ;;  %v2907_v51 = vld [vmem:[#allocation10 + $0x290] sm:$0xff] }
0x1129   :  { %2984 = vmatprep.subr.mxu0 %v2934_v12  ;;  %3097 = vmatprep.subr.mxu1 %v2936_v5  ;;  %v2902_v12 = vld [vmem:[#allocation10 + $0x268] sm:$0xff]  ;;  %v2904_v5 = vld [vmem:[#allocation10 + $0x278] sm:$0xff] }
0x112a   :  { %2985 = vmatpush1.msra.mxu0 %v2933_v61  ;;  %3098 = vmatpush1.msra.mxu1 %v2935_v15  ;;  %v2901_v61 = vld [vmem:[#allocation10 + $0x260] sm:$0xff]  ;;  %v2903_v15 = vld [vmem:[#allocation10 + $0x270] sm:$0xff] }
0x112b   :  { %2986 = vmatprep.subr.mxu0 %v2930_v55  ;;  %3099 = vmatprep.subr.mxu1 %v2932_v14  ;;  %v2898_v55 = vld [vmem:[#allocation10 + $0x248] sm:$0xff]  ;;  %v2900_v14 = vld [vmem:[#allocation10 + $0x258] sm:$0xff] }
0x112c   :  { %2987 = vmatpush1.msra.mxu0 %v2929_v6  ;;  %3100 = vmatpush1.msra.mxu1 %v2931_v31  ;;  %v2897_v6 = vld [vmem:[#allocation10 + $0x240] sm:$0xff]  ;;  %v2899_v31 = vld [vmem:[#allocation10 + $0x250] sm:$0xff] }
0x112d   :  { %2988 = vmatprep.subr.mxu0 %v2926_v21  ;;  %3101 = vmatprep.subr.mxu1 %v2928_v59  ;;  %v2894_v21 = vld [vmem:[#allocation10 + $0x228] sm:$0xff]  ;;  %v2896_v59 = vld [vmem:[#allocation10 + $0x238] sm:$0xff] }
0x112e   :  { %2989 = vmatpush1.msra.mxu0 %v2925_v2  ;;  %3102 = vmatpush1.msra.mxu1 %v2927_v7  ;;  %v2893_v2 = vld [vmem:[#allocation10 + $0x220] sm:$0xff]  ;;  %v2895_v7 = vld [vmem:[#allocation10 + $0x230] sm:$0xff] }
0x112f   :  { %2990 = vmatprep.subr.mxu0 %v2922_v58  ;;  %3103 = vmatprep.subr.mxu1 %v2924_v20  ;;  %v2890_v58 = vld [vmem:[#allocation10 + $0x208] sm:$0xff]  ;;  %v2892_v20 = vld [vmem:[#allocation10 + $0x218] sm:$0xff] }
0x1130   :  { %2991 = vmatpush1.msra.mxu0 %v2921_v17  ;;  %3104 = vmatpush1.msra.mxu1 %v2923_v9  ;;  %v2889_v17 = vld [vmem:[#allocation10 + $0x200] sm:$0xff]  ;;  %v2891_v9 = vld [vmem:[#allocation10 + $0x210] sm:$0xff] }
0x1131   :  { %2992 = vmatprep.subr.mxu0 %v2918_v42  ;;  %3105 = vmatprep.subr.mxu1 %v2920_v18  ;;  %v10942_v42 = vld [vmem:[#allocation104_spill] sm:$0xff]  ;;  %v10943_v18 = vld [vmem:[#allocation29_spill] sm:$0xff] }
0x1132   :  { %2993 = vmatpush1.msra.mxu0 %v2917_v40  ;;  %3106 = vmatpush1.msra.mxu1 %v2919_v16  ;;  %v10944_v40 = vld [vmem:[#allocation77_spill] sm:$0xff]  ;;  %v10945_v16 = vld [vmem:[#allocation79_spill] sm:$0xff] }
0x1133   :  { %2994 = vmatprep.subr.mxu0 %v2914_v19  ;;  %3107 = vmatprep.subr.mxu1 %v2916_v33  ;;  %v10946_v19 = vld [vmem:[#allocation80_spill] sm:$0xff] }
0x1134   :  { %2995 = vmatpush1.msra.mxu0 %v2913_v4  ;;  %3108 = vmatpush1.msra.mxu1 %v2915_v38 }
0x1135   :  { %2996 = vmatprep.subr.mxu0 %v2910_v35  ;;  %3109 = vmatprep.subr.mxu1 %v2912_v39 }
0x1136   :  { %2997 = vmatpush1.msra.mxu0 %v2909_v8  ;;  %3110 = vmatpush1.msra.mxu1 %v2911_v53 }
0x1137   :  { %2998 = vmatprep.subr.mxu0 %v2906_v28  ;;  %3111 = vmatprep.subr.mxu1 %v2908_v23 }
0x1138   :  { %2999 = vmatpush1.msra.mxu0 %v2905_v10  ;;  %3112 = vmatpush1.msra.mxu1 %v2907_v51 }
0x1139   :  { %3000 = vmatprep.subr.mxu0 %v2902_v12  ;;  %3113 = vmatprep.subr.mxu1 %v2904_v5 }
0x113a   :  { %3001 = vmatpush1.msra.mxu0 %v2901_v61  ;;  %3114 = vmatpush1.msra.mxu1 %v2903_v15 }
0x113b   :  { %3002 = vmatprep.subr.mxu0 %v2898_v55  ;;  %3115 = vmatprep.subr.mxu1 %v2900_v14 }
0x113c   :  { %3003 = vmatpush1.msra.mxu0 %v2897_v6  ;;  %3116 = vmatpush1.msra.mxu1 %v2899_v31 }
0x113d   :  { %3004 = vmatprep.subr.mxu0 %v2894_v21  ;;  %3117 = vmatprep.subr.mxu1 %v2896_v59 }
0x113e   :  { %3005 = vmatpush1.msra.mxu0 %v2893_v2  ;;  %3118 = vmatpush1.msra.mxu1 %v2895_v7  ;;  %v707_v2 = vsub.f32 %v10939_v48, %v8275_v57 }
0x113f   :  { %3006 = vmatprep.subr.mxu0 %v2890_v58  ;;  %3119 = vmatprep.subr.mxu1 %v2892_v20 }
0x1140   :  { %3007 = vmatpush1.msra.mxu0 %v2889_v17  ;;  %3040 = vmatprep.mubr.f32.mxu0 %v10934_v13  ;;  %v755_v58 = vmul.f32 %v8286_v11, %v707_v2  ;;  %v10955_v2 = vld [vmem:[#allocation73_spill] sm:$0xff] }
0x1141   :  { %3120 = vmatpush1.msra.mxu1 %v2891_v9  ;;  %3153 = vmatprep.mubr.f32.mxu1 %v10934_v13 }
0x1142   :  { %3041 = vmatmul.mubr.f32.vlgmr.msra.gmra.mxu0 %v10942_v42  ;;  %3154 = vmatmul.mubr.f32.vlgmr.msra.gmra.mxu1 %v10942_v42 }
0x1143   :  { %3046 = vmatprep.mubr.f32.mxu0 %v10934_v13  ;;  %3159 = vmatprep.mubr.f32.mxu1 %v10934_v13 }
0x1146   :  { %3047 = vmatmul.mubr.f32.gmra.mxu0 %v10943_v18  ;;  %3160 = vmatmul.mubr.f32.gmra.mxu1 %v10943_v18 }
0x1147   :  { %3052 = vmatprep.mubr.f32.mxu0 %v10934_v13  ;;  %3165 = vmatprep.mubr.f32.mxu1 %v10934_v13 }
0x114a   :  { %3053 = vmatmul.mubr.f32.gmra.mxu0 %v10944_v40  ;;  %3166 = vmatmul.mubr.f32.gmra.mxu1 %v10944_v40  ;;  %v808_v40 = vmul.f32 %v7138_v44, %v755_v58 }
0x114b   :  { %3058 = vmatprep.mubr.f32.mxu0 %v10934_v13  ;;  %3171 = vmatprep.mubr.f32.mxu1 %v10934_v13 }
0x114e   :  { %3059 = vmatmul.mubr.f32.gmra.mxu0 %v10945_v16  ;;  %3172 = vmatmul.mubr.f32.gmra.mxu1 %v10945_v16 }
0x114f   :  { %3064 = vmatprep.mubr.f32.mxu0 %v10934_v13  ;;  %3177 = vmatprep.mubr.f32.mxu1 %v10934_v13 }
0x1152   :  { %3065 = vmatmul.mubr.f32.gmra.mxu0 %v10946_v19  ;;  %3178 = vmatmul.mubr.f32.gmra.mxu1 %v10946_v19 }
0x1153   :  { %3070 = vmatprep.mubr.f32.mxu0 %v10934_v13  ;;  %3183 = vmatprep.mubr.f32.mxu1 %v10934_v13 }
0x1156   :  { %3071 = vmatmul.mubr.f32.gmra.mxu0 %v8159_v24  ;;  %3184 = vmatmul.mubr.f32.gmra.mxu1 %v8159_v24 }
0x1157   :  { %3076 = vmatprep.mubr.f32.mxu0 %v10934_v13  ;;  %3189 = vmatprep.mubr.f32.mxu1 %v10934_v13 }
0x115a   :  { %3077 = vmatmul.mubr.f32.gmra.mxu0 %v8293_v3  ;;  %3190 = vmatmul.mubr.f32.gmra.mxu1 %v8293_v3 }
0x115b   :  { %3082 = vmatprep.mubr.f32.mxu0 %v10934_v13  ;;  %3195 = vmatprep.mubr.f32.mxu1 %v10934_v13 }
0x11e1   :  { %v2716_v33 = vpop.f32.mrf.mxu0  ;;  %v2787_v4 = vpop.f32.mrf.mxu1 }
0x11e2   :  { %v2717_v38 = vadd.f32 %v2716_v33, %v10935_v56  ;;  %v2788_v39 = vadd.f32 %v2787_v4, %v10936_v27 }
0x11e3   :  { %v2718_v35 = vpop.f32.mrf.mxu0  ;;  %v2789_v8 = vpop.f32.mrf.mxu1 }
0x11e4   :  { %v2719_v24 = vadd.f32 %v2718_v35, %v10937_v37  ;;  %v2798_v53 = vmul.f32 %v2717_v38, %v2717_v38  ;;  %v2800_v10 = vmul.f32 %v2788_v39, %v2788_v39  ;;  %v2790_v3 = vadd.f32 %v2789_v8, %v10664_v60 }
0x11e5   :  { %v706_v60 = vsub.f32 %v10938_v36, %v8275_v57  ;;  %v809_v36 = vmul.f32 %v10665_v29, %v8291_v62 }
0x11e6   :  { %v2792_v28 = vadd.f32 %v2719_v24, %v2717_v38  ;;  %v2799_v23 = vmul.f32 %v2719_v24, %v2719_v24  ;;  %v2801_v15 = vmul.f32 %v2790_v3, %v2790_v3 }
0x11e7   :  { %v754_v7 = vmul.f32 %v8286_v11, %v706_v60 }
0x11e8   :  { %v2793_v51 = vadd.f32 %v2792_v28, %v2788_v39  ;;  %v2802_v12 = vadd.f32 %v2799_v23, %v2798_v53 }
0x11e9   :  { %v807_v18 = vmul.f32 %v7135_v43, %v754_v7 }
0x11ea   :  { %v2794_v5 = vadd.f32 %v2793_v51, %v2790_v3  ;;  %v2803_v61 = vadd.f32 %v2802_v12, %v2800_v10 }
0x11ec   :  { %2795 = vadd.xlane.f32.xlu1 %v2794_v5  ;;  %v2804_v55 = vadd.f32 %v2803_v61, %v2801_v15  ;;  %v10953_v15 = vld [vmem:[#allocation72_spill] sm:$0xff] }
0x11f0   :  { %2805 = vadd.xlane.f32.xlu1 %v2804_v55 }
0x1275   :  { %v2796_v56 = vpop.xlane.xlu1 %2795 }
0x1276   :  { %v2797_v14 = vmul.f32 0.0078125, %v2796_v56 }
0x1278   :  { %v2808_v6 = vmul.f32 %v2797_v14, %v2797_v14  ;;  %v2811_v20 = vsub.f32 %v2717_v38, %v2797_v14  ;;  %v2812_v17 = vsub.f32 %v2719_v24, %v2797_v14  ;;  %v2813_v9 = vsub.f32 %v2788_v39, %v2797_v14 }
0x1279   :  { %v2806_v27 = vpop.xlane.xlu1 %2805  ;;  %v860_v38 = vadd.f32 %v7141_v41, %v807_v18  ;;  %v861_v39 = vadd.f32 %v7144_v0, %v808_v40  ;;  %v862_v24 = vadd.f32 %v7159_v47, %v809_v36 }
0x127a   :  { %v2807_v37 = vmul.f32 0.0078125, %v2806_v27 }
0x127c   :  { %v2809_v31 = vsub.f32 %v2807_v37, %v2808_v6 }
0x127e   :  { %v2810_v21 = vmax.f32 %v2809_v31, 0.0 }
0x1280   :  { %v2815_v59 = vadd.f32 1e-05, %v2810_v21 }
0x1282   :  { %5810 = vrsqrt.f32 %v2815_v59 }
0x128f   :  { %v5811_v42 = vpop.eup %5810 }
0x1290   :  { %v2817_v16 = vmul.f32 %v5811_v42, %v2811_v20  ;;  %v2818_v19 = vmul.f32 %v5811_v42, %v2812_v17  ;;  %v2819_v33 = vmul.f32 %v5811_v42, %v2813_v9 }
0x1292   :  { %v2821_v48 = vmul.f32 %v2817_v16, %v7150_v52  ;;  %v2822_v4 = vmul.f32 %v2818_v19, %v10666_v1  ;;  %v2823_v35 = vmul.f32 %v2819_v33, %v7165_v34  ;;  %v2814_v52 = vsub.f32 %v2790_v3, %v2797_v14  ;;  %v3155_v14 = vpop.f32.mrf.mxu1 }
0x1293   :  { %v709_v34 = vsub.f32 %v10941_v49, %v8275_v57  ;;  %v3042_v49 = vpop.f32.mrf.mxu0  ;;  %v5604_v57 = vld [vmem:[%s10009_s5 + $0x4] sm:$0xf] }
0x1294   :  { %v2825_v43 = vadd.f32 %v2821_v48, %v7156_v45  ;;  %v2826_v44 = vadd.f32 %v2822_v4, %v7170_v54  ;;  %v2827_v8 = vadd.f32 %v2823_v35, %v7173_v30  ;;  %v2820_v41 = vmul.f32 %v5811_v42, %v2814_v52  ;;  %v3157_v20 = vpop.f32.mrf.mxu1  ;;  %v8404_v48 = vld [vmem:[#allocation12 + $0x3e8] sm:$0xff]  ;;  %v8407_v4 = vld [vmem:[#allocation12 + $0x3e0] sm:$0xff]  ;;  %v8436_v52 = vld [vmem:[#allocation12 + $0x3b8] sm:$0xff] }
0x1295   :  { %v757_v0 = vmul.f32 %v8286_v11, %v709_v34  ;;  %v8375_v55 = vrot.slane %v5604_v57, %v10953_v15  ;;  %v8387_v7 = vrot.slane %v5604_v57, %v10955_v2  ;;  %10958 = vst [vmem:[#allocation85_spill] sm:$0xff] %v8404_v48  ;;  %3730 = vmatprep.subr.mxu0 %v8404_v48  ;;  %v8410_v35 = vld [vmem:[#allocation12 + $0x3c8] sm:$0xff]  ;;  %v8444_v34 = vld [vmem:[#allocation12 + $0x3b0] sm:$0xff]  ;;  %v8570_v15 = vld [vmem:[#allocation12 + $0x258] sm:$0xff] }
0x1296   :  { %v2834_v29 = vadd.f32 %v2825_v43, %v860_v38  ;;  %v2835_v62 = vadd.f32 %v2826_v44, %v861_v39  ;;  %v8350_v53 = vadd.f32 %v2827_v8, %v862_v24  ;;  %v2824_v54 = vmul.f32 %v2820_v41, %v7189_v32  ;;  %v10947_v32 = vld [vmem:[#allocation71_spill] sm:$0xff]  ;;  %3731 = vmatpush1.msra.mxu0 %v8407_v4  ;;  %v8418_v43 = vld [vmem:[#allocation12 + $0x3f0] sm:$0xff]  ;;  %v8421_v44 = vld [vmem:[#allocation12 + $0x3a8] sm:$0xff] }
0x1297   :  { %v810_v45 = vmul.f32 %v7192_v46, %v757_v0  ;;  %v8363_v11 = vrot.slane %v5604_v57, %v10947_v32  ;;  %v3044_v46 = vpop.f32.mrf.mxu0  ;;  %10954 = vst [vmem:[#allocation76_spill] sm:$0xff] %v8375_v55  ;;  %v8384_v60 = vadd.f32 %v3155_v14, %v8375_v55  ;;  %10956 = vst [vmem:[#allocation78_spill] sm:$0xff] %v8387_v7  ;;  %v8412_v38 = vld [vmem:[#allocation12 + $0x3f8] sm:$0xff]  ;;  %3732 = vmatprep.subr.mxu0 %v8410_v35  ;;  %v8415_v39 = vld [vmem:[#allocation12 + $0x3c0] sm:$0xff] }
0x1298   :  { %v5601_v1 = vmul.f32 -1.442695, %v2834_v29  ;;  %v5602_v28 = vmul.f32 -1.442695, %v2835_v62  ;;  %v2828_v30 = vadd.f32 %v2824_v54, %v7195_v25  ;;  %v10949_v25 = vld [vmem:[#allocation70_spill] sm:$0xff]  ;;  %v8396_v40 = vadd.f32 %v3157_v20, %v8387_v7  ;;  %10959 = vst [vmem:[#allocation87_spill] sm:$0xff] %v8412_v38  ;;  %3801 = vmatprep.subr.mxu1 %v8412_v38  ;;  %3733 = vmatpush1.msra.mxu0 %v8415_v39 }
0x1299   :  { %v863_v47 = vadd.f32 %v7200_v50, %v810_v45  ;;  %10948 = vst [vmem:[#allocation102_spill] sm:$0xff] %v8363_v11  ;;  %v8366_v5 = vrot.slane %v5604_v57, %v10949_v25  ;;  %v8369_v50 = vadd.f32 %v3044_v46, %v8363_v11  ;;  %v3256_v18 = vmul.f32 %v8384_v60, %v8384_v60  ;;  %v8424_v24 = vld [vmem:[#allocation12 + $0x3d8] sm:$0xff]  ;;  %v8427_v8 = vld [vmem:[#allocation12 + $0x3a0] sm:$0xff]  ;;  %v8430_v29 = vld [vmem:[#allocation12 + $0x3d0] sm:$0xff] }
0x129a   :  { %5812 = vpow2.f32 %v5601_v1  ;;  %10957 = vst [vmem:[#allocation105_spill] sm:$0xff] %v8396_v40  ;;  %v3257_v36 = vmul.f32 %v8396_v40, %v8396_v40  ;;  %3802 = vmatpush1.msra.mxu1 %v8418_v43  ;;  %3734 = vmatprep.subr.mxu0 %v8421_v44  ;;  %v8433_v62 = vld [vmem:[#allocation12 + $0x388] sm:$0xff]  ;;  %v8439_v1 = vld [vmem:[#allocation12 + $0x380] sm:$0xff]  ;;  %v8450_v0 = vld [vmem:[#allocation12 + $0x398] sm:$0xff] }
0x129b   :  { %5814 = vpow2.f32 %v5602_v28  ;;  %v2837_v23 = vadd.f32 %v2828_v30, %v863_v47  ;;  %10950 = vst [vmem:[#allocation103_spill] sm:$0xff] %v8366_v5  ;;  %10951 = vst [vmem:[#allocation74_spill] sm:$0xff] %v8369_v50  ;;  %v8372_v61 = vadd.f32 %v3042_v49, %v8366_v5  ;;  %v3255_v37 = vmul.f32 %v8369_v50, %v8369_v50  ;;  %v8442_v28 = vld [vmem:[#allocation12 + $0x368] sm:$0xff]  ;;  %v8448_v41 = vld [vmem:[#allocation12 + $0x360] sm:$0xff] }
0x129c   :  { %3803 = vmatprep.subr.mxu1 %v8424_v24  ;;  %3735 = vmatpush1.msra.mxu0 %v8427_v8  ;;  %v8452_v54 = vld [vmem:[#allocation12 + $0x348] sm:$0xff]  ;;  %v8456_v45 = vld [vmem:[#allocation12 + $0x390] sm:$0xff]  ;;  %v8458_v30 = vld [vmem:[#allocation12 + $0x340] sm:$0xff]  ;;  %10991 = vst [vmem:[#allocation52_spill] sm:$0xff] %v8570_v15 }
0x129d   :  { %5816 = vtanh.f32 %v2837_v23  ;;  %10952 = vst [vmem:[#allocation75_spill] sm:$0xff] %v8372_v61  ;;  %v3206_v6 = vadd.f32 %v8369_v50, %v8372_v61  ;;  %v3254_v59 = vmul.f32 %v8372_v61, %v8372_v61  ;;  %3804 = vmatpush1.msra.mxu1 %v8430_v29  ;;  %3736 = vmatprep.subr.mxu0 %v8433_v62  ;;  %v8460_v47 = vld [vmem:[#allocation12 + $0x378] sm:$0xff]  ;;  %v8464_v23 = vld [vmem:[#allocation12 + $0x328] sm:$0xff]  ;;  %v8484_v46 = vld [vmem:[#allocation12 + $0x300] sm:$0xff] }
0x129e   :  { %3805 = vmatprep.subr.mxu1 %v8436_v52  ;;  %3737 = vmatpush1.msra.mxu0 %v8439_v1  ;;  %v8478_v49 = vld [vmem:[#allocation12 + $0x308] sm:$0xff]  ;;  %v8480_v57 = vld [vmem:[#allocation12 + $0x338] sm:$0xff]  ;;  %10963 = vst [vmem:[#allocation91_spill] sm:$0xff] %v8484_v46  ;;  %v8544_v55 = vld [vmem:[#allocation12 + $0x260] sm:$0xff] }
0x129f   :  { %v3207_v9 = vadd.f32 %v3206_v6, %v8384_v60  ;;  %v3286_v42 = vadd.f32 %v3255_v37, %v3254_v59  ;;  %3806 = vmatpush1.msra.mxu1 %v8444_v34  ;;  %3738 = vmatprep.subr.mxu0 %v8442_v28  ;;  %10961 = vst [vmem:[#allocation90_spill] sm:$0xff] %v8478_v49  ;;  %10962 = vst [vmem:[#allocation89_spill] sm:$0xff] %v8480_v57  ;;  %v8490_v14 = vld [vmem:[#allocation12 + $0x2e8] sm:$0xff]  ;;  %v8496_v6 = vld [vmem:[#allocation12 + $0x2e0] sm:$0xff] }
0x12a0   :  { %3807 = vmatprep.subr.mxu1 %v8450_v0  ;;  %3739 = vmatpush1.msra.mxu0 %v8448_v41  ;;  %10965 = vst [vmem:[#allocation94_spill] sm:$0xff] %v8490_v14  ;;  %10967 = vst [vmem:[#allocation34_spill] sm:$0xff] %v8496_v6  ;;  %v8498_v37 = vld [vmem:[#allocation12 + $0x310] sm:$0xff]  ;;  %v8508_v59 = vld [vmem:[#allocation12 + $0x2c0] sm:$0xff] }
0x12a1   :  { %v3287_v19 = vadd.f32 %v3286_v42, %v3256_v18  ;;  %3808 = vmatpush1.msra.mxu1 %v8456_v45  ;;  %3740 = vmatprep.subr.mxu0 %v8452_v54  ;;  %10968 = vst [vmem:[#allocation30_spill] sm:$0xff] %v8498_v37  ;;  %10971 = vst [vmem:[#allocation81_spill] sm:$0xff] %v8508_v59  ;;  %v8514_v20 = vld [vmem:[#allocation12 + $0x2a8] sm:$0xff]  ;;  %v8520_v42 = vld [vmem:[#allocation12 + $0x2a0] sm:$0xff] }
0x12a2   :  { %3809 = vmatprep.subr.mxu1 %v8460_v47  ;;  %3741 = vmatpush1.msra.mxu0 %v8458_v30  ;;  %10973 = vst [vmem:[#allocation84_spill] sm:$0xff] %v8514_v20  ;;  %10975 = vst [vmem:[#allocation36_spill] sm:$0xff] %v8520_v42  ;;  %v8522_v18 = vld [vmem:[#allocation12 + $0x2d0] sm:$0xff]  ;;  %v8540_v7 = vld [vmem:[#allocation12 + $0x298] sm:$0xff] }
0x12a3   :  { %v3288_v33 = vadd.f32 %v3287_v19, %v3257_v36  ;;  %3742 = vmatprep.subr.mxu0 %v8464_v23  ;;  %10976 = vst [vmem:[#allocation31_spill] sm:$0xff] %v8522_v18  ;;  %v8532_v19 = vld [vmem:[#allocation12 + $0x280] sm:$0xff]  ;;  %v8534_v36 = vld [vmem:[#allocation12 + $0x2b0] sm:$0xff]  ;;  %10982 = vst [vmem:[#allocation37_spill] sm:$0xff] %v8540_v7 }
0x12a4   :  { %10979 = vst [vmem:[#allocation40_spill] sm:$0xff] %v8532_v19  ;;  %10980 = vst [vmem:[#allocation35_spill] sm:$0xff] %v8534_v36  ;;  %v8546_v5 = vld [vmem:[#allocation12 + $0x290] sm:$0xff]  ;;  %v8550_v11 = vld [vmem:[#allocation12 + $0x248] sm:$0xff] }
0x12a5   :  { %10983 = vst [vmem:[#allocation44_spill] sm:$0xff] %v8544_v55  ;;  %10984 = vst [vmem:[#allocation39_spill] sm:$0xff] %v8546_v5  ;;  %v8556_v50 = vld [vmem:[#allocation12 + $0x240] sm:$0xff]  ;;  %v8562_v61 = vld [vmem:[#allocation12 + $0x228] sm:$0xff] }
0x12a6   :  { %10985 = vst [vmem:[#allocation46_spill] sm:$0xff] %v8550_v11  ;;  %10987 = vst [vmem:[#allocation48_spill] sm:$0xff] %v8556_v50  ;;  %v8564_v2 = vld [vmem:[#allocation12 + $0x270] sm:$0xff]  ;;  %v8566_v32 = vld [vmem:[#allocation12 + $0x220] sm:$0xff] }
0x12a7   :  { %v5813_v10 = vpop.eup %5812  ;;  %10988 = vst [vmem:[#allocation43_spill] sm:$0xff] %v8562_v61  ;;  %10989 = vst [vmem:[#allocation50_spill] sm:$0xff] %v8564_v2  ;;  %v8572_v25 = vld [vmem:[#allocation12 + $0x208] sm:$0xff] }
0x12a8   :  { %v5815_v3 = vpop.eup %5814  ;;  %v2841_v51 = vadd.f32 1.0, %v5813_v10  ;;  %v8466_v10 = vld [vmem:[#allocation12 + $0x370] sm:$0xff]  ;;  %10990 = vst [vmem:[#allocation45_spill] sm:$0xff] %v8566_v32  ;;  %10992 = vst [vmem:[#allocation47_spill] sm:$0xff] %v8572_v25 }
0x12a9   :  { %v2847_v12 = vadd.f32 1.0, %v5815_v3  ;;  %v8470_v3 = vld [vmem:[#allocation12 + $0x320] sm:$0xff]  ;;  %3810 = vmatpush1.msra.mxu1 %v8466_v10 }
0x12aa   :  { %5818 = vrcp.f32 %v2841_v51  ;;  %v5817_v56 = vpop.eup %5816  ;;  %10960 = vst [vmem:[#allocation88_spill] sm:$0xff] %v8470_v3  ;;  %v8472_v51 = vld [vmem:[#allocation12 + $0x358] sm:$0xff]  ;;  %3743 = vmatpush1.msra.mxu0 %v8470_v3 }
0x12ab   :  { %5820 = vrcp.f32 %v2847_v12  ;;  %v8474_v12 = vld [vmem:[#allocation12 + $0x350] sm:$0xff]  ;;  %3811 = vmatprep.subr.mxu1 %v8472_v51  ;;  %3744 = vmatprep.subr.mxu0 %v8478_v49 }
0x12ac   :  { %3812 = vmatpush1.msra.mxu1 %v8474_v12  ;;  %3745 = vmatpush1.msra.mxu0 %v8484_v46 }
0x12ad   :  { %3813 = vmatprep.subr.mxu1 %v8480_v57  ;;  %3746 = vmatprep.subr.mxu0 %v8490_v14 }
0x12ae   :  { %3747 = vmatpush1.msra.mxu0 %v8496_v6 }
0x12b7   :  { %v5819_v27 = vpop.eup %5818 }
0x12b8   :  { %v5821_v31 = vpop.eup %5820  ;;  %v2858_v21 = vmul.f32 %v5819_v27, %v5817_v56  ;;  %v8486_v56 = vld [vmem:[#allocation12 + $0x330] sm:$0xff]  ;;  %v8492_v27 = vld [vmem:[#allocation12 + $0x318] sm:$0xff] }
0x12b9   :  { %v2857_v58 = vmul.f32 %v5821_v31, %v8266_v26  ;;  %v3208_v26 = vadd.f32 %v3207_v9, %v8396_v40  ;;  %10964 = vst [vmem:[#allocation92_spill] sm:$0xff] %v8486_v56  ;;  %10966 = vst [vmem:[#allocation82_spill] sm:$0xff] %v8492_v27  ;;  %3814 = vmatpush1.msra.mxu1 %v8486_v56  ;;  %v8502_v31 = vld [vmem:[#allocation12 + $0x2c8] sm:$0xff]  ;;  %v8516_v9 = vld [vmem:[#allocation12 + $0x2d8] sm:$0xff] }
0x12ba   :  { %10969 = vst [vmem:[#allocation28_spill] sm:$0xff] %v8502_v31  ;;  %3815 = vmatprep.subr.mxu1 %v8492_v27  ;;  %10974 = vst [vmem:[#allocation86_spill] sm:$0xff] %v8516_v9  ;;  %3748 = vmatprep.subr.mxu0 %v8502_v31  ;;  %v8552_v40 = vld [vmem:[#allocation12 + $0x278] sm:$0xff] }
0x12bb   :  { %v8390_v17 = vadd.f32 %v2858_v21, %v2857_v58  ;;  %v8504_v21 = vld [vmem:[#allocation12 + $0x2f8] sm:$0xff]  ;;  %v8510_v58 = vld [vmem:[#allocation12 + $0x2f0] sm:$0xff]  ;;  %3816 = vmatpush1.msra.mxu1 %v8498_v37  ;;  %3749 = vmatpush1.msra.mxu0 %v8508_v59  ;;  %10986 = vst [vmem:[#allocation41_spill] sm:$0xff] %v8552_v40 }
0x12bc   :  { %10970 = vst [vmem:[#allocation32_spill] sm:$0xff] %v8504_v21  ;;  %10972 = vst [vmem:[#allocation83_spill] sm:$0xff] %v8510_v58  ;;  %3817 = vmatprep.subr.mxu1 %v8504_v21  ;;  %3750 = vmatprep.subr.mxu0 %v8514_v20 }
0x12bd   :  { %2860 = vadd.xlane.f32.xlu0 %v8390_v17  ;;  %v2863_v16 = vmul.f32 %v8390_v17, %v8390_v17  ;;  %3818 = vmatpush1.msra.mxu1 %v8510_v58 }
0x12be   :  { %3819 = vmatprep.subr.mxu1 %v8516_v9  ;;  %3751 = vmatpush1.msra.mxu0 %v8520_v42 }
0x12bf   :  { %2864 = vadd.xlane.f32.xlu1 %v2863_v16  ;;  %v8526_v16 = vld [vmem:[#allocation12 + $0x288] sm:$0xff]  ;;  %3820 = vmatpush1.msra.mxu1 %v8522_v18 }
0x12c0   :  { %10977 = vst [vmem:[#allocation38_spill] sm:$0xff] %v8526_v16  ;;  %3752 = vmatprep.subr.mxu0 %v8526_v16 }
0x12c1   :  { %3209 = vadd.xlane.f32.xlu0 %v3208_v26  ;;  %v8528_v26 = vld [vmem:[#allocation12 + $0x2b8] sm:$0xff]  ;;  %3753 = vmatpush1.msra.mxu0 %v8532_v19 }
0x12c2   :  { %10978 = vst [vmem:[#allocation33_spill] sm:$0xff] %v8528_v26  ;;  %3821 = vmatprep.subr.mxu1 %v8528_v26 }
0x12c3   :  { %3822 = vmatpush1.msra.mxu1 %v8534_v36 }
0x12c4   :  { %3823 = vmatprep.subr.mxu1 %v8540_v7 }
0x12c5   :  { %3289 = vadd.xlane.f32.xlu0 %v3288_v33  ;;  %v8538_v33 = vld [vmem:[#allocation12 + $0x268] sm:$0xff]  ;;  %3824 = vmatpush1.msra.mxu1 %v8546_v5 }
0x12c6   :  { %10981 = vst [vmem:[#allocation42_spill] sm:$0xff] %v8538_v33  ;;  %3754 = vmatprep.subr.mxu0 %v8538_v33  ;;  %3825 = vmatprep.subr.mxu1 %v8552_v40  ;;  %v8580_v40 = vld [vmem:[#allocation12 + $0x238] sm:$0xff]  ;;  %v8590_v33 = vld [vmem:[#allocation12 + $0x210] sm:$0xff] }
0x12c7   :  { %3755 = vmatpush1.msra.mxu0 %v8544_v55  ;;  %3826 = vmatpush1.msra.mxu1 %v8564_v2  ;;  %v8574_v55 = vld [vmem:[#allocation12 + $0x250] sm:$0xff]  ;;  %10995 = vst [vmem:[#allocation56_spill] sm:$0xff] %v8580_v40  ;;  %v8588_v2 = vld [vmem:[#allocation12 + $0x218] sm:$0xff]  ;;  %10998 = vst [vmem:[#allocation53_spill] sm:$0xff] %v8590_v33 }
0x12c8   :  { %3756 = vmatprep.subr.mxu0 %v8550_v11  ;;  %10993 = vst [vmem:[#allocation54_spill] sm:$0xff] %v8574_v55  ;;  %3827 = vmatprep.subr.mxu1 %v8570_v15  ;;  %v8578_v11 = vld [vmem:[#allocation12 + $0x200] sm:$0xff]  ;;  %10997 = vst [vmem:[#allocation58_spill] sm:$0xff] %v8588_v2 }
0x12c9   :  { %3757 = vmatpush1.msra.mxu0 %v8556_v50  ;;  %10994 = vst [vmem:[#allocation49_spill] sm:$0xff] %v8578_v11  ;;  %3828 = vmatpush1.msra.mxu1 %v8574_v55  ;;  %v8586_v50 = vld [vmem:[#allocation12 + $0x230] sm:$0xff] }
0x12ca   :  { %3758 = vmatprep.subr.mxu0 %v8562_v61  ;;  %3829 = vmatprep.subr.mxu1 %v8580_v40  ;;  %10996 = vst [vmem:[#allocation51_spill] sm:$0xff] %v8586_v50 }
0x12cb   :  { %3759 = vmatpush1.msra.mxu0 %v8566_v32  ;;  %3830 = vmatpush1.msra.mxu1 %v8586_v50 }
0x12cc   :  { %3760 = vmatprep.subr.mxu0 %v8572_v25  ;;  %3831 = vmatprep.subr.mxu1 %v8588_v2 }
0x12cd   :  { %3761 = vmatpush1.msra.mxu0 %v8578_v11  ;;  %3832 = vmatpush1.msra.mxu1 %v8590_v33  ;;  %v5603_v11 = vmul.f32 -1.442695, %v8350_v53 }
0x12ce   :  { %3957 = vmatprep.subr.mxu0 %v8404_v48  ;;  %4028 = vmatprep.subr.mxu1 %v8412_v38 }
0x12cf   :  { %5822 = vpow2.f32 %v5603_v11 }
0x1346   :  { %v2861_v25 = vpop.xlane.xlu0 %2860 }
0x1347   :  { %v2862_v32 = vmul.f32 0.03125, %v2861_v25 }
0x1348   :  { %v2865_v40 = vpop.xlane.xlu1 %2864 }
0x1349   :  { %v2867_v61 = vmul.f32 %v2862_v32, %v2862_v32  ;;  %v2866_v55 = vmul.f32 0.03125, %v2865_v40  ;;  %v5823_v40 = vpop.eup %5822 }
0x134a   :  { %v3210_v15 = vpop.xlane.xlu0 %3209  ;;  %v2853_v36 = vadd.f32 1.0, %v5823_v40  ;;  %v11007_v40 = vld [vmem:[#allocation50_spill] sm:$0xff] }
0x134b   :  { %v2868_v5 = vsub.f32 %v2866_v55, %v2867_v61  ;;  %v8598_v19 = vmul.f32 0.0078125, %v3210_v15  ;;  %v2870_v61 = vsub.f32 %v8390_v17, %v2862_v32  ;;  %v11001_v17 = vld [vmem:[#allocation37_spill] sm:$0xff] }
0x134d   :  { %v2869_v50 = vmax.f32 %v2868_v5, 0.0  ;;  %v3334_v48 = vmul.f32 %v8598_v19, %v8598_v19  ;;  %v3360_v11 = vsub.f32 %v8384_v60, %v8598_v19  ;;  %v11000_v60 = vld [vmem:[#allocation38_spill] sm:$0xff] }
0x134e   :  { %v3290_v7 = vpop.xlane.xlu0 %3289 }
0x134f   :  { %v2871_v2 = vadd.f32 1e-05, %v2869_v50  ;;  %v3326_v33 = vmul.f32 0.0078125, %v3290_v7 }
0x1351   :  { %5824 = vrsqrt.f32 %v2871_v2  ;;  %v3342_v38 = vsub.f32 %v3326_v33, %v3334_v48  ;;  %v11005_v33 = vld [vmem:[#allocation41_spill] sm:$0xff] }
0x1353   :  { %v3350_v25 = vmax.f32 %v3342_v38, 0.0  ;;  %v11002_v38 = vld [vmem:[#allocation40_spill] sm:$0xff] }
0x1355   :  { %v3390_v16 = vadd.f32 1e-05, %v3350_v25  ;;  %v11006_v25 = vld [vmem:[#allocation44_spill] sm:$0xff] }
0x1357   :  { %5826 = vrsqrt.f32 %v3390_v16  ;;  %v11003_v16 = vld [vmem:[#allocation39_spill] sm:$0xff] }
0x1358   :  { %5828 = vrcp.f32 %v2853_v36  ;;  %v11004_v36 = vld [vmem:[#allocation42_spill] sm:$0xff] }
0x135e   :  { %v5825_v15 = vpop.eup %5824 }
0x135f   :  { %v2873_v55 = vmul.f32 %v5825_v15, %v2870_v61  ;;  %v11008_v61 = vld [vmem:[#allocation46_spill] sm:$0xff]  ;;  %v11009_v15 = vld [vmem:[#allocation52_spill] sm:$0xff] }
0x1361   :  { %v2874_v53 = vmul.f32 %v8280_v22, %v2873_v55  ;;  %v3727_v22 = vld [vmem:[#allocation7 + $0x8] sm:$0xff] }
0x1362   :  { %v11010_v55 = vld [vmem:[#allocation48_spill] sm:$0xff] }
0x1363   :  { %v2875_v5 = vadd.f32 %v8283_v63, %v2874_v53  ;;  %v10999_v63 = vld [vmem:[#allocation35_spill] sm:$0xff]  ;;  %v11011_v53 = vld [vmem:[#allocation54_spill] sm:$0xff] }
0x1364   :  { %v8606_v50 = vpop.eup %5826 }
0x1365   :  { %5830 = vtanh.f32 %v2875_v5  ;;  %v8611_v2 = vmul.f32 %v8606_v50, %v3360_v11  ;;  %v5829_v7 = vpop.eup %5828  ;;  %v11012_v5 = vld [vmem:[#allocation43_spill] sm:$0xff]  ;;  %v11013_v11 = vld [vmem:[#allocation56_spill] sm:$0xff] }
0x1372   :  { %v5831_v48 = vpop.eup %5830 }
0x1373   :  { %v2877_v32 = vmul.f32 %v5831_v48, %v5829_v7  ;;  %v11014_v7 = vld [vmem:[#allocation45_spill] sm:$0xff]  ;;  %v11015_v48 = vld [vmem:[#allocation51_spill] sm:$0xff] }
0x1375   :  { %3083 = vmatmul.mubr.f32.gmra.mxu0 %v2877_v32  ;;  %3196 = vmatmul.mubr.f32.gmra.mxu1 %v2877_v32  ;;  %v11016_v32 = vld [vmem:[#allocation47_spill] sm:$0xff] }
0x1376   :  { %3794 = vmatprep.mubr.f32.mxu0 %v10934_v13  ;;  %3865 = vmatprep.mubr.f32.mxu1 %v10934_v13 }
0x1379   :  { %3795 = vmatmul.mubr.f32.vlgmr.msra.gmra.mxu0 %v3727_v22  ;;  %3866 = vmatmul.mubr.f32.vlgmr.msra.gmra.mxu1 %v3727_v22  ;;  %v11017_v22 = vld [vmem:[#allocation58_spill] sm:$0xff] }
0x137a   :  { %3958 = vmatpush1.msra.mxu0 %v8407_v4  ;;  %4029 = vmatpush1.msra.mxu1 %v8418_v43 }
0x137b   :  { %3959 = vmatprep.subr.mxu0 %v8410_v35  ;;  %4030 = vmatprep.subr.mxu1 %v8424_v24 }
0x137c   :  { %3960 = vmatpush1.msra.mxu0 %v8415_v39  ;;  %4031 = vmatpush1.msra.mxu1 %v8430_v29 }
0x137d   :  { %3961 = vmatprep.subr.mxu0 %v8421_v44  ;;  %4032 = vmatprep.subr.mxu1 %v8436_v52 }
0x137e   :  { %3962 = vmatpush1.msra.mxu0 %v8427_v8  ;;  %4033 = vmatpush1.msra.mxu1 %v8444_v34 }
0x137f   :  { %3963 = vmatprep.subr.mxu0 %v8433_v62  ;;  %4034 = vmatprep.subr.mxu1 %v8450_v0 }
0x1380   :  { %3964 = vmatpush1.msra.mxu0 %v8439_v1  ;;  %4035 = vmatpush1.msra.mxu1 %v8456_v45 }
0x1381   :  { %3965 = vmatprep.subr.mxu0 %v8442_v28  ;;  %4036 = vmatprep.subr.mxu1 %v8460_v47 }
0x1382   :  { %3966 = vmatpush1.msra.mxu0 %v8448_v41  ;;  %4037 = vmatpush1.msra.mxu1 %v8466_v10 }
0x1383   :  { %3967 = vmatprep.subr.mxu0 %v8452_v54  ;;  %4038 = vmatprep.subr.mxu1 %v8472_v51 }
0x1384   :  { %3968 = vmatpush1.msra.mxu0 %v8458_v30  ;;  %4039 = vmatpush1.msra.mxu1 %v8474_v12 }
0x1385   :  { %3969 = vmatprep.subr.mxu0 %v8464_v23  ;;  %4040 = vmatprep.subr.mxu1 %v8480_v57 }
0x1386   :  { %3970 = vmatpush1.msra.mxu0 %v8470_v3  ;;  %4041 = vmatpush1.msra.mxu1 %v8486_v56 }
0x1387   :  { %3971 = vmatprep.subr.mxu0 %v8478_v49  ;;  %4042 = vmatprep.subr.mxu1 %v8492_v27 }
0x1388   :  { %3972 = vmatpush1.msra.mxu0 %v8484_v46  ;;  %4043 = vmatpush1.msra.mxu1 %v8498_v37 }
0x1389   :  { %3973 = vmatprep.subr.mxu0 %v8490_v14  ;;  %4044 = vmatprep.subr.mxu1 %v8504_v21 }
0x138a   :  { %3974 = vmatpush1.msra.mxu0 %v8496_v6  ;;  %4045 = vmatpush1.msra.mxu1 %v8510_v58 }
0x138b   :  { %3975 = vmatprep.subr.mxu0 %v8502_v31  ;;  %4046 = vmatprep.subr.mxu1 %v8516_v9 }
0x138c   :  { %3976 = vmatpush1.msra.mxu0 %v8508_v59  ;;  %4047 = vmatpush1.msra.mxu1 %v8522_v18 }
0x138d   :  { %3977 = vmatprep.subr.mxu0 %v8514_v20  ;;  %4048 = vmatprep.subr.mxu1 %v8528_v26 }
0x138e   :  { %3978 = vmatpush1.msra.mxu0 %v8520_v42  ;;  %4049 = vmatpush1.msra.mxu1 %v10999_v63  ;;  %v11052_v63 = vld [vmem:[#allocation73_spill] sm:$0xff] }
0x138f   :  { %3979 = vmatprep.subr.mxu0 %v11000_v60  ;;  %4050 = vmatprep.subr.mxu1 %v11001_v17 }
0x1390   :  { %3980 = vmatpush1.msra.mxu0 %v11002_v38  ;;  %4051 = vmatpush1.msra.mxu1 %v11003_v16 }
0x1391   :  { %3981 = vmatprep.subr.mxu0 %v11004_v36  ;;  %4052 = vmatprep.subr.mxu1 %v11005_v33 }
0x1392   :  { %3982 = vmatpush1.msra.mxu0 %v11006_v25  ;;  %4053 = vmatpush1.msra.mxu1 %v11007_v40  ;;  %v11018_v40 = vld [vmem:[#allocation49_spill] sm:$0xff] }
0x1393   :  { %3983 = vmatprep.subr.mxu0 %v11008_v61  ;;  %4054 = vmatprep.subr.mxu1 %v11009_v15  ;;  %v11019_v15 = vld [vmem:[#allocation53_spill] sm:$0xff] }
0x1394   :  { %3984 = vmatpush1.msra.mxu0 %v11010_v55  ;;  %4055 = vmatpush1.msra.mxu1 %v11011_v53  ;;  %v11020_v53 = vld [vmem:[#allocation85_spill] sm:$0xff] }
0x1395   :  { %3985 = vmatprep.subr.mxu0 %v11012_v5  ;;  %4056 = vmatprep.subr.mxu1 %v11013_v11  ;;  %v11021_v5 = vld [vmem:[#allocation87_spill] sm:$0xff]  ;;  %v8681_v11 = vpop.f32.mrf.mxu0 }
0x1396   :  { %3986 = vmatpush1.msra.mxu0 %v11014_v7  ;;  %4057 = vmatpush1.msra.mxu1 %v11015_v48  ;;  %v8683_v7 = vpop.f32.mrf.mxu1 }
0x1397   :  { %3987 = vmatprep.subr.mxu0 %v11016_v32  ;;  %4058 = vmatprep.subr.mxu1 %v11017_v22  ;;  %v8685_v48 = vpop.f32.mrf.mxu0 }
0x1398   :  { %3988 = vmatpush1.msra.mxu0 %v11018_v40  ;;  %4021 = vmatprep.mubr.f32.mxu0 %v10934_v13  ;;  %v8687_v32 = vpop.f32.mrf.mxu1 }
0x1399   :  { %4059 = vmatpush1.msra.mxu1 %v11019_v15  ;;  %4092 = vmatprep.mubr.f32.mxu1 %v10934_v13  ;;  %v8689_v22 = vpop.f32.mrf.mxu0 }
0x139a   :  { %4184 = vmatprep.subr.mxu0 %v11020_v53  ;;  %4255 = vmatprep.subr.mxu1 %v11021_v5  ;;  %11022 = vst [vmem:[#allocation60_spill] sm:$0xff] %v8689_v22  ;;  %v8691_v40 = vpop.f32.mrf.mxu1 }
0x139b   :  { %11023 = vst [vmem:[#allocation55_spill] sm:$0xff] %v8691_v40  ;;  %v8693_v55 = vpop.f32.mrf.mxu0 }
0x139c   :  { %11024 = vst [vmem:[#allocation62_spill] sm:$0xff] %v8693_v55  ;;  %v8695_v15 = vpop.f32.mrf.mxu1 }
0x139d   :  { %11025 = vst [vmem:[#allocation57_spill] sm:$0xff] %v8695_v15  ;;  %v8697_v13 = vpop.f32.mrf.mxu0 }
0x139e   :  { %11026 = vst [vmem:[#allocation64_spill] sm:$0xff] %v8697_v13  ;;  %v8699_v53 = vpop.f32.mrf.mxu1 }
0x139f   :  { %11027 = vst [vmem:[#allocation59_spill] sm:$0xff] %v8699_v53  ;;  %v8701_v5 = vpop.f32.mrf.mxu0 }
0x13a0   :  { %11028 = vst [vmem:[#allocation66_spill] sm:$0xff] %v8701_v5  ;;  %v8703_v61 = vpop.f32.mrf.mxu1 }
0x13a1   :  { %11029 = vst [vmem:[#allocation61_spill] sm:$0xff] %v8703_v61  ;;  %v8705_v25 = vpop.f32.mrf.mxu0 }
0x13a2   :  { %11030 = vst [vmem:[#allocation67_spill] sm:$0xff] %v8705_v25  ;;  %v8707_v33 = vpop.f32.mrf.mxu1 }
0x13a3   :  { %11031 = vst [vmem:[#allocation63_spill] sm:$0xff] %v8707_v33  ;;  %v8709_v36 = vpop.f32.mrf.mxu0  ;;  %v3642_v33 = vld [vmem:[#allocation13 + $0x4] sm:$0xf] }
0x13a4   :  { %11032 = vst [vmem:[#allocation68_spill] sm:$0xff] %v8709_v36  ;;  %v8711_v22 = vpop.f32.mrf.mxu1  ;;  %v8750_v42 = vrot.slane %v3642_v33, %v11052_v63 }
0x13a5   :  { %11033 = vst [vmem:[#allocation65_spill] sm:$0xff] %v8711_v22  ;;  %v8713_v40 = vpop.f32.mrf.mxu0 }
0x13a6   :  { %11034 = vst [vmem:[#allocation69_spill] sm:$0xff] %v8713_v40  ;;  %v8715_v55 = vpop.f32.mrf.mxu1  ;;  %v11044_v40 = vld [vmem:[#allocation70_spill] sm:$0xff] }
0x13a7   :  { %11035 = vst [vmem:[#allocation101_spill] sm:$0xff] %v8715_v55  ;;  %v8717_v15 = vpop.f32.mrf.mxu0  ;;  %v8734_v16 = vrot.slane %v3642_v33, %v11044_v40  ;;  %v11046_v55 = vld [vmem:[#allocation72_spill] sm:$0xff] }
0x13a8   :  { %11036 = vst [vmem:[#allocation96_spill] sm:$0xff] %v8717_v15  ;;  %v8719_v13 = vpop.f32.mrf.mxu1  ;;  %v8737_v15 = vrot.slane %v3642_v33, %v11046_v55  ;;  %11053 = vst [vmem:[#allocation72_spill] sm:$0xff] %v8750_v42 }
0x13a9   :  { %11037 = vst [vmem:[#allocation99_spill] sm:$0xff] %v8719_v13  ;;  %v8721_v53 = vpop.f32.mrf.mxu0  ;;  %11045 = vst [vmem:[#allocation29_spill] sm:$0xff] %v8734_v16 }
0x13aa   :  { %11038 = vst [vmem:[#allocation97_spill] sm:$0xff] %v8721_v53  ;;  %v8723_v5 = vpop.f32.mrf.mxu1  ;;  %11047 = vst [vmem:[#allocation77_spill] sm:$0xff] %v8737_v15 }
0x13ab   :  { %11039 = vst [vmem:[#allocation93_spill] sm:$0xff] %v8723_v5  ;;  %v8725_v61 = vpop.f32.mrf.mxu0  ;;  %v11050_v5 = vld [vmem:[#allocation71_spill] sm:$0xff] }
0x13ac   :  { %11040 = vst [vmem:[#allocation95_spill] sm:$0xff] %v8725_v61  ;;  %v8727_v25 = vpop.f32.mrf.mxu1  ;;  %v8744_v38 = vrot.slane %v3642_v33, %v11050_v5 }
0x13ad   :  { %11041 = vst [vmem:[#allocation98_spill] sm:$0xff] %v8727_v25 }
0x13ae   :  { %11051 = vst [vmem:[#allocation70_spill] sm:$0xff] %v8744_v38 }
0x1435   :  { %v8729_v36 = vpop.f32.mrf.mxu0  ;;  %v8731_v22 = vpop.f32.mrf.mxu1 }
0x1436   :  { %11042 = vst [vmem:[#allocation100_spill] sm:$0xff] %v8729_v36  ;;  %11043 = vst [vmem:[#allocation104_spill] sm:$0xff] %v8731_v22 }
0x1437   :  { %v8739_v13 = vpop.f32.mrf.mxu0  ;;  %v8741_v53 = vpop.f32.mrf.mxu1 }
0x1438   :  { %11048 = vst [vmem:[#allocation79_spill] sm:$0xff] %v8739_v13  ;;  %11049 = vst [vmem:[#allocation80_spill] sm:$0xff] %v8741_v53 }
0x1439   :  { %v3796_v61 = vpop.f32.mrf.mxu0  ;;  %v3867_v25 = vpop.f32.mrf.mxu1 }
0x143a   :  { %v3797_v17 = vadd.f32 %v3796_v61, %v8734_v16  ;;  %v3868_v36 = vadd.f32 %v3867_v25, %v8737_v15 }
0x143b   :  { %v3798_v22 = vpop.f32.mrf.mxu0  ;;  %v3869_v26 = vpop.f32.mrf.mxu1 }
0x143c   :  { %v3799_v60 = vadd.f32 %v3798_v22, %v8744_v38  ;;  %v3878_v20 = vmul.f32 %v3797_v17, %v3797_v17  ;;  %v3880_v53 = vmul.f32 %v3868_v36, %v3868_v36  ;;  %v8753_v59 = vadd.f32 %v3869_v26, %v8750_v42 }
0x143e   :  { %v3872_v13 = vadd.f32 %v3799_v60, %v3797_v17  ;;  %v3879_v18 = vmul.f32 %v3799_v60, %v3799_v60  ;;  %v3881_v25 = vmul.f32 %v8753_v59, %v8753_v59 }
0x1440   :  { %v3873_v9 = vadd.f32 %v3872_v13, %v3868_v36  ;;  %v3882_v31 = vadd.f32 %v3879_v18, %v3878_v20  ;;  %v3203_v13 = vld [vmem:[#allocation15 + $0x4] sm:$0xf]  ;;  %v11054_v20 = vld [vmem:[#allocation75_spill] sm:$0xff] }
0x1442   :  { %v3874_v61 = vadd.f32 %v3873_v9, %v8753_v59  ;;  %v3883_v16 = vadd.f32 %v3882_v31, %v3880_v53  ;;  %v3358_v9 = vsub.f32 %v11054_v20, %v8598_v19  ;;  %v11055_v31 = vld [vmem:[#allocation74_spill] sm:$0xff] }
0x1443   :  { %v3359_v18 = vsub.f32 %v11055_v31, %v8598_v19 }
0x1444   :  { %3875 = vadd.xlane.f32.xlu1 %v3874_v61  ;;  %v3884_v22 = vadd.f32 %v3883_v16, %v3881_v25  ;;  %v5605_v16 = vld [vmem:[%s10012_s8 + $0x4] sm:$0xf]  ;;  %v3406_v53 = vmul.f32 %v8606_v50, %v3358_v9  ;;  %v8767_v61 = vrot.slane %v3203_v13, %v11044_v40 }
0x1445   :  { %v8780_v25 = vrot.slane %v5605_v16, %v11050_v5  ;;  %v8790_v9 = vrot.slane %v5605_v16, %v11046_v55 }
0x1446   :  { %11056 = vst [vmem:[#allocation71_spill] sm:$0xff] %v8767_v61 }
0x1448   :  { %3885 = vadd.xlane.f32.xlu1 %v3884_v22  ;;  %v3688_v22 = vld [vmem:[#allocation18 + $0x4] sm:$0xf] }
0x14cd   :  { %v3876_v33 = vpop.xlane.xlu1 %3875 }
0x14ce   :  { %v3877_v38 = vmul.f32 0.0078125, %v3876_v33  ;;  %v3459_v33 = vmul.f32 %v8767_v61, %v3406_v53  ;;  %v8797_v53 = vrot.slane %v3688_v22, %v11044_v40  ;;  %v8800_v61 = vrot.slane %v3688_v22, %v11050_v5 }
0x14d0   :  { %v3888_v58 = vmul.f32 %v3877_v38, %v3877_v38  ;;  %v3891_v31 = vsub.f32 %v3797_v17, %v3877_v38  ;;  %v3893_v42 = vsub.f32 %v3868_v36, %v3877_v38 }
0x14d1   :  { %v3886_v15 = vpop.xlane.xlu1 %3885 }
0x14d2   :  { %v3887_v6 = vmul.f32 0.0078125, %v3886_v15  ;;  %v8777_v15 = vrot.slane %v5605_v16, %v11044_v40 }
0x14d4   :  { %v3889_v21 = vsub.f32 %v3887_v6, %v3888_v58  ;;  %v3665_v6 = vld [vmem:[#allocation16 + $0x4] sm:$0xf]  ;;  %v8774_v58 = vrot.slane %v3203_v13, %v11046_v55 }
0x14d5   :  { %v8787_v20 = vrot.slane %v3665_v6, %v11050_v5  ;;  %v8793_v37 = vrot.slane %v3665_v6, %v11046_v55 }
0x14d6   :  { %v3890_v14 = vmax.f32 %v3889_v21, 0.0  ;;  %v8771_v21 = vrot.slane %v3203_v13, %v11050_v5  ;;  %11058 = vst [vmem:[#allocation75_spill] sm:$0xff] %v8774_v58  ;;  %v3461_v49 = vmul.f32 %v8774_v58, %v8611_v2 }
0x14d7   :  { %11059 = vst [vmem:[#allocation74_spill] sm:$0xff] %v8787_v20 }
0x14d8   :  { %v3895_v26 = vadd.f32 1e-05, %v3890_v14  ;;  %v3407_v14 = vmul.f32 %v8606_v50, %v3359_v18  ;;  %11057 = vst [vmem:[#allocation73_spill] sm:$0xff] %v8771_v21  ;;  %v3892_v18 = vsub.f32 %v3799_v60, %v3877_v38  ;;  %v8805_v60 = vrot.slane %v3688_v22, %v11046_v55 }
0x14da   :  { %5832 = vrsqrt.f32 %v3895_v26  ;;  %v8784_v26 = vrot.slane %v3665_v6, %v11044_v40  ;;  %v3460_v27 = vmul.f32 %v8771_v21, %v3407_v14  ;;  %v3512_v40 = vadd.f32 %v8777_v15, %v3459_v33 }
0x14dc   :  { %v3513_v5 = vadd.f32 %v8780_v25, %v3460_v27  ;;  %v8820_v27 = vrot.slane %v3665_v6, %v11052_v63 }
0x14e7   :  { %v5833_v46 = vpop.eup %5832 }
0x14e8   :  { %v3897_v56 = vmul.f32 %v5833_v46, %v3891_v31  ;;  %v3898_v3 = vmul.f32 %v5833_v46, %v3892_v18  ;;  %v3899_v17 = vmul.f32 %v5833_v46, %v3893_v42  ;;  %v3514_v31 = vadd.f32 %v8790_v9, %v3461_v49 }
0x14e9   :  { %v8824_v49 = vrot.slane %v3203_v13, %v11052_v63 }
0x14ea   :  { %v3901_v36 = vmul.f32 %v3897_v56, %v8784_v26  ;;  %v3902_v57 = vmul.f32 %v3898_v3, %v8787_v20  ;;  %v3903_v14 = vmul.f32 %v3899_v17, %v8793_v37  ;;  %v3894_v56 = vsub.f32 %v8753_v59, %v3877_v38  ;;  %v11060_v17 = vld [vmem:[#allocation105_spill] sm:$0xff] }
0x14eb   :  { %v3361_v33 = vsub.f32 %v11060_v17, %v8598_v19  ;;  %v8832_v19 = vrot.slane %v5605_v16, %v11052_v63 }
0x14ec   :  { %v3905_v21 = vadd.f32 %v3901_v36, %v8797_v53  ;;  %v3906_v2 = vadd.f32 %v3902_v57, %v8800_v61  ;;  %v3907_v55 = vadd.f32 %v3903_v14, %v8805_v60  ;;  %v3900_v36 = vmul.f32 %v5833_v46, %v3894_v56 }
0x14ed   :  { %v3409_v57 = vmul.f32 %v8606_v50, %v3361_v33 }
0x14ee   :  { %v3913_v18 = vadd.f32 %v3905_v21, %v3512_v40  ;;  %v3914_v42 = vadd.f32 %v3906_v2, %v3513_v5  ;;  %v3915_v58 = vadd.f32 %v3907_v55, %v3514_v31  ;;  %v8827_v21 = vrot.slane %v3688_v22, %v11052_v63  ;;  %v11061_v22 = vld [vmem:[#allocation102_spill] sm:$0xff]  ;;  %v11062_v2 = vld [vmem:[#allocation103_spill] sm:$0xff] }
0x14ef   :  { %v3904_v59 = vmul.f32 %v3900_v36, %v8820_v27  ;;  %v3462_v38 = vmul.f32 %v8824_v49, %v3409_v57  ;;  %v8842_v63 = vadd.f32 %v8681_v11, %v11062_v2  ;;  %v3729_v31 = vld [vmem:[#allocation9 + $0x8] sm:$0xff] }
0x14f0   :  { %v5608_v3 = vmul.f32 -1.442695, %v3913_v18  ;;  %v5609_v20 = vmul.f32 -1.442695, %v3914_v42 }
0x14f1   :  { %v3908_v6 = vadd.f32 %v3904_v59, %v8827_v21  ;;  %v3515_v46 = vadd.f32 %v8832_v19, %v3462_v38  ;;  %v3258_v17 = vmul.f32 %v8842_v63, %v8842_v63 }
0x14f2   :  { %5834 = vpow2.f32 %v5608_v3 }
0x14f3   :  { %5836 = vpow2.f32 %v5609_v20  ;;  %v3916_v14 = vadd.f32 %v3908_v6, %v3515_v46  ;;  %v8838_v20 = vadd.f32 %v8685_v48, %v11061_v22  ;;  %v11063_v48 = vld [vmem:[#allocation76_spill] sm:$0xff]  ;;  %v11064_v6 = vld [vmem:[#allocation78_spill] sm:$0xff] }
0x14f4   :  { %v3162_v33 = vadd.f32 %v8683_v7, %v11063_v48  ;;  %v8856_v46 = vadd.f32 %v8687_v32, %v11064_v6 }
0x14f5   :  { %5838 = vtanh.f32 %v3916_v14  ;;  %v3211_v18 = vadd.f32 %v8838_v20, %v8842_v63  ;;  %v3259_v42 = vmul.f32 %v8838_v20, %v8838_v20 }
0x14f6   :  { %v3260_v38 = vmul.f32 %v3162_v33, %v3162_v33  ;;  %v3261_v7 = vmul.f32 %v8856_v46, %v8856_v46 }
0x14f7   :  { %v3212_v57 = vadd.f32 %v3211_v18, %v3162_v33  ;;  %v3291_v59 = vadd.f32 %v3259_v42, %v3258_v17 }
0x14ff   :  { %v5835_v50 = vpop.eup %5834 }
0x1500   :  { %v5837_v40 = vpop.eup %5836  ;;  %v3920_v13 = vadd.f32 1.0, %v5835_v50  ;;  %v3213_v50 = vadd.f32 %v3212_v57, %v8856_v46 }
0x1501   :  { %v3926_v5 = vadd.f32 1.0, %v5837_v40  ;;  %v3292_v40 = vadd.f32 %v3291_v59, %v3260_v38 }
0x1502   :  { %5840 = vrcp.f32 %v3920_v13  ;;  %v5839_v16 = vpop.eup %5838 }
0x1503   :  { %5842 = vrcp.f32 %v3926_v5  ;;  %v3293_v13 = vadd.f32 %v3292_v40, %v3261_v7 }
0x150f   :  { %v5841_v55 = vpop.eup %5840 }
0x1510   :  { %v5843_v56 = vpop.eup %5842  ;;  %v3937_v3 = vmul.f32 %v5841_v55, %v5839_v16 }
0x1511   :  { %v3936_v36 = vmul.f32 %v5843_v56, %v3729_v31 }
0x1513   :  { %v8852_v11 = vadd.f32 %v3937_v3, %v3936_v36  ;;  %v5610_v3 = vmul.f32 -1.442695, %v3915_v58 }
0x1515   :  { %3939 = vadd.xlane.f32.xlu0 %v8852_v11  ;;  %v3942_v14 = vmul.f32 %v8852_v11, %v8852_v11  ;;  %5844 = vpow2.f32 %v5610_v3 }
0x1517   :  { %3943 = vadd.xlane.f32.xlu1 %v3942_v14 }
0x1519   :  { %3214 = vadd.xlane.f32.xlu0 %v3213_v50 }
0x151d   :  { %3294 = vadd.xlane.f32.xlu0 %v3293_v13 }
0x1522   :  { %v5845_v7 = vpop.eup %5844 }
0x159e   :  { %v3940_v5 = vpop.xlane.xlu0 %3939 }
0x159f   :  { %v3941_v16 = vmul.f32 0.03125, %v3940_v5 }
0x15a0   :  { %v3944_v31 = vpop.xlane.xlu1 %3943 }
0x15a1   :  { %v3946_v32 = vmul.f32 %v3941_v16, %v3941_v16  ;;  %v3945_v55 = vmul.f32 0.03125, %v3944_v31  ;;  %v3949_v13 = vsub.f32 %v8852_v11, %v3941_v16  ;;  %v8869_v31 = vld [vmem:[#allocation19 + $0x1] ss:$0 sm:$0xff] }
0x15a2   :  { %v3215_v18 = vpop.xlane.xlu0 %3214 }
0x15a3   :  { %v3947_v42 = vsub.f32 %v3945_v55, %v3946_v32  ;;  %v8864_v56 = vmul.f32 0.0078125, %v3215_v18  ;;  %v8871_v32 = vld [vmem:[#allocation21 + $0x1] ss:$0 sm:$0xff]  ;;  %v3932_v55 = vadd.f32 1.0, %v5845_v7  ;;  %v11093_v7 = vld [vmem:[#allocation52_spill] sm:$0xff] }
0x15a5   :  { %v3948_v17 = vmax.f32 %v3947_v42, 0.0  ;;  %v3335_v59 = vmul.f32 %v8864_v56, %v8864_v56 }
0x15a6   :  { %v3295_v36 = vpop.xlane.xlu0 %3294 }
0x15a7   :  { %v3950_v57 = vadd.f32 1e-05, %v3948_v17  ;;  %v3327_v38 = vmul.f32 0.0078125, %v3295_v36  ;;  %v3364_v17 = vsub.f32 %v3162_v33, %v8864_v56  ;;  %v11088_v33 = vld [vmem:[#allocation42_spill] sm:$0xff] }
0x15a9   :  { %5846 = vrsqrt.f32 %v3950_v57  ;;  %v3343_v14 = vsub.f32 %v3327_v38, %v3335_v59  ;;  %v11089_v38 = vld [vmem:[#allocation41_spill] sm:$0xff] }
0x15ab   :  { %v3351_v50 = vmax.f32 %v3343_v14, 0.0  ;;  %v11090_v14 = vld [vmem:[#allocation44_spill] sm:$0xff] }
0x15ad   :  { %v3391_v40 = vadd.f32 1e-05, %v3351_v50  ;;  %v11091_v50 = vld [vmem:[#allocation50_spill] sm:$0xff] }
0x15af   :  { %5848 = vrsqrt.f32 %v3391_v40  ;;  %v11092_v40 = vld [vmem:[#allocation46_spill] sm:$0xff] }
0x15b0   :  { %5850 = vrcp.f32 %v3932_v55  ;;  %v11097_v55 = vld [vmem:[#allocation56_spill] sm:$0xff] }
0x15b6   :  { %v5847_v5 = vpop.eup %5846 }
0x15b7   :  { %v3952_v58 = vmul.f32 %v5847_v5, %v3949_v13  ;;  %v11094_v13 = vld [vmem:[#allocation48_spill] sm:$0xff]  ;;  %v11095_v5 = vld [vmem:[#allocation54_spill] sm:$0xff] }
0x15b9   :  { %v3953_v18 = vmul.f32 %v8869_v31, %v3952_v58  ;;  %v11096_v58 = vld [vmem:[#allocation43_spill] sm:$0xff] }
0x15bb   :  { %v3954_v42 = vadd.f32 %v8871_v32, %v3953_v18  ;;  %v11098_v18 = vld [vmem:[#allocation45_spill] sm:$0xff] }
0x15bc   :  { %v8875_v3 = vpop.eup %5848 }
0x15bd   :  { %5852 = vtanh.f32 %v3954_v42  ;;  %v8879_v36 = vmul.f32 %v8875_v3, %v3364_v17  ;;  %v5851_v16 = vpop.eup %5850  ;;  %v11099_v42 = vld [vmem:[#allocation51_spill] sm:$0xff] }
0x15be   :  { %v11100_v17 = vld [vmem:[#allocation47_spill] sm:$0xff] }
0x15ca   :  { %v5853_v57 = vpop.eup %5852 }
0x15cb   :  { %v3956_v59 = vmul.f32 %v5853_v57, %v5851_v16  ;;  %v11101_v16 = vld [vmem:[#allocation58_spill] sm:$0xff]  ;;  %v11102_v57 = vld [vmem:[#allocation49_spill] sm:$0xff] }
0x15cd   :  { %4022 = vmatmul.mubr.f32.vlgmr.msra.gmra.mxu0 %v3956_v59  ;;  %4093 = vmatmul.mubr.f32.vlgmr.msra.gmra.mxu1 %v3956_v59  ;;  %v11103_v59 = vmov 0.0  }
0x15ce   :  { %4185 = vmatpush1.msra.mxu0 %v8407_v4  ;;  %4256 = vmatpush1.msra.mxu1 %v8418_v43  ;;  %v11065_v4 = vld [vmem:[#allocation89_spill] sm:$0xff]  ;;  %v11068_v43 = vld [vmem:[#allocation90_spill] sm:$0xff] }
0x15cf   :  { %4186 = vmatprep.subr.mxu0 %v8410_v35  ;;  %4257 = vmatprep.subr.mxu1 %v8424_v24  ;;  %v11066_v35 = vld [vmem:[#allocation88_spill] sm:$0xff]  ;;  %v11070_v24 = vld [vmem:[#allocation91_spill] sm:$0xff] }
0x15d0   :  { %4187 = vmatpush1.msra.mxu0 %v8415_v39  ;;  %4258 = vmatpush1.msra.mxu1 %v8430_v29  ;;  %v11067_v39 = vld [vmem:[#allocation92_spill] sm:$0xff]  ;;  %v11072_v29 = vld [vmem:[#allocation94_spill] sm:$0xff] }
0x15d1   :  { %4188 = vmatprep.subr.mxu0 %v8421_v44  ;;  %4259 = vmatprep.subr.mxu1 %v8436_v52  ;;  %v11069_v44 = vld [vmem:[#allocation82_spill] sm:$0xff] }
0x15d2   :  { %4189 = vmatpush1.msra.mxu0 %v8427_v8  ;;  %4260 = vmatpush1.msra.mxu1 %v8444_v34  ;;  %v11071_v8 = vld [vmem:[#allocation30_spill] sm:$0xff] }
0x15d3   :  { %4190 = vmatprep.subr.mxu0 %v8433_v62  ;;  %4261 = vmatprep.subr.mxu1 %v8450_v0  ;;  %v11073_v62 = vld [vmem:[#allocation32_spill] sm:$0xff]  ;;  %v11074_v52 = vld [vmem:[#allocation34_spill] sm:$0xff]  ;;  %v11079_v0 = vld [vmem:[#allocation31_spill] sm:$0xff] }
0x15d4   :  { %4191 = vmatpush1.msra.mxu0 %v8439_v1  ;;  %4262 = vmatpush1.msra.mxu1 %v8456_v45  ;;  %v11075_v1 = vld [vmem:[#allocation83_spill] sm:$0xff]  ;;  %v11077_v34 = vld [vmem:[#allocation86_spill] sm:$0xff]  ;;  %v11081_v45 = vld [vmem:[#allocation33_spill] sm:$0xff] }
0x15d5   :  { %4192 = vmatprep.subr.mxu0 %v8442_v28  ;;  %4263 = vmatprep.subr.mxu1 %v8460_v47  ;;  %v11076_v28 = vld [vmem:[#allocation28_spill] sm:$0xff]  ;;  %v11083_v47 = vld [vmem:[#allocation35_spill] sm:$0xff] }
0x15d6   :  { %4193 = vmatpush1.msra.mxu0 %v8448_v41  ;;  %4264 = vmatpush1.msra.mxu1 %v8466_v10  ;;  %v11078_v41 = vld [vmem:[#allocation81_spill] sm:$0xff] }
0x15d7   :  { %4194 = vmatprep.subr.mxu0 %v8452_v54  ;;  %4265 = vmatprep.subr.mxu1 %v8472_v51  ;;  %v11080_v54 = vld [vmem:[#allocation84_spill] sm:$0xff]  ;;  %v11085_v10 = vld [vmem:[#allocation37_spill] sm:$0xff] }
0x15d8   :  { %4195 = vmatpush1.msra.mxu0 %v8458_v30  ;;  %4266 = vmatpush1.msra.mxu1 %v8474_v12  ;;  %v11082_v30 = vld [vmem:[#allocation36_spill] sm:$0xff]  ;;  %v11087_v12 = vld [vmem:[#allocation39_spill] sm:$0xff] }
0x15d9   :  { %4196 = vmatprep.subr.mxu0 %v8464_v23  ;;  %4267 = vmatprep.subr.mxu1 %v11065_v4  ;;  %v11084_v23 = vld [vmem:[#allocation38_spill] sm:$0xff]  ;;  %v11086_v51 = vld [vmem:[#allocation40_spill] sm:$0xff]  ;;  %v11104_v4 = vld [vmem:[#allocation53_spill] sm:$0xff] }
0x15da   :  { %4197 = vmatpush1.msra.mxu0 %v11066_v35  ;;  %4268 = vmatpush1.msra.mxu1 %v11067_v39  ;;  %v11105_v35 = vld [vmem:[#allocation85_spill] sm:$0xff]  ;;  %v11106_v39 = vld [vmem:[#allocation87_spill] sm:$0xff] }
0x15db   :  { %4198 = vmatprep.subr.mxu0 %v11068_v43  ;;  %4269 = vmatprep.subr.mxu1 %v11069_v44 }
0x15dc   :  { %4199 = vmatpush1.msra.mxu0 %v11070_v24  ;;  %4270 = vmatpush1.msra.mxu1 %v11071_v8  ;;  %v11107_v24 = vld [vmem:[#allocation29_spill] sm:$0xff] }
0x15dd   :  { %4200 = vmatprep.subr.mxu0 %v11072_v29  ;;  %4271 = vmatprep.subr.mxu1 %v11073_v62  ;;  %v11108_v62 = vld [vmem:[#allocation77_spill] sm:$0xff] }
0x15de   :  { %4201 = vmatpush1.msra.mxu0 %v11074_v52  ;;  %4272 = vmatpush1.msra.mxu1 %v11075_v1  ;;  %v11109_v1 = vld [vmem:[#allocation70_spill] sm:$0xff] }
0x15df   :  { %4202 = vmatprep.subr.mxu0 %v11076_v28  ;;  %4273 = vmatprep.subr.mxu1 %v11077_v34 }
0x15e0   :  { %4203 = vmatpush1.msra.mxu0 %v11078_v41  ;;  %4274 = vmatpush1.msra.mxu1 %v11079_v0 }
0x15e1   :  { %4204 = vmatprep.subr.mxu0 %v11080_v54  ;;  %4275 = vmatprep.subr.mxu1 %v11081_v45 }
0x15e2   :  { %4205 = vmatpush1.msra.mxu0 %v11082_v30  ;;  %4276 = vmatpush1.msra.mxu1 %v11083_v47  ;;  %v11110_v30 = vld [vmem:[#allocation72_spill] sm:$0xff] }
0x15e3   :  { %4206 = vmatprep.subr.mxu0 %v11084_v23  ;;  %4277 = vmatprep.subr.mxu1 %v11085_v10 }
0x15e4   :  { %4207 = vmatpush1.msra.mxu0 %v11086_v51  ;;  %4278 = vmatpush1.msra.mxu1 %v11087_v12 }
0x15e5   :  { %4208 = vmatprep.subr.mxu0 %v11088_v33  ;;  %4279 = vmatprep.subr.mxu1 %v11089_v38 }
0x15e6   :  { %4209 = vmatpush1.msra.mxu0 %v11090_v14  ;;  %4280 = vmatpush1.msra.mxu1 %v11091_v50 }
0x15e7   :  { %4210 = vmatprep.subr.mxu0 %v11092_v40  ;;  %4281 = vmatprep.subr.mxu1 %v11093_v7 }
0x15e8   :  { %4211 = vmatpush1.msra.mxu0 %v11094_v13  ;;  %4282 = vmatpush1.msra.mxu1 %v11095_v5 }
0x15e9   :  { %4212 = vmatprep.subr.mxu0 %v11096_v58  ;;  %4283 = vmatprep.subr.mxu1 %v11097_v55 }
0x15ea   :  { %4213 = vmatpush1.msra.mxu0 %v11098_v18  ;;  %4284 = vmatpush1.msra.mxu1 %v11099_v42  ;;  %v3362_v18 = vsub.f32 %v8842_v63, %v8864_v56  ;;  %v3363_v42 = vsub.f32 %v8838_v20, %v8864_v56 }
0x15eb   :  { %4214 = vmatprep.subr.mxu0 %v11100_v17  ;;  %4285 = vmatprep.subr.mxu1 %v11101_v16 }
0x15ec   :  { %4215 = vmatpush1.msra.mxu0 %v11102_v57  ;;  %4248 = vmatprep.mubr.f32.mxu0 %v11103_v59  ;;  %v3410_v17 = vmul.f32 %v8875_v3, %v3362_v18  ;;  %v3411_v16 = vmul.f32 %v8875_v3, %v3363_v42 }
0x15ed   :  { %4286 = vmatpush1.msra.mxu1 %v11104_v4  ;;  %4319 = vmatprep.mubr.f32.mxu1 %v11103_v59 }
0x15ee   :  { %4411 = vmatprep.subr.mxu0 %v11105_v35  ;;  %4482 = vmatprep.subr.mxu1 %v11106_v39 }
0x168d   :  { %v4023_v43 = vpop.f32.mrf.mxu0  ;;  %v4094_v44 = vpop.f32.mrf.mxu1 }
0x168e   :  { %v4024_v8 = vadd.f32 %v4023_v43, %v11107_v24  ;;  %v4095_v52 = vadd.f32 %v4094_v44, %v11108_v62  ;;  %v11111_v43 = vld [vmem:[#allocation71_spill] sm:$0xff] }
0x168f   :  { %v4025_v29 = vpop.f32.mrf.mxu0  ;;  %v4096_v34 = vpop.f32.mrf.mxu1  ;;  %v3463_v44 = vmul.f32 %v11111_v43, %v3410_v17 }
0x1690   :  { %v4026_v28 = vadd.f32 %v4025_v29, %v11109_v1  ;;  %v4105_v41 = vmul.f32 %v4024_v8, %v4024_v8  ;;  %v4107_v45 = vmul.f32 %v4095_v52, %v4095_v52  ;;  %v4097_v47 = vadd.f32 %v4096_v34, %v11110_v30  ;;  %v11112_v29 = vld [vmem:[#allocation73_spill] sm:$0xff] }
0x1691   :  { %v3464_v34 = vmul.f32 %v11112_v29, %v3411_v16 }
0x1692   :  { %v4099_v0 = vadd.f32 %v4026_v28, %v4024_v8  ;;  %v4106_v54 = vmul.f32 %v4026_v28, %v4026_v28  ;;  %v4108_v33 = vmul.f32 %v4097_v47, %v4097_v47 }
0x1694   :  { %v4100_v23 = vadd.f32 %v4099_v0, %v4095_v52  ;;  %v4109_v10 = vadd.f32 %v4106_v54, %v4105_v41  ;;  %v11113_v54 = vld [vmem:[#allocation75_spill] sm:$0xff] }
0x1695   :  { %v3465_v63 = vmul.f32 %v11113_v54, %v8879_v36 }
0x1696   :  { %v4101_v51 = vadd.f32 %v4100_v23, %v4097_v47  ;;  %v4110_v12 = vadd.f32 %v4109_v10, %v4107_v45  ;;  %v11114_v23 = vld [vmem:[#allocation74_spill] sm:$0xff] }
0x1698   :  { %4102 = vadd.xlane.f32.xlu1 %v4101_v51  ;;  %v4111_v38 = vadd.f32 %v4110_v12, %v4108_v33  ;;  %v3518_v33 = vadd.f32 %v8790_v9, %v3465_v63 }
0x169c   :  { %4112 = vadd.xlane.f32.xlu1 %v4111_v38 }
0x1721   :  { %v4103_v14 = vpop.xlane.xlu1 %4102 }
0x1722   :  { %v4104_v50 = vmul.f32 0.0078125, %v4103_v14 }
0x1724   :  { %v4115_v7 = vmul.f32 %v4104_v50, %v4104_v50  ;;  %v4118_v57 = vsub.f32 %v4024_v8, %v4104_v50  ;;  %v4119_v4 = vsub.f32 %v4026_v28, %v4104_v50  ;;  %v4120_v35 = vsub.f32 %v4095_v52, %v4104_v50 }
0x1725   :  { %v4113_v40 = vpop.xlane.xlu1 %4112  ;;  %v3516_v8 = vadd.f32 %v8777_v15, %v3463_v44  ;;  %v3517_v52 = vadd.f32 %v8780_v25, %v3464_v34 }
0x1726   :  { %v4114_v13 = vmul.f32 0.0078125, %v4113_v40 }
0x1728   :  { %v4116_v5 = vsub.f32 %v4114_v13, %v4115_v7  ;;  %v4121_v7 = vsub.f32 %v4097_v47, %v4104_v50 }
0x172a   :  { %v4117_v58 = vmax.f32 %v4116_v5, 0.0 }
0x172c   :  { %v4122_v55 = vadd.f32 1e-05, %v4117_v58  ;;  %v3365_v58 = vsub.f32 %v8856_v46, %v8864_v56  ;;  %v11115_v46 = vld [vmem:[#allocation62_spill] sm:$0xff] }
0x172d   :  { %v8979_v56 = vadd.f32 %v11115_v46, %v11061_v22 }
0x172e   :  { %5854 = vrsqrt.f32 %v4122_v55  ;;  %v3413_v18 = vmul.f32 %v8875_v3, %v3365_v58  ;;  %v11116_v3 = vld [vmem:[#allocation60_spill] sm:$0xff] }
0x172f   :  { %v3263_v63 = vmul.f32 %v8979_v56, %v8979_v56 }
0x1730   :  { %v3466_v17 = vmul.f32 %v8824_v49, %v3413_v18 }
0x173b   :  { %v5855_v39 = vpop.eup %5854 }
0x173c   :  { %v4124_v41 = vmul.f32 %v5855_v39, %v4118_v57  ;;  %v4125_v0 = vmul.f32 %v5855_v39, %v4119_v4  ;;  %v4126_v45 = vmul.f32 %v5855_v39, %v4120_v35  ;;  %v4127_v55 = vmul.f32 %v5855_v39, %v4121_v7 }
0x173d   :  { %v3519_v57 = vadd.f32 %v8832_v19, %v3466_v17  ;;  %v8983_v39 = vadd.f32 %v11116_v3, %v11062_v2 }
0x173e   :  { %v4128_v20 = vmul.f32 %v4124_v41, %v8784_v26  ;;  %v4129_v10 = vmul.f32 %v4125_v0, %v11114_v23  ;;  %v4130_v51 = vmul.f32 %v4126_v45, %v8793_v37  ;;  %v4131_v42 = vmul.f32 %v4127_v55, %v8820_v27 }
0x173f   :  { %v3216_v0 = vadd.f32 %v8979_v56, %v8983_v39 }
0x1740   :  { %v4132_v28 = vadd.f32 %v4128_v20, %v8797_v53  ;;  %v4133_v12 = vadd.f32 %v4129_v10, %v8800_v61  ;;  %v4134_v38 = vadd.f32 %v4130_v51, %v8805_v60  ;;  %v4135_v16 = vadd.f32 %v4131_v42, %v8827_v21  ;;  %v11117_v51 = vld [vmem:[#allocation55_spill] sm:$0xff] }
0x1741   :  { %v3262_v10 = vmul.f32 %v8983_v39, %v8983_v39 }
0x1742   :  { %v4140_v36 = vadd.f32 %v4132_v28, %v3516_v8  ;;  %v4141_v14 = vadd.f32 %v4133_v12, %v3517_v52  ;;  %v4142_v40 = vadd.f32 %v4134_v38, %v3518_v33  ;;  %v4143_v4 = vadd.f32 %v4135_v16, %v3519_v57 }
0x1743   :  { %v3168_v8 = vadd.f32 %v11117_v51, %v11063_v48  ;;  %v3296_v33 = vadd.f32 %v3263_v63, %v3262_v10 }
0x1744   :  { %v5611_v13 = vmul.f32 -1.442695, %v4140_v36  ;;  %v5612_v5 = vmul.f32 -1.442695, %v4141_v14  ;;  %v11118_v36 = vld [vmem:[#allocation57_spill] sm:$0xff] }
0x1745   :  { %v3217_v12 = vadd.f32 %v3216_v0, %v3168_v8  ;;  %v3264_v38 = vmul.f32 %v3168_v8, %v3168_v8  ;;  %v8998_v14 = vadd.f32 %v11118_v36, %v11064_v6 }
0x1746   :  { %5856 = vpow2.f32 %v5611_v13 }
0x1747   :  { %5858 = vpow2.f32 %v5612_v5  ;;  %v3218_v13 = vadd.f32 %v3217_v12, %v8998_v14  ;;  %v3297_v5 = vadd.f32 %v3296_v33, %v3264_v38 }
0x1748   :  { %5860 = vtanh.f32 %v4143_v4 }
0x1753   :  { %v5857_v47 = vpop.eup %5856 }
0x1754   :  { %v5859_v50 = vpop.eup %5858  ;;  %v4147_v35 = vadd.f32 1.0, %v5857_v47 }
0x1755   :  { %v4153_v44 = vadd.f32 1.0, %v5859_v50  ;;  %v5861_v34 = vpop.eup %5860  ;;  %v5613_v50 = vmul.f32 -1.442695, %v4142_v40 }
0x1756   :  { %5862 = vrcp.f32 %v4147_v35 }
0x1757   :  { %5864 = vrcp.f32 %v4153_v44 }
0x1758   :  { %5866 = vpow2.f32 %v5613_v50  ;;  %v9049_v50 = vld [vmem:[#allocation12 + $0x388] sm:$0xff] }
0x1763   :  { %v5863_v41 = vpop.eup %5862 }
0x1764   :  { %v5865_v45 = vpop.eup %5864  ;;  %v4164_v20 = vmul.f32 %v5863_v41, %v5861_v34 }
0x1765   :  { %v4163_v52 = vmul.f32 %v5865_v45, %v8852_v11  ;;  %v3265_v11 = vmul.f32 %v8998_v14, %v8998_v14  ;;  %v5867_v45 = vpop.eup %5866 }
0x1767   :  { %v8994_v28 = vadd.f32 %v4164_v20, %v4163_v52  ;;  %v3298_v58 = vadd.f32 %v3297_v5, %v3265_v11  ;;  %v4159_v52 = vadd.f32 1.0, %v5867_v45  ;;  %v9019_v11 = vld [vmem:[#allocation12 + $0x3e0] sm:$0xff]  ;;  %v9076_v45 = vld [vmem:[#allocation12 + $0x358] sm:$0xff] }
0x1768   :  { %11127 = vst [vmem:[#allocation90_spill] sm:$0xff] %v9076_v45 }
0x1769   :  { %4166 = vadd.xlane.f32.xlu0 %v8994_v28  ;;  %v4169_v7 = vmul.f32 %v8994_v28, %v8994_v28 }
0x176b   :  { %4170 = vadd.xlane.f32.xlu1 %v4169_v7 }
0x176d   :  { %3219 = vadd.xlane.f32.xlu0 %v3218_v13 }
0x1771   :  { %3299 = vadd.xlane.f32.xlu0 %v3298_v58  ;;  %v9022_v58 = vld [vmem:[#allocation12 + $0x3f0] sm:$0xff] }
0x17f2   :  { %v4167_v55 = vpop.xlane.xlu0 %4166 }
0x17f3   :  { %v4168_v18 = vmul.f32 0.03125, %v4167_v55  ;;  %v9025_v55 = vld [vmem:[#allocation12 + $0x3c8] sm:$0xff] }
0x17f4   :  { %v4171_v42 = vpop.xlane.xlu1 %4170 }
0x17f5   :  { %v4173_v17 = vmul.f32 %v4168_v18, %v4168_v18  ;;  %v4172_v16 = vmul.f32 0.03125, %v4171_v42  ;;  %v4176_v20 = vsub.f32 %v8994_v28, %v4168_v18  ;;  %v9031_v18 = vld [vmem:[#allocation12 + $0x3c0] sm:$0xff]  ;;  %v9034_v42 = vld [vmem:[#allocation12 + $0x3d0] sm:$0xff] }
0x17f6   :  { %v3220_v57 = vpop.xlane.xlu0 %3219 }
0x17f7   :  { %v4174_v4 = vsub.f32 %v4172_v16, %v4173_v17  ;;  %v9006_v47 = vmul.f32 0.0078125, %v3220_v57  ;;  %v9037_v17 = vld [vmem:[#allocation12 + $0x3a8] sm:$0xff]  ;;  %v9040_v16 = vld [vmem:[#allocation12 + $0x3b8] sm:$0xff]  ;;  %v9043_v57 = vld [vmem:[#allocation12 + $0x3a0] sm:$0xff] }
0x17f9   :  { %v4175_v35 = vmax.f32 %v4174_v4, 0.0  ;;  %v3336_v3 = vmul.f32 %v9006_v47, %v9006_v47  ;;  %v3368_v38 = vsub.f32 %v3168_v8, %v9006_v47  ;;  %v9028_v8 = vld [vmem:[#allocation12 + $0x3d8] sm:$0xff]  ;;  %v9046_v4 = vld [vmem:[#allocation12 + $0x3b0] sm:$0xff] }
0x17fa   :  { %v3300_v44 = vpop.xlane.xlu0 %3299 }
0x17fb   :  { %v4177_v46 = vadd.f32 1e-05, %v4175_v35  ;;  %v3328_v34 = vmul.f32 0.0078125, %v3300_v44  ;;  %v9052_v35 = vld [vmem:[#allocation12 + $0x398] sm:$0xff]  ;;  %v9055_v44 = vld [vmem:[#allocation12 + $0x380] sm:$0xff] }
0x17fc   :  { %11119 = vst [vmem:[#allocation105_spill] sm:$0xff] %v9052_v35  ;;  %11120 = vst [vmem:[#allocation102_spill] sm:$0xff] %v9055_v44 }
0x17fd   :  { %5868 = vrsqrt.f32 %v4177_v46  ;;  %v3344_v41 = vsub.f32 %v3328_v34, %v3336_v3  ;;  %v9058_v46 = vld [vmem:[#allocation12 + $0x390] sm:$0xff]  ;;  %v9061_v3 = vld [vmem:[#allocation12 + $0x368] sm:$0xff]  ;;  %v9064_v34 = vld [vmem:[#allocation12 + $0x378] sm:$0xff] }
0x17fe   :  { %11121 = vst [vmem:[#allocation103_spill] sm:$0xff] %v9058_v46  ;;  %11122 = vst [vmem:[#allocation76_spill] sm:$0xff] %v9061_v3 }
0x17ff   :  { %v3352_v0 = vmax.f32 %v3344_v41, 0.0  ;;  %11123 = vst [vmem:[#allocation78_spill] sm:$0xff] %v9064_v34  ;;  %v9067_v41 = vld [vmem:[#allocation12 + $0x360] sm:$0xff] }
0x1800   :  { %11124 = vst [vmem:[#allocation89_spill] sm:$0xff] %v9067_v41 }
0x1801   :  { %v3392_v63 = vadd.f32 1e-05, %v3352_v0  ;;  %v9070_v0 = vld [vmem:[#allocation12 + $0x370] sm:$0xff] }
0x1802   :  { %11125 = vst [vmem:[#allocation88_spill] sm:$0xff] %v9070_v0 }
0x1803   :  { %5870 = vrsqrt.f32 %v3392_v63  ;;  %v9073_v63 = vld [vmem:[#allocation12 + $0x348] sm:$0xff] }
0x1804   :  { %5872 = vrcp.f32 %v4159_v52  ;;  %11126 = vst [vmem:[#allocation92_spill] sm:$0xff] %v9073_v63  ;;  %v9088_v52 = vld [vmem:[#allocation12 + $0x338] sm:$0xff] }
0x1805   :  { %11131 = vst [vmem:[#allocation94_spill] sm:$0xff] %v9088_v52 }
0x180a   :  { %v5869_v10 = vpop.eup %5868 }
0x180b   :  { %v4179_v51 = vmul.f32 %v5869_v10, %v4176_v20  ;;  %v9079_v20 = vld [vmem:[#allocation12 + $0x340] sm:$0xff]  ;;  %v9082_v10 = vld [vmem:[#allocation12 + $0x350] sm:$0xff] }
0x180c   :  { %11128 = vst [vmem:[#allocation82_spill] sm:$0xff] %v9079_v20  ;;  %11129 = vst [vmem:[#allocation91_spill] sm:$0xff] %v9082_v10 }
0x180d   :  { %v4180_v40 = vmul.f32 %v8869_v31, %v4179_v51  ;;  %v9085_v51 = vld [vmem:[#allocation12 + $0x328] sm:$0xff] }
0x180e   :  { %11130 = vst [vmem:[#allocation30_spill] sm:$0xff] %v9085_v51 }
0x180f   :  { %v4181_v12 = vadd.f32 %v8871_v32, %v4180_v40  ;;  %v9091_v40 = vld [vmem:[#allocation12 + $0x320] sm:$0xff] }
0x1810   :  { %v9013_v33 = vpop.eup %5870  ;;  %11132 = vst [vmem:[#allocation32_spill] sm:$0xff] %v9091_v40 }
0x1811   :  { %5874 = vtanh.f32 %v4181_v12  ;;  %v9017_v36 = vmul.f32 %v9013_v33, %v3368_v38  ;;  %v5873_v7 = vpop.eup %5872  ;;  %v9094_v12 = vld [vmem:[#allocation12 + $0x330] sm:$0xff]  ;;  %v9097_v38 = vld [vmem:[#allocation12 + $0x308] sm:$0xff] }
0x1812   :  { %11133 = vst [vmem:[#allocation34_spill] sm:$0xff] %v9094_v12  ;;  %11134 = vst [vmem:[#allocation83_spill] sm:$0xff] %v9097_v38 }
0x181e   :  { %v5875_v13 = vpop.eup %5874 }
0x181f   :  { %v4183_v5 = vmul.f32 %v5875_v13, %v5873_v7  ;;  %v9100_v7 = vld [vmem:[#allocation12 + $0x318] sm:$0xff]  ;;  %v9103_v13 = vld [vmem:[#allocation12 + $0x300] sm:$0xff] }
0x1820   :  { %11135 = vst [vmem:[#allocation28_spill] sm:$0xff] %v9100_v7  ;;  %11136 = vst [vmem:[#allocation86_spill] sm:$0xff] %v9103_v13 }
0x1821   :  { %4249 = vmatmul.mubr.f32.vlgmr.msra.gmra.mxu0 %v4183_v5  ;;  %4320 = vmatmul.mubr.f32.vlgmr.msra.gmra.mxu1 %v4183_v5  ;;  %v9106_v5 = vld [vmem:[#allocation12 + $0x310] sm:$0xff] }
0x1822   :  { %4412 = vmatpush1.msra.mxu0 %v9019_v11  ;;  %4483 = vmatpush1.msra.mxu1 %v9022_v58  ;;  %11137 = vst [vmem:[#allocation81_spill] sm:$0xff] %v9106_v5 }
0x1823   :  { %4413 = vmatprep.subr.mxu0 %v9025_v55  ;;  %4484 = vmatprep.subr.mxu1 %v9028_v8 }
0x1824   :  { %4414 = vmatpush1.msra.mxu0 %v9031_v18  ;;  %4485 = vmatpush1.msra.mxu1 %v9034_v42 }
0x1825   :  { %4415 = vmatprep.subr.mxu0 %v9037_v17  ;;  %4486 = vmatprep.subr.mxu1 %v9040_v16 }
0x1826   :  { %4416 = vmatpush1.msra.mxu0 %v9043_v57  ;;  %4487 = vmatpush1.msra.mxu1 %v9046_v4 }
0x1827   :  { %4417 = vmatprep.subr.mxu0 %v9049_v50  ;;  %4488 = vmatprep.subr.mxu1 %v9052_v35 }
0x1828   :  { %4418 = vmatpush1.msra.mxu0 %v9055_v44  ;;  %4489 = vmatpush1.msra.mxu1 %v9058_v46 }
0x1829   :  { %4419 = vmatprep.subr.mxu0 %v9061_v3  ;;  %4490 = vmatprep.subr.mxu1 %v9064_v34 }
0x182a   :  { %4420 = vmatpush1.msra.mxu0 %v9067_v41  ;;  %4491 = vmatpush1.msra.mxu1 %v9070_v0 }
0x182b   :  { %4421 = vmatprep.subr.mxu0 %v9073_v63  ;;  %4492 = vmatprep.subr.mxu1 %v9076_v45 }
0x182c   :  { %4422 = vmatpush1.msra.mxu0 %v9079_v20  ;;  %4493 = vmatpush1.msra.mxu1 %v9082_v10 }
0x182d   :  { %4423 = vmatprep.subr.mxu0 %v9085_v51  ;;  %4494 = vmatprep.subr.mxu1 %v9088_v52 }
0x182e   :  { %4424 = vmatpush1.msra.mxu0 %v9091_v40  ;;  %4495 = vmatpush1.msra.mxu1 %v9094_v12  ;;  %v9109_v40 = vld [vmem:[#allocation12 + $0x2e8] sm:$0xff]  ;;  %v9112_v12 = vld [vmem:[#allocation12 + $0x2f8] sm:$0xff] }
0x182f   :  { %4425 = vmatprep.subr.mxu0 %v9097_v38  ;;  %4496 = vmatprep.subr.mxu1 %v9100_v7  ;;  %11138 = vst [vmem:[#allocation31_spill] sm:$0xff] %v9109_v40  ;;  %11139 = vst [vmem:[#allocation84_spill] sm:$0xff] %v9112_v12  ;;  %v9115_v38 = vld [vmem:[#allocation12 + $0x2e0] sm:$0xff]  ;;  %v9118_v7 = vld [vmem:[#allocation12 + $0x2f0] sm:$0xff] }
0x1830   :  { %4426 = vmatpush1.msra.mxu0 %v9103_v13  ;;  %4497 = vmatpush1.msra.mxu1 %v9106_v5  ;;  %11140 = vst [vmem:[#allocation33_spill] sm:$0xff] %v9115_v38  ;;  %11141 = vst [vmem:[#allocation36_spill] sm:$0xff] %v9118_v7  ;;  %v9121_v13 = vld [vmem:[#allocation12 + $0x2c8] sm:$0xff]  ;;  %v9124_v5 = vld [vmem:[#allocation12 + $0x2d8] sm:$0xff] }
0x1831   :  { %4427 = vmatprep.subr.mxu0 %v9109_v40  ;;  %4498 = vmatprep.subr.mxu1 %v9112_v12  ;;  %11142 = vst [vmem:[#allocation35_spill] sm:$0xff] %v9121_v13  ;;  %11143 = vst [vmem:[#allocation38_spill] sm:$0xff] %v9124_v5  ;;  %v9127_v40 = vld [vmem:[#allocation12 + $0x2c0] sm:$0xff]  ;;  %v9130_v12 = vld [vmem:[#allocation12 + $0x2d0] sm:$0xff] }
0x1832   :  { %4428 = vmatpush1.msra.mxu0 %v9115_v38  ;;  %4499 = vmatpush1.msra.mxu1 %v9118_v7  ;;  %11144 = vst [vmem:[#allocation37_spill] sm:$0xff] %v9127_v40  ;;  %11145 = vst [vmem:[#allocation40_spill] sm:$0xff] %v9130_v12  ;;  %v9133_v38 = vld [vmem:[#allocation12 + $0x2a8] sm:$0xff]  ;;  %v9136_v7 = vld [vmem:[#allocation12 + $0x2b8] sm:$0xff] }
0x1833   :  { %4429 = vmatprep.subr.mxu0 %v9121_v13  ;;  %4500 = vmatprep.subr.mxu1 %v9124_v5  ;;  %11146 = vst [vmem:[#allocation39_spill] sm:$0xff] %v9133_v38  ;;  %11147 = vst [vmem:[#allocation42_spill] sm:$0xff] %v9136_v7  ;;  %v9139_v13 = vld [vmem:[#allocation12 + $0x2a0] sm:$0xff]  ;;  %v9142_v5 = vld [vmem:[#allocation12 + $0x2b0] sm:$0xff] }
0x1834   :  { %4430 = vmatpush1.msra.mxu0 %v9127_v40  ;;  %4501 = vmatpush1.msra.mxu1 %v9130_v12  ;;  %11148 = vst [vmem:[#allocation41_spill] sm:$0xff] %v9139_v13  ;;  %11149 = vst [vmem:[#allocation44_spill] sm:$0xff] %v9142_v5  ;;  %v9145_v40 = vld [vmem:[#allocation12 + $0x288] sm:$0xff]  ;;  %v9148_v12 = vld [vmem:[#allocation12 + $0x298] sm:$0xff] }
0x1835   :  { %4431 = vmatprep.subr.mxu0 %v9133_v38  ;;  %4502 = vmatprep.subr.mxu1 %v9136_v7  ;;  %11150 = vst [vmem:[#allocation50_spill] sm:$0xff] %v9145_v40  ;;  %11151 = vst [vmem:[#allocation46_spill] sm:$0xff] %v9148_v12  ;;  %v9151_v38 = vld [vmem:[#allocation12 + $0x280] sm:$0xff]  ;;  %v9154_v7 = vld [vmem:[#allocation12 + $0x290] sm:$0xff] }
0x1836   :  { %4432 = vmatpush1.msra.mxu0 %v9139_v13  ;;  %4503 = vmatpush1.msra.mxu1 %v9142_v5  ;;  %11152 = vst [vmem:[#allocation52_spill] sm:$0xff] %v9151_v38  ;;  %11153 = vst [vmem:[#allocation48_spill] sm:$0xff] %v9154_v7  ;;  %v9157_v13 = vld [vmem:[#allocation12 + $0x268] sm:$0xff]  ;;  %v9160_v5 = vld [vmem:[#allocation12 + $0x278] sm:$0xff] }
0x1837   :  { %4433 = vmatprep.subr.mxu0 %v9145_v40  ;;  %4504 = vmatprep.subr.mxu1 %v9148_v12  ;;  %11154 = vst [vmem:[#allocation54_spill] sm:$0xff] %v9157_v13  ;;  %11155 = vst [vmem:[#allocation43_spill] sm:$0xff] %v9160_v5  ;;  %v9163_v40 = vld [vmem:[#allocation12 + $0x260] sm:$0xff]  ;;  %v9166_v12 = vld [vmem:[#allocation12 + $0x270] sm:$0xff] }
0x1838   :  { %4434 = vmatpush1.msra.mxu0 %v9151_v38  ;;  %4505 = vmatpush1.msra.mxu1 %v9154_v7  ;;  %11156 = vst [vmem:[#allocation56_spill] sm:$0xff] %v9163_v40  ;;  %11157 = vst [vmem:[#allocation45_spill] sm:$0xff] %v9166_v12  ;;  %v9169_v38 = vld [vmem:[#allocation12 + $0x248] sm:$0xff]  ;;  %v9172_v7 = vld [vmem:[#allocation12 + $0x258] sm:$0xff] }
0x1839   :  { %4435 = vmatprep.subr.mxu0 %v9157_v13  ;;  %4506 = vmatprep.subr.mxu1 %v9160_v5  ;;  %11158 = vst [vmem:[#allocation51_spill] sm:$0xff] %v9169_v38  ;;  %11159 = vst [vmem:[#allocation47_spill] sm:$0xff] %v9172_v7  ;;  %v9175_v13 = vld [vmem:[#allocation12 + $0x240] sm:$0xff]  ;;  %v9178_v5 = vld [vmem:[#allocation12 + $0x250] sm:$0xff] }
0x183a   :  { %4436 = vmatpush1.msra.mxu0 %v9163_v40  ;;  %4507 = vmatpush1.msra.mxu1 %v9166_v12  ;;  %11160 = vst [vmem:[#allocation58_spill] sm:$0xff] %v9175_v13  ;;  %11161 = vst [vmem:[#allocation49_spill] sm:$0xff] %v9178_v5  ;;  %v9181_v40 = vld [vmem:[#allocation12 + $0x228] sm:$0xff]  ;;  %v9184_v12 = vld [vmem:[#allocation12 + $0x238] sm:$0xff] }
0x183b   :  { %4437 = vmatprep.subr.mxu0 %v9169_v38  ;;  %4508 = vmatprep.subr.mxu1 %v9172_v7  ;;  %11162 = vst [vmem:[#allocation53_spill] sm:$0xff] %v9181_v40  ;;  %11163 = vst [vmem:[#allocation85_spill] sm:$0xff] %v9184_v12  ;;  %v9187_v38 = vld [vmem:[#allocation12 + $0x220] sm:$0xff]  ;;  %v9190_v7 = vld [vmem:[#allocation12 + $0x230] sm:$0xff] }
0x183c   :  { %4438 = vmatpush1.msra.mxu0 %v9175_v13  ;;  %4509 = vmatpush1.msra.mxu1 %v9178_v5  ;;  %11164 = vst [vmem:[#allocation87_spill] sm:$0xff] %v9187_v38  ;;  %11165 = vst [vmem:[#allocation72_spill] sm:$0xff] %v9190_v7  ;;  %v9193_v13 = vld [vmem:[#allocation12 + $0x208] sm:$0xff]  ;;  %v9196_v5 = vld [vmem:[#allocation12 + $0x218] sm:$0xff] }
0x183d   :  { %4439 = vmatprep.subr.mxu0 %v9181_v40  ;;  %4510 = vmatprep.subr.mxu1 %v9184_v12  ;;  %11166 = vst [vmem:[#allocation71_spill] sm:$0xff] %v9193_v13  ;;  %11167 = vst [vmem:[#allocation73_spill] sm:$0xff] %v9196_v5  ;;  %v9199_v40 = vld [vmem:[#allocation12 + $0x200] sm:$0xff]  ;;  %v9203_v12 = vld [vmem:[#allocation12 + $0x210] sm:$0xff] }
0x183e   :  { %4440 = vmatpush1.msra.mxu0 %v9187_v38  ;;  %4511 = vmatpush1.msra.mxu1 %v9190_v7  ;;  %11168 = vst [vmem:[#allocation75_spill] sm:$0xff] %v9199_v40  ;;  %11169 = vst [vmem:[#allocation74_spill] sm:$0xff] %v9203_v12  ;;  %v9207_v7 = vld [vmem:[#allocation12 + $0x3e8] sm:$0xff] }
0x183f   :  { %4441 = vmatprep.subr.mxu0 %v9193_v13  ;;  %4512 = vmatprep.subr.mxu1 %v9196_v5  ;;  %11170 = vst [vmem:[#allocation62_spill] sm:$0xff] %v9207_v7  ;;  %v9210_v13 = vld [vmem:[#allocation12 + $0x3f8] sm:$0xff] }
0x1840   :  { %4442 = vmatpush1.msra.mxu0 %v9199_v40  ;;  %4475 = vmatprep.mubr.f32.mxu0 %v11103_v59  ;;  %11171 = vst [vmem:[#allocation60_spill] sm:$0xff] %v9210_v13 }
0x1841   :  { %4513 = vmatpush1.msra.mxu1 %v9203_v12  ;;  %4546 = vmatprep.mubr.f32.mxu1 %v11103_v59 }
0x1842   :  { %4638 = vmatprep.subr.mxu0 %v9207_v7  ;;  %4709 = vmatprep.subr.mxu1 %v9210_v13 }
0x18e1   :  { %v4250_v5 = vpop.f32.mrf.mxu0  ;;  %v4321_v38 = vpop.f32.mrf.mxu1 }
0x18e2   :  { %v4251_v40 = vadd.f32 %v4250_v5, %v11107_v24  ;;  %v4322_v51 = vadd.f32 %v4321_v38, %v11108_v62 }
0x18e3   :  { %v4252_v52 = vpop.f32.mrf.mxu0  ;;  %v4323_v12 = vpop.f32.mrf.mxu1 }
0x18e4   :  { %v4253_v10 = vadd.f32 %v4252_v52, %v11109_v1  ;;  %v4332_v20 = vmul.f32 %v4251_v40, %v4251_v40  ;;  %v4334_v63 = vmul.f32 %v4322_v51, %v4322_v51  ;;  %v4324_v7 = vadd.f32 %v4323_v12, %v11110_v30 }
0x18e5   :  { %v3366_v12 = vsub.f32 %v8983_v39, %v9006_v47  ;;  %v3469_v39 = vmul.f32 %v11113_v54, %v9017_v36 }
0x18e6   :  { %v4326_v59 = vadd.f32 %v4253_v10, %v4251_v40  ;;  %v4333_v45 = vmul.f32 %v4253_v10, %v4253_v10  ;;  %v4335_v3 = vmul.f32 %v4324_v7, %v4324_v7 }
0x18e8   :  { %v4327_v0 = vadd.f32 %v4326_v59, %v4322_v51  ;;  %v4336_v41 = vadd.f32 %v4333_v45, %v4332_v20  ;;  %v3367_v59 = vsub.f32 %v8979_v56, %v9006_v47 }
0x18ea   :  { %v4328_v34 = vadd.f32 %v4327_v0, %v4324_v7  ;;  %v4337_v13 = vadd.f32 %v4336_v41, %v4334_v63 }
0x18ec   :  { %4329 = vadd.xlane.f32.xlu1 %v4328_v34  ;;  %v4338_v46 = vadd.f32 %v4337_v13, %v4335_v3  ;;  %v3414_v34 = vmul.f32 %v9013_v33, %v3366_v12  ;;  %v3415_v3 = vmul.f32 %v9013_v33, %v3367_v59 }
0x18ee   :  { %v3467_v45 = vmul.f32 %v11111_v43, %v3414_v34 }
0x18f0   :  { %4339 = vadd.xlane.f32.xlu1 %v4338_v46 }
0x1975   :  { %v4330_v5 = vpop.xlane.xlu1 %4329 }
0x1976   :  { %v4331_v24 = vmul.f32 0.0078125, %v4330_v5 }
0x1978   :  { %v4342_v62 = vmul.f32 %v4331_v24, %v4331_v24  ;;  %v4345_v46 = vsub.f32 %v4251_v40, %v4331_v24  ;;  %v4346_v41 = vsub.f32 %v4253_v10, %v4331_v24  ;;  %v4347_v0 = vsub.f32 %v4322_v51, %v4331_v24 }
0x1979   :  { %v4340_v38 = vpop.xlane.xlu1 %4339  ;;  %v3520_v10 = vadd.f32 %v8777_v15, %v3467_v45  ;;  %v4348_v34 = vsub.f32 %v4324_v7, %v4331_v24 }
0x197a   :  { %v4341_v52 = vmul.f32 0.0078125, %v4340_v38  ;;  %v3522_v38 = vadd.f32 %v8790_v9, %v3469_v39 }
0x197c   :  { %v4343_v1 = vsub.f32 %v4341_v52, %v4342_v62  ;;  %v3468_v62 = vmul.f32 %v11112_v29, %v3415_v3 }
0x197e   :  { %v4344_v44 = vmax.f32 %v4343_v1, 0.0  ;;  %v3521_v51 = vadd.f32 %v8780_v25, %v3468_v62 }
0x1980   :  { %v4349_v35 = vadd.f32 1e-05, %v4344_v44 }
0x1982   :  { %5876 = vrsqrt.f32 %v4349_v35 }
0x198f   :  { %v5877_v63 = vpop.eup %5876 }
0x1990   :  { %v4351_v1 = vmul.f32 %v5877_v63, %v4345_v46  ;;  %v4352_v35 = vmul.f32 %v5877_v63, %v4346_v41  ;;  %v4353_v44 = vmul.f32 %v5877_v63, %v4347_v0  ;;  %v3369_v41 = vsub.f32 %v8998_v14, %v9006_v47  ;;  %v11172_v14 = vld [vmem:[#allocation66_spill] sm:$0xff] }
0x1991   :  { %v4354_v0 = vmul.f32 %v5877_v63, %v4348_v34  ;;  %v9245_v47 = vadd.f32 %v11172_v14, %v11061_v22 }
0x1992   :  { %v4355_v56 = vmul.f32 %v4351_v1, %v8784_v26  ;;  %v4356_v20 = vmul.f32 %v4352_v35, %v11114_v23  ;;  %v4357_v13 = vmul.f32 %v4353_v44, %v8793_v37  ;;  %v3417_v45 = vmul.f32 %v9013_v33, %v3369_v41  ;;  %v11173_v33 = vld [vmem:[#allocation64_spill] sm:$0xff] }
0x1993   :  { %v4358_v62 = vmul.f32 %v4354_v0, %v8820_v27  ;;  %v9249_v63 = vadd.f32 %v11173_v33, %v11062_v2 }
0x1994   :  { %v4359_v40 = vadd.f32 %v4355_v56, %v8797_v53  ;;  %v4360_v5 = vadd.f32 %v4356_v20, %v8800_v61  ;;  %v4361_v52 = vadd.f32 %v4357_v13, %v8805_v60  ;;  %v3470_v1 = vmul.f32 %v8824_v49, %v3417_v45  ;;  %v11175_v45 = vld [vmem:[#allocation61_spill] sm:$0xff] }
0x1995   :  { %v4362_v35 = vadd.f32 %v4358_v62, %v8827_v21  ;;  %v9264_v62 = vadd.f32 %v11175_v45, %v11064_v6 }
0x1996   :  { %v4367_v36 = vadd.f32 %v4359_v40, %v3520_v10  ;;  %v4368_v12 = vadd.f32 %v4360_v5, %v3521_v51  ;;  %v4369_v59 = vadd.f32 %v4361_v52, %v3522_v38  ;;  %v3523_v39 = vadd.f32 %v8832_v19, %v3470_v1 }
0x1997   :  { %v3221_v51 = vadd.f32 %v9245_v47, %v9249_v63  ;;  %v3267_v40 = vmul.f32 %v9245_v47, %v9245_v47  ;;  %v3266_v52 = vmul.f32 %v9249_v63, %v9249_v63 }
0x1998   :  { %v5614_v3 = vmul.f32 -1.442695, %v4367_v36  ;;  %v5615_v46 = vmul.f32 -1.442695, %v4368_v12  ;;  %v4370_v44 = vadd.f32 %v4362_v35, %v3523_v39  ;;  %v11174_v36 = vld [vmem:[#allocation59_spill] sm:$0xff] }
0x1999   :  { %v3174_v12 = vadd.f32 %v11174_v36, %v11063_v48  ;;  %v3301_v41 = vadd.f32 %v3267_v40, %v3266_v52 }
0x199a   :  { %5878 = vpow2.f32 %v5614_v3 }
0x199b   :  { %5880 = vpow2.f32 %v5615_v46  ;;  %v3222_v46 = vadd.f32 %v3221_v51, %v3174_v12  ;;  %v3268_v0 = vmul.f32 %v3174_v12, %v3174_v12  ;;  %v5616_v51 = vmul.f32 -1.442695, %v4369_v59 }
0x199c   :  { %5882 = vtanh.f32 %v4370_v44 }
0x199d   :  { %v3223_v35 = vadd.f32 %v3222_v46, %v9264_v62  ;;  %v3302_v39 = vadd.f32 %v3301_v41, %v3268_v0 }
0x19a7   :  { %v5879_v24 = vpop.eup %5878 }
0x19a8   :  { %v5881_v7 = vpop.eup %5880  ;;  %v4374_v56 = vadd.f32 1.0, %v5879_v24 }
0x19a9   :  { %v4380_v20 = vadd.f32 1.0, %v5881_v7  ;;  %v5883_v13 = vpop.eup %5882 }
0x19aa   :  { %5884 = vrcp.f32 %v4374_v56 }
0x19ab   :  { %5886 = vrcp.f32 %v4380_v20 }
0x19ac   :  { %5888 = vpow2.f32 %v5616_v51  ;;  %v11181_v51 = vld [vmem:[#allocation89_spill] sm:$0xff] }
0x19b7   :  { %v5885_v10 = vpop.eup %5884 }
0x19b8   :  { %v5887_v5 = vpop.eup %5886  ;;  %v4391_v38 = vmul.f32 %v5885_v10, %v5883_v13 }
0x19b9   :  { %v4390_v34 = vmul.f32 %v5887_v5, %v8994_v28  ;;  %v3269_v28 = vmul.f32 %v9264_v62, %v9264_v62  ;;  %v5889_v0 = vpop.eup %5888 }
0x19bb   :  { %v9260_v3 = vadd.f32 %v4391_v38, %v4390_v34  ;;  %v3303_v44 = vadd.f32 %v3302_v39, %v3269_v28  ;;  %v4386_v39 = vadd.f32 1.0, %v5889_v0  ;;  %v11190_v0 = vld [vmem:[#allocation34_spill] sm:$0xff] }
0x19bd   :  { %4393 = vadd.xlane.f32.xlu0 %v9260_v3  ;;  %v4396_v1 = vmul.f32 %v9260_v3, %v9260_v3 }
0x19bf   :  { %4397 = vadd.xlane.f32.xlu1 %v4396_v1 }
0x19c1   :  { %3224 = vadd.xlane.f32.xlu0 %v3223_v35 }
0x19c5   :  { %3304 = vadd.xlane.f32.xlu0 %v3303_v44 }
0x1a46   :  { %v4394_v24 = vpop.xlane.xlu0 %4393 }
0x1a47   :  { %v4395_v7 = vmul.f32 0.03125, %v4394_v24 }
0x1a48   :  { %v4398_v56 = vpop.xlane.xlu1 %4397 }
0x1a49   :  { %v4400_v20 = vmul.f32 %v4395_v7, %v4395_v7  ;;  %v4399_v14 = vmul.f32 0.03125, %v4398_v56  ;;  %v4403_v45 = vsub.f32 %v9260_v3, %v4395_v7  ;;  %v11179_v7 = vld [vmem:[#allocation76_spill] sm:$0xff] }
0x1a4a   :  { %v3225_v33 = vpop.xlane.xlu0 %3224 }
0x1a4b   :  { %v4401_v13 = vsub.f32 %v4399_v14, %v4400_v20  ;;  %v9272_v10 = vmul.f32 0.0078125, %v3225_v33 }
0x1a4d   :  { %v4402_v40 = vmax.f32 %v4401_v13, 0.0  ;;  %v3337_v52 = vmul.f32 %v9272_v10, %v9272_v10  ;;  %v3372_v24 = vsub.f32 %v3174_v12, %v9272_v10  ;;  %v11178_v12 = vld [vmem:[#allocation103_spill] sm:$0xff]  ;;  %v11180_v13 = vld [vmem:[#allocation78_spill] sm:$0xff] }
0x1a4e   :  { %v3305_v5 = vpop.xlane.xlu0 %3304 }
0x1a4f   :  { %v4404_v38 = vadd.f32 1e-05, %v4402_v40  ;;  %v3329_v36 = vmul.f32 0.0078125, %v3305_v5  ;;  %v11182_v40 = vld [vmem:[#allocation88_spill] sm:$0xff] }
0x1a50   :  { %v11183_v5 = vld [vmem:[#allocation92_spill] sm:$0xff] }
0x1a51   :  { %5890 = vrsqrt.f32 %v4404_v38  ;;  %v3345_v34 = vsub.f32 %v3329_v36, %v3337_v52  ;;  %v11184_v38 = vld [vmem:[#allocation90_spill] sm:$0xff]  ;;  %v11186_v36 = vld [vmem:[#allocation91_spill] sm:$0xff] }
0x1a52   :  { %v11185_v52 = vld [vmem:[#allocation82_spill] sm:$0xff] }
0x1a53   :  { %v3353_v46 = vmax.f32 %v3345_v34, 0.0  ;;  %v11187_v34 = vld [vmem:[#allocation30_spill] sm:$0xff] }
0x1a55   :  { %v3393_v41 = vadd.f32 1e-05, %v3353_v46  ;;  %v11188_v46 = vld [vmem:[#allocation94_spill] sm:$0xff] }
0x1a57   :  { %5892 = vrsqrt.f32 %v3393_v41  ;;  %v11189_v41 = vld [vmem:[#allocation32_spill] sm:$0xff] }
0x1a58   :  { %5894 = vrcp.f32 %v4386_v39  ;;  %v11194_v39 = vld [vmem:[#allocation81_spill] sm:$0xff] }
0x1a5e   :  { %v5891_v1 = vpop.eup %5890 }
0x1a5f   :  { %v4406_v35 = vmul.f32 %v5891_v1, %v4403_v45  ;;  %v11191_v45 = vld [vmem:[#allocation83_spill] sm:$0xff]  ;;  %v11192_v1 = vld [vmem:[#allocation28_spill] sm:$0xff] }
0x1a61   :  { %v4407_v59 = vmul.f32 %v8869_v31, %v4406_v35  ;;  %v11176_v31 = vld [vmem:[#allocation105_spill] sm:$0xff]  ;;  %v11193_v35 = vld [vmem:[#allocation86_spill] sm:$0xff] }
0x1a63   :  { %v4408_v28 = vadd.f32 %v8871_v32, %v4407_v59  ;;  %v11177_v32 = vld [vmem:[#allocation102_spill] sm:$0xff]  ;;  %v11195_v59 = vld [vmem:[#allocation31_spill] sm:$0xff] }
0x1a64   :  { %v9279_v44 = vpop.eup %5892 }
0x1a65   :  { %5896 = vtanh.f32 %v4408_v28  ;;  %v9283_v56 = vmul.f32 %v9279_v44, %v3372_v24  ;;  %v5895_v20 = vpop.eup %5894  ;;  %v11196_v28 = vld [vmem:[#allocation84_spill] sm:$0xff]  ;;  %v11197_v24 = vld [vmem:[#allocation33_spill] sm:$0xff] }
0x1a72   :  { %v5897_v14 = vpop.eup %5896 }
0x1a73   :  { %v4410_v33 = vmul.f32 %v5897_v14, %v5895_v20  ;;  %v11198_v20 = vld [vmem:[#allocation36_spill] sm:$0xff]  ;;  %v11199_v14 = vld [vmem:[#allocation35_spill] sm:$0xff] }
0x1a75   :  { %4476 = vmatmul.mubr.f32.vlgmr.msra.gmra.mxu0 %v4410_v33  ;;  %4547 = vmatmul.mubr.f32.vlgmr.msra.gmra.mxu1 %v4410_v33  ;;  %v11200_v33 = vld [vmem:[#allocation38_spill] sm:$0xff] }
0x1a76   :  { %4639 = vmatpush1.msra.mxu0 %v9019_v11  ;;  %4710 = vmatpush1.msra.mxu1 %v9022_v58 }
0x1a77   :  { %4640 = vmatprep.subr.mxu0 %v9025_v55  ;;  %4711 = vmatprep.subr.mxu1 %v9028_v8 }
0x1a78   :  { %4641 = vmatpush1.msra.mxu0 %v9031_v18  ;;  %4712 = vmatpush1.msra.mxu1 %v9034_v42 }
0x1a79   :  { %4642 = vmatprep.subr.mxu0 %v9037_v17  ;;  %4713 = vmatprep.subr.mxu1 %v9040_v16 }
0x1a7a   :  { %4643 = vmatpush1.msra.mxu0 %v9043_v57  ;;  %4714 = vmatpush1.msra.mxu1 %v9046_v4 }
0x1a7b   :  { %4644 = vmatprep.subr.mxu0 %v9049_v50  ;;  %4715 = vmatprep.subr.mxu1 %v11176_v31 }
0x1a7c   :  { %4645 = vmatpush1.msra.mxu0 %v11177_v32  ;;  %4716 = vmatpush1.msra.mxu1 %v11178_v12 }
0x1a7d   :  { %4646 = vmatprep.subr.mxu0 %v11179_v7  ;;  %4717 = vmatprep.subr.mxu1 %v11180_v13 }
0x1a7e   :  { %4647 = vmatpush1.msra.mxu0 %v11181_v51  ;;  %4718 = vmatpush1.msra.mxu1 %v11182_v40 }
0x1a7f   :  { %4648 = vmatprep.subr.mxu0 %v11183_v5  ;;  %4719 = vmatprep.subr.mxu1 %v11184_v38 }
0x1a80   :  { %4649 = vmatpush1.msra.mxu0 %v11185_v52  ;;  %4720 = vmatpush1.msra.mxu1 %v11186_v36 }
0x1a81   :  { %4650 = vmatprep.subr.mxu0 %v11187_v34  ;;  %4721 = vmatprep.subr.mxu1 %v11188_v46 }
0x1a82   :  { %4651 = vmatpush1.msra.mxu0 %v11189_v41  ;;  %4722 = vmatpush1.msra.mxu1 %v11190_v0  ;;  %v11201_v0 = vld [vmem:[#allocation37_spill] sm:$0xff] }
0x1a83   :  { %4652 = vmatprep.subr.mxu0 %v11191_v45  ;;  %4723 = vmatprep.subr.mxu1 %v11192_v1  ;;  %v11202_v45 = vld [vmem:[#allocation40_spill] sm:$0xff]  ;;  %v11203_v1 = vld [vmem:[#allocation39_spill] sm:$0xff] }
0x1a84   :  { %4653 = vmatpush1.msra.mxu0 %v11193_v35  ;;  %4724 = vmatpush1.msra.mxu1 %v11194_v39  ;;  %v11204_v35 = vld [vmem:[#allocation42_spill] sm:$0xff]  ;;  %v11205_v39 = vld [vmem:[#allocation41_spill] sm:$0xff] }
0x1a85   :  { %4654 = vmatprep.subr.mxu0 %v11195_v59  ;;  %4725 = vmatprep.subr.mxu1 %v11196_v28  ;;  %v11206_v59 = vld [vmem:[#allocation44_spill] sm:$0xff]  ;;  %v11207_v28 = vld [vmem:[#allocation50_spill] sm:$0xff] }
0x1a86   :  { %4655 = vmatpush1.msra.mxu0 %v11197_v24  ;;  %4726 = vmatpush1.msra.mxu1 %v11198_v20  ;;  %v11208_v24 = vld [vmem:[#allocation46_spill] sm:$0xff]  ;;  %v11209_v20 = vld [vmem:[#allocation52_spill] sm:$0xff] }
0x1a87   :  { %4656 = vmatprep.subr.mxu0 %v11199_v14  ;;  %4727 = vmatprep.subr.mxu1 %v11200_v33  ;;  %v11210_v14 = vld [vmem:[#allocation48_spill] sm:$0xff]  ;;  %v11211_v33 = vld [vmem:[#allocation54_spill] sm:$0xff] }
0x1a88   :  { %4657 = vmatpush1.msra.mxu0 %v11201_v0  ;;  %4728 = vmatpush1.msra.mxu1 %v11202_v45  ;;  %v11212_v0 = vld [vmem:[#allocation43_spill] sm:$0xff]  ;;  %v11213_v45 = vld [vmem:[#allocation56_spill] sm:$0xff] }
0x1a89   :  { %4658 = vmatprep.subr.mxu0 %v11203_v1  ;;  %4729 = vmatprep.subr.mxu1 %v11204_v35  ;;  %v11214_v1 = vld [vmem:[#allocation45_spill] sm:$0xff]  ;;  %v11215_v35 = vld [vmem:[#allocation51_spill] sm:$0xff] }
0x1a8a   :  { %4659 = vmatpush1.msra.mxu0 %v11205_v39  ;;  %4730 = vmatpush1.msra.mxu1 %v11206_v59  ;;  %v11216_v39 = vld [vmem:[#allocation47_spill] sm:$0xff]  ;;  %v11217_v59 = vld [vmem:[#allocation58_spill] sm:$0xff] }
0x1a8b   :  { %4660 = vmatprep.subr.mxu0 %v11207_v28  ;;  %4731 = vmatprep.subr.mxu1 %v11208_v24  ;;  %v11218_v28 = vld [vmem:[#allocation49_spill] sm:$0xff] }
0x1a8c   :  { %4661 = vmatpush1.msra.mxu0 %v11209_v20  ;;  %4732 = vmatpush1.msra.mxu1 %v11210_v14  ;;  %v11219_v24 = vld [vmem:[#allocation53_spill] sm:$0xff]  ;;  %v11221_v14 = vld [vmem:[#allocation87_spill] sm:$0xff] }
0x1a8d   :  { %4662 = vmatprep.subr.mxu0 %v11211_v33  ;;  %4733 = vmatprep.subr.mxu1 %v11212_v0  ;;  %v11220_v20 = vld [vmem:[#allocation85_spill] sm:$0xff]  ;;  %v11222_v33 = vld [vmem:[#allocation72_spill] sm:$0xff]  ;;  %v11223_v0 = vld [vmem:[#allocation71_spill] sm:$0xff] }
0x1a8e   :  { %4663 = vmatpush1.msra.mxu0 %v11213_v45  ;;  %4734 = vmatpush1.msra.mxu1 %v11214_v1  ;;  %v11224_v45 = vld [vmem:[#allocation73_spill] sm:$0xff]  ;;  %v11225_v1 = vld [vmem:[#allocation75_spill] sm:$0xff] }
0x1a8f   :  { %4664 = vmatprep.subr.mxu0 %v11215_v35  ;;  %4735 = vmatprep.subr.mxu1 %v11216_v39  ;;  %v11226_v35 = vmov 0.0   ;;  %v11227_v39 = vld [vmem:[#allocation74_spill] sm:$0xff] }
0x1a90   :  { %4665 = vmatpush1.msra.mxu0 %v11217_v59  ;;  %4736 = vmatpush1.msra.mxu1 %v11218_v28  ;;  %v11228_v28 = vld [vmem:[#allocation62_spill] sm:$0xff]  ;;  %v11230_v59 = vld [vmem:[#allocation29_spill] sm:$0xff] }
0x1a91   :  { %4666 = vmatprep.subr.mxu0 %v11219_v24  ;;  %4737 = vmatprep.subr.mxu1 %v11220_v20  ;;  %v11229_v24 = vld [vmem:[#allocation60_spill] sm:$0xff] }
0x1a92   :  { %4667 = vmatpush1.msra.mxu0 %v11221_v14  ;;  %4738 = vmatpush1.msra.mxu1 %v11222_v33 }
0x1a93   :  { %4668 = vmatprep.subr.mxu0 %v11223_v0  ;;  %4739 = vmatprep.subr.mxu1 %v11224_v45  ;;  %v11231_v0 = vld [vmem:[#allocation77_spill] sm:$0xff]  ;;  %v11232_v45 = vld [vmem:[#allocation70_spill] sm:$0xff] }
0x1a94   :  { %4669 = vmatpush1.msra.mxu0 %v11225_v1  ;;  %4702 = vmatprep.mubr.f32.mxu0 %v11226_v35 }
0x1a95   :  { %4740 = vmatpush1.msra.mxu1 %v11227_v39  ;;  %4773 = vmatprep.mubr.f32.mxu1 %v11226_v35 }
0x1a96   :  { %4865 = vmatprep.subr.mxu0 %v11228_v28  ;;  %4936 = vmatprep.subr.mxu1 %v11229_v24 }
0x1b35   :  { %v4477_v20 = vpop.f32.mrf.mxu0  ;;  %v4548_v14 = vpop.f32.mrf.mxu1 }
0x1b36   :  { %v4478_v33 = vadd.f32 %v4477_v20, %v11230_v59  ;;  %v4549_v46 = vadd.f32 %v4548_v14, %v11231_v0 }
0x1b37   :  { %v4479_v41 = vpop.f32.mrf.mxu0  ;;  %v4550_v1 = vpop.f32.mrf.mxu1 }
0x1b38   :  { %v4480_v34 = vadd.f32 %v4479_v41, %v11232_v45  ;;  %v4559_v36 = vmul.f32 %v4478_v33, %v4478_v33  ;;  %v4561_v39 = vmul.f32 %v4549_v46, %v4549_v46  ;;  %v4551_v35 = vadd.f32 %v4550_v1, %v11110_v30 }
0x1b39   :  { %v3370_v1 = vsub.f32 %v9249_v63, %v9272_v10  ;;  %v3473_v63 = vmul.f32 %v11113_v54, %v9283_v56 }
0x1b3a   :  { %v4553_v52 = vadd.f32 %v4480_v34, %v4478_v33  ;;  %v4560_v38 = vmul.f32 %v4480_v34, %v4480_v34  ;;  %v4562_v51 = vmul.f32 %v4551_v35, %v4551_v35 }
0x1b3c   :  { %v4554_v5 = vadd.f32 %v4553_v52, %v4549_v46  ;;  %v4563_v28 = vadd.f32 %v4560_v38, %v4559_v36 }
0x1b3e   :  { %v4555_v40 = vadd.f32 %v4554_v5, %v4551_v35  ;;  %v4564_v24 = vadd.f32 %v4563_v28, %v4561_v39  ;;  %v3371_v5 = vsub.f32 %v9245_v47, %v9272_v10 }
0x1b40   :  { %4556 = vadd.xlane.f32.xlu1 %v4555_v40  ;;  %v4565_v13 = vadd.f32 %v4564_v24, %v4562_v51  ;;  %v3418_v40 = vmul.f32 %v9279_v44, %v3370_v1  ;;  %v3419_v51 = vmul.f32 %v9279_v44, %v3371_v5 }
0x1b42   :  { %v3471_v39 = vmul.f32 %v11111_v43, %v3418_v40 }
0x1b44   :  { %4566 = vadd.xlane.f32.xlu1 %v4565_v13 }
0x1bc9   :  { %v4557_v20 = vpop.xlane.xlu1 %4556 }
0x1bca   :  { %v4558_v59 = vmul.f32 0.0078125, %v4557_v20 }
0x1bcc   :  { %v4569_v0 = vmul.f32 %v4558_v59, %v4558_v59  ;;  %v4572_v13 = vsub.f32 %v4478_v33, %v4558_v59  ;;  %v4573_v38 = vsub.f32 %v4480_v34, %v4558_v59  ;;  %v4574_v52 = vsub.f32 %v4549_v46, %v4558_v59 }
0x1bcd   :  { %v4567_v14 = vpop.xlane.xlu1 %4566  ;;  %v3524_v34 = vadd.f32 %v8777_v15, %v3471_v39  ;;  %v4575_v40 = vsub.f32 %v4551_v35, %v4558_v59 }
0x1bce   :  { %v4568_v41 = vmul.f32 0.0078125, %v4567_v14  ;;  %v3526_v14 = vadd.f32 %v8790_v9, %v3473_v63 }
0x1bd0   :  { %v4570_v45 = vsub.f32 %v4568_v41, %v4569_v0  ;;  %v3472_v0 = vmul.f32 %v11112_v29, %v3419_v51 }
0x1bd2   :  { %v4571_v7 = vmax.f32 %v4570_v45, 0.0  ;;  %v3525_v46 = vadd.f32 %v8780_v25, %v3472_v0 }
0x1bd4   :  { %v4576_v12 = vadd.f32 1e-05, %v4571_v7 }
0x1bd6   :  { %5898 = vrsqrt.f32 %v4576_v12 }
0x1be3   :  { %v5899_v36 = vpop.eup %5898 }
0x1be4   :  { %v4578_v7 = vmul.f32 %v5899_v36, %v4572_v13  ;;  %v4579_v12 = vmul.f32 %v5899_v36, %v4573_v38  ;;  %v4580_v45 = vmul.f32 %v5899_v36, %v4574_v52  ;;  %v3373_v38 = vsub.f32 %v9264_v62, %v9272_v10  ;;  %v11233_v62 = vld [vmem:[#allocation68_spill] sm:$0xff] }
0x1be5   :  { %v4581_v52 = vmul.f32 %v5899_v36, %v4575_v40  ;;  %v9383_v10 = vadd.f32 %v11233_v62, %v11061_v22 }
0x1be6   :  { %v4582_v47 = vmul.f32 %v4578_v7, %v8784_v26  ;;  %v4583_v28 = vmul.f32 %v4579_v12, %v11114_v23  ;;  %v4584_v24 = vmul.f32 %v4580_v45, %v8793_v37  ;;  %v3421_v39 = vmul.f32 %v9279_v44, %v3373_v38  ;;  %v11234_v44 = vld [vmem:[#allocation67_spill] sm:$0xff] }
0x1be7   :  { %v4585_v0 = vmul.f32 %v4581_v52, %v8820_v27  ;;  %v9387_v36 = vadd.f32 %v11234_v44, %v11062_v2 }
0x1be8   :  { %v4586_v33 = vadd.f32 %v4582_v47, %v8797_v53  ;;  %v4587_v20 = vadd.f32 %v4583_v28, %v8800_v61  ;;  %v4588_v41 = vadd.f32 %v4584_v24, %v8805_v60  ;;  %v3474_v7 = vmul.f32 %v8824_v49, %v3421_v39  ;;  %v11236_v39 = vld [vmem:[#allocation65_spill] sm:$0xff] }
0x1be9   :  { %v4589_v12 = vadd.f32 %v4585_v0, %v8827_v21  ;;  %v9402_v0 = vadd.f32 %v11236_v39, %v11064_v6 }
0x1bea   :  { %v4594_v56 = vadd.f32 %v4586_v33, %v3524_v34  ;;  %v4595_v1 = vadd.f32 %v4587_v20, %v3525_v46  ;;  %v4596_v5 = vadd.f32 %v4588_v41, %v3526_v14  ;;  %v3527_v63 = vadd.f32 %v8832_v19, %v3474_v7 }
0x1beb   :  { %v3226_v46 = vadd.f32 %v9383_v10, %v9387_v36  ;;  %v3271_v33 = vmul.f32 %v9383_v10, %v9383_v10  ;;  %v3270_v41 = vmul.f32 %v9387_v36, %v9387_v36 }
0x1bec   :  { %v5617_v51 = vmul.f32 -1.442695, %v4594_v56  ;;  %v5618_v13 = vmul.f32 -1.442695, %v4595_v1  ;;  %v4597_v45 = vadd.f32 %v4589_v12, %v3527_v63  ;;  %v11235_v56 = vld [vmem:[#allocation63_spill] sm:$0xff] }
0x1bed   :  { %v3180_v1 = vadd.f32 %v11235_v56, %v11063_v48  ;;  %v3306_v38 = vadd.f32 %v3271_v33, %v3270_v41 }
0x1bee   :  { %5900 = vpow2.f32 %v5617_v51 }
0x1bef   :  { %5902 = vpow2.f32 %v5618_v13  ;;  %v3227_v13 = vadd.f32 %v3226_v46, %v3180_v1  ;;  %v3272_v52 = vmul.f32 %v3180_v1, %v3180_v1  ;;  %v5619_v46 = vmul.f32 -1.442695, %v4596_v5  ;;  %v9415_v5 = vld [vmem:[#allocation19 + $0x1] ss:$0 sm:$0xff] }
0x1bf0   :  { %5904 = vtanh.f32 %v4597_v45 }
0x1bf1   :  { %v3228_v12 = vadd.f32 %v3227_v13, %v9402_v0  ;;  %v3307_v63 = vadd.f32 %v3306_v38, %v3272_v52 }
0x1bfb   :  { %v5901_v35 = vpop.eup %5900 }
0x1bfc   :  { %v5903_v59 = vpop.eup %5902  ;;  %v4601_v47 = vadd.f32 1.0, %v5901_v35 }
0x1bfd   :  { %v4607_v28 = vadd.f32 1.0, %v5903_v59  ;;  %v5905_v24 = vpop.eup %5904 }
0x1bfe   :  { %5906 = vrcp.f32 %v4601_v47 }
0x1bff   :  { %5908 = vrcp.f32 %v4607_v28 }
0x1c00   :  { %5910 = vpow2.f32 %v5619_v46  ;;  %v11251_v46 = vld [vmem:[#allocation28_spill] sm:$0xff] }
0x1c0b   :  { %v5907_v34 = vpop.eup %5906 }
0x1c0c   :  { %v5909_v20 = vpop.eup %5908  ;;  %v4618_v14 = vmul.f32 %v5907_v34, %v5905_v24 }
0x1c0d   :  { %v4617_v40 = vmul.f32 %v5909_v20, %v9260_v3  ;;  %v3273_v3 = vmul.f32 %v9402_v0, %v9402_v0  ;;  %v5911_v52 = vpop.eup %5910 }
0x1c0f   :  { %v9398_v51 = vadd.f32 %v4618_v14, %v4617_v40  ;;  %v3308_v45 = vadd.f32 %v3307_v63, %v3273_v3  ;;  %v4613_v63 = vadd.f32 1.0, %v5911_v52  ;;  %v11260_v52 = vld [vmem:[#allocation37_spill] sm:$0xff] }
0x1c11   :  { %4620 = vadd.xlane.f32.xlu0 %v9398_v51  ;;  %v4623_v7 = vmul.f32 %v9398_v51, %v9398_v51 }
0x1c13   :  { %4624 = vadd.xlane.f32.xlu1 %v4623_v7 }
0x1c15   :  { %3229 = vadd.xlane.f32.xlu0 %v3228_v12 }
0x1c19   :  { %3309 = vadd.xlane.f32.xlu0 %v3308_v45  ;;  %v9418_v45 = vld [vmem:[#allocation21 + $0x1] ss:$0 sm:$0xff] }
0x1c9a   :  { %v4621_v35 = vpop.xlane.xlu0 %4620 }
0x1c9b   :  { %v4622_v59 = vmul.f32 0.03125, %v4621_v35 }
0x1c9c   :  { %v4625_v47 = vpop.xlane.xlu1 %4624 }
0x1c9d   :  { %v4627_v28 = vmul.f32 %v4622_v59, %v4622_v59  ;;  %v4626_v62 = vmul.f32 0.03125, %v4625_v47  ;;  %v4630_v39 = vsub.f32 %v9398_v51, %v4622_v59 }
0x1c9e   :  { %v3230_v44 = vpop.xlane.xlu0 %3229 }
0x1c9f   :  { %v4628_v24 = vsub.f32 %v4626_v62, %v4627_v28  ;;  %v9410_v34 = vmul.f32 0.0078125, %v3230_v44 }
0x1ca1   :  { %v4629_v33 = vmax.f32 %v4628_v24, 0.0  ;;  %v3338_v41 = vmul.f32 %v9410_v34, %v9410_v34  ;;  %v3376_v28 = vsub.f32 %v3180_v1, %v9410_v34  ;;  %v11250_v1 = vld [vmem:[#allocation83_spill] sm:$0xff] }
0x1ca2   :  { %v3310_v20 = vpop.xlane.xlu0 %3309 }
0x1ca3   :  { %v4631_v14 = vadd.f32 1e-05, %v4629_v33  ;;  %v3330_v56 = vmul.f32 0.0078125, %v3310_v20  ;;  %v11252_v33 = vld [vmem:[#allocation86_spill] sm:$0xff]  ;;  %v11253_v20 = vld [vmem:[#allocation81_spill] sm:$0xff] }
0x1ca5   :  { %5912 = vrsqrt.f32 %v4631_v14  ;;  %v3346_v40 = vsub.f32 %v3330_v56, %v3338_v41  ;;  %v11254_v14 = vld [vmem:[#allocation31_spill] sm:$0xff]  ;;  %v11255_v41 = vld [vmem:[#allocation84_spill] sm:$0xff]  ;;  %v11256_v56 = vld [vmem:[#allocation33_spill] sm:$0xff] }
0x1ca7   :  { %v3354_v13 = vmax.f32 %v3346_v40, 0.0  ;;  %v11257_v40 = vld [vmem:[#allocation36_spill] sm:$0xff] }
0x1ca9   :  { %v3394_v38 = vadd.f32 1e-05, %v3354_v13  ;;  %v11258_v13 = vld [vmem:[#allocation35_spill] sm:$0xff] }
0x1cab   :  { %5914 = vrsqrt.f32 %v3394_v38  ;;  %v11259_v38 = vld [vmem:[#allocation38_spill] sm:$0xff] }
0x1cac   :  { %5916 = vrcp.f32 %v4613_v63  ;;  %v11264_v63 = vld [vmem:[#allocation41_spill] sm:$0xff] }
0x1cb2   :  { %v5913_v7 = vpop.eup %5912 }
0x1cb3   :  { %v4633_v12 = vmul.f32 %v5913_v7, %v4630_v39  ;;  %v11261_v39 = vld [vmem:[#allocation40_spill] sm:$0xff]  ;;  %v11262_v7 = vld [vmem:[#allocation39_spill] sm:$0xff] }
0x1cb5   :  { %v4634_v3 = vmul.f32 %v9415_v5, %v4633_v12  ;;  %v11263_v12 = vld [vmem:[#allocation42_spill] sm:$0xff] }
0x1cb7   :  { %v4635_v35 = vadd.f32 %v9418_v45, %v4634_v3  ;;  %v11265_v3 = vld [vmem:[#allocation44_spill] sm:$0xff] }
0x1cb8   :  { %v9421_v47 = vpop.eup %5914 }
0x1cb9   :  { %5918 = vtanh.f32 %v4635_v35  ;;  %v9425_v62 = vmul.f32 %v9421_v47, %v3376_v28  ;;  %v5917_v59 = vpop.eup %5916  ;;  %v11266_v35 = vld [vmem:[#allocation50_spill] sm:$0xff] }
0x1cba   :  { %v11267_v28 = vld [vmem:[#allocation46_spill] sm:$0xff] }
0x1cc6   :  { %v5919_v44 = vpop.eup %5918 }
0x1cc7   :  { %v4637_v24 = vmul.f32 %v5919_v44, %v5917_v59  ;;  %v11268_v59 = vld [vmem:[#allocation52_spill] sm:$0xff] }
0x1cc8   :  { %v11269_v44 = vld [vmem:[#allocation48_spill] sm:$0xff] }
0x1cc9   :  { %4703 = vmatmul.mubr.f32.vlgmr.msra.gmra.mxu0 %v4637_v24  ;;  %4774 = vmatmul.mubr.f32.vlgmr.msra.gmra.mxu1 %v4637_v24  ;;  %v11270_v24 = vld [vmem:[#allocation54_spill] sm:$0xff] }
0x1cca   :  { %4866 = vmatpush1.msra.mxu0 %v9019_v11  ;;  %4937 = vmatpush1.msra.mxu1 %v9022_v58  ;;  %v11237_v11 = vld [vmem:[#allocation103_spill] sm:$0xff]  ;;  %v11238_v58 = vld [vmem:[#allocation76_spill] sm:$0xff] }
0x1ccb   :  { %4867 = vmatprep.subr.mxu0 %v9025_v55  ;;  %4938 = vmatprep.subr.mxu1 %v9028_v8  ;;  %v11239_v55 = vld [vmem:[#allocation78_spill] sm:$0xff]  ;;  %v11240_v8 = vld [vmem:[#allocation89_spill] sm:$0xff] }
0x1ccc   :  { %4868 = vmatpush1.msra.mxu0 %v9031_v18  ;;  %4939 = vmatpush1.msra.mxu1 %v9034_v42  ;;  %v11241_v18 = vld [vmem:[#allocation88_spill] sm:$0xff] }
0x1ccd   :  { %4869 = vmatprep.subr.mxu0 %v9037_v17  ;;  %4940 = vmatprep.subr.mxu1 %v9040_v16  ;;  %v11242_v42 = vld [vmem:[#allocation92_spill] sm:$0xff]  ;;  %v11243_v17 = vld [vmem:[#allocation90_spill] sm:$0xff] }
0x1cce   :  { %4870 = vmatpush1.msra.mxu0 %v9043_v57  ;;  %4941 = vmatpush1.msra.mxu1 %v9046_v4  ;;  %v11244_v16 = vld [vmem:[#allocation82_spill] sm:$0xff]  ;;  %v11245_v57 = vld [vmem:[#allocation91_spill] sm:$0xff] }
0x1ccf   :  { %4871 = vmatprep.subr.mxu0 %v9049_v50  ;;  %4942 = vmatprep.subr.mxu1 %v11176_v31  ;;  %v11246_v4 = vld [vmem:[#allocation30_spill] sm:$0xff]  ;;  %v11248_v31 = vld [vmem:[#allocation32_spill] sm:$0xff] }
0x1cd0   :  { %4872 = vmatpush1.msra.mxu0 %v11177_v32  ;;  %4943 = vmatpush1.msra.mxu1 %v11237_v11  ;;  %v11247_v50 = vld [vmem:[#allocation94_spill] sm:$0xff]  ;;  %v11271_v11 = vld [vmem:[#allocation43_spill] sm:$0xff] }
0x1cd1   :  { %4873 = vmatprep.subr.mxu0 %v11238_v58  ;;  %4944 = vmatprep.subr.mxu1 %v11239_v55  ;;  %v11249_v32 = vld [vmem:[#allocation34_spill] sm:$0xff]  ;;  %v11272_v58 = vld [vmem:[#allocation56_spill] sm:$0xff]  ;;  %v11273_v55 = vld [vmem:[#allocation45_spill] sm:$0xff] }
0x1cd2   :  { %4874 = vmatpush1.msra.mxu0 %v11240_v8  ;;  %4945 = vmatpush1.msra.mxu1 %v11241_v18  ;;  %v11274_v8 = vld [vmem:[#allocation51_spill] sm:$0xff] }
0x1cd3   :  { %4875 = vmatprep.subr.mxu0 %v11242_v42  ;;  %4946 = vmatprep.subr.mxu1 %v11243_v17  ;;  %v11275_v18 = vld [vmem:[#allocation47_spill] sm:$0xff]  ;;  %v11276_v42 = vld [vmem:[#allocation58_spill] sm:$0xff]  ;;  %v11277_v17 = vld [vmem:[#allocation49_spill] sm:$0xff] }
0x1cd4   :  { %4876 = vmatpush1.msra.mxu0 %v11244_v16  ;;  %4947 = vmatpush1.msra.mxu1 %v11245_v57  ;;  %v11278_v16 = vld [vmem:[#allocation53_spill] sm:$0xff] }
0x1cd5   :  { %4877 = vmatprep.subr.mxu0 %v11246_v4  ;;  %4948 = vmatprep.subr.mxu1 %v11247_v50  ;;  %v11279_v57 = vld [vmem:[#allocation85_spill] sm:$0xff]  ;;  %v11280_v4 = vld [vmem:[#allocation87_spill] sm:$0xff]  ;;  %v11281_v50 = vld [vmem:[#allocation72_spill] sm:$0xff] }
0x1cd6   :  { %4878 = vmatpush1.msra.mxu0 %v11248_v31  ;;  %4949 = vmatpush1.msra.mxu1 %v11249_v32  ;;  %v11282_v31 = vld [vmem:[#allocation71_spill] sm:$0xff]  ;;  %v11283_v32 = vld [vmem:[#allocation73_spill] sm:$0xff] }
0x1cd7   :  { %4879 = vmatprep.subr.mxu0 %v11250_v1  ;;  %4950 = vmatprep.subr.mxu1 %v11251_v46  ;;  %v11284_v1 = vld [vmem:[#allocation75_spill] sm:$0xff]  ;;  %v11285_v46 = vmov 0.0  }
0x1cd8   :  { %4880 = vmatpush1.msra.mxu0 %v11252_v33  ;;  %4951 = vmatpush1.msra.mxu1 %v11253_v20  ;;  %v11286_v33 = vld [vmem:[#allocation74_spill] sm:$0xff] }
0x1cd9   :  { %4881 = vmatprep.subr.mxu0 %v11254_v14  ;;  %4952 = vmatprep.subr.mxu1 %v11255_v41  ;;  %v11287_v20 = vld [vmem:[#allocation62_spill] sm:$0xff]  ;;  %v11288_v14 = vld [vmem:[#allocation60_spill] sm:$0xff] }
0x1cda   :  { %4882 = vmatpush1.msra.mxu0 %v11256_v56  ;;  %4953 = vmatpush1.msra.mxu1 %v11257_v40  ;;  %v11289_v40 = vld [vmem:[#allocation29_spill] sm:$0xff] }
0x1cdb   :  { %4883 = vmatprep.subr.mxu0 %v11258_v13  ;;  %4954 = vmatprep.subr.mxu1 %v11259_v38 }
0x1cdc   :  { %4884 = vmatpush1.msra.mxu0 %v11260_v52  ;;  %4955 = vmatpush1.msra.mxu1 %v11261_v39  ;;  %v11290_v52 = vld [vmem:[#allocation77_spill] sm:$0xff] }
0x1cdd   :  { %4885 = vmatprep.subr.mxu0 %v11262_v7  ;;  %4956 = vmatprep.subr.mxu1 %v11263_v12  ;;  %v11291_v7 = vld [vmem:[#allocation70_spill] sm:$0xff] }
0x1cde   :  { %4886 = vmatpush1.msra.mxu0 %v11264_v63  ;;  %4957 = vmatpush1.msra.mxu1 %v11265_v3 }
0x1cdf   :  { %4887 = vmatprep.subr.mxu0 %v11266_v35  ;;  %4958 = vmatprep.subr.mxu1 %v11267_v28 }
0x1ce0   :  { %4888 = vmatpush1.msra.mxu0 %v11268_v59  ;;  %4959 = vmatpush1.msra.mxu1 %v11269_v44 }
0x1ce1   :  { %4889 = vmatprep.subr.mxu0 %v11270_v24  ;;  %4960 = vmatprep.subr.mxu1 %v11271_v11 }
0x1ce2   :  { %4890 = vmatpush1.msra.mxu0 %v11272_v58  ;;  %4961 = vmatpush1.msra.mxu1 %v11273_v55 }
0x1ce3   :  { %4891 = vmatprep.subr.mxu0 %v11274_v8  ;;  %4962 = vmatprep.subr.mxu1 %v11275_v18 }
0x1ce4   :  { %4892 = vmatpush1.msra.mxu0 %v11276_v42  ;;  %4963 = vmatpush1.msra.mxu1 %v11277_v17 }
0x1ce5   :  { %4893 = vmatprep.subr.mxu0 %v11278_v16  ;;  %4964 = vmatprep.subr.mxu1 %v11279_v57 }
0x1ce6   :  { %4894 = vmatpush1.msra.mxu0 %v11280_v4  ;;  %4965 = vmatpush1.msra.mxu1 %v11281_v50 }
0x1ce7   :  { %4895 = vmatprep.subr.mxu0 %v11282_v31  ;;  %4966 = vmatprep.subr.mxu1 %v11283_v32 }
0x1ce8   :  { %4896 = vmatpush1.msra.mxu0 %v11284_v1  ;;  %4929 = vmatprep.mubr.f32.mxu0 %v11285_v46  ;;  %v3374_v1 = vsub.f32 %v9387_v36, %v9410_v34  ;;  %v3477_v36 = vmul.f32 %v11113_v54, %v9425_v62 }
0x1ce9   :  { %4967 = vmatpush1.msra.mxu1 %v11286_v33  ;;  %5000 = vmatprep.mubr.f32.mxu1 %v11285_v46  ;;  %v3375_v33 = vsub.f32 %v9383_v10, %v9410_v34 }
0x1cea   :  { %5092 = vmatprep.subr.mxu0 %v11287_v20  ;;  %5163 = vmatprep.subr.mxu1 %v11288_v14  ;;  %v3422_v20 = vmul.f32 %v9421_v47, %v3374_v1 }
0x1ceb   :  { %v3423_v14 = vmul.f32 %v9421_v47, %v3375_v33 }
0x1d89   :  { %v4704_v41 = vpop.f32.mrf.mxu0  ;;  %v4775_v56 = vpop.f32.mrf.mxu1 }
0x1d8a   :  { %v4705_v13 = vadd.f32 %v4704_v41, %v11289_v40  ;;  %v4776_v39 = vadd.f32 %v4775_v56, %v11290_v52 }
0x1d8b   :  { %v4706_v38 = vpop.f32.mrf.mxu0  ;;  %v4777_v63 = vpop.f32.mrf.mxu1 }
0x1d8c   :  { %v4707_v12 = vadd.f32 %v4706_v38, %v11291_v7  ;;  %v4786_v3 = vmul.f32 %v4705_v13, %v4705_v13  ;;  %v4788_v59 = vmul.f32 %v4776_v39, %v4776_v39  ;;  %v4778_v44 = vadd.f32 %v4777_v63, %v11110_v30 }
0x1d8e   :  { %v4780_v35 = vadd.f32 %v4707_v12, %v4705_v13  ;;  %v4787_v28 = vmul.f32 %v4707_v12, %v4707_v12  ;;  %v4789_v8 = vmul.f32 %v4778_v44, %v4778_v44 }
0x1d90   :  { %v4781_v24 = vadd.f32 %v4780_v35, %v4776_v39  ;;  %v4790_v11 = vadd.f32 %v4787_v28, %v4786_v3  ;;  %v3475_v3 = vmul.f32 %v11111_v43, %v3422_v20  ;;  %v3476_v35 = vmul.f32 %v11112_v29, %v3423_v14 }
0x1d92   :  { %v4782_v58 = vadd.f32 %v4781_v24, %v4778_v44  ;;  %v4791_v55 = vadd.f32 %v4790_v11, %v4788_v59 }
0x1d94   :  { %4783 = vadd.xlane.f32.xlu1 %v4782_v58  ;;  %v4792_v18 = vadd.f32 %v4791_v55, %v4789_v8  ;;  %v3530_v8 = vadd.f32 %v8790_v9, %v3477_v36 }
0x1d98   :  { %4793 = vadd.xlane.f32.xlu1 %v4792_v18 }
0x1e1d   :  { %v4784_v42 = vpop.xlane.xlu1 %4783 }
0x1e1e   :  { %v4785_v17 = vmul.f32 0.0078125, %v4784_v42 }
0x1e20   :  { %v4796_v57 = vmul.f32 %v4785_v17, %v4785_v17  ;;  %v4799_v41 = vsub.f32 %v4705_v13, %v4785_v17  ;;  %v4800_v56 = vsub.f32 %v4707_v12, %v4785_v17  ;;  %v4801_v38 = vsub.f32 %v4776_v39, %v4785_v17 }
0x1e21   :  { %v4794_v16 = vpop.xlane.xlu1 %4793  ;;  %v3528_v13 = vadd.f32 %v8777_v15, %v3475_v3  ;;  %v3529_v39 = vadd.f32 %v8780_v25, %v3476_v35 }
0x1e22   :  { %v4795_v4 = vmul.f32 0.0078125, %v4794_v16 }
0x1e24   :  { %v4797_v50 = vsub.f32 %v4795_v4, %v4796_v57  ;;  %v4802_v57 = vsub.f32 %v4778_v44, %v4785_v17 }
0x1e26   :  { %v4798_v31 = vmax.f32 %v4797_v50, 0.0 }
0x1e28   :  { %v4803_v32 = vadd.f32 1e-05, %v4798_v31  ;;  %v3377_v31 = vsub.f32 %v9402_v0, %v9410_v34  ;;  %v11292_v0 = vld [vmem:[#allocation96_spill] sm:$0xff] }
0x1e29   :  { %v9525_v34 = vadd.f32 %v11292_v0, %v11061_v22 }
0x1e2a   :  { %5920 = vrsqrt.f32 %v4803_v32  ;;  %v3425_v1 = vmul.f32 %v9421_v47, %v3377_v31  ;;  %v11293_v47 = vld [vmem:[#allocation69_spill] sm:$0xff] }
0x1e2b   :  { %v3275_v36 = vmul.f32 %v9525_v34, %v9525_v34 }
0x1e2c   :  { %v3478_v20 = vmul.f32 %v8824_v49, %v3425_v1 }
0x1e37   :  { %v5921_v63 = vpop.eup %5920 }
0x1e38   :  { %v4805_v28 = vmul.f32 %v5921_v63, %v4799_v41  ;;  %v4806_v59 = vmul.f32 %v5921_v63, %v4800_v56  ;;  %v4807_v24 = vmul.f32 %v5921_v63, %v4801_v38  ;;  %v4808_v32 = vmul.f32 %v5921_v63, %v4802_v57 }
0x1e39   :  { %v3531_v41 = vadd.f32 %v8832_v19, %v3478_v20  ;;  %v9529_v63 = vadd.f32 %v11293_v47, %v11062_v2 }
0x1e3a   :  { %v4809_v10 = vmul.f32 %v4805_v28, %v8784_v26  ;;  %v4810_v11 = vmul.f32 %v4806_v59, %v11114_v23  ;;  %v4811_v58 = vmul.f32 %v4807_v24, %v8793_v37  ;;  %v4812_v33 = vmul.f32 %v4808_v32, %v8820_v27 }
0x1e3b   :  { %v3231_v59 = vadd.f32 %v9525_v34, %v9529_v63 }
0x1e3c   :  { %v4813_v12 = vadd.f32 %v4809_v10, %v8797_v53  ;;  %v4814_v55 = vadd.f32 %v4810_v11, %v8800_v61  ;;  %v4815_v18 = vadd.f32 %v4811_v58, %v8805_v60  ;;  %v4816_v14 = vadd.f32 %v4812_v33, %v8827_v21  ;;  %v11294_v58 = vld [vmem:[#allocation101_spill] sm:$0xff] }
0x1e3d   :  { %v3274_v11 = vmul.f32 %v9529_v63, %v9529_v63 }
0x1e3e   :  { %v4821_v62 = vadd.f32 %v4813_v12, %v3528_v13  ;;  %v4822_v42 = vadd.f32 %v4814_v55, %v3529_v39  ;;  %v4823_v16 = vadd.f32 %v4815_v18, %v3530_v8  ;;  %v4824_v56 = vadd.f32 %v4816_v14, %v3531_v41 }
0x1e3f   :  { %v3186_v13 = vadd.f32 %v11294_v58, %v11063_v48  ;;  %v3311_v8 = vadd.f32 %v3275_v36, %v3274_v11 }
0x1e40   :  { %v5620_v4 = vmul.f32 -1.442695, %v4821_v62  ;;  %v5621_v50 = vmul.f32 -1.442695, %v4822_v42  ;;  %v11295_v62 = vld [vmem:[#allocation99_spill] sm:$0xff] }
0x1e41   :  { %v3232_v55 = vadd.f32 %v3231_v59, %v3186_v13  ;;  %v3276_v18 = vmul.f32 %v3186_v13, %v3186_v13  ;;  %v9544_v42 = vadd.f32 %v11295_v62, %v11064_v6 }
0x1e42   :  { %5922 = vpow2.f32 %v5620_v4 }
0x1e43   :  { %5924 = vpow2.f32 %v5621_v50  ;;  %v3233_v4 = vadd.f32 %v3232_v55, %v9544_v42  ;;  %v3312_v50 = vadd.f32 %v3311_v8, %v3276_v18 }
0x1e44   :  { %5926 = vtanh.f32 %v4824_v56 }
0x1e4f   :  { %v5923_v44 = vpop.eup %5922 }
0x1e50   :  { %v5925_v17 = vpop.eup %5924  ;;  %v4828_v38 = vadd.f32 1.0, %v5923_v44 }
0x1e51   :  { %v4834_v3 = vadd.f32 1.0, %v5925_v17  ;;  %v5927_v35 = vpop.eup %5926  ;;  %v5622_v17 = vmul.f32 -1.442695, %v4823_v16 }
0x1e52   :  { %5928 = vrcp.f32 %v4828_v38 }
0x1e53   :  { %5930 = vrcp.f32 %v4834_v3 }
0x1e54   :  { %5932 = vpow2.f32 %v5622_v17  ;;  %v9595_v17 = vld [vmem:[#allocation12 + $0x388] sm:$0xff] }
0x1e5f   :  { %v5929_v28 = vpop.eup %5928 }
0x1e60   :  { %v5931_v24 = vpop.eup %5930  ;;  %v4845_v10 = vmul.f32 %v5929_v28, %v5927_v35 }
0x1e61   :  { %v4844_v39 = vmul.f32 %v5931_v24, %v9398_v51  ;;  %v3277_v51 = vmul.f32 %v9544_v42, %v9544_v42  ;;  %v5933_v24 = vpop.eup %5932 }
0x1e63   :  { %v9540_v12 = vadd.f32 %v4845_v10, %v4844_v39  ;;  %v3313_v31 = vadd.f32 %v3312_v50, %v3277_v51  ;;  %v4840_v39 = vadd.f32 1.0, %v5933_v24  ;;  %v9565_v51 = vld [vmem:[#allocation12 + $0x3e0] sm:$0xff]  ;;  %v9622_v24 = vld [vmem:[#allocation12 + $0x358] sm:$0xff] }
0x1e64   :  { %11304 = vst [vmem:[#allocation68_spill] sm:$0xff] %v9622_v24 }
0x1e65   :  { %4847 = vadd.xlane.f32.xlu0 %v9540_v12  ;;  %v4850_v57 = vmul.f32 %v9540_v12, %v9540_v12 }
0x1e67   :  { %4851 = vadd.xlane.f32.xlu1 %v4850_v57 }
0x1e69   :  { %3234 = vadd.xlane.f32.xlu0 %v3233_v4 }
0x1e6d   :  { %3314 = vadd.xlane.f32.xlu0 %v3313_v31  ;;  %v9568_v31 = vld [vmem:[#allocation12 + $0x3f0] sm:$0xff] }
0x1eee   :  { %v4848_v32 = vpop.xlane.xlu0 %4847 }
0x1eef   :  { %v4849_v1 = vmul.f32 0.03125, %v4848_v32  ;;  %v9571_v32 = vld [vmem:[#allocation12 + $0x3c8] sm:$0xff] }
0x1ef0   :  { %v4852_v33 = vpop.xlane.xlu1 %4851 }
0x1ef1   :  { %v4854_v20 = vmul.f32 %v4849_v1, %v4849_v1  ;;  %v4853_v14 = vmul.f32 0.03125, %v4852_v33  ;;  %v4857_v10 = vsub.f32 %v9540_v12, %v4849_v1  ;;  %v9577_v1 = vld [vmem:[#allocation12 + $0x3c0] sm:$0xff]  ;;  %v9580_v33 = vld [vmem:[#allocation12 + $0x3d0] sm:$0xff] }
0x1ef2   :  { %v3235_v41 = vpop.xlane.xlu0 %3234 }
0x1ef3   :  { %v4855_v56 = vsub.f32 %v4853_v14, %v4854_v20  ;;  %v9552_v44 = vmul.f32 0.0078125, %v3235_v41  ;;  %v9583_v20 = vld [vmem:[#allocation12 + $0x3a8] sm:$0xff]  ;;  %v9586_v14 = vld [vmem:[#allocation12 + $0x3b8] sm:$0xff]  ;;  %v9589_v41 = vld [vmem:[#allocation12 + $0x3a0] sm:$0xff] }
0x1ef5   :  { %v4856_v38 = vmax.f32 %v4855_v56, 0.0  ;;  %v3339_v47 = vmul.f32 %v9552_v44, %v9552_v44  ;;  %v3380_v18 = vsub.f32 %v3186_v13, %v9552_v44  ;;  %v9574_v13 = vld [vmem:[#allocation12 + $0x3d8] sm:$0xff]  ;;  %v9592_v56 = vld [vmem:[#allocation12 + $0x3b0] sm:$0xff] }
0x1ef6   :  { %v3315_v3 = vpop.xlane.xlu0 %3314 }
0x1ef7   :  { %v4858_v0 = vadd.f32 1e-05, %v4856_v38  ;;  %v3331_v35 = vmul.f32 0.0078125, %v3315_v3  ;;  %v9598_v38 = vld [vmem:[#allocation12 + $0x398] sm:$0xff]  ;;  %v9601_v3 = vld [vmem:[#allocation12 + $0x380] sm:$0xff] }
0x1ef8   :  { %11296 = vst [vmem:[#allocation55_spill] sm:$0xff] %v9598_v38  ;;  %11297 = vst [vmem:[#allocation57_spill] sm:$0xff] %v9601_v3 }
0x1ef9   :  { %5934 = vrsqrt.f32 %v4858_v0  ;;  %v3347_v28 = vsub.f32 %v3331_v35, %v3339_v47  ;;  %v9604_v0 = vld [vmem:[#allocation12 + $0x390] sm:$0xff]  ;;  %v9607_v47 = vld [vmem:[#allocation12 + $0x368] sm:$0xff]  ;;  %v9610_v35 = vld [vmem:[#allocation12 + $0x378] sm:$0xff] }
0x1efa   :  { %11298 = vst [vmem:[#allocation66_spill] sm:$0xff] %v9604_v0  ;;  %11299 = vst [vmem:[#allocation64_spill] sm:$0xff] %v9607_v47 }
0x1efb   :  { %v3355_v59 = vmax.f32 %v3347_v28, 0.0  ;;  %11300 = vst [vmem:[#allocation59_spill] sm:$0xff] %v9610_v35  ;;  %v9613_v28 = vld [vmem:[#allocation12 + $0x360] sm:$0xff] }
0x1efc   :  { %11301 = vst [vmem:[#allocation61_spill] sm:$0xff] %v9613_v28 }
0x1efd   :  { %v3395_v36 = vadd.f32 1e-05, %v3355_v59  ;;  %v9616_v59 = vld [vmem:[#allocation12 + $0x370] sm:$0xff] }
0x1efe   :  { %11302 = vst [vmem:[#allocation105_spill] sm:$0xff] %v9616_v59 }
0x1eff   :  { %5936 = vrsqrt.f32 %v3395_v36  ;;  %v9619_v36 = vld [vmem:[#allocation12 + $0x348] sm:$0xff] }
0x1f00   :  { %5938 = vrcp.f32 %v4840_v39  ;;  %11303 = vst [vmem:[#allocation102_spill] sm:$0xff] %v9619_v36  ;;  %v9634_v39 = vld [vmem:[#allocation12 + $0x338] sm:$0xff] }
0x1f01   :  { %11308 = vst [vmem:[#allocation103_spill] sm:$0xff] %v9634_v39 }
0x1f06   :  { %v5935_v11 = vpop.eup %5934 }
0x1f07   :  { %v4860_v58 = vmul.f32 %v5935_v11, %v4857_v10  ;;  %v9625_v10 = vld [vmem:[#allocation12 + $0x340] sm:$0xff]  ;;  %v9628_v11 = vld [vmem:[#allocation12 + $0x350] sm:$0xff] }
0x1f08   :  { %11305 = vst [vmem:[#allocation67_spill] sm:$0xff] %v9625_v10  ;;  %11306 = vst [vmem:[#allocation63_spill] sm:$0xff] %v9628_v11 }
0x1f09   :  { %v4861_v16 = vmul.f32 %v9415_v5, %v4860_v58  ;;  %v9631_v58 = vld [vmem:[#allocation12 + $0x328] sm:$0xff] }
0x1f0a   :  { %11307 = vst [vmem:[#allocation65_spill] sm:$0xff] %v9631_v58 }
0x1f0b   :  { %v4862_v55 = vadd.f32 %v9418_v45, %v4861_v16  ;;  %v9637_v16 = vld [vmem:[#allocation12 + $0x320] sm:$0xff] }
0x1f0c   :  { %v9559_v8 = vpop.eup %5936  ;;  %11309 = vst [vmem:[#allocation76_spill] sm:$0xff] %v9637_v16 }
0x1f0d   :  { %5940 = vtanh.f32 %v4862_v55  ;;  %v9563_v62 = vmul.f32 %v9559_v8, %v3380_v18  ;;  %v5939_v57 = vpop.eup %5938  ;;  %v9640_v55 = vld [vmem:[#allocation12 + $0x330] sm:$0xff]  ;;  %v9643_v18 = vld [vmem:[#allocation12 + $0x308] sm:$0xff] }
0x1f0e   :  { %11310 = vst [vmem:[#allocation78_spill] sm:$0xff] %v9640_v55  ;;  %11311 = vst [vmem:[#allocation89_spill] sm:$0xff] %v9643_v18 }
0x1f1a   :  { %v5941_v4 = vpop.eup %5940 }
0x1f1b   :  { %v4864_v50 = vmul.f32 %v5941_v4, %v5939_v57  ;;  %v9646_v57 = vld [vmem:[#allocation12 + $0x318] sm:$0xff]  ;;  %v9649_v4 = vld [vmem:[#allocation12 + $0x300] sm:$0xff] }
0x1f1c   :  { %11312 = vst [vmem:[#allocation88_spill] sm:$0xff] %v9646_v57  ;;  %11313 = vst [vmem:[#allocation92_spill] sm:$0xff] %v9649_v4 }
0x1f1d   :  { %4930 = vmatmul.mubr.f32.vlgmr.msra.gmra.mxu0 %v4864_v50  ;;  %5001 = vmatmul.mubr.f32.vlgmr.msra.gmra.mxu1 %v4864_v50  ;;  %v9652_v50 = vld [vmem:[#allocation12 + $0x310] sm:$0xff] }
0x1f1e   :  { %5093 = vmatpush1.msra.mxu0 %v9565_v51  ;;  %5164 = vmatpush1.msra.mxu1 %v9568_v31  ;;  %11314 = vst [vmem:[#allocation90_spill] sm:$0xff] %v9652_v50 }
0x1f1f   :  { %5094 = vmatprep.subr.mxu0 %v9571_v32  ;;  %5165 = vmatprep.subr.mxu1 %v9574_v13 }
0x1f20   :  { %5095 = vmatpush1.msra.mxu0 %v9577_v1  ;;  %5166 = vmatpush1.msra.mxu1 %v9580_v33 }
0x1f21   :  { %5096 = vmatprep.subr.mxu0 %v9583_v20  ;;  %5167 = vmatprep.subr.mxu1 %v9586_v14 }
0x1f22   :  { %5097 = vmatpush1.msra.mxu0 %v9589_v41  ;;  %5168 = vmatpush1.msra.mxu1 %v9592_v56 }
0x1f23   :  { %5098 = vmatprep.subr.mxu0 %v9595_v17  ;;  %5169 = vmatprep.subr.mxu1 %v9598_v38 }
0x1f24   :  { %5099 = vmatpush1.msra.mxu0 %v9601_v3  ;;  %5170 = vmatpush1.msra.mxu1 %v9604_v0 }
0x1f25   :  { %5100 = vmatprep.subr.mxu0 %v9607_v47  ;;  %5171 = vmatprep.subr.mxu1 %v9610_v35 }
0x1f26   :  { %5101 = vmatpush1.msra.mxu0 %v9613_v28  ;;  %5172 = vmatpush1.msra.mxu1 %v9616_v59 }
0x1f27   :  { %5102 = vmatprep.subr.mxu0 %v9619_v36  ;;  %5173 = vmatprep.subr.mxu1 %v9622_v24 }
0x1f28   :  { %5103 = vmatpush1.msra.mxu0 %v9625_v10  ;;  %5174 = vmatpush1.msra.mxu1 %v9628_v11 }
0x1f29   :  { %5104 = vmatprep.subr.mxu0 %v9631_v58  ;;  %5175 = vmatprep.subr.mxu1 %v9634_v39 }
0x1f2a   :  { %5105 = vmatpush1.msra.mxu0 %v9637_v16  ;;  %5176 = vmatpush1.msra.mxu1 %v9640_v55  ;;  %v9655_v16 = vld [vmem:[#allocation12 + $0x2e8] sm:$0xff]  ;;  %v9658_v55 = vld [vmem:[#allocation12 + $0x2f8] sm:$0xff] }
0x1f2b   :  { %5106 = vmatprep.subr.mxu0 %v9643_v18  ;;  %5177 = vmatprep.subr.mxu1 %v9646_v57  ;;  %11315 = vst [vmem:[#allocation82_spill] sm:$0xff] %v9655_v16  ;;  %11316 = vst [vmem:[#allocation91_spill] sm:$0xff] %v9658_v55  ;;  %v9661_v18 = vld [vmem:[#allocation12 + $0x2e0] sm:$0xff]  ;;  %v9664_v57 = vld [vmem:[#allocation12 + $0x2f0] sm:$0xff] }
0x1f2c   :  { %5107 = vmatpush1.msra.mxu0 %v9649_v4  ;;  %5178 = vmatpush1.msra.mxu1 %v9652_v50  ;;  %11317 = vst [vmem:[#allocation30_spill] sm:$0xff] %v9661_v18  ;;  %11318 = vst [vmem:[#allocation94_spill] sm:$0xff] %v9664_v57  ;;  %v9667_v4 = vld [vmem:[#allocation12 + $0x2c8] sm:$0xff]  ;;  %v9670_v50 = vld [vmem:[#allocation12 + $0x2d8] sm:$0xff] }
0x1f2d   :  { %5108 = vmatprep.subr.mxu0 %v9655_v16  ;;  %5179 = vmatprep.subr.mxu1 %v9658_v55  ;;  %11319 = vst [vmem:[#allocation32_spill] sm:$0xff] %v9667_v4  ;;  %11320 = vst [vmem:[#allocation34_spill] sm:$0xff] %v9670_v50  ;;  %v9673_v16 = vld [vmem:[#allocation12 + $0x2c0] sm:$0xff]  ;;  %v9676_v55 = vld [vmem:[#allocation12 + $0x2d0] sm:$0xff] }
0x1f2e   :  { %5109 = vmatpush1.msra.mxu0 %v9661_v18  ;;  %5180 = vmatpush1.msra.mxu1 %v9664_v57  ;;  %11321 = vst [vmem:[#allocation83_spill] sm:$0xff] %v9673_v16  ;;  %11322 = vst [vmem:[#allocation28_spill] sm:$0xff] %v9676_v55  ;;  %v9679_v18 = vld [vmem:[#allocation12 + $0x2a8] sm:$0xff]  ;;  %v9682_v57 = vld [vmem:[#allocation12 + $0x2b8] sm:$0xff] }
0x1f2f   :  { %5110 = vmatprep.subr.mxu0 %v9667_v4  ;;  %5181 = vmatprep.subr.mxu1 %v9670_v50  ;;  %11323 = vst [vmem:[#allocation86_spill] sm:$0xff] %v9679_v18  ;;  %11324 = vst [vmem:[#allocation81_spill] sm:$0xff] %v9682_v57  ;;  %v9685_v4 = vld [vmem:[#allocation12 + $0x2a0] sm:$0xff]  ;;  %v9688_v50 = vld [vmem:[#allocation12 + $0x2b0] sm:$0xff] }
0x1f30   :  { %5111 = vmatpush1.msra.mxu0 %v9673_v16  ;;  %5182 = vmatpush1.msra.mxu1 %v9676_v55  ;;  %11325 = vst [vmem:[#allocation31_spill] sm:$0xff] %v9685_v4  ;;  %11326 = vst [vmem:[#allocation84_spill] sm:$0xff] %v9688_v50  ;;  %v9691_v16 = vld [vmem:[#allocation12 + $0x288] sm:$0xff]  ;;  %v9694_v55 = vld [vmem:[#allocation12 + $0x298] sm:$0xff] }
0x1f31   :  { %5112 = vmatprep.subr.mxu0 %v9679_v18  ;;  %5183 = vmatprep.subr.mxu1 %v9682_v57  ;;  %11327 = vst [vmem:[#allocation33_spill] sm:$0xff] %v9691_v16  ;;  %11328 = vst [vmem:[#allocation36_spill] sm:$0xff] %v9694_v55  ;;  %v9697_v18 = vld [vmem:[#allocation12 + $0x280] sm:$0xff]  ;;  %v9700_v57 = vld [vmem:[#allocation12 + $0x290] sm:$0xff] }
0x1f32   :  { %5113 = vmatpush1.msra.mxu0 %v9685_v4  ;;  %5184 = vmatpush1.msra.mxu1 %v9688_v50  ;;  %11329 = vst [vmem:[#allocation35_spill] sm:$0xff] %v9697_v18  ;;  %11330 = vst [vmem:[#allocation38_spill] sm:$0xff] %v9700_v57  ;;  %v9703_v4 = vld [vmem:[#allocation12 + $0x268] sm:$0xff]  ;;  %v9706_v50 = vld [vmem:[#allocation12 + $0x278] sm:$0xff] }
0x1f33   :  { %5114 = vmatprep.subr.mxu0 %v9691_v16  ;;  %5185 = vmatprep.subr.mxu1 %v9694_v55  ;;  %11331 = vst [vmem:[#allocation37_spill] sm:$0xff] %v9703_v4  ;;  %11332 = vst [vmem:[#allocation40_spill] sm:$0xff] %v9706_v50  ;;  %v9709_v16 = vld [vmem:[#allocation12 + $0x260] sm:$0xff]  ;;  %v9712_v55 = vld [vmem:[#allocation12 + $0x270] sm:$0xff] }
0x1f34   :  { %5115 = vmatpush1.msra.mxu0 %v9697_v18  ;;  %5186 = vmatpush1.msra.mxu1 %v9700_v57  ;;  %11333 = vst [vmem:[#allocation39_spill] sm:$0xff] %v9709_v16  ;;  %11334 = vst [vmem:[#allocation42_spill] sm:$0xff] %v9712_v55  ;;  %v9715_v18 = vld [vmem:[#allocation12 + $0x248] sm:$0xff]  ;;  %v9718_v57 = vld [vmem:[#allocation12 + $0x258] sm:$0xff] }
0x1f35   :  { %5116 = vmatprep.subr.mxu0 %v9703_v4  ;;  %5187 = vmatprep.subr.mxu1 %v9706_v50  ;;  %11335 = vst [vmem:[#allocation41_spill] sm:$0xff] %v9715_v18  ;;  %11336 = vst [vmem:[#allocation44_spill] sm:$0xff] %v9718_v57  ;;  %v9721_v4 = vld [vmem:[#allocation12 + $0x240] sm:$0xff]  ;;  %v9724_v50 = vld [vmem:[#allocation12 + $0x250] sm:$0xff] }
0x1f36   :  { %5117 = vmatpush1.msra.mxu0 %v9709_v16  ;;  %5188 = vmatpush1.msra.mxu1 %v9712_v55  ;;  %11337 = vst [vmem:[#allocation50_spill] sm:$0xff] %v9721_v4  ;;  %11338 = vst [vmem:[#allocation46_spill] sm:$0xff] %v9724_v50  ;;  %v9727_v16 = vld [vmem:[#allocation12 + $0x228] sm:$0xff]  ;;  %v9730_v55 = vld [vmem:[#allocation12 + $0x238] sm:$0xff] }
0x1f37   :  { %5118 = vmatprep.subr.mxu0 %v9715_v18  ;;  %5189 = vmatprep.subr.mxu1 %v9718_v57  ;;  %11339 = vst [vmem:[#allocation52_spill] sm:$0xff] %v9727_v16  ;;  %11340 = vst [vmem:[#allocation48_spill] sm:$0xff] %v9730_v55  ;;  %v9733_v18 = vld [vmem:[#allocation12 + $0x220] sm:$0xff]  ;;  %v9736_v57 = vld [vmem:[#allocation12 + $0x230] sm:$0xff] }
0x1f38   :  { %5119 = vmatpush1.msra.mxu0 %v9721_v4  ;;  %5190 = vmatpush1.msra.mxu1 %v9724_v50  ;;  %11341 = vst [vmem:[#allocation54_spill] sm:$0xff] %v9733_v18  ;;  %11342 = vst [vmem:[#allocation43_spill] sm:$0xff] %v9736_v57  ;;  %v9739_v4 = vld [vmem:[#allocation12 + $0x208] sm:$0xff]  ;;  %v9742_v50 = vld [vmem:[#allocation12 + $0x218] sm:$0xff] }
0x1f39   :  { %5120 = vmatprep.subr.mxu0 %v9727_v16  ;;  %5191 = vmatprep.subr.mxu1 %v9730_v55  ;;  %11343 = vst [vmem:[#allocation56_spill] sm:$0xff] %v9739_v4  ;;  %11344 = vst [vmem:[#allocation45_spill] sm:$0xff] %v9742_v50  ;;  %v9745_v16 = vld [vmem:[#allocation12 + $0x200] sm:$0xff]  ;;  %v9749_v55 = vld [vmem:[#allocation12 + $0x210] sm:$0xff] }
0x1f3a   :  { %5121 = vmatpush1.msra.mxu0 %v9733_v18  ;;  %5192 = vmatpush1.msra.mxu1 %v9736_v57  ;;  %11345 = vst [vmem:[#allocation51_spill] sm:$0xff] %v9745_v16  ;;  %11346 = vst [vmem:[#allocation47_spill] sm:$0xff] %v9749_v55  ;;  %v6266_v57 = vld [vmem:[#allocation12 + $0x3e8] sm:$0xff]  ;;  %v6267_v18 = vld [vmem:[#allocation12 + $0x3f8] sm:$0xff] }
0x1f3b   :  { %5122 = vmatprep.subr.mxu0 %v9739_v4  ;;  %5193 = vmatprep.subr.mxu1 %v9742_v50 }
0x1f3c   :  { %5123 = vmatpush1.msra.mxu0 %v9745_v16  ;;  %5156 = vmatprep.mubr.f32.mxu0 %v11285_v46 }
0x1f3d   :  { %5194 = vmatpush1.msra.mxu1 %v9749_v55  ;;  %5227 = vmatprep.mubr.f32.mxu1 %v11285_v46 }
0x1f3e   :  { %5319 = vmatprep.subr.mxu0 %v6266_v57  ;;  %5390 = vmatprep.subr.mxu1 %v6267_v18 }
0x1fdd   :  { %v4931_v4 = vpop.f32.mrf.mxu0  ;;  %v5002_v39 = vpop.f32.mrf.mxu1 }
0x1fde   :  { %v4932_v50 = vadd.f32 %v4931_v4, %v11289_v40  ;;  %v5003_v11 = vadd.f32 %v5002_v39, %v11290_v52 }
0x1fdf   :  { %v4933_v58 = vpop.f32.mrf.mxu0  ;;  %v5004_v10 = vpop.f32.mrf.mxu1 }
0x1fe0   :  { %v4934_v16 = vadd.f32 %v4933_v58, %v11291_v7  ;;  %v5013_v24 = vmul.f32 %v4932_v50, %v4932_v50  ;;  %v5015_v55 = vmul.f32 %v5003_v11, %v5003_v11  ;;  %v5005_v46 = vadd.f32 %v5004_v10, %v11110_v30 }
0x1fe1   :  { %v3378_v10 = vsub.f32 %v9529_v63, %v9552_v44  ;;  %v3481_v63 = vmul.f32 %v11113_v54, %v9563_v62 }
0x1fe2   :  { %v5007_v36 = vadd.f32 %v4934_v16, %v4932_v50  ;;  %v5014_v59 = vmul.f32 %v4934_v16, %v4934_v16  ;;  %v5016_v47 = vmul.f32 %v5005_v46, %v5005_v46 }
0x1fe4   :  { %v5008_v28 = vadd.f32 %v5007_v36, %v5003_v11  ;;  %v5017_v57 = vadd.f32 %v5014_v59, %v5013_v24 }
0x1fe6   :  { %v5009_v35 = vadd.f32 %v5008_v28, %v5005_v46  ;;  %v5018_v18 = vadd.f32 %v5017_v57, %v5015_v55  ;;  %v3379_v28 = vsub.f32 %v9525_v34, %v9552_v44 }
0x1fe8   :  { %5010 = vadd.xlane.f32.xlu1 %v5009_v35  ;;  %v5019_v0 = vadd.f32 %v5018_v18, %v5016_v47  ;;  %v3426_v35 = vmul.f32 %v9559_v8, %v3378_v10  ;;  %v3427_v47 = vmul.f32 %v9559_v8, %v3379_v28 }
0x1fea   :  { %v3479_v55 = vmul.f32 %v11111_v43, %v3426_v35 }
0x1fec   :  { %5020 = vadd.xlane.f32.xlu1 %v5019_v0 }
0x2071   :  { %v5011_v4 = vpop.xlane.xlu1 %5010 }
0x2072   :  { %v5012_v40 = vmul.f32 0.0078125, %v5011_v4 }
0x2074   :  { %v5023_v52 = vmul.f32 %v5012_v40, %v5012_v40  ;;  %v5026_v0 = vsub.f32 %v4932_v50, %v5012_v40  ;;  %v5027_v59 = vsub.f32 %v4934_v16, %v5012_v40  ;;  %v5028_v36 = vsub.f32 %v5003_v11, %v5012_v40 }
0x2075   :  { %v5021_v39 = vpop.xlane.xlu1 %5020  ;;  %v3532_v16 = vadd.f32 %v8777_v15, %v3479_v55  ;;  %v5029_v35 = vsub.f32 %v5005_v46, %v5012_v40 }
0x2076   :  { %v5022_v58 = vmul.f32 0.0078125, %v5021_v39  ;;  %v3534_v39 = vadd.f32 %v8790_v9, %v3481_v63 }
0x2078   :  { %v5024_v7 = vsub.f32 %v5022_v58, %v5023_v52  ;;  %v3480_v52 = vmul.f32 %v11112_v29, %v3427_v47 }
0x207a   :  { %v5025_v3 = vmax.f32 %v5024_v7, 0.0  ;;  %v3533_v11 = vadd.f32 %v8780_v25, %v3480_v52 }
0x207c   :  { %v5030_v38 = vadd.f32 1e-05, %v5025_v3 }
0x207e   :  { %5942 = vrsqrt.f32 %v5030_v38 }
0x208b   :  { %v5943_v24 = vpop.eup %5942 }
0x208c   :  { %v5032_v7 = vmul.f32 %v5943_v24, %v5026_v0  ;;  %v5033_v38 = vmul.f32 %v5943_v24, %v5027_v59  ;;  %v5034_v3 = vmul.f32 %v5943_v24, %v5028_v36  ;;  %v3381_v59 = vsub.f32 %v9544_v42, %v9552_v44  ;;  %v11347_v42 = vld [vmem:[#allocation95_spill] sm:$0xff] }
0x208d   :  { %v5035_v36 = vmul.f32 %v5943_v24, %v5029_v35  ;;  %v9785_v44 = vadd.f32 %v11347_v42, %v11061_v22 }
0x208e   :  { %v5036_v34 = vmul.f32 %v5032_v7, %v8784_v26  ;;  %v5037_v57 = vmul.f32 %v5033_v38, %v11114_v23  ;;  %v5038_v18 = vmul.f32 %v5034_v3, %v8793_v37  ;;  %v3429_v55 = vmul.f32 %v9559_v8, %v3381_v59  ;;  %v11348_v8 = vld [vmem:[#allocation97_spill] sm:$0xff] }
0x208f   :  { %v5039_v52 = vmul.f32 %v5035_v36, %v8820_v27  ;;  %v9789_v24 = vadd.f32 %v11348_v8, %v11062_v2 }
0x2090   :  { %v5040_v50 = vadd.f32 %v5036_v34, %v8797_v53  ;;  %v5041_v4 = vadd.f32 %v5037_v57, %v8800_v61  ;;  %v5042_v58 = vadd.f32 %v5038_v18, %v8805_v60  ;;  %v3482_v7 = vmul.f32 %v8824_v49, %v3429_v55  ;;  %v11350_v55 = vld [vmem:[#allocation98_spill] sm:$0xff] }
0x2091   :  { %v5043_v38 = vadd.f32 %v5039_v52, %v8827_v21  ;;  %v9804_v52 = vadd.f32 %v11350_v55, %v11064_v6 }
0x2092   :  { %v5048_v62 = vadd.f32 %v5040_v50, %v3532_v16  ;;  %v5049_v10 = vadd.f32 %v5041_v4, %v3533_v11  ;;  %v5050_v28 = vadd.f32 %v5042_v58, %v3534_v39  ;;  %v3535_v63 = vadd.f32 %v8832_v19, %v3482_v7 }
0x2093   :  { %v3236_v11 = vadd.f32 %v9785_v44, %v9789_v24  ;;  %v3279_v50 = vmul.f32 %v9785_v44, %v9785_v44  ;;  %v3278_v58 = vmul.f32 %v9789_v24, %v9789_v24 }
0x2094   :  { %v5623_v47 = vmul.f32 -1.442695, %v5048_v62  ;;  %v5624_v0 = vmul.f32 -1.442695, %v5049_v10  ;;  %v5051_v3 = vadd.f32 %v5043_v38, %v3535_v63  ;;  %v11349_v62 = vld [vmem:[#allocation93_spill] sm:$0xff] }
0x2095   :  { %v3192_v10 = vadd.f32 %v11349_v62, %v11063_v48  ;;  %v3316_v59 = vadd.f32 %v3279_v50, %v3278_v58 }
0x2096   :  { %5944 = vpow2.f32 %v5623_v47 }
0x2097   :  { %5946 = vpow2.f32 %v5624_v0  ;;  %v3237_v0 = vadd.f32 %v3236_v11, %v3192_v10  ;;  %v3280_v36 = vmul.f32 %v3192_v10, %v3192_v10  ;;  %v5625_v11 = vmul.f32 -1.442695, %v5050_v28 }
0x2098   :  { %5948 = vtanh.f32 %v5051_v3 }
0x2099   :  { %v3238_v38 = vadd.f32 %v3237_v0, %v9804_v52  ;;  %v3317_v63 = vadd.f32 %v3316_v59, %v3280_v36 }
0x20a3   :  { %v5945_v46 = vpop.eup %5944 }
0x20a4   :  { %v5947_v40 = vpop.eup %5946  ;;  %v5055_v34 = vadd.f32 1.0, %v5945_v46 }
0x20a5   :  { %v5061_v57 = vadd.f32 1.0, %v5947_v40  ;;  %v5949_v18 = vpop.eup %5948 }
0x20a6   :  { %5950 = vrcp.f32 %v5055_v34 }
0x20a7   :  { %5952 = vrcp.f32 %v5061_v57 }
0x20a8   :  { %5954 = vpow2.f32 %v5625_v11  ;;  %v11367_v11 = vld [vmem:[#allocation88_spill] sm:$0xff] }
0x20b3   :  { %v5951_v16 = vpop.eup %5950 }
0x20b4   :  { %v5953_v4 = vpop.eup %5952  ;;  %v5072_v39 = vmul.f32 %v5951_v16, %v5949_v18 }
0x20b5   :  { %v5071_v35 = vmul.f32 %v5953_v4, %v9540_v12  ;;  %v3281_v12 = vmul.f32 %v9804_v52, %v9804_v52  ;;  %v5955_v36 = vpop.eup %5954 }
0x20b7   :  { %v9800_v47 = vadd.f32 %v5072_v39, %v5071_v35  ;;  %v3318_v3 = vadd.f32 %v3317_v63, %v3281_v12  ;;  %v5067_v63 = vadd.f32 1.0, %v5955_v36  ;;  %v11376_v36 = vld [vmem:[#allocation83_spill] sm:$0xff] }
0x20b9   :  { %5074 = vadd.xlane.f32.xlu0 %v9800_v47  ;;  %v5077_v7 = vmul.f32 %v9800_v47, %v9800_v47 }
0x20bb   :  { %5078 = vadd.xlane.f32.xlu1 %v5077_v7 }
0x20bd   :  { %3239 = vadd.xlane.f32.xlu0 %v3238_v38 }
0x20c1   :  { %3319 = vadd.xlane.f32.xlu0 %v3318_v3 }
0x2142   :  { %v5075_v46 = vpop.xlane.xlu0 %5074 }
0x2143   :  { %v5076_v40 = vmul.f32 0.03125, %v5075_v46 }
0x2144   :  { %v5079_v34 = vpop.xlane.xlu1 %5078 }
0x2145   :  { %v5081_v57 = vmul.f32 %v5076_v40, %v5076_v40  ;;  %v5080_v42 = vmul.f32 0.03125, %v5079_v34  ;;  %v5084_v55 = vsub.f32 %v9800_v47, %v5076_v40  ;;  %v11365_v40 = vld [vmem:[#allocation78_spill] sm:$0xff] }
0x2146   :  { %v3240_v8 = vpop.xlane.xlu0 %3239 }
0x2147   :  { %v5082_v18 = vsub.f32 %v5080_v42, %v5081_v57  ;;  %v9812_v16 = vmul.f32 0.0078125, %v3240_v8 }
0x2149   :  { %v5083_v50 = vmax.f32 %v5082_v18, 0.0  ;;  %v3340_v58 = vmul.f32 %v9812_v16, %v9812_v16  ;;  %v3384_v46 = vsub.f32 %v3192_v10, %v9812_v16  ;;  %v11364_v10 = vld [vmem:[#allocation76_spill] sm:$0xff]  ;;  %v11366_v18 = vld [vmem:[#allocation89_spill] sm:$0xff] }
0x214a   :  { %v3320_v4 = vpop.xlane.xlu0 %3319 }
0x214b   :  { %v5085_v39 = vadd.f32 1e-05, %v5083_v50  ;;  %v3332_v62 = vmul.f32 0.0078125, %v3320_v4  ;;  %v11368_v50 = vld [vmem:[#allocation92_spill] sm:$0xff]  ;;  %v11369_v4 = vld [vmem:[#allocation90_spill] sm:$0xff] }
0x214d   :  { %5956 = vrsqrt.f32 %v5085_v39  ;;  %v3348_v35 = vsub.f32 %v3332_v62, %v3340_v58  ;;  %v11370_v39 = vld [vmem:[#allocation82_spill] sm:$0xff]  ;;  %v11371_v58 = vld [vmem:[#allocation91_spill] sm:$0xff] }
0x214e   :  { %v11372_v62 = vld [vmem:[#allocation30_spill] sm:$0xff] }
0x214f   :  { %v3356_v0 = vmax.f32 %v3348_v35, 0.0  ;;  %v11373_v35 = vld [vmem:[#allocation94_spill] sm:$0xff] }
0x2151   :  { %v3396_v59 = vadd.f32 1e-05, %v3356_v0  ;;  %v11374_v0 = vld [vmem:[#allocation32_spill] sm:$0xff] }
0x2153   :  { %5958 = vrsqrt.f32 %v3396_v59  ;;  %v11375_v59 = vld [vmem:[#allocation34_spill] sm:$0xff] }
0x2154   :  { %5960 = vrcp.f32 %v5067_v63  ;;  %v11380_v63 = vld [vmem:[#allocation31_spill] sm:$0xff] }
0x215a   :  { %v5957_v7 = vpop.eup %5956 }
0x215b   :  { %v5087_v38 = vmul.f32 %v5957_v7, %v5084_v55  ;;  %v11377_v55 = vld [vmem:[#allocation28_spill] sm:$0xff]  ;;  %v11378_v7 = vld [vmem:[#allocation86_spill] sm:$0xff] }
0x215d   :  { %v5088_v28 = vmul.f32 %v9415_v5, %v5087_v38  ;;  %v11351_v5 = vld [vmem:[#allocation55_spill] sm:$0xff]  ;;  %v11379_v38 = vld [vmem:[#allocation81_spill] sm:$0xff] }
0x215f   :  { %v5089_v12 = vadd.f32 %v9418_v45, %v5088_v28  ;;  %v11352_v45 = vld [vmem:[#allocation57_spill] sm:$0xff]  ;;  %v11381_v28 = vld [vmem:[#allocation84_spill] sm:$0xff] }
0x2160   :  { %v9819_v3 = vpop.eup %5958 }
0x2161   :  { %5962 = vtanh.f32 %v5089_v12  ;;  %v9823_v34 = vmul.f32 %v9819_v3, %v3384_v46  ;;  %v5961_v57 = vpop.eup %5960  ;;  %v11382_v12 = vld [vmem:[#allocation33_spill] sm:$0xff]  ;;  %v11383_v46 = vld [vmem:[#allocation36_spill] sm:$0xff] }
0x216e   :  { %v5963_v42 = vpop.eup %5962 }
0x216f   :  { %v5091_v8 = vmul.f32 %v5963_v42, %v5961_v57  ;;  %v11384_v57 = vld [vmem:[#allocation35_spill] sm:$0xff]  ;;  %v11385_v42 = vld [vmem:[#allocation38_spill] sm:$0xff] }
0x2171   :  { %5157 = vmatmul.mubr.f32.vlgmr.msra.gmra.mxu0 %v5091_v8  ;;  %5228 = vmatmul.mubr.f32.vlgmr.msra.gmra.mxu1 %v5091_v8  ;;  %v11386_v8 = vld [vmem:[#allocation37_spill] sm:$0xff] }
0x2172   :  { %5320 = vmatpush1.msra.mxu0 %v9565_v51  ;;  %5391 = vmatpush1.msra.mxu1 %v9568_v31  ;;  %v11353_v51 = vld [vmem:[#allocation66_spill] sm:$0xff]  ;;  %v11354_v31 = vld [vmem:[#allocation64_spill] sm:$0xff] }
0x2173   :  { %5321 = vmatprep.subr.mxu0 %v9571_v32  ;;  %5392 = vmatprep.subr.mxu1 %v9574_v13  ;;  %v11355_v32 = vld [vmem:[#allocation59_spill] sm:$0xff]  ;;  %v11356_v13 = vld [vmem:[#allocation61_spill] sm:$0xff] }
0x2174   :  { %5322 = vmatpush1.msra.mxu0 %v9577_v1  ;;  %5393 = vmatpush1.msra.mxu1 %v9580_v33  ;;  %v11357_v1 = vld [vmem:[#allocation105_spill] sm:$0xff]  ;;  %v11358_v33 = vld [vmem:[#allocation102_spill] sm:$0xff] }
0x2175   :  { %5323 = vmatprep.subr.mxu0 %v9583_v20  ;;  %5394 = vmatprep.subr.mxu1 %v9586_v14  ;;  %v11359_v20 = vld [vmem:[#allocation68_spill] sm:$0xff]  ;;  %v11360_v14 = vld [vmem:[#allocation67_spill] sm:$0xff] }
0x2176   :  { %5324 = vmatpush1.msra.mxu0 %v9589_v41  ;;  %5395 = vmatpush1.msra.mxu1 %v9592_v56  ;;  %v11361_v41 = vld [vmem:[#allocation63_spill] sm:$0xff]  ;;  %v11362_v56 = vld [vmem:[#allocation65_spill] sm:$0xff] }
0x2177   :  { %5325 = vmatprep.subr.mxu0 %v9595_v17  ;;  %5396 = vmatprep.subr.mxu1 %v11351_v5  ;;  %v11363_v17 = vld [vmem:[#allocation103_spill] sm:$0xff]  ;;  %v11387_v5 = vld [vmem:[#allocation40_spill] sm:$0xff] }
0x2178   :  { %5326 = vmatpush1.msra.mxu0 %v11352_v45  ;;  %5397 = vmatpush1.msra.mxu1 %v11353_v51  ;;  %v11388_v45 = vld [vmem:[#allocation39_spill] sm:$0xff]  ;;  %v11389_v51 = vld [vmem:[#allocation42_spill] sm:$0xff] }
0x2179   :  { %5327 = vmatprep.subr.mxu0 %v11354_v31  ;;  %5398 = vmatprep.subr.mxu1 %v11355_v32  ;;  %v11390_v31 = vld [vmem:[#allocation41_spill] sm:$0xff]  ;;  %v11391_v32 = vld [vmem:[#allocation44_spill] sm:$0xff] }
0x217a   :  { %5328 = vmatpush1.msra.mxu0 %v11356_v13  ;;  %5399 = vmatpush1.msra.mxu1 %v11357_v1  ;;  %v11392_v13 = vld [vmem:[#allocation50_spill] sm:$0xff] }
0x217b   :  { %5329 = vmatprep.subr.mxu0 %v11358_v33  ;;  %5400 = vmatprep.subr.mxu1 %v11359_v20  ;;  %v11393_v1 = vld [vmem:[#allocation46_spill] sm:$0xff]  ;;  %v11394_v33 = vld [vmem:[#allocation52_spill] sm:$0xff] }
0x217c   :  { %5330 = vmatpush1.msra.mxu0 %v11360_v14  ;;  %5401 = vmatpush1.msra.mxu1 %v11361_v41  ;;  %v11395_v20 = vld [vmem:[#allocation48_spill] sm:$0xff]  ;;  %v11396_v14 = vld [vmem:[#allocation54_spill] sm:$0xff]  ;;  %v11397_v41 = vld [vmem:[#allocation43_spill] sm:$0xff] }
0x217d   :  { %5331 = vmatprep.subr.mxu0 %v11362_v56  ;;  %5402 = vmatprep.subr.mxu1 %v11363_v17  ;;  %v11398_v56 = vld [vmem:[#allocation56_spill] sm:$0xff]  ;;  %v11399_v17 = vld [vmem:[#allocation45_spill] sm:$0xff] }
0x217e   :  { %5332 = vmatpush1.msra.mxu0 %v11364_v10  ;;  %5403 = vmatpush1.msra.mxu1 %v11365_v40  ;;  %v11400_v10 = vld [vmem:[#allocation51_spill] sm:$0xff]  ;;  %v11401_v40 = vmov 0.0  }
0x217f   :  { %5333 = vmatprep.subr.mxu0 %v11366_v18  ;;  %5404 = vmatprep.subr.mxu1 %v11367_v11  ;;  %v11402_v18 = vld [vmem:[#allocation47_spill] sm:$0xff] }
0x2180   :  { %5334 = vmatpush1.msra.mxu0 %v11368_v50  ;;  %5405 = vmatpush1.msra.mxu1 %v11369_v4  ;;  %v11403_v4 = vld [vmem:[#allocation29_spill] sm:$0xff] }
0x2181   :  { %5335 = vmatprep.subr.mxu0 %v11370_v39  ;;  %5406 = vmatprep.subr.mxu1 %v11371_v58 }
0x2182   :  { %5336 = vmatpush1.msra.mxu0 %v11372_v62  ;;  %5407 = vmatpush1.msra.mxu1 %v11373_v35  ;;  %v11404_v62 = vld [vmem:[#allocation77_spill] sm:$0xff] }
0x2183   :  { %5337 = vmatprep.subr.mxu0 %v11374_v0  ;;  %5408 = vmatprep.subr.mxu1 %v11375_v59  ;;  %v11405_v0 = vld [vmem:[#allocation70_spill] sm:$0xff] }
0x2184   :  { %5338 = vmatpush1.msra.mxu0 %v11376_v36  ;;  %5409 = vmatpush1.msra.mxu1 %v11377_v55 }
0x2185   :  { %5339 = vmatprep.subr.mxu0 %v11378_v7  ;;  %5410 = vmatprep.subr.mxu1 %v11379_v38 }
0x2186   :  { %5340 = vmatpush1.msra.mxu0 %v11380_v63  ;;  %5411 = vmatpush1.msra.mxu1 %v11381_v28 }
0x2187   :  { %5341 = vmatprep.subr.mxu0 %v11382_v12  ;;  %5412 = vmatprep.subr.mxu1 %v11383_v46 }
0x2188   :  { %5342 = vmatpush1.msra.mxu0 %v11384_v57  ;;  %5413 = vmatpush1.msra.mxu1 %v11385_v42 }
0x2189   :  { %5343 = vmatprep.subr.mxu0 %v11386_v8  ;;  %5414 = vmatprep.subr.mxu1 %v11387_v5 }
0x218a   :  { %5344 = vmatpush1.msra.mxu0 %v11388_v45  ;;  %5415 = vmatpush1.msra.mxu1 %v11389_v51 }
0x218b   :  { %5345 = vmatprep.subr.mxu0 %v11390_v31  ;;  %5416 = vmatprep.subr.mxu1 %v11391_v32 }
0x218c   :  { %5346 = vmatpush1.msra.mxu0 %v11392_v13  ;;  %5417 = vmatpush1.msra.mxu1 %v11393_v1 }
0x218d   :  { %5347 = vmatprep.subr.mxu0 %v11394_v33  ;;  %5418 = vmatprep.subr.mxu1 %v11395_v20 }
0x218e   :  { %5348 = vmatpush1.msra.mxu0 %v11396_v14  ;;  %5419 = vmatpush1.msra.mxu1 %v11397_v41  ;;  %v3382_v14 = vsub.f32 %v9789_v24, %v9812_v16  ;;  %v3383_v41 = vsub.f32 %v9785_v44, %v9812_v16  ;;  %v3485_v24 = vmul.f32 %v11113_v54, %v9823_v34 }
0x218f   :  { %5349 = vmatprep.subr.mxu0 %v11398_v56  ;;  %5420 = vmatprep.subr.mxu1 %v11399_v17 }
0x2190   :  { %5350 = vmatpush1.msra.mxu0 %v11400_v10  ;;  %5383 = vmatprep.mubr.f32.mxu0 %v11401_v40  ;;  %v3430_v56 = vmul.f32 %v9819_v3, %v3382_v14  ;;  %v3431_v17 = vmul.f32 %v9819_v3, %v3383_v41 }
0x2191   :  { %5421 = vmatpush1.msra.mxu1 %v11402_v18  ;;  %5454 = vmatprep.mubr.f32.mxu1 %v11401_v40 }
0x2231   :  { %v5158_v11 = vpop.f32.mrf.mxu0  ;;  %v5229_v50 = vpop.f32.mrf.mxu1 }
0x2232   :  { %v5159_v39 = vadd.f32 %v5158_v11, %v11403_v4  ;;  %v5230_v35 = vadd.f32 %v5229_v50, %v11404_v62  ;;  %v3483_v50 = vmul.f32 %v11111_v43, %v3430_v56 }
0x2233   :  { %v5160_v58 = vpop.f32.mrf.mxu0  ;;  %v5231_v36 = vpop.f32.mrf.mxu1 }
0x2234   :  { %v5161_v59 = vadd.f32 %v5160_v58, %v11405_v0  ;;  %v5240_v55 = vmul.f32 %v5159_v39, %v5159_v39  ;;  %v5242_v63 = vmul.f32 %v5230_v35, %v5230_v35  ;;  %v5232_v28 = vadd.f32 %v5231_v36, %v11110_v30 }
0x2235   :  { %v3484_v58 = vmul.f32 %v11112_v29, %v3431_v17 }
0x2236   :  { %v5234_v7 = vadd.f32 %v5161_v59, %v5159_v39  ;;  %v5241_v38 = vmul.f32 %v5161_v59, %v5161_v59  ;;  %v5243_v8 = vmul.f32 %v5232_v28, %v5232_v28 }
0x2238   :  { %v5235_v12 = vadd.f32 %v5234_v7, %v5230_v35  ;;  %v5244_v46 = vadd.f32 %v5241_v38, %v5240_v55 }
0x223a   :  { %v5236_v57 = vadd.f32 %v5235_v12, %v5232_v28  ;;  %v5245_v42 = vadd.f32 %v5244_v46, %v5242_v63  ;;  %v3538_v46 = vadd.f32 %v8790_v9, %v3485_v24 }
0x223c   :  { %5237 = vadd.xlane.f32.xlu1 %v5236_v57  ;;  %v5246_v5 = vadd.f32 %v5245_v42, %v5243_v8 }
0x2240   :  { %5247 = vadd.xlane.f32.xlu1 %v5246_v5 }
0x22c5   :  { %v5238_v45 = vpop.xlane.xlu1 %5237 }
0x22c6   :  { %v5239_v51 = vmul.f32 0.0078125, %v5238_v45 }
0x22c8   :  { %v5250_v32 = vmul.f32 %v5239_v51, %v5239_v51  ;;  %v5253_v10 = vsub.f32 %v5159_v39, %v5239_v51  ;;  %v5254_v40 = vsub.f32 %v5161_v59, %v5239_v51  ;;  %v5255_v18 = vsub.f32 %v5230_v35, %v5239_v51 }
0x22c9   :  { %v5248_v31 = vpop.xlane.xlu1 %5247  ;;  %v3536_v39 = vadd.f32 %v8777_v15, %v3483_v50  ;;  %v3537_v35 = vadd.f32 %v8780_v25, %v3484_v58  ;;  %v5256_v5 = vsub.f32 %v5232_v28, %v5239_v51 }
0x22ca   :  { %v5249_v13 = vmul.f32 0.0078125, %v5248_v31 }
0x22cc   :  { %v5251_v1 = vsub.f32 %v5249_v13, %v5250_v32  ;;  %v3385_v32 = vsub.f32 %v9804_v52, %v9812_v16  ;;  %v11406_v52 = vld [vmem:[#allocation79_spill] sm:$0xff] }
0x22cd   :  { %v9921_v16 = vadd.f32 %v11406_v52, %v11061_v22  ;;  %v11408_v22 = vld [vmem:[#allocation104_spill] sm:$0xff] }
0x22ce   :  { %v5252_v33 = vmax.f32 %v5251_v1, 0.0  ;;  %v3433_v1 = vmul.f32 %v9819_v3, %v3385_v32  ;;  %v11407_v3 = vld [vmem:[#allocation100_spill] sm:$0xff] }
0x22cf   :  { %v3283_v58 = vmul.f32 %v9921_v16, %v9921_v16 }
0x22d0   :  { %v5257_v20 = vadd.f32 1e-05, %v5252_v33 }
0x22d2   :  { %5964 = vrsqrt.f32 %v5257_v20  ;;  %v3486_v20 = vmul.f32 %v8824_v49, %v3433_v1 }
0x22d4   :  { %v3539_v41 = vadd.f32 %v8832_v19, %v3486_v20 }
0x22df   :  { %v5965_v11 = vpop.eup %5964 }
0x22e0   :  { %v5259_v36 = vmul.f32 %v5965_v11, %v5253_v10  ;;  %v5260_v55 = vmul.f32 %v5965_v11, %v5254_v40  ;;  %v5261_v7 = vmul.f32 %v5965_v11, %v5255_v18  ;;  %v5262_v13 = vmul.f32 %v5965_v11, %v5256_v5 }
0x22e1   :  { %v9925_v40 = vadd.f32 %v11407_v3, %v11062_v2 }
0x22e2   :  { %v5263_v44 = vmul.f32 %v5259_v36, %v8784_v26  ;;  %v5264_v38 = vmul.f32 %v5260_v55, %v11114_v23  ;;  %v5265_v63 = vmul.f32 %v5261_v7, %v8793_v37  ;;  %v5266_v33 = vmul.f32 %v5262_v13, %v8820_v27 }
0x22e3   :  { %v3241_v50 = vadd.f32 %v9921_v16, %v9925_v40  ;;  %v3282_v24 = vmul.f32 %v9925_v40, %v9925_v40  ;;  %v3198_v7 = vadd.f32 %v11408_v22, %v11063_v48 }
0x22e4   :  { %v5267_v59 = vadd.f32 %v5263_v44, %v8797_v53  ;;  %v5268_v12 = vadd.f32 %v5264_v38, %v8800_v61  ;;  %v5269_v57 = vadd.f32 %v5265_v63, %v8805_v60  ;;  %v5270_v14 = vadd.f32 %v5266_v33, %v8827_v21 }
0x22e5   :  { %v3242_v38 = vadd.f32 %v3241_v50, %v3198_v7  ;;  %v3321_v63 = vadd.f32 %v3283_v58, %v3282_v24  ;;  %v9956_v58 = vld [vmem:[#allocation21 + $0x1] ss:$0 sm:$0xff] }
0x22e6   :  { %v5275_v34 = vadd.f32 %v5267_v59, %v3536_v39  ;;  %v5276_v42 = vadd.f32 %v5268_v12, %v3537_v35  ;;  %v5277_v8 = vadd.f32 %v5269_v57, %v3538_v46  ;;  %v5278_v56 = vadd.f32 %v5270_v14, %v3539_v41  ;;  %v11409_v35 = vld [vmem:[#allocation80_spill] sm:$0xff] }
0x22e7   :  { %v3284_v39 = vmul.f32 %v3198_v7, %v3198_v7  ;;  %v9940_v59 = vadd.f32 %v11409_v35, %v11064_v6 }
0x22e8   :  { %v5626_v45 = vmul.f32 -1.442695, %v5275_v34  ;;  %v5627_v31 = vmul.f32 -1.442695, %v5276_v42  ;;  %v5628_v1 = vmul.f32 -1.442695, %v5277_v8 }
0x22e9   :  { %v3243_v46 = vadd.f32 %v3242_v38, %v9940_v59  ;;  %v3322_v48 = vadd.f32 %v3321_v63, %v3284_v39  ;;  %v9953_v8 = vld [vmem:[#allocation19 + $0x1] ss:$0 sm:$0xff] }
0x22ea   :  { %5966 = vpow2.f32 %v5626_v45 }
0x22eb   :  { %5968 = vpow2.f32 %v5627_v31 }
0x22ec   :  { %5970 = vtanh.f32 %v5278_v56 }
0x22f7   :  { %v5967_v28 = vpop.eup %5966 }
0x22f8   :  { %v5969_v51 = vpop.eup %5968  ;;  %v5282_v17 = vadd.f32 1.0, %v5967_v28 }
0x22f9   :  { %v5288_v10 = vadd.f32 1.0, %v5969_v51  ;;  %v5971_v18 = vpop.eup %5970 }
0x22fa   :  { %5972 = vrcp.f32 %v5282_v17 }
0x22fb   :  { %5974 = vrcp.f32 %v5288_v10 }
0x22fc   :  { %5976 = vpow2.f32 %v5628_v1 }
0x2307   :  { %v5973_v11 = vpop.eup %5972 }
0x2308   :  { %v5975_v36 = vpop.eup %5974  ;;  %v5299_v55 = vmul.f32 %v5973_v11, %v5971_v18 }
0x2309   :  { %v5298_v44 = vmul.f32 %v5975_v36, %v9800_v47  ;;  %v3285_v47 = vmul.f32 %v9940_v59, %v9940_v59  ;;  %v5977_v10 = vpop.eup %5976 }
0x230a   :  { %v5294_v11 = vadd.f32 1.0, %v5977_v10 }
0x230b   :  { %v9936_v2 = vadd.f32 %v5299_v55, %v5298_v44  ;;  %v3323_v57 = vadd.f32 %v3322_v48, %v3285_v47 }
0x230d   :  { %5301 = vadd.xlane.f32.xlu0 %v9936_v2  ;;  %v5304_v12 = vmul.f32 %v9936_v2, %v9936_v2 }
0x230f   :  { %5305 = vadd.xlane.f32.xlu1 %v5304_v12 }
0x2311   :  { %3244 = vadd.xlane.f32.xlu0 %v3243_v46 }
0x2315   :  { %3324 = vadd.xlane.f32.xlu0 %v3323_v57 }
0x2396   :  { %v5302_v34 = vpop.xlane.xlu0 %5301 }
0x2397   :  { %v5303_v42 = vmul.f32 0.03125, %v5302_v34 }
0x2398   :  { %v5306_v5 = vpop.xlane.xlu1 %5305 }
0x2399   :  { %v5308_v6 = vmul.f32 %v5303_v42, %v5303_v42  ;;  %v5307_v45 = vmul.f32 0.03125, %v5306_v5  ;;  %v5311_v52 = vsub.f32 %v9936_v2, %v5303_v42 }
0x239a   :  { %v3245_v31 = vpop.xlane.xlu0 %3244 }
0x239b   :  { %v5309_v32 = vsub.f32 %v5307_v45, %v5308_v6  ;;  %v9948_v13 = vmul.f32 0.0078125, %v3245_v31 }
0x239d   :  { %v5310_v33 = vmax.f32 %v5309_v32, 0.0  ;;  %v3341_v41 = vmul.f32 %v9948_v13, %v9948_v13  ;;  %v3388_v24 = vsub.f32 %v3198_v7, %v9948_v13 }
0x239e   :  { %v3325_v20 = vpop.xlane.xlu0 %3324 }
0x239f   :  { %v5312_v14 = vadd.f32 1e-05, %v5310_v33  ;;  %v3333_v56 = vmul.f32 0.0078125, %v3325_v20 }
0x23a1   :  { %5978 = vrsqrt.f32 %v5312_v14  ;;  %v3349_v28 = vsub.f32 %v3333_v56, %v3341_v41 }
0x23a3   :  { %v3357_v51 = vmax.f32 %v3349_v28, 0.0 }
0x23a5   :  { %v3397_v17 = vadd.f32 1e-05, %v3357_v51 }
0x23a7   :  { %5980 = vrsqrt.f32 %v3397_v17  ;;  %v3387_v17 = vsub.f32 %v9921_v16, %v9948_v13 }
0x23a8   :  { %5982 = vrcp.f32 %v5294_v11 }
0x23ae   :  { %v5979_v3 = vpop.eup %5978 }
0x23af   :  { %v5314_v18 = vmul.f32 %v5979_v3, %v5311_v52 }
0x23b1   :  { %v5315_v50 = vmul.f32 %v9953_v8, %v5314_v18 }
0x23b3   :  { %v5316_v36 = vadd.f32 %v9956_v58, %v5315_v50 }
0x23b4   :  { %v9959_v55 = vpop.eup %5980 }
0x23b5   :  { %5984 = vtanh.f32 %v5316_v36  ;;  %v3436_v22 = vmul.f32 %v9959_v55, %v3388_v24  ;;  %v5983_v44 = vpop.eup %5982  ;;  %v3435_v52 = vmul.f32 %v9959_v55, %v3387_v17 }
0x23b7   :  { %v3488_v24 = vmul.f32 %v11112_v29, %v3435_v52 }
0x23c2   :  { %v5985_v38 = vpop.eup %5984 }
0x23c3   :  { %v5318_v63 = vmul.f32 %v5985_v38, %v5983_v44 }
0x23c5   :  { %5384 = vmatmul.mubr.f32.vlgmr.msra.gmra.mxu0 %v5318_v63  ;;  %5455 = vmatmul.mubr.f32.vlgmr.msra.gmra.mxu1 %v5318_v63  ;;  %v3489_v63 = vmul.f32 %v11113_v54, %v3436_v22 }
0x23c7   :  { %v3542_v29 = vadd.f32 %v8790_v9, %v3489_v63 }
0x2485   :  { %v5385_v39 = vpop.f32.mrf.mxu0  ;;  %v5456_v35 = vpop.f32.mrf.mxu1 }
0x2486   :  { %v5386_v12 = vadd.f32 %v5385_v39, %v11403_v4  ;;  %v5457_v48 = vadd.f32 %v5456_v35, %v11404_v62 }
0x2487   :  { %v5387_v46 = vpop.f32.mrf.mxu0  ;;  %v5458_v57 = vpop.f32.mrf.mxu1 }
0x2488   :  { %v5388_v47 = vadd.f32 %v5387_v46, %v11405_v0  ;;  %v5467_v7 = vmul.f32 %v5386_v12, %v5386_v12  ;;  %v5469_v5 = vmul.f32 %v5457_v48, %v5457_v48  ;;  %v5459_v6 = vadd.f32 %v5458_v57, %v11110_v30 }
0x2489   :  { %v3386_v30 = vsub.f32 %v9925_v40, %v9948_v13  ;;  %v3541_v46 = vadd.f32 %v8780_v25, %v3488_v24  ;;  %v5633_v24 = vld [vmem:[#allocation4] ss:$0 sm:$0xff] }
0x248a   :  { %v5461_v34 = vadd.f32 %v5388_v47, %v5386_v12  ;;  %v5468_v42 = vmul.f32 %v5388_v47, %v5388_v47  ;;  %v5470_v33 = vmul.f32 %v5459_v6, %v5459_v6 }
0x248b   :  { %v3434_v10 = vmul.f32 %v9959_v55, %v3386_v30 }
0x248c   :  { %v5462_v45 = vadd.f32 %v5461_v34, %v5457_v48  ;;  %v5471_v31 = vadd.f32 %v5468_v42, %v5467_v7 }
0x248d   :  { %v3487_v36 = vmul.f32 %v11111_v43, %v3434_v10 }
0x248e   :  { %v5463_v32 = vadd.f32 %v5462_v45, %v5459_v6  ;;  %v5472_v1 = vadd.f32 %v5471_v31, %v5469_v5 }
0x2490   :  { %5464 = vadd.xlane.f32.xlu1 %v5463_v32  ;;  %v5473_v20 = vadd.f32 %v5472_v1, %v5470_v33 }
0x2494   :  { %5474 = vadd.xlane.f32.xlu1 %v5473_v20 }
0x2519   :  { %v5465_v4 = vpop.xlane.xlu1 %5464 }
0x251a   :  { %v5466_v14 = vmul.f32 0.0078125, %v5465_v4 }
0x251c   :  { %v5477_v41 = vmul.f32 %v5466_v14, %v5466_v14  ;;  %v5480_v3 = vsub.f32 %v5386_v12, %v5466_v14  ;;  %v5481_v18 = vsub.f32 %v5388_v47, %v5466_v14  ;;  %v5482_v11 = vsub.f32 %v5457_v48, %v5466_v14 }
0x251d   :  { %v5475_v62 = vpop.xlane.xlu1 %5474  ;;  %v3540_v12 = vadd.f32 %v8777_v15, %v3487_v36 }
0x251e   :  { %v5476_v0 = vmul.f32 0.0078125, %v5475_v62 }
0x2520   :  { %v5478_v56 = vsub.f32 %v5476_v0, %v5477_v41 }
0x2522   :  { %v5479_v28 = vmax.f32 %v5478_v56, 0.0 }
0x2524   :  { %v5484_v51 = vadd.f32 1e-05, %v5479_v28 }
0x2526   :  { %5986 = vrsqrt.f32 %v5484_v51 }
0x2533   :  { %v5987_v50 = vpop.eup %5986 }
0x2534   :  { %v5486_v44 = vmul.f32 %v5987_v50, %v5480_v3  ;;  %v5487_v38 = vmul.f32 %v5987_v50, %v5481_v18  ;;  %v5488_v40 = vmul.f32 %v5987_v50, %v5482_v11  ;;  %v5546_v3 = vld [vmem:[%s10019_s15] sm:$0xff] }
0x2535   :  { %v5632_v11 = vld [vmem:[%s10017_s13] ss:$0 sm:$0xff] }
0x2536   :  { %v5490_v39 = vmul.f32 %v5486_v44, %v8784_v26  ;;  %v5491_v16 = vmul.f32 %v5487_v38, %v11114_v23  ;;  %v5492_v35 = vmul.f32 %v5488_v40, %v8793_v37  ;;  %v5483_v26 = vsub.f32 %v5459_v6, %v5466_v14 }
0x2537   :  { %v3389_v37 = vsub.f32 %v9940_v59, %v9948_v13 }
0x2538   :  { %v5494_v48 = vadd.f32 %v5490_v39, %v8797_v53  ;;  %v5495_v43 = vadd.f32 %v5491_v16, %v8800_v61  ;;  %v5496_v47 = vadd.f32 %v5492_v35, %v8805_v60  ;;  %v5489_v15 = vmul.f32 %v5987_v50, %v5483_v26 }
0x2539   :  { %v3437_v25 = vmul.f32 %v9959_v55, %v3389_v37 }
0x253a   :  { %v5502_v54 = vadd.f32 %v5494_v48, %v3540_v12  ;;  %v5503_v22 = vadd.f32 %v5495_v43, %v3541_v46  ;;  %v5504_v57 = vadd.f32 %v5496_v47, %v3542_v29  ;;  %v5493_v61 = vmul.f32 %v5489_v15, %v8820_v27 }
0x253b   :  { %v3490_v9 = vmul.f32 %v8824_v49, %v3437_v25 }
0x253c   :  { %v5629_v7 = vmul.f32 -1.442695, %v5502_v54  ;;  %v5630_v23 = vmul.f32 -1.442695, %v5503_v22  ;;  %v5497_v53 = vadd.f32 %v5493_v61, %v8827_v21  ;;  %v5631_v14 = vmul.f32 -1.442695, %v5504_v57 }
0x253d   :  { %v3543_v60 = vadd.f32 %v8832_v19, %v3490_v9 }
0x253e   :  { %5988 = vpow2.f32 %v5629_v7 }
0x253f   :  { %5990 = vpow2.f32 %v5630_v23  ;;  %v5505_v34 = vadd.f32 %v5497_v53, %v3543_v60 }
0x2541   :  { %5992 = vtanh.f32 %v5505_v34 }
0x254b   :  { %v5989_v42 = vpop.eup %5988 }
0x254c   :  { %v5991_v5 = vpop.eup %5990  ;;  %v5509_v6 = vadd.f32 1.0, %v5989_v42 }
0x254d   :  { %v5515_v45 = vadd.f32 1.0, %v5991_v5 }
0x254e   :  { %5994 = vrcp.f32 %v5509_v6  ;;  %v5993_v59 = vpop.eup %5992 }
0x254f   :  { %5996 = vrcp.f32 %v5515_v45 }
0x2550   :  { %5998 = vpow2.f32 %v5631_v14 }
0x255b   :  { %v5995_v13 = vpop.eup %5994 }
0x255c   :  { %v5997_v55 = vpop.eup %5996  ;;  %v5526_v31 = vmul.f32 %v5995_v13, %v5993_v59 }
0x255d   :  { %v5525_v27 = vmul.f32 %v5997_v55, %v9936_v2  ;;  %v5999_v0 = vpop.eup %5998 }
0x255e   :  { %v5521_v2 = vadd.f32 1.0, %v5999_v0 }
0x255f   :  { %v5527_v32 = vadd.f32 %v5526_v31, %v5525_v27 }
0x2561   :  { %5528 = vadd.xlane.f32.xlu0 %v5527_v32  ;;  %v5531_v49 = vmul.f32 %v5527_v32, %v5527_v32 }
0x2563   :  { %5532 = vadd.xlane.f32.xlu1 %v5531_v49 }
0x25ea   :  { %v5529_v21 = vpop.xlane.xlu0 %5528 }
0x25eb   :  { %v5530_v19 = vmul.f32 0.03125, %v5529_v21 }
0x25ec   :  { %v5533_v1 = vpop.xlane.xlu1 %5532 }
0x25ed   :  { %v5535_v33 = vmul.f32 %v5530_v19, %v5530_v19  ;;  %v5534_v20 = vmul.f32 0.03125, %v5533_v1  ;;  %v5538_v56 = vsub.f32 %v5527_v32, %v5530_v19 }
0x25ef   :  { %v5536_v4 = vsub.f32 %v5534_v20, %v5535_v33 }
0x25f1   :  { %v5537_v62 = vmax.f32 %v5536_v4, 0.0 }
0x25f3   :  { %v5539_v41 = vadd.f32 1e-05, %v5537_v62 }
0x25f5   :  { %6000 = vrsqrt.f32 %v5539_v41 }
0x25f6   :  { %6002 = vrcp.f32 %v5521_v2 }
0x2602   :  { %v6001_v28 = vpop.eup %6000 }
0x2603   :  { %v5541_v51 = vmul.f32 %v6001_v28, %v5538_v56  ;;  %v6003_v10 = vpop.eup %6002 }
0x2605   :  { %v5542_v30 = vmul.f32 %v9953_v8, %v5541_v51 }
0x2607   :  { %v5543_v17 = vadd.f32 %v9956_v58, %v5542_v30 }
0x2609   :  { %6004 = vtanh.f32 %v5543_v17 }
0x2616   :  { %v6005_v52 = vpop.eup %6004 }
0x2617   :  { %v5545_v18 = vmul.f32 %v6005_v52, %v6003_v10 }
0x2619   :  { %v5547_v50 = vmul.f32 %v5546_v3, %v5545_v18 }
0x261b   :  { %v5555_v36 = vmul.f32 %v5632_v11, %v5547_v50 }
0x261d   :  { %5556 = vadd.xlane.f32.xlu0 %v5555_v36 }
0x26a6   :  { %v5557_v8 = vpop.xlane.xlu0 %5556 }
0x26a7   :  { %v5565_v58 = vadd.f32 %v5633_v24, %v5557_v8 }
0x26a9   :  { %5567 = vst.msk [vmem:[%s10020_s16] sm:$0xff] %vm5566_vm0, %v5565_v58 }
0x26aa   :  { %5572 = vsyncpa [#allocation6], 1 }
0x26ab   :  { %5573 = vsyncpa [#allocation8], 1 }
0x26ac   :  { %5574 = vsyncpa [#allocation11], 1 }
0x26ad   :  { %5575 = vsyncpa [#allocation14], 1 }
0x26ae   :  { %5576 = vsyncpa [#allocation17], 1 }
0x26af   :  { %5577 = vsyncpa [#allocation20], 1 }

</bundles_post_ra>
